<compile_context>
chip_gen: v6e
topology: v6e:2x2x1
jax: 0.10.0
libtpu: 0.0.40
codegen_flags: <defaults>
</compile_context>

<pallas_src>
import functools

import jax
import jax.numpy as jnp
from jax.experimental import pallas as pl
from jax.experimental.pallas import tpu as pltpu


# ---------------------------------------------------------------------------
# Pallas kernels
# ---------------------------------------------------------------------------
def _conv3x3_relu_kernel(x_ref, w_ref, b_ref, o_ref, *, th, w):
    # x_ref: (1, th+2, w+2, cin)  bf16  reflection-padded input row band
    # w_ref: (9, cin, cout)       bf16  conv weight, tap-major
    # b_ref: (1, cout)            f32
    # o_ref: (1, th, w, cout)     bf16
    cin = x_ref.shape[-1]
    cout = o_ref.shape[-1]
    m = th * w
    acc = jnp.zeros((m, cout), jnp.float32)
    # 3x3 conv as 9 shifted GEMMs on the VMEM-resident band (no im2col in HBM).
    for t in range(9):
        dy, dx = divmod(t, 3)
        tap = x_ref[0, dy:dy + th, dx:dx + w, :].reshape(m, cin)
        acc = acc + jnp.dot(tap, w_ref[t], preferred_element_type=jnp.float32)
    acc = jnp.maximum(acc + b_ref[...], 0.0)          # bias + ReLU in f32
    o_ref[0] = acc.reshape(th, w, cout).astype(o_ref.dtype)


def _aad_fused_kernel(h_ref, a_ref, gbid_ref, wgb_ref, bgb_ref, wh_ref, bh_ref,
                      o_ref, *, th, w, c_x, eps):
    # h_ref:    (1, th+2, w+2, c_x) f32   raw h_in row band (reflection-padded)
    # a_ref:    (1, th+2, w+2, 128) bf16  actv row band (reflection-padded)
    # gbid_ref: (1, 1, 2*c_x)       f32   [gamma_id | beta_id] for this batch elem
    # wgb_ref:  (9, 128, 2*c_x)     bf16  conv1|conv2 weights, tap-major
    # bgb_ref:  (1, 2*c_x)          f32
    # wh_ref:   (9, 1, c_x)         f32   conv_h weights, tap-major
    # bh_ref:   (1, 1)              f32
    # o_ref:    (1, th, w, c_x)     f32   final blended output row band
    m = th * w
    k = a_ref.shape[-1]

    # PositionalNorm2d folded in (per-position mean / unbiased var over channels).
    # Normalizing the padded band == padding the normalized tensor, since both
    # reflection padding and the norm act per spatial position.
    hp = h_ref[0].astype(jnp.float32)                            # (th+2, w+2, c_x)
    mean = jnp.mean(hp, axis=-1, keepdims=True)
    d = hp - mean
    var = jnp.sum(d * d, axis=-1, keepdims=True) * (1.0 / max(c_x - 1, 1))
    hn = d * jax.lax.rsqrt(var + eps)                            # rsqrt -> EUP slot

    acc = jnp.zeros((m, 2 * c_x), jnp.float32)                   # conv1|conv2 acc
    mlogit = jnp.zeros((th, w, 1), jnp.float32)                  # conv_h (F=1), VPU
    for t in range(9):
        dy, dx = divmod(t, 3)
        a_tap = a_ref[0, dy:dy + th, dx:dx + w, :].reshape(m, k)
        acc = acc + jnp.dot(a_tap, wgb_ref[t], preferred_element_type=jnp.float32)
        h_tap = hn[dy:dy + th, dx:dx + w, :]
        mlogit = mlogit + jnp.sum(h_tap * wh_ref[t], axis=-1, keepdims=True)

    gb = (acc + bgb_ref[...]).reshape(th, w, 2 * c_x)
    gamma_a, beta_a = gb[:, :, :c_x], gb[:, :, c_x:]
    gid = gbid_ref[0, :, :c_x]                                   # (1, c_x) broadcast
    bid = gbid_ref[0, :, c_x:]
    h_c = hn[1:1 + th, 1:1 + w, :]                               # central normalized h
    a_out = gamma_a * h_c + beta_a
    b_out = gid * h_c + bid
    mask = jax.nn.sigmoid(mlogit + bh_ref[...])                  # (th, w, 1), f32
    o_ref[0] = ((1.0 - mask) * a_out + mask * b_out).astype(o_ref.dtype)


# ---------------------------------------------------------------------------
# pallas_call wrappers
# ---------------------------------------------------------------------------
_VMEM_LIMIT = 32 * 1024 * 1024   # fits the v7x 64 MiB / scoped-32 MiB budget


def conv3x3_relu(x_bands, w_taps, b, *, n, r, th, w):
    nr, thp, wp, cin = x_bands.shape
    cout = w_taps.shape[-1]
    kernel = functools.partial(_conv3x3_relu_kernel, th=th, w=w)
    return pl.pallas_call(
        kernel,
        out_shape=jax.ShapeDtypeStruct((nr, th, w, cout), jnp.bfloat16),
        grid=(n, r),
        in_specs=[
            pl.BlockSpec((1, thp, wp, cin), lambda i, j: (i * r + j, 0, 0, 0)),
            pl.BlockSpec((9, cin, cout), lambda i, j: (0, 0, 0)),
            pl.BlockSpec((1, cout), lambda i, j: (0, 0)),
        ],
        out_specs=pl.BlockSpec((1, th, w, cout), lambda i, j: (i * r + j, 0, 0, 0)),
        compiler_params=pltpu.CompilerParams(
            dimension_semantics=("parallel", "parallel"),
            vmem_limit_bytes=_VMEM_LIMIT),
    )(x_bands, w_taps, b)


def aad_fused(h_bands, a_bands, gbid, w_gb, b_gb, w_h, b_h, *, n, r, th, w, c_x, eps):
    nr, thp, wp, _ = h_bands.shape
    k = a_bands.shape[-1]
    kernel = functools.partial(_aad_fused_kernel, th=th, w=w, c_x=c_x, eps=eps)
    return pl.pallas_call(
        kernel,
        out_shape=jax.ShapeDtypeStruct((nr, th, w, c_x), jnp.float32),
        grid=(n, r),
        in_specs=[
            pl.BlockSpec((1, thp, wp, c_x), lambda i, j: (i * r + j, 0, 0, 0)),
            pl.BlockSpec((1, thp, wp, k), lambda i, j: (i * r + j, 0, 0, 0)),
            pl.BlockSpec((1, 1, 2 * c_x), lambda i, j: (i, 0, 0)),
            pl.BlockSpec((9, k, 2 * c_x), lambda i, j: (0, 0, 0)),
            pl.BlockSpec((1, 2 * c_x), lambda i, j: (0, 0)),
            pl.BlockSpec((9, 1, c_x), lambda i, j: (0, 0, 0)),
            pl.BlockSpec((1, 1), lambda i, j: (0, 0)),
        ],
        out_specs=pl.BlockSpec((1, th, w, c_x), lambda i, j: (i * r + j, 0, 0, 0)),
        compiler_params=pltpu.CompilerParams(
            dimension_semantics=("parallel", "parallel"),
            vmem_limit_bytes=_VMEM_LIMIT),
    )(h_bands, a_bands, gbid, w_gb, b_gb, w_h, b_h)


# ---------------------------------------------------------------------------
# Cheap XLA glue: layout prep only (no 9x-inflated im2col buffers)
# ---------------------------------------------------------------------------
def _reflect_pad(x_nhwc):
    return jnp.pad(x_nhwc, ((0, 0), (1, 1), (1, 1), (0, 0)), mode="reflect")


def _row_bands(xpad, th):
    """(N, H+2, W+2, C) -> (N*R, th+2, W+2, C): overlapping row bands, one per
    output row tile. ~(th+2)/th duplication vs. the 9x of im2col."""
    n, hp, wp, c = xpad.shape
    h = hp - 2
    r = h // th
    bands = jnp.stack([xpad[:, i * th:i * th + th + 2] for i in range(r)], axis=1)
    return bands.reshape(n * r, th + 2, wp, c)


def _conv_w_taps(w_oihw):
    """PyTorch conv weight (Cout, Cin, 3, 3) -> (9, Cin, Cout), tap-major."""
    cout, cin = w_oihw.shape[0], w_oihw.shape[1]
    return jnp.transpose(w_oihw, (2, 3, 1, 0)).reshape(9, cin, cout)


def _row_tile(h, target=8):
    """Largest divisor of H that is <= target (bigger tiles are better for big
    images; target keeps the example grid longer than the batch for v7x)."""
    th = min(h, target)
    while h % th:
        th -= 1
    return th


# ---------------------------------------------------------------------------
# AADLayer forward
# ---------------------------------------------------------------------------
def aad_forward(params, h_in, z_attr, z_id, eps=1e-5, row_tile=8):
    # h_in: (N, c_x, H, W) NCHW ; z_attr: (N, attr_c, H, W) ; z_id: (N, c_id)
    n, c_x, h, w = h_in.shape
    nh = params["w_shared"].shape[0]          # nhidden = 128
    assert h >= 2 and w >= 2, "ReflectionPad2d(1) requires H, W >= 2"
    th = _row_tile(h, row_tile)
    r = h // th

    h_nhwc = jnp.transpose(h_in, (0, 2, 3, 1)).astype(jnp.float32)
    za_nhwc = jnp.transpose(z_attr, (0, 2, 3, 1)).astype(jnp.bfloat16)

    # gamma_id / beta_id (fc1/fc2): tiny (N, c_id) x (c_id, 2*c_x) -> plain XLA.
    w_fc = jnp.concatenate([params["w_fc1"].T, params["w_fc2"].T], axis=1)
    b_fc = jnp.concatenate([params["b_fc1"], params["b_fc2"]], axis=0)
    gbid = (z_id.astype(jnp.float32) @ w_fc.astype(jnp.float32)
            + b_fc.astype(jnp.float32))[:, None, :]                     # (N,1,2c_x)

    # mlp_shared: 3x3 reflect-pad conv + ReLU (bf16 MXU, f32 accumulate).
    za_bands = _row_bands(_reflect_pad(za_nhwc), th)                    # (N*R,th+2,Wp,attr_c)
    w_sh = _conv_w_taps(params["w_shared"]).astype(jnp.bfloat16)        # (9,attr_c,128)
    b_sh = params["b_shared"].reshape(1, -1).astype(jnp.float32)
    actv = conv3x3_relu(za_bands, w_sh, b_sh, n=n, r=r, th=th, w=w)     # (N*R,th,W,128) bf16
    actv = actv.reshape(n, h, w, nh)

    # Fused: PositionalNorm2d + conv1/conv2 + conv_h mask + sigmoid + blend.
    a_bands = _row_bands(_reflect_pad(actv), th)                        # (N*R,th+2,Wp,128) bf16
    h_bands = _row_bands(_reflect_pad(h_nhwc), th)                      # (N*R,th+2,Wp,c_x) f32
    w_gb = jnp.concatenate([_conv_w_taps(params["w_conv1"]),
                            _conv_w_taps(params["w_conv2"])],
                           axis=-1).astype(jnp.bfloat16)                # (9,128,2c_x)
    b_gb = jnp.concatenate([params["b_conv1"],
                            params["b_conv2"]]).reshape(1, -1).astype(jnp.float32)
    w_h = jnp.transpose(params["w_conv_h"], (2, 3, 0, 1)).reshape(9, 1, c_x)
    w_h = w_h.astype(jnp.float32)
    b_h = params["b_conv_h"].reshape(1, 1).astype(jnp.float32)

    out = aad_fused(h_bands, a_bands, gbid, w_gb, b_gb, w_h, b_h,
                    n=n, r=r, th=th, w=w, c_x=c_x, eps=eps)             # (N*R,th,W,c_x)
    out = out.reshape(n, h, w, c_x)
    return jnp.transpose(out, (0, 3, 1, 2))                             # back to NCHW


# ---------------------------------------------------------------------------
# Deterministic synthetic parameters + example run
# ---------------------------------------------------------------------------
if __name__ == "__main__":
    N, C_X, ATTR_C, C_ID, H, W = 2, 4, 8, 32, 16, 16
    NHIDDEN = 128  # fixed by the module

    key = jax.random.PRNGKey(0)
    keys = jax.random.split(key, 16)

    def rn(k, shape, scale=0.05):
        return (scale * jax.random.normal(k, shape)).astype(jnp.float32)

    params = {
        "w_shared": rn(keys[0], (NHIDDEN, ATTR_C, 3, 3)),
        "b_shared": rn(keys[1], (NHIDDEN,)),
        "w_conv1": rn(keys[2], (C_X, NHIDDEN, 3, 3)),
        "b_conv1": rn(keys[3], (C_X,)),
        "w_conv2": rn(keys[4], (C_X, NHIDDEN, 3, 3)),
        "b_conv2": rn(keys[5], (C_X,)),
        "w_fc1": rn(keys[6], (C_X, C_ID)),
        "b_fc1": rn(keys[7], (C_X,)),
        "w_fc2": rn(keys[8], (C_X, C_ID)),
        "b_fc2": rn(keys[9], (C_X,)),
        "w_conv_h": rn(keys[10], (1, C_X, 3, 3)),
        "b_conv_h": rn(keys[11], (1,)),
    }

    h_in = jax.random.normal(keys[12], (N, C_X, H, W), jnp.float32)
    z_attr = jax.random.normal(keys[13], (N, ATTR_C, H, W), jnp.float32)
    z_id = jax.random.normal(keys[14], (N, C_ID), jnp.float32)

    out = jax.jit(aad_forward)(params, h_in, z_attr, z_id)
    out = jax.block_until_ready(out)
    assert out.shape == (N, C_X, H, W), out.shape
    print("KERNEL_OK")
</pallas_src>

<mosaic_0001>
module attributes {stable_mosaic.version = 11 : i64} {
  func.func @_conv3x3_relu_kernel(%arg0: i32, %arg1: i32, %arg2: memref<1x10x18x8xbf16, #tpu.memory_space<vmem>>, %arg3: memref<9x8x128xbf16, #tpu.memory_space<vmem>>, %arg4: memref<1x128xf32, #tpu.memory_space<vmem>>, %arg5: memref<1x8x16x128xbf16, #tpu.memory_space<vmem>>) attributes {dimension_semantics = [#tpu.dimension_semantics<parallel>, #tpu.dimension_semantics<parallel>], iteration_bounds = array<i64: 2, 2>, scalar_prefetch = 0 : i64, scratch_operands = 0 : i64, tpu.core_type = #tpu.core_type<tc>, window_params = [{transform_indices = @transform_0, window_bounds = array<i64: 1, 10, 18, 8>}, {pipeline_mode = #tpu.pipeline_mode<synchronous>, transform_indices = @transform_1, window_bounds = array<i64: 9, 8, 128>}, {pipeline_mode = #tpu.pipeline_mode<synchronous>, transform_indices = @transform_2, window_bounds = array<i64: 1, 128>}, {transform_indices = @transform_3, window_bounds = array<i64: 1, 8, 16, 128>}]} {
    %cst = arith.constant 0.000000e+00 : f32
    %0 = vector.broadcast %cst : f32 to vector<128x128xf32>
    %c0 = arith.constant 0 : index
    %c0_0 = arith.constant 0 : index
    %c0_1 = arith.constant 0 : index
    %c0_2 = arith.constant 0 : index
    %1 = vector.load %arg2[%c0, %c0_0, %c0_1, %c0_2] : memref<1x10x18x8xbf16, #tpu.memory_space<vmem>>, vector<1x8x16x8xbf16>
    %2 = vector.shape_cast %1 : vector<1x8x16x8xbf16> to vector<8x16x8xbf16>
    %3 = vector.shape_cast %2 : vector<8x16x8xbf16> to vector<128x8xbf16>
    %c0_3 = arith.constant 0 : index
    %c0_4 = arith.constant 0 : index
    %c0_5 = arith.constant 0 : index
    %4 = vector.load %arg3[%c0_3, %c0_4, %c0_5] : memref<9x8x128xbf16, #tpu.memory_space<vmem>>, vector<1x8x128xbf16>
    %5 = vector.shape_cast %4 : vector<1x8x128xbf16> to vector<8x128xbf16>
    %cst_6 = arith.constant dense<0.000000e+00> : vector<128x128xf32>
    %6 = tpu.matmul %3, %5, %cst_6 {dimension_numbers = #tpu.dot_dimension_numbers<[1], [0], [0], [1], [0, 0, 1, 1], [], []>} : vector<128x8xbf16>, vector<8x128xbf16>, vector<128x128xf32> -> vector<128x128xf32>
    %7 = arith.addf %0, %6 : vector<128x128xf32>
    %c0_7 = arith.constant 0 : index
    %c0_8 = arith.constant 0 : index
    %c1 = arith.constant 1 : index
    %c0_9 = arith.constant 0 : index
    %8 = vector.load %arg2[%c0_7, %c0_8, %c1, %c0_9] : memref<1x10x18x8xbf16, #tpu.memory_space<vmem>>, vector<1x8x16x8xbf16>
    %9 = vector.shape_cast %8 : vector<1x8x16x8xbf16> to vector<8x16x8xbf16>
    %10 = vector.shape_cast %9 : vector<8x16x8xbf16> to vector<128x8xbf16>
    %c1_10 = arith.constant 1 : index
    %c0_11 = arith.constant 0 : index
    %c0_12 = arith.constant 0 : index
    %11 = vector.load %arg3[%c1_10, %c0_11, %c0_12] : memref<9x8x128xbf16, #tpu.memory_space<vmem>>, vector<1x8x128xbf16>
    %12 = vector.shape_cast %11 : vector<1x8x128xbf16> to vector<8x128xbf16>
    %cst_13 = arith.constant dense<0.000000e+00> : vector<128x128xf32>
    %13 = tpu.matmul %10, %12, %cst_13 {dimension_numbers = #tpu.dot_dimension_numbers<[1], [0], [0], [1], [0, 0, 1, 1], [], []>} : vector<128x8xbf16>, vector<8x128xbf16>, vector<128x128xf32> -> vector<128x128xf32>
    %14 = arith.addf %7, %13 : vector<128x128xf32>
    %c0_14 = arith.constant 0 : index
    %c0_15 = arith.constant 0 : index
    %c2 = arith.constant 2 : index
    %c0_16 = arith.constant 0 : index
    %15 = vector.load %arg2[%c0_14, %c0_15, %c2, %c0_16] : memref<1x10x18x8xbf16, #tpu.memory_space<vmem>>, vector<1x8x16x8xbf16>
    %16 = vector.shape_cast %15 : vector<1x8x16x8xbf16> to vector<8x16x8xbf16>
    %17 = vector.shape_cast %16 : vector<8x16x8xbf16> to vector<128x8xbf16>
    %c2_17 = arith.constant 2 : index
    %c0_18 = arith.constant 0 : index
    %c0_19 = arith.constant 0 : index
    %18 = vector.load %arg3[%c2_17, %c0_18, %c0_19] : memref<9x8x128xbf16, #tpu.memory_space<vmem>>, vector<1x8x128xbf16>
    %19 = vector.shape_cast %18 : vector<1x8x128xbf16> to vector<8x128xbf16>
    %cst_20 = arith.constant dense<0.000000e+00> : vector<128x128xf32>
    %20 = tpu.matmul %17, %19, %cst_20 {dimension_numbers = #tpu.dot_dimension_numbers<[1], [0], [0], [1], [0, 0, 1, 1], [], []>} : vector<128x8xbf16>, vector<8x128xbf16>, vector<128x128xf32> -> vector<128x128xf32>
    %21 = arith.addf %14, %20 : vector<128x128xf32>
    %c0_21 = arith.constant 0 : index
    %c1_22 = arith.constant 1 : index
    %c0_23 = arith.constant 0 : index
    %c0_24 = arith.constant 0 : index
    %22 = vector.load %arg2[%c0_21, %c1_22, %c0_23, %c0_24] : memref<1x10x18x8xbf16, #tpu.memory_space<vmem>>, vector<1x8x16x8xbf16>
    %23 = vector.shape_cast %22 : vector<1x8x16x8xbf16> to vector<8x16x8xbf16>
    %24 = vector.shape_cast %23 : vector<8x16x8xbf16> to vector<128x8xbf16>
    %c3 = arith.constant 3 : index
    %c0_25 = arith.constant 0 : index
    %c0_26 = arith.constant 0 : index
    %25 = vector.load %arg3[%c3, %c0_25, %c0_26] : memref<9x8x128xbf16, #tpu.memory_space<vmem>>, vector<1x8x128xbf16>
    %26 = vector.shape_cast %25 : vector<1x8x128xbf16> to vector<8x128xbf16>
    %cst_27 = arith.constant dense<0.000000e+00> : vector<128x128xf32>
    %27 = tpu.matmul %24, %26, %cst_27 {dimension_numbers = #tpu.dot_dimension_numbers<[1], [0], [0], [1], [0, 0, 1, 1], [], []>} : vector<128x8xbf16>, vector<8x128xbf16>, vector<128x128xf32> -> vector<128x128xf32>
    %28 = arith.addf %21, %27 : vector<128x128xf32>
    %c0_28 = arith.constant 0 : index
    %c1_29 = arith.constant 1 : index
    %c1_30 = arith.constant 1 : index
    %c0_31 = arith.constant 0 : index
    %29 = vector.load %arg2[%c0_28, %c1_29, %c1_30, %c0_31] : memref<1x10x18x8xbf16, #tpu.memory_space<vmem>>, vector<1x8x16x8xbf16>
    %30 = vector.shape_cast %29 : vector<1x8x16x8xbf16> to vector<8x16x8xbf16>
    %31 = vector.shape_cast %30 : vector<8x16x8xbf16> to vector<128x8xbf16>
    %c4 = arith.constant 4 : index
    %c0_32 = arith.constant 0 : index
    %c0_33 = arith.constant 0 : index
    %32 = vector.load %arg3[%c4, %c0_32, %c0_33] : memref<9x8x128xbf16, #tpu.memory_space<vmem>>, vector<1x8x128xbf16>
    %33 = vector.shape_cast %32 : vector<1x8x128xbf16> to vector<8x128xbf16>
    %cst_34 = arith.constant dense<0.000000e+00> : vector<128x128xf32>
    %34 = tpu.matmul %31, %33, %cst_34 {dimension_numbers = #tpu.dot_dimension_numbers<[1], [0], [0], [1], [0, 0, 1, 1], [], []>} : vector<128x8xbf16>, vector<8x128xbf16>, vector<128x128xf32> -> vector<128x128xf32>
    %35 = arith.addf %28, %34 : vector<128x128xf32>
    %c0_35 = arith.constant 0 : index
    %c1_36 = arith.constant 1 : index
    %c2_37 = arith.constant 2 : index
    %c0_38 = arith.constant 0 : index
    %36 = vector.load %arg2[%c0_35, %c1_36, %c2_37, %c0_38] : memref<1x10x18x8xbf16, #tpu.memory_space<vmem>>, vector<1x8x16x8xbf16>
    %37 = vector.shape_cast %36 : vector<1x8x16x8xbf16> to vector<8x16x8xbf16>
    %38 = vector.shape_cast %37 : vector<8x16x8xbf16> to vector<128x8xbf16>
    %c5 = arith.constant 5 : index
    %c0_39 = arith.constant 0 : index
    %c0_40 = arith.constant 0 : index
    %39 = vector.load %arg3[%c5, %c0_39, %c0_40] : memref<9x8x128xbf16, #tpu.memory_space<vmem>>, vector<1x8x128xbf16>
    %40 = vector.shape_cast %39 : vector<1x8x128xbf16> to vector<8x128xbf16>
    %cst_41 = arith.constant dense<0.000000e+00> : vector<128x128xf32>
    %41 = tpu.matmul %38, %40, %cst_41 {dimension_numbers = #tpu.dot_dimension_numbers<[1], [0], [0], [1], [0, 0, 1, 1], [], []>} : vector<128x8xbf16>, vector<8x128xbf16>, vector<128x128xf32> -> vector<128x128xf32>
    %42 = arith.addf %35, %41 : vector<128x128xf32>
    %c0_42 = arith.constant 0 : index
    %c2_43 = arith.constant 2 : index
    %c0_44 = arith.constant 0 : index
    %c0_45 = arith.constant 0 : index
    %43 = vector.load %arg2[%c0_42, %c2_43, %c0_44, %c0_45] : memref<1x10x18x8xbf16, #tpu.memory_space<vmem>>, vector<1x8x16x8xbf16>
    %44 = vector.shape_cast %43 : vector<1x8x16x8xbf16> to vector<8x16x8xbf16>
    %45 = vector.shape_cast %44 : vector<8x16x8xbf16> to vector<128x8xbf16>
    %c6 = arith.constant 6 : index
    %c0_46 = arith.constant 0 : index
    %c0_47 = arith.constant 0 : index
    %46 = vector.load %arg3[%c6, %c0_46, %c0_47] : memref<9x8x128xbf16, #tpu.memory_space<vmem>>, vector<1x8x128xbf16>
    %47 = vector.shape_cast %46 : vector<1x8x128xbf16> to vector<8x128xbf16>
    %cst_48 = arith.constant dense<0.000000e+00> : vector<128x128xf32>
    %48 = tpu.matmul %45, %47, %cst_48 {dimension_numbers = #tpu.dot_dimension_numbers<[1], [0], [0], [1], [0, 0, 1, 1], [], []>} : vector<128x8xbf16>, vector<8x128xbf16>, vector<128x128xf32> -> vector<128x128xf32>
    %49 = arith.addf %42, %48 : vector<128x128xf32>
    %c0_49 = arith.constant 0 : index
    %c2_50 = arith.constant 2 : index
    %c1_51 = arith.constant 1 : index
    %c0_52 = arith.constant 0 : index
    %50 = vector.load %arg2[%c0_49, %c2_50, %c1_51, %c0_52] : memref<1x10x18x8xbf16, #tpu.memory_space<vmem>>, vector<1x8x16x8xbf16>
    %51 = vector.shape_cast %50 : vector<1x8x16x8xbf16> to vector<8x16x8xbf16>
    %52 = vector.shape_cast %51 : vector<8x16x8xbf16> to vector<128x8xbf16>
    %c7 = arith.constant 7 : index
    %c0_53 = arith.constant 0 : index
    %c0_54 = arith.constant 0 : index
    %53 = vector.load %arg3[%c7, %c0_53, %c0_54] : memref<9x8x128xbf16, #tpu.memory_space<vmem>>, vector<1x8x128xbf16>
    %54 = vector.shape_cast %53 : vector<1x8x128xbf16> to vector<8x128xbf16>
    %cst_55 = arith.constant dense<0.000000e+00> : vector<128x128xf32>
    %55 = tpu.matmul %52, %54, %cst_55 {dimension_numbers = #tpu.dot_dimension_numbers<[1], [0], [0], [1], [0, 0, 1, 1], [], []>} : vector<128x8xbf16>, vector<8x128xbf16>, vector<128x128xf32> -> vector<128x128xf32>
    %56 = arith.addf %49, %55 : vector<128x128xf32>
    %c0_56 = arith.constant 0 : index
    %c2_57 = arith.constant 2 : index
    %c2_58 = arith.constant 2 : index
    %c0_59 = arith.constant 0 : index
    %57 = vector.load %arg2[%c0_56, %c2_57, %c2_58, %c0_59] : memref<1x10x18x8xbf16, #tpu.memory_space<vmem>>, vector<1x8x16x8xbf16>
    %58 = vector.shape_cast %57 : vector<1x8x16x8xbf16> to vector<8x16x8xbf16>
    %59 = vector.shape_cast %58 : vector<8x16x8xbf16> to vector<128x8xbf16>
    %c8 = arith.constant 8 : index
    %c0_60 = arith.constant 0 : index
    %c0_61 = arith.constant 0 : index
    %60 = vector.load %arg3[%c8, %c0_60, %c0_61] : memref<9x8x128xbf16, #tpu.memory_space<vmem>>, vector<1x8x128xbf16>
    %61 = vector.shape_cast %60 : vector<1x8x128xbf16> to vector<8x128xbf16>
    %cst_62 = arith.constant dense<0.000000e+00> : vector<128x128xf32>
    %62 = tpu.matmul %59, %61, %cst_62 {dimension_numbers = #tpu.dot_dimension_numbers<[1], [0], [0], [1], [0, 0, 1, 1], [], []>} : vector<128x8xbf16>, vector<8x128xbf16>, vector<128x128xf32> -> vector<128x128xf32>
    %63 = arith.addf %56, %62 : vector<128x128xf32>
    %c0_63 = arith.constant 0 : index
    %c0_64 = arith.constant 0 : index
    %64 = vector.load %arg4[%c0_63, %c0_64] : memref<1x128xf32, #tpu.memory_space<vmem>>, vector<1x128xf32>
    %65 = vector.broadcast %64 : vector<1x128xf32> to vector<128x128xf32>
    %66 = arith.addf %63, %65 : vector<128x128xf32>
    %cst_65 = arith.constant 0.000000e+00 : f32
    %67 = vector.broadcast %cst_65 : f32 to vector<128x128xf32>
    %68 = arith.maximumf %66, %67 : vector<128x128xf32>
    %69 = vector.shape_cast %68 : vector<128x128xf32> to vector<8x16x128xf32>
    %70 = arith.truncf %69 : vector<8x16x128xf32> to vector<8x16x128xbf16>
    %c0_66 = arith.constant 0 : index
    %c0_67 = arith.constant 0 : index
    %c0_68 = arith.constant 0 : index
    %c0_69 = arith.constant 0 : index
    %71 = vector.load %arg5[%c0_66, %c0_67, %c0_68, %c0_69] : memref<1x8x16x128xbf16, #tpu.memory_space<vmem>>, vector<1x8x16x128xbf16>
    %72 = vector.shape_cast %71 : vector<1x8x16x128xbf16> to vector<8x16x128xbf16>
    %73 = vector.shape_cast %70 : vector<8x16x128xbf16> to vector<1x8x16x128xbf16>
    tpu.vector_store %arg5[%c0_66, %c0_67, %c0_68, %c0_69], %73 {strides = array<i32>} : memref<1x8x16x128xbf16, #tpu.memory_space<vmem>>, vector<1x8x16x128xbf16>,
    return
  }
  func.func @transform_0(%arg0: i32, %arg1: i32) -> (i32, i32, i32, i32) {
    %c2_i32 = arith.constant 2 : i32
    %0 = arith.muli %arg0, %c2_i32 : i32
    %1 = arith.addi %0, %arg1 : i32
    %c0_i32 = arith.constant 0 : i32
    %c0_i32_0 = arith.constant 0 : i32
    %c0_i32_1 = arith.constant 0 : i32
    %c0_i32_2 = arith.constant 0 : i32
    return %1, %c0_i32, %c0_i32_0, %c0_i32_1 : i32, i32, i32, i32
  }
  func.func @transform_1(%arg0: i32, %arg1: i32) -> (i32, i32, i32) {
    %c0_i32 = arith.constant 0 : i32
    %c0_i32_0 = arith.constant 0 : i32
    %c0_i32_1 = arith.constant 0 : i32
    %c0_i32_2 = arith.constant 0 : i32
    return %c0_i32, %c0_i32_0, %c0_i32_1 : i32, i32, i32
  }
  func.func @transform_2(%arg0: i32, %arg1: i32) -> (i32, i32) {
    %c0_i32 = arith.constant 0 : i32
    %c0_i32_0 = arith.constant 0 : i32
    %c0_i32_1 = arith.constant 0 : i32
    return %c0_i32, %c0_i32_0 : i32, i32
  }
  func.func @transform_3(%arg0: i32, %arg1: i32) -> (i32, i32, i32, i32) {
    %c2_i32 = arith.constant 2 : i32
    %0 = arith.muli %arg0, %c2_i32 : i32
    %1 = arith.addi %0, %arg1 : i32
    %c0_i32 = arith.constant 0 : i32
    %c0_i32_0 = arith.constant 0 : i32
    %c0_i32_1 = arith.constant 0 : i32
    %c0_i32_2 = arith.constant 0 : i32
    return %1, %c0_i32, %c0_i32_0, %c0_i32_1 : i32, i32, i32, i32
  }
}

module attributes {stable_mosaic.version = 11 : i64} {
  func.func @_aad_fused_kernel(%arg0: i32, %arg1: i32, %arg2: memref<1x10x18x4xf32, #tpu.memory_space<vmem>>, %arg3: memref<1x10x18x128xbf16, #tpu.memory_space<vmem>>, %arg4: memref<1x1x8xf32, #tpu.memory_space<vmem>>, %arg5: memref<9x128x8xbf16, #tpu.memory_space<vmem>>, %arg6: memref<1x8xf32, #tpu.memory_space<vmem>>, %arg7: memref<9x1x4xf32, #tpu.memory_space<vmem>>, %arg8: memref<1x1xf32, #tpu.memory_space<vmem>>, %arg9: memref<1x8x16x4xf32, #tpu.memory_space<vmem>>) attributes {dimension_semantics = [#tpu.dimension_semantics<parallel>, #tpu.dimension_semantics<parallel>], iteration_bounds = array<i64: 2, 2>, scalar_prefetch = 0 : i64, scratch_operands = 0 : i64, tpu.core_type = #tpu.core_type<tc>, window_params = [{transform_indices = @transform_0, window_bounds = array<i64: 1, 10, 18, 4>}, {transform_indices = @transform_1, window_bounds = array<i64: 1, 10, 18, 128>}, {transform_indices = @transform_2, window_bounds = array<i64: 1, 1, 8>}, {pipeline_mode = #tpu.pipeline_mode<synchronous>, transform_indices = @transform_3, window_bounds = array<i64: 9, 128, 8>}, {pipeline_mode = #tpu.pipeline_mode<synchronous>, transform_indices = @transform_4, window_bounds = array<i64: 1, 8>}, {pipeline_mode = #tpu.pipeline_mode<synchronous>, transform_indices = @transform_5, window_bounds = array<i64: 9, 1, 4>}, {pipeline_mode = #tpu.pipeline_mode<synchronous>, transform_indices = @transform_6, window_bounds = array<i64: 1, 1>}, {transform_indices = @transform_7, window_bounds = array<i64: 1, 8, 16, 4>}]} {
    %c0 = arith.constant 0 : index
    %c0_0 = arith.constant 0 : index
    %c0_1 = arith.constant 0 : index
    %c0_2 = arith.constant 0 : index
    %0 = vector.load %arg2[%c0, %c0_0, %c0_1, %c0_2] : memref<1x10x18x4xf32, #tpu.memory_space<vmem>>, vector<1x10x18x4xf32>
    %1 = vector.shape_cast %0 : vector<1x10x18x4xf32> to vector<10x18x4xf32>
    %cst = arith.constant dense<0.000000e+00> : vector<10x18xf32>
    %2 = vector.multi_reduction <add>, %1, %cst [2] : vector<10x18x4xf32> to vector<10x18xf32>
    %3 = vector.shape_cast %2 : vector<10x18xf32> to vector<10x18x1xf32>
    %cst_3 = arith.constant 4.000000e+00 : f32
    %4 = vector.broadcast %cst_3 : f32 to vector<10x18x1xf32>
    %5 = arith.divf %3, %4 : vector<10x18x1xf32>
    %6 = vector.broadcast %5 : vector<10x18x1xf32> to vector<10x18x4xf32>
    %7 = arith.subf %1, %6 : vector<10x18x4xf32>
    %8 = arith.mulf %7, %7 : vector<10x18x4xf32>
    %cst_4 = arith.constant dense<0.000000e+00> : vector<10x18xf32>
    %9 = vector.multi_reduction <add>, %8, %cst_4 [2] : vector<10x18x4xf32> to vector<10x18xf32>
    %10 = vector.shape_cast %9 : vector<10x18xf32> to vector<10x18x1xf32>
    %cst_5 = arith.constant 0.333333343 : f32
    %11 = vector.broadcast %cst_5 : f32 to vector<10x18x1xf32>
    %12 = arith.mulf %10, %11 : vector<10x18x1xf32>
    %cst_6 = arith.constant 9.99999974E-6 : f32
    %13 = vector.broadcast %cst_6 : f32 to vector<10x18x1xf32>
    %14 = arith.addf %12, %13 : vector<10x18x1xf32>
    %15 = math.rsqrt %14 : vector<10x18x1xf32>
    %16 = vector.broadcast %15 : vector<10x18x1xf32> to vector<10x18x4xf32>
    %17 = arith.mulf %7, %16 : vector<10x18x4xf32>
    %cst_7 = arith.constant 0.000000e+00 : f32
    %18 = vector.broadcast %cst_7 : f32 to vector<128x8xf32>
    %cst_8 = arith.constant 0.000000e+00 : f32
    %19 = vector.broadcast %cst_8 : f32 to vector<8x16x1xf32>
    %c0_9 = arith.constant 0 : index
    %c0_10 = arith.constant 0 : index
    %c0_11 = arith.constant 0 : index
    %c0_12 = arith.constant 0 : index
    %20 = vector.load %arg3[%c0_9, %c0_10, %c0_11, %c0_12] : memref<1x10x18x128xbf16, #tpu.memory_space<vmem>>, vector<1x8x16x128xbf16>
    %21 = vector.shape_cast %20 : vector<1x8x16x128xbf16> to vector<8x16x128xbf16>
    %22 = vector.shape_cast %21 : vector<8x16x128xbf16> to vector<128x128xbf16>
    %c0_13 = arith.constant 0 : index
    %c0_14 = arith.constant 0 : index
    %c0_15 = arith.constant 0 : index
    %23 = vector.load %arg5[%c0_13, %c0_14, %c0_15] : memref<9x128x8xbf16, #tpu.memory_space<vmem>>, vector<1x128x8xbf16>
    %24 = vector.shape_cast %23 : vector<1x128x8xbf16> to vector<128x8xbf16>
    %cst_16 = arith.constant dense<0.000000e+00> : vector<128x8xf32>
    %25 = tpu.matmul %22, %24, %cst_16 {dimension_numbers = #tpu.dot_dimension_numbers<[1], [0], [0], [1], [0, 0, 1, 1], [], []>} : vector<128x128xbf16>, vector<128x8xbf16>, vector<128x8xf32> -> vector<128x8xf32>
    %26 = arith.addf %18, %25 : vector<128x8xf32>
    %27 = vector.extract_strided_slice %17 {offsets = [0, 0, 0], sizes = [8, 16, 4], strides = [1, 1, 1]} : vector<10x18x4xf32> to vector<8x16x4xf32>
    %c0_17 = arith.constant 0 : index
    %c0_18 = arith.constant 0 : index
    %c0_19 = arith.constant 0 : index
    %28 = vector.load %arg7[%c0_17, %c0_18, %c0_19] : memref<9x1x4xf32, #tpu.memory_space<vmem>>, vector<1x1x4xf32>
    %29 = vector.shape_cast %28 : vector<1x1x4xf32> to vector<1x4xf32>
    %30 = vector.shape_cast %29 : vector<1x4xf32> to vector<1x1x4xf32>
    %31 = vector.broadcast %30 : vector<1x1x4xf32> to vector<8x16x4xf32>
    %32 = arith.mulf %27, %31 : vector<8x16x4xf32>
    %cst_20 = arith.constant dense<0.000000e+00> : vector<8x16xf32>
    %33 = vector.multi_reduction <add>, %32, %cst_20 [2] : vector<8x16x4xf32> to vector<8x16xf32>
    %34 = vector.shape_cast %33 : vector<8x16xf32> to vector<8x16x1xf32>
    %35 = arith.addf %19, %34 : vector<8x16x1xf32>
    %c0_21 = arith.constant 0 : index
    %c0_22 = arith.constant 0 : index
    %c1 = arith.constant 1 : index
    %c0_23 = arith.constant 0 : index
    %36 = vector.load %arg3[%c0_21, %c0_22, %c1, %c0_23] : memref<1x10x18x128xbf16, #tpu.memory_space<vmem>>, vector<1x8x16x128xbf16>
    %37 = vector.shape_cast %36 : vector<1x8x16x128xbf16> to vector<8x16x128xbf16>
    %38 = vector.shape_cast %37 : vector<8x16x128xbf16> to vector<128x128xbf16>
    %c1_24 = arith.constant 1 : index
    %c0_25 = arith.constant 0 : index
    %c0_26 = arith.constant 0 : index
    %39 = vector.load %arg5[%c1_24, %c0_25, %c0_26] : memref<9x128x8xbf16, #tpu.memory_space<vmem>>, vector<1x128x8xbf16>
    %40 = vector.shape_cast %39 : vector<1x128x8xbf16> to vector<128x8xbf16>
    %cst_27 = arith.constant dense<0.000000e+00> : vector<128x8xf32>
    %41 = tpu.matmul %38, %40, %cst_27 {dimension_numbers = #tpu.dot_dimension_numbers<[1], [0], [0], [1], [0, 0, 1, 1], [], []>} : vector<128x128xbf16>, vector<128x8xbf16>, vector<128x8xf32> -> vector<128x8xf32>
    %42 = arith.addf %26, %41 : vector<128x8xf32>
    %43 = vector.extract_strided_slice %17 {offsets = [0, 1, 0], sizes = [8, 16, 4], strides = [1, 1, 1]} : vector<10x18x4xf32> to vector<8x16x4xf32>
    %c1_28 = arith.constant 1 : index
    %c0_29 = arith.constant 0 : index
    %c0_30 = arith.constant 0 : index
    %44 = vector.load %arg7[%c1_28, %c0_29, %c0_30] : memref<9x1x4xf32, #tpu.memory_space<vmem>>, vector<1x1x4xf32>
    %45 = vector.shape_cast %44 : vector<1x1x4xf32> to vector<1x4xf32>
    %46 = vector.shape_cast %45 : vector<1x4xf32> to vector<1x1x4xf32>
    %47 = vector.broadcast %46 : vector<1x1x4xf32> to vector<8x16x4xf32>
    %48 = arith.mulf %43, %47 : vector<8x16x4xf32>
    %cst_31 = arith.constant dense<0.000000e+00> : vector<8x16xf32>
    %49 = vector.multi_reduction <add>, %48, %cst_31 [2] : vector<8x16x4xf32> to vector<8x16xf32>
    %50 = vector.shape_cast %49 : vector<8x16xf32> to vector<8x16x1xf32>
    %51 = arith.addf %35, %50 : vector<8x16x1xf32>
    %c0_32 = arith.constant 0 : index
    %c0_33 = arith.constant 0 : index
    %c2 = arith.constant 2 : index
    %c0_34 = arith.constant 0 : index
    %52 = vector.load %arg3[%c0_32, %c0_33, %c2, %c0_34] : memref<1x10x18x128xbf16, #tpu.memory_space<vmem>>, vector<1x8x16x128xbf16>
    %53 = vector.shape_cast %52 : vector<1x8x16x128xbf16> to vector<8x16x128xbf16>
    %54 = vector.shape_cast %53 : vector<8x16x128xbf16> to vector<128x128xbf16>
    %c2_35 = arith.constant 2 : index
    %c0_36 = arith.constant 0 : index
    %c0_37 = arith.constant 0 : index
    %55 = vector.load %arg5[%c2_35, %c0_36, %c0_37] : memref<9x128x8xbf16, #tpu.memory_space<vmem>>, vector<1x128x8xbf16>
    %56 = vector.shape_cast %55 : vector<1x128x8xbf16> to vector<128x8xbf16>
    %cst_38 = arith.constant dense<0.000000e+00> : vector<128x8xf32>
    %57 = tpu.matmul %54, %56, %cst_38 {dimension_numbers = #tpu.dot_dimension_numbers<[1], [0], [0], [1], [0, 0, 1, 1], [], []>} : vector<128x128xbf16>, vector<128x8xbf16>, vector<128x8xf32> -> vector<128x8xf32>
    %58 = arith.addf %42, %57 : vector<128x8xf32>
    %59 = vector.extract_strided_slice %17 {offsets = [0, 2, 0], sizes = [8, 16, 4], strides = [1, 1, 1]} : vector<10x18x4xf32> to vector<8x16x4xf32>
    %c2_39 = arith.constant 2 : index
    %c0_40 = arith.constant 0 : index
    %c0_41 = arith.constant 0 : index
    %60 = vector.load %arg7[%c2_39, %c0_40, %c0_41] : memref<9x1x4xf32, #tpu.memory_space<vmem>>, vector<1x1x4xf32>
    %61 = vector.shape_cast %60 : vector<1x1x4xf32> to vector<1x4xf32>
    %62 = vector.shape_cast %61 : vector<1x4xf32> to vector<1x1x4xf32>
    %63 = vector.broadcast %62 : vector<1x1x4xf32> to vector<8x16x4xf32>
    %64 = arith.mulf %59, %63 : vector<8x16x4xf32>
    %cst_42 = arith.constant dense<0.000000e+00> : vector<8x16xf32>
    %65 = vector.multi_reduction <add>, %64, %cst_42 [2] : vector<8x16x4xf32> to vector<8x16xf32>
    %66 = vector.shape_cast %65 : vector<8x16xf32> to vector<8x16x1xf32>
    %67 = arith.addf %51, %66 : vector<8x16x1xf32>
    %c0_43 = arith.constant 0 : index
    %c1_44 = arith.constant 1 : index
    %c0_45 = arith.constant 0 : index
    %c0_46 = arith.constant 0 : index
    %68 = vector.load %arg3[%c0_43, %c1_44, %c0_45, %c0_46] : memref<1x10x18x128xbf16, #tpu.memory_space<vmem>>, vector<1x8x16x128xbf16>
    %69 = vector.shape_cast %68 : vector<1x8x16x128xbf16> to vector<8x16x128xbf16>
    %70 = vector.shape_cast %69 : vector<8x16x128xbf16> to vector<128x128xbf16>
    %c3 = arith.constant 3 : index
    %c0_47 = arith.constant 0 : index
    %c0_48 = arith.constant 0 : index
    %71 = vector.load %arg5[%c3, %c0_47, %c0_48] : memref<9x128x8xbf16, #tpu.memory_space<vmem>>, vector<1x128x8xbf16>
    %72 = vector.shape_cast %71 : vector<1x128x8xbf16> to vector<128x8xbf16>
    %cst_49 = arith.constant dense<0.000000e+00> : vector<128x8xf32>
    %73 = tpu.matmul %70, %72, %cst_49 {dimension_numbers = #tpu.dot_dimension_numbers<[1], [0], [0], [1], [0, 0, 1, 1], [], []>} : vector<128x128xbf16>, vector<128x8xbf16>, vector<128x8xf32> -> vector<128x8xf32>
    %74 = arith.addf %58, %73 : vector<128x8xf32>
    %75 = vector.extract_strided_slice %17 {offsets = [1, 0, 0], sizes = [8, 16, 4], strides = [1, 1, 1]} : vector<10x18x4xf32> to vector<8x16x4xf32>
    %c3_50 = arith.constant 3 : index
    %c0_51 = arith.constant 0 : index
    %c0_52 = arith.constant 0 : index
    %76 = vector.load %arg7[%c3_50, %c0_51, %c0_52] : memref<9x1x4xf32, #tpu.memory_space<vmem>>, vector<1x1x4xf32>
    %77 = vector.shape_cast %76 : vector<1x1x4xf32> to vector<1x4xf32>
    %78 = vector.shape_cast %77 : vector<1x4xf32> to vector<1x1x4xf32>
    %79 = vector.broadcast %78 : vector<1x1x4xf32> to vector<8x16x4xf32>
    %80 = arith.mulf %75, %79 : vector<8x16x4xf32>
    %cst_53 = arith.constant dense<0.000000e+00> : vector<8x16xf32>
    %81 = vector.multi_reduction <add>, %80, %cst_53 [2] : vector<8x16x4xf32> to vector<8x16xf32>
    %82 = vector.shape_cast %81 : vector<8x16xf32> to vector<8x16x1xf32>
    %83 = arith.addf %67, %82 : vector<8x16x1xf32>
    %c0_54 = arith.constant 0 : index
    %c1_55 = arith.constant 1 : index
    %c1_56 = arith.constant 1 : index
    %c0_57 = arith.constant 0 : index
    %84 = vector.load %arg3[%c0_54, %c1_55, %c1_56, %c0_57] : memref<1x10x18x128xbf16, #tpu.memory_space<vmem>>, vector<1x8x16x128xbf16>
    %85 = vector.shape_cast %84 : vector<1x8x16x128xbf16> to vector<8x16x128xbf16>
    %86 = vector.shape_cast %85 : vector<8x16x128xbf16> to vector<128x128xbf16>
    %c4 = arith.constant 4 : index
    %c0_58 = arith.constant 0 : index
    %c0_59 = arith.constant 0 : index
    %87 = vector.load %arg5[%c4, %c0_58, %c0_59] : memref<9x128x8xbf16, #tpu.memory_space<vmem>>, vector<1x128x8xbf16>
    %88 = vector.shape_cast %87 : vector<1x128x8xbf16> to vector<128x8xbf16>
    %cst_60 = arith.constant dense<0.000000e+00> : vector<128x8xf32>
    %89 = tpu.matmul %86, %88, %cst_60 {dimension_numbers = #tpu.dot_dimension_numbers<[1], [0], [0], [1], [0, 0, 1, 1], [], []>} : vector<128x128xbf16>, vector<128x8xbf16>, vector<128x8xf32> -> vector<128x8xf32>
    %90 = arith.addf %74, %89 : vector<128x8xf32>
    %91 = vector.extract_strided_slice %17 {offsets = [1, 1, 0], sizes = [8, 16, 4], strides = [1, 1, 1]} : vector<10x18x4xf32> to vector<8x16x4xf32>
    %c4_61 = arith.constant 4 : index
    %c0_62 = arith.constant 0 : index
    %c0_63 = arith.constant 0 : index
    %92 = vector.load %arg7[%c4_61, %c0_62, %c0_63] : memref<9x1x4xf32, #tpu.memory_space<vmem>>, vector<1x1x4xf32>
    %93 = vector.shape_cast %92 : vector<1x1x4xf32> to vector<1x4xf32>
    %94 = vector.shape_cast %93 : vector<1x4xf32> to vector<1x1x4xf32>
    %95 = vector.broadcast %94 : vector<1x1x4xf32> to vector<8x16x4xf32>
    %96 = arith.mulf %91, %95 : vector<8x16x4xf32>
    %cst_64 = arith.constant dense<0.000000e+00> : vector<8x16xf32>
    %97 = vector.multi_reduction <add>, %96, %cst_64 [2] : vector<8x16x4xf32> to vector<8x16xf32>
    %98 = vector.shape_cast %97 : vector<8x16xf32> to vector<8x16x1xf32>
    %99 = arith.addf %83, %98 : vector<8x16x1xf32>
    %c0_65 = arith.constant 0 : index
    %c1_66 = arith.constant 1 : index
    %c2_67 = arith.constant 2 : index
    %c0_68 = arith.constant 0 : index
    %100 = vector.load %arg3[%c0_65, %c1_66, %c2_67, %c0_68] : memref<1x10x18x128xbf16, #tpu.memory_space<vmem>>, vector<1x8x16x128xbf16>
    %101 = vector.shape_cast %100 : vector<1x8x16x128xbf16> to vector<8x16x128xbf16>
    %102 = vector.shape_cast %101 : vector<8x16x128xbf16> to vector<128x128xbf16>
    %c5 = arith.constant 5 : index
    %c0_69 = arith.constant 0 : index
    %c0_70 = arith.constant 0 : index
    %103 = vector.load %arg5[%c5, %c0_69, %c0_70] : memref<9x128x8xbf16, #tpu.memory_space<vmem>>, vector<1x128x8xbf16>
    %104 = vector.shape_cast %103 : vector<1x128x8xbf16> to vector<128x8xbf16>
    %cst_71 = arith.constant dense<0.000000e+00> : vector<128x8xf32>
    %105 = tpu.matmul %102, %104, %cst_71 {dimension_numbers = #tpu.dot_dimension_numbers<[1], [0], [0], [1], [0, 0, 1, 1], [], []>} : vector<128x128xbf16>, vector<128x8xbf16>, vector<128x8xf32> -> vector<128x8xf32>
    %106 = arith.addf %90, %105 : vector<128x8xf32>
    %107 = vector.extract_strided_slice %17 {offsets = [1, 2, 0], sizes = [8, 16, 4], strides = [1, 1, 1]} : vector<10x18x4xf32> to vector<8x16x4xf32>
    %c5_72 = arith.constant 5 : index
    %c0_73 = arith.constant 0 : index
    %c0_74 = arith.constant 0 : index
    %108 = vector.load %arg7[%c5_72, %c0_73, %c0_74] : memref<9x1x4xf32, #tpu.memory_space<vmem>>, vector<1x1x4xf32>
    %109 = vector.shape_cast %108 : vector<1x1x4xf32> to vector<1x4xf32>
    %110 = vector.shape_cast %109 : vector<1x4xf32> to vector<1x1x4xf32>
    %111 = vector.broadcast %110 : vector<1x1x4xf32> to vector<8x16x4xf32>
    %112 = arith.mulf %107, %111 : vector<8x16x4xf32>
    %cst_75 = arith.constant dense<0.000000e+00> : vector<8x16xf32>
    %113 = vector.multi_reduction <add>, %112, %cst_75 [2] : vector<8x16x4xf32> to vector<8x16xf32>
    %114 = vector.shape_cast %113 : vector<8x16xf32> to vector<8x16x1xf32>
    %115 = arith.addf %99, %114 : vector<8x16x1xf32>
    %c0_76 = arith.constant 0 : index
    %c2_77 = arith.constant 2 : index
    %c0_78 = arith.constant 0 : index
    %c0_79 = arith.constant 0 : index
    %116 = vector.load %arg3[%c0_76, %c2_77, %c0_78, %c0_79] : memref<1x10x18x128xbf16, #tpu.memory_space<vmem>>, vector<1x8x16x128xbf16>
    %117 = vector.shape_cast %116 : vector<1x8x16x128xbf16> to vector<8x16x128xbf16>
    %118 = vector.shape_cast %117 : vector<8x16x128xbf16> to vector<128x128xbf16>
    %c6 = arith.constant 6 : index
    %c0_80 = arith.constant 0 : index
    %c0_81 = arith.constant 0 : index
    %119 = vector.load %arg5[%c6, %c0_80, %c0_81] : memref<9x128x8xbf16, #tpu.memory_space<vmem>>, vector<1x128x8xbf16>
    %120 = vector.shape_cast %119 : vector<1x128x8xbf16> to vector<128x8xbf16>
    %cst_82 = arith.constant dense<0.000000e+00> : vector<128x8xf32>
    %121 = tpu.matmul %118, %120, %cst_82 {dimension_numbers = #tpu.dot_dimension_numbers<[1], [0], [0], [1], [0, 0, 1, 1], [], []>} : vector<128x128xbf16>, vector<128x8xbf16>, vector<128x8xf32> -> vector<128x8xf32>
    %122 = arith.addf %106, %121 : vector<128x8xf32>
    %123 = vector.extract_strided_slice %17 {offsets = [2, 0, 0], sizes = [8, 16, 4], strides = [1, 1, 1]} : vector<10x18x4xf32> to vector<8x16x4xf32>
    %c6_83 = arith.constant 6 : index
    %c0_84 = arith.constant 0 : index
    %c0_85 = arith.constant 0 : index
    %124 = vector.load %arg7[%c6_83, %c0_84, %c0_85] : memref<9x1x4xf32, #tpu.memory_space<vmem>>, vector<1x1x4xf32>
    %125 = vector.shape_cast %124 : vector<1x1x4xf32> to vector<1x4xf32>
    %126 = vector.shape_cast %125 : vector<1x4xf32> to vector<1x1x4xf32>
    %127 = vector.broadcast %126 : vector<1x1x4xf32> to vector<8x16x4xf32>
    %128 = arith.mulf %123, %127 : vector<8x16x4xf32>
    %cst_86 = arith.constant dense<0.000000e+00> : vector<8x16xf32>
    %129 = vector.multi_reduction <add>, %128, %cst_86 [2] : vector<8x16x4xf32> to vector<8x16xf32>
    %130 = vector.shape_cast %129 : vector<8x16xf32> to vector<8x16x1xf32>
    %131 = arith.addf %115, %130 : vector<8x16x1xf32>
    %c0_87 = arith.constant 0 : index
    %c2_88 = arith.constant 2 : index
    %c1_89 = arith.constant 1 : index
    %c0_90 = arith.constant 0 : index
    %132 = vector.load %arg3[%c0_87, %c2_88, %c1_89, %c0_90] : memref<1x10x18x128xbf16, #tpu.memory_space<vmem>>, vector<1x8x16x128xbf16>
    %133 = vector.shape_cast %132 : vector<1x8x16x128xbf16> to vector<8x16x128xbf16>
    %134 = vector.shape_cast %133 : vector<8x16x128xbf16> to vector<128x128xbf16>
    %c7 = arith.constant 7 : index
    %c0_91 = arith.constant 0 : index
    %c0_92 = arith.constant 0 : index
    %135 = vector.load %arg5[%c7, %c0_91, %c0_92] : memref<9x128x8xbf16, #tpu.memory_space<vmem>>, vector<1x128x8xbf16>
    %136 = vector.shape_cast %135 : vector<1x128x8xbf16> to vector<128x8xbf16>
    %cst_93 = arith.constant dense<0.000000e+00> : vector<128x8xf32>
    %137 = tpu.matmul %134, %136, %cst_93 {dimension_numbers = #tpu.dot_dimension_numbers<[1], [0], [0], [1], [0, 0, 1, 1], [], []>} : vector<128x128xbf16>, vector<128x8xbf16>, vector<128x8xf32> -> vector<128x8xf32>
    %138 = arith.addf %122, %137 : vector<128x8xf32>
    %139 = vector.extract_strided_slice %17 {offsets = [2, 1, 0], sizes = [8, 16, 4], strides = [1, 1, 1]} : vector<10x18x4xf32> to vector<8x16x4xf32>
    %c7_94 = arith.constant 7 : index
    %c0_95 = arith.constant 0 : index
    %c0_96 = arith.constant 0 : index
    %140 = vector.load %arg7[%c7_94, %c0_95, %c0_96] : memref<9x1x4xf32, #tpu.memory_space<vmem>>, vector<1x1x4xf32>
    %141 = vector.shape_cast %140 : vector<1x1x4xf32> to vector<1x4xf32>
    %142 = vector.shape_cast %141 : vector<1x4xf32> to vector<1x1x4xf32>
    %143 = vector.broadcast %142 : vector<1x1x4xf32> to vector<8x16x4xf32>
    %144 = arith.mulf %139, %143 : vector<8x16x4xf32>
    %cst_97 = arith.constant dense<0.000000e+00> : vector<8x16xf32>
    %145 = vector.multi_reduction <add>, %144, %cst_97 [2] : vector<8x16x4xf32> to vector<8x16xf32>
    %146 = vector.shape_cast %145 : vector<8x16xf32> to vector<8x16x1xf32>
    %147 = arith.addf %131, %146 : vector<8x16x1xf32>
    %c0_98 = arith.constant 0 : index
    %c2_99 = arith.constant 2 : index
    %c2_100 = arith.constant 2 : index
    %c0_101 = arith.constant 0 : index
    %148 = vector.load %arg3[%c0_98, %c2_99, %c2_100, %c0_101] : memref<1x10x18x128xbf16, #tpu.memory_space<vmem>>, vector<1x8x16x128xbf16>
    %149 = vector.shape_cast %148 : vector<1x8x16x128xbf16> to vector<8x16x128xbf16>
    %150 = vector.shape_cast %149 : vector<8x16x128xbf16> to vector<128x128xbf16>
    %c8 = arith.constant 8 : index
    %c0_102 = arith.constant 0 : index
    %c0_103 = arith.constant 0 : index
    %151 = vector.load %arg5[%c8, %c0_102, %c0_103] : memref<9x128x8xbf16, #tpu.memory_space<vmem>>, vector<1x128x8xbf16>
    %152 = vector.shape_cast %151 : vector<1x128x8xbf16> to vector<128x8xbf16>
    %cst_104 = arith.constant dense<0.000000e+00> : vector<128x8xf32>
    %153 = tpu.matmul %150, %152, %cst_104 {dimension_numbers = #tpu.dot_dimension_numbers<[1], [0], [0], [1], [0, 0, 1, 1], [], []>} : vector<128x128xbf16>, vector<128x8xbf16>, vector<128x8xf32> -> vector<128x8xf32>
    %154 = arith.addf %138, %153 : vector<128x8xf32>
    %155 = vector.extract_strided_slice %17 {offsets = [2, 2, 0], sizes = [8, 16, 4], strides = [1, 1, 1]} : vector<10x18x4xf32> to vector<8x16x4xf32>
    %c8_105 = arith.constant 8 : index
    %c0_106 = arith.constant 0 : index
    %c0_107 = arith.constant 0 : index
    %156 = vector.load %arg7[%c8_105, %c0_106, %c0_107] : memref<9x1x4xf32, #tpu.memory_space<vmem>>, vector<1x1x4xf32>
    %157 = vector.shape_cast %156 : vector<1x1x4xf32> to vector<1x4xf32>
    %158 = vector.shape_cast %157 : vector<1x4xf32> to vector<1x1x4xf32>
    %159 = vector.broadcast %158 : vector<1x1x4xf32> to vector<8x16x4xf32>
    %160 = arith.mulf %155, %159 : vector<8x16x4xf32>
    %cst_108 = arith.constant dense<0.000000e+00> : vector<8x16xf32>
    %161 = vector.multi_reduction <add>, %160, %cst_108 [2] : vector<8x16x4xf32> to vector<8x16xf32>
    %162 = vector.shape_cast %161 : vector<8x16xf32> to vector<8x16x1xf32>
    %163 = arith.addf %147, %162 : vector<8x16x1xf32>
    %c0_109 = arith.constant 0 : index
    %c0_110 = arith.constant 0 : index
    %164 = vector.load %arg6[%c0_109, %c0_110] : memref<1x8xf32, #tpu.memory_space<vmem>>, vector<1x8xf32>
    %165 = vector.broadcast %164 : vector<1x8xf32> to vector<128x8xf32>
    %166 = arith.addf %154, %165 : vector<128x8xf32>
    %167 = vector.shape_cast %166 : vector<128x8xf32> to vector<8x16x8xf32>
    %168 = vector.extract_strided_slice %167 {offsets = [0, 0, 0], sizes = [8, 16, 4], strides = [1, 1, 1]} : vector<8x16x8xf32> to vector<8x16x4xf32>
    %169 = vector.extract_strided_slice %167 {offsets = [0, 0, 4], sizes = [8, 16, 4], strides = [1, 1, 1]} : vector<8x16x8xf32> to vector<8x16x4xf32>
    %c0_111 = arith.constant 0 : index
    %c0_112 = arith.constant 0 : index
    %c0_113 = arith.constant 0 : index
    %170 = vector.load %arg4[%c0_111, %c0_112, %c0_113] : memref<1x1x8xf32, #tpu.memory_space<vmem>>, vector<1x1x4xf32>
    %171 = vector.shape_cast %170 : vector<1x1x4xf32> to vector<1x4xf32>
    %c0_114 = arith.constant 0 : index
    %c0_115 = arith.constant 0 : index
    %c4_116 = arith.constant 4 : index
    %172 = vector.load %arg4[%c0_114, %c0_115, %c4_116] : memref<1x1x8xf32, #tpu.memory_space<vmem>>, vector<1x1x4xf32>
    %173 = vector.shape_cast %172 : vector<1x1x4xf32> to vector<1x4xf32>
    %174 = vector.extract_strided_slice %17 {offsets = [1, 1, 0], sizes = [8, 16, 4], strides = [1, 1, 1]} : vector<10x18x4xf32> to vector<8x16x4xf32>
    %175 = arith.mulf %168, %174 : vector<8x16x4xf32>
    %176 = arith.addf %175, %169 : vector<8x16x4xf32>
    %177 = vector.shape_cast %171 : vector<1x4xf32> to vector<1x1x4xf32>
    %178 = vector.broadcast %177 : vector<1x1x4xf32> to vector<8x16x4xf32>
    %179 = arith.mulf %178, %174 : vector<8x16x4xf32>
    %180 = vector.shape_cast %173 : vector<1x4xf32> to vector<1x1x4xf32>
    %181 = vector.broadcast %180 : vector<1x1x4xf32> to vector<8x16x4xf32>
    %182 = arith.addf %179, %181 : vector<8x16x4xf32>
    %c0_117 = arith.constant 0 : index
    %c0_118 = arith.constant 0 : index
    %183 = vector.load %arg8[%c0_117, %c0_118] : memref<1x1xf32, #tpu.memory_space<vmem>>, vector<1x1xf32>
    %184 = vector.shape_cast %183 : vector<1x1xf32> to vector<1x1x1xf32>
    %185 = vector.broadcast %184 : vector<1x1x1xf32> to vector<8x16x1xf32>
    %186 = arith.addf %163, %185 : vector<8x16x1xf32>
    %187 = arith.negf %186 : vector<8x16x1xf32>
    %188 = math.exp %187 : vector<8x16x1xf32>
    %cst_119 = arith.constant 1.000000e+00 : f32
    %189 = vector.broadcast %cst_119 : f32 to vector<8x16x1xf32>
    %190 = arith.addf %189, %188 : vector<8x16x1xf32>
    %191 = arith.divf %189, %190 : vector<8x16x1xf32>
    %cst_120 = arith.constant 1.000000e+00 : f32
    %192 = vector.broadcast %cst_120 : f32 to vector<8x16x1xf32>
    %193 = arith.subf %192, %191 : vector<8x16x1xf32>
    %194 = vector.broadcast %193 : vector<8x16x1xf32> to vector<8x16x4xf32>
    %195 = arith.mulf %194, %176 : vector<8x16x4xf32>
    %196 = vector.broadcast %191 : vector<8x16x1xf32> to vector<8x16x4xf32>
    %197 = arith.mulf %196, %182 : vector<8x16x4xf32>
    %198 = arith.addf %195, %197 : vector<8x16x4xf32>
    %c0_121 = arith.constant 0 : index
    %c0_122 = arith.constant 0 : index
    %c0_123 = arith.constant 0 : index
    %c0_124 = arith.constant 0 : index
    %199 = vector.load %arg9[%c0_121, %c0_122, %c0_123, %c0_124] : memref<1x8x16x4xf32, #tpu.memory_space<vmem>>, vector<1x8x16x4xf32>
    %200 = vector.shape_cast %199 : vector<1x8x16x4xf32> to vector<8x16x4xf32>
    %201 = vector.shape_cast %198 : vector<8x16x4xf32> to vector<1x8x16x4xf32>
    tpu.vector_store %arg9[%c0_121, %c0_122, %c0_123, %c0_124], %201 {strides = array<i32>} : memref<1x8x16x4xf32, #tpu.memory_space<vmem>>, vector<1x8x16x4xf32>,
    return
  }
  func.func @transform_0(%arg0: i32, %arg1: i32) -> (i32, i32, i32, i32) {
    %c2_i32 = arith.constant 2 : i32
    %0 = arith.muli %arg0, %c2_i32 : i32
    %1 = arith.addi %0, %arg1 : i32
    %c0_i32 = arith.constant 0 : i32
    %c0_i32_0 = arith.constant 0 : i32
    %c0_i32_1 = arith.constant 0 : i32
    %c0_i32_2 = arith.constant 0 : i32
    return %1, %c0_i32, %c0_i32_0, %c0_i32_1 : i32, i32, i32, i32
  }
  func.func @transform_1(%arg0: i32, %arg1: i32) -> (i32, i32, i32, i32) {
    %c2_i32 = arith.constant 2 : i32
    %0 = arith.muli %arg0, %c2_i32 : i32
    %1 = arith.addi %0, %arg1 : i32
    %c0_i32 = arith.constant 0 : i32
    %c0_i32_0 = arith.constant 0 : i32
    %c0_i32_1 = arith.constant 0 : i32
    %c0_i32_2 = arith.constant 0 : i32
    return %1, %c0_i32, %c0_i32_0, %c0_i32_1 : i32, i32, i32, i32
  }
  func.func @transform_2(%arg0: i32, %arg1: i32) -> (i32, i32, i32) {
    %c0_i32 = arith.constant 0 : i32
    %c0_i32_0 = arith.constant 0 : i32
    %c0_i32_1 = arith.constant 0 : i32
    return %arg0, %c0_i32, %c0_i32_0 : i32, i32, i32
  }
  func.func @transform_3(%arg0: i32, %arg1: i32) -> (i32, i32, i32) {
    %c0_i32 = arith.constant 0 : i32
    %c0_i32_0 = arith.constant 0 : i32
    %c0_i32_1 = arith.constant 0 : i32
    %c0_i32_2 = arith.constant 0 : i32
    return %c0_i32, %c0_i32_0, %c0_i32_1 : i32, i32, i32
  }
  func.func @transform_4(%arg0: i32, %arg1: i32) -> (i32, i32) {
    %c0_i32 = arith.constant 0 : i32
    %c0_i32_0 = arith.constant 0 : i32
    %c0_i32_1 = arith.constant 0 : i32
    return %c0_i32, %c0_i32_0 : i32, i32
  }
  func.func @transform_5(%arg0: i32, %arg1: i32) -> (i32, i32, i32) {
    %c0_i32 = arith.constant 0 : i32
    %c0_i32_0 = arith.constant 0 : i32
    %c0_i32_1 = arith.constant 0 : i32
    %c0_i32_2 = arith.constant 0 : i32
    return %c0_i32, %c0_i32_0, %c0_i32_1 : i32, i32, i32
  }
  func.func @transform_6(%arg0: i32, %arg1: i32) -> (i32, i32) {
    %c0_i32 = arith.constant 0 : i32
    %c0_i32_0 = arith.constant 0 : i32
    %c0_i32_1 = arith.constant 0 : i32
    return %c0_i32, %c0_i32_0 : i32, i32
  }
  func.func @transform_7(%arg0: i32, %arg1: i32) -> (i32, i32, i32, i32) {
    %c2_i32 = arith.constant 2 : i32
    %0 = arith.muli %arg0, %c2_i32 : i32
    %1 = arith.addi %0, %arg1 : i32
    %c0_i32 = arith.constant 0 : i32
    %c0_i32_0 = arith.constant 0 : i32
    %c0_i32_1 = arith.constant 0 : i32
    %c0_i32_2 = arith.constant 0 : i32
    return %1, %c0_i32, %c0_i32_0, %c0_i32_1 : i32, i32, i32, i32
  }
}

</mosaic_0001>

<bundles_post_ra>
// kernel: aad_forward.2
= control target key start
LH: loop header
LB: loop body
LE: loop exit
PB: predicated region body
PF: predicated region fallthrough
CT: control target
= control target key end

     0   :  { %s3604_s12 = smov 0   ;;  %s3606_s13 = smov 0   ;;  %s4760_s0 = inlined_call_operand.vmem [shape: bf16[4,10,18,8], index: 0, kind: input, shape index: {}]   ;;  %s4761_s1 = inlined_call_operand.vmem [shape: bf16[9,8,128], index: 1, kind: input, shape index: {}]   ;;  %s4762_s2 = inlined_call_operand.vmem [shape: f32[1,128], index: 2, kind: input, shape index: {}]   ;;  %s4763_s3 = inlined_call_operand.vmem [shape: bf16[4,8,16,128], index: 3, kind: output, shape index: {}]  }
   0x1   :  { %s3608_s14 = smov 0   ;;  %s3610_s15 = smov 0  }
   0x2   :  { %s3612_s16 = smov 0  }
   0x3 LB: > { %s22_s17 = sadd.s32 1, %s3574_s14  ;;  %s25_s18 = sadd.s32 1, %s3578_s15  ;;  %s3582_s16 = sphi %s3612_s16, %s13_s16   ;;  %s3578_s15 = sphi %s3610_s15, %s4819_s15   ;;  %s3574_s14 = sphi %s3608_s14, %s4818_s14   ;;  %s3570_s13 = sphi %s3606_s13, %s4817_s13   ;;  %s3566_s12 = sphi %s3604_s12, %s4816_s12  }
   0x4   : > { %p23_p0 = scmp.ge.s32.totalorder %s22_s17, 2  ;;  %p2863_p1 = scmp.ge.s32.totalorder %s3582_s16, 1 }
   0x5   : > { %p161_p2 = scmp.lt.s32.totalorder %s3582_s16, 5 }
   0x6   : > { %s4821_s17 = smov (%p23_p0, %s22_s17), 0  ;;  %s4823_s18 = smov (!%p23_p0, %s25_s18), %s3578_s15 }
   0x7   : > { %p162_p3 = pnand %p2863_p1, %p161_p2  ;;  %p27_p4 = scmp.ge.s32.totalorder %s4823_s18, 2 }
   0x9   : > { %s4825_s18 = smov (%p27_p4, %s4823_s18), 0  ;;  %165 = sbr.rel (%p162_p3) target bundleno = 401 (0x191), region = 32 }
   0xe   : > { %v2869_v0 = vld [vmem:[%s4761_s1 + $0x4] sm:$0xf]  ;;  %vm479_vm0 = vcmask 1043456   ;;  %s2864_s21 = sshll.u32 %s3570_s13, 1  ;;  %v224_v2 = vld [vmem:[%s4761_s1] sm:$0xf] }
   0xf   : > { %3470 = vmatprep.subr.msk.bf16.mxu1 %vm479_vm0, %v2869_v0  ;;  %3469 = vmatprep.subr.msk.bf16.mxu0 %vm479_vm0, %v2869_v0  ;;  %v481_v1 = vsel %vm479_vm0, %v2869_v0, 0  ;;  %s190_s22 = sadd.s32 %s3566_s12, %s2864_s21  ;;  %v2910_v3 = vld [vmem:[%s4761_s1 + $0x8] sm:$0xf]  ;;  %vm233_vm1 = vsmask.f32 3328  ;;  %vm454_vm3 = vcmask 64512  }
  0x10   : > { %3468 = vmatpush3.bf16.msra.mxu1 %v481_v1  ;;  %3306 = vmatpush3.bf16.msra.mxu0 %v481_v1  ;;  %p191_p5 = scmp.lt.s32.totalorder %s190_s22, 3  ;;  %vm234_vm2 = vsmask.f32 7440  ;;  %v3680_v15 = vsel %vm479_vm0, %v224_v2, 0  ;;  %v3700_v34 = vsel %vm479_vm0, %v2910_v3, 0  ;;  %vm768_vm5 = vcmask 1042432  }
  0x11   : > { %3471 = vmatprep.subr.msk.bf16.mxu1 %vm479_vm0, %v224_v2  ;;  %3472 = vmatprep.subr.msk.bf16.mxu0 %vm479_vm0, %v2910_v3  ;;  %vm3695_vm4 = vmor %vm233_vm1, %vm234_vm2  ;;  %vm769_vm6 = vcmask 1046532  }
  0x12   : > { %s4827_s22 = smov (!%p191_p5, %s190_s22), 3  ;;  %vm3831_vm7 = vmor %vm768_vm5, %vm769_vm6 }
  0x13   : > { %s3479_s27 = smul.u32 120, %s4827_s22  ;;  %s3160_s24 = sshll.u32 %s4827_s22, 6 }
  0x14   : > { %s4698_s26 = scalar_lea.vmem %s4763_s3, %s3160_s24 }
  0x15   : > { %s3654_s30 = scalar_lea.vmem %s4760_s0, %s3479_s27 }
  0x16   : > { %v3657_v4 = vld [vmem:[%s3654_s30] sm:$0xf]  ;;  %v3660_v5 = vld [vmem:[%s3654_s30 + $0x4] sm:$0xf]  ;;  %v3663_v6 = vld [vmem:[%s3654_s30 + $0x8] sm:$0x1] }
  0x17   : > { %v237_v7 = vshrl.u32 %v3657_v4, 16  ;;  %v240_v8 = vshll.u32 %v3657_v4, 16  ;;  %v246_v9 = vshll.u32 %v3660_v5, 16  ;;  %v250_v10 = vshrl.u32 %v3660_v5, 16  ;;  %v3670_v11 = vld [vmem:[%s3654_s30 + $0x30] sm:$0xf] }
  0x18   : > { %v256_v12 = vshll.u32 %v3663_v6, 16  ;;  %v3674_v13 = vld [vmem:[%s3654_s30 + $0x34] sm:$0xf]  ;;  %v3677_v14 = vld [vmem:[%s3654_s30 + $0x38] sm:$0x1]  ;;  %v333_v21 = vshrl.u32 %v3670_v11, 16 }
  0x19   : > { %v239_v16 = vrot.slane %v237_v7, 4  ;;  %v242_v17 = vrot.slane %v240_v8, 5  ;;  %v248_v18 = vrot.slane %v246_v9, 5  ;;  %v252_v19 = vrot.slane %v250_v10, 4  ;;  %v3688_v28 = vld [vmem:[%s3654_s30 + $0xc] sm:$0xf] }
  0x1a   : > { %v258_v20 = vrot.slane %v256_v12, 5  ;;  %v336_v22 = vshll.u32 %v3670_v11, 16  ;;  %v342_v23 = vshll.u32 %v3674_v13, 16  ;;  %v346_v26 = vshrl.u32 %v3674_v13, 16  ;;  %v3691_v29 = vld [vmem:[%s3654_s30 + $0x10] sm:$0xf] }
  0x1b   : > { %v243_v24 = vor.u32 %v242_v17, %v239_v16  ;;  %v253_v25 = vor.u32 %v252_v19, %v248_v18  ;;  %v352_v27 = vshll.u32 %v3677_v14, 16  ;;  %v335_v31 = vrot.slane %v333_v21, 4  ;;  %v3703_v40 = vld [vmem:[%s3654_s30 + $0x14] sm:$0x1]  ;;  %v3714_v52 = vld [vmem:[%s3654_s30 + $0x3c] sm:$0xf] }
  0x1c   : > { %v338_v32 = vrot.slane %v336_v22, 5  ;;  %v344_v33 = vrot.slane %v342_v23, 5  ;;  %v348_v37 = vrot.slane %v346_v26, 4  ;;  %v261_v41 = vshrl.u32 %v3688_v28, 16  ;;  %v3718_v57 = vld [vmem:[%s3654_s30 + $0x40] sm:$0xf] }
  0x1d   : > { %v244_v35 = vrot.slane %v243_v24, 4  ;;  %v254_v36 = vrot.slane %v253_v25, 4  ;;  %v354_v38 = vrot.slane %v352_v27, 5  ;;  %v264_v42 = vshll.u32 %v3688_v28, 16  ;;  %v3726_v62 = vld [vmem:[%s3654_s30 + $0x44] sm:$0x1] }
  0x1e   : > { %v339_v39 = vor.u32 %v338_v32, %v335_v31  ;;  %v270_v43 = vshll.u32 %v3691_v29, 16  ;;  %v349_v46 = vor.u32 %v348_v37, %v344_v33  ;;  %v274_v47 = vshrl.u32 %v3691_v29, 16  ;;  %v3732_v3 = vld [vmem:[%s3654_s30 + $0x18] sm:$0xf]  ;;  %v3739_v19 = vld [vmem:[%s3654_s30 + $0x1c] sm:$0xf] }
  0x1f   : > { %v249_v44 = vsel %vm3695_vm4, %v244_v35, %v248_v18  ;;  %v259_v45 = vsel %vm3695_vm4, %v254_v36, %v258_v20  ;;  %v263_v50 = vrot.slane %v261_v41, 4  ;;  %v266_v51 = vrot.slane %v264_v42, 5  ;;  %v3745_v23 = vld [vmem:[%s3654_s30 + $0x20] sm:$0x1]  ;;  %v3752_v32 = vld [vmem:[%s3654_s30 + $0x48] sm:$0xf] }
  0x20   : > { %v2870_v48 = vcombine.low %v249_v44, %v259_v45  ;;  %v340_v49 = vrot.slane %v339_v39, 4  ;;  %v350_v53 = vrot.slane %v349_v46, 4  ;;  %v272_v54 = vrot.slane %v270_v43, 5  ;;  %v3763_v44 = vld [vmem:[%s3654_s30 + $0x4c] sm:$0xf] }
  0x21   : > { %v276_v55 = vrot.slane %v274_v47, 4  ;;  %v280_v56 = vshll.u32 %v3703_v40, 16  ;;  %v776_v58 = vrot.slane %v3663_v6, 5  ;;  %v267_v60 = vor.u32 %v266_v51, %v263_v50 }
  0x22   : > { %3307 = vmatprep.mubr.msk.bf16.mxu0 %vm454_vm3, %v2870_v48  ;;  %v345_v59 = vsel %vm3695_vm4, %v340_v49, %v344_v33  ;;  %v780_v61 = vrot.slane %v3691_v29, 5  ;;  %v355_v63 = vsel %vm3695_vm4, %v350_v53, %v354_v38  ;;  %v357_v2 = vshrl.u32 %v3714_v52, 16  ;;  %v3758_v38 = vld [vmem:[%s4761_s1 + $0x10] sm:$0xf] }
  0x23   : > { %v277_v0 = vor.u32 %v276_v55, %v272_v54  ;;  %v282_v1 = vrot.slane %v280_v56, 5  ;;  %v2874_v7 = vcombine.low %v345_v59, %v355_v63  ;;  %v268_v8 = vrot.slane %v267_v60, 4  ;;  %v3776_v63 = vld [vmem:[%s3654_s30 + $0x24] sm:$0xf] }
  0x24   : > { %v360_v9 = vshll.u32 %v3714_v52, 16  ;;  %v366_v10 = vshll.u32 %v3718_v57, 16  ;;  %v359_v16 = vrot.slane %v357_v2, 4  ;;  %v370_v17 = vshrl.u32 %v3718_v57, 16 }
  0x25   : > { %v278_v12 = vrot.slane %v277_v0, 4  ;;  %v376_v18 = vshll.u32 %v3726_v62, 16  ;;  %3315 = vmatprep.mubr.msk.bf16.mxu1 %vm454_vm3, %v2874_v7  ;;  %v273_v20 = vsel %vm3695_vm4, %v268_v8, %v272_v54  ;;  %v285_v24 = vshrl.u32 %v3732_v3, 16  ;;  %v3770_v54 = vld [vmem:[%s3654_s30 + $0x50] sm:$0x1] }
  0x26   : > { %v362_v21 = vrot.slane %v360_v9, 5  ;;  %v368_v22 = vrot.slane %v366_v10, 5  ;;  %v372_v26 = vrot.slane %v370_v17, 4  ;;  %v288_v31 = vshll.u32 %v3732_v3, 16  ;;  %v3784_v7 = vld [vmem:[%s3654_s30 + $0x28] sm:$0xf] }
  0x27   : > { %v283_v25 = vsel %vm3695_vm4, %v278_v12, %v282_v1  ;;  %v378_v27 = vrot.slane %v376_v18, 5  ;;  %v287_v36 = vrot.slane %v285_v24, 4  ;;  %v294_v37 = vshll.u32 %v3739_v19, 16  ;;  %v3789_v8 = vld [vmem:[%s4761_s1 + $0xc] sm:$0xf] }
  0x28   : > { %v2871_v33 = vcombine.low %v273_v20, %v283_v25  ;;  %v363_v35 = vor.u32 %v362_v21, %v359_v16  ;;  %v373_v39 = vor.u32 %v372_v26, %v368_v22  ;;  %v290_v41 = vrot.slane %v288_v31, 5  ;;  %v3793_v17 = vld [vmem:[%s3654_s30 + $0x2c] sm:$0x1]  ;;  %v3799_v24 = vld [vmem:[%s3654_s30 + $0x54] sm:$0xf] }
  0x29   : > { %v298_v42 = vshrl.u32 %v3739_v19, 16  ;;  %v304_v43 = vshll.u32 %v3745_v23, 16  ;;  %v296_v46 = vrot.slane %v294_v37, 5  ;;  %v381_v47 = vshrl.u32 %v3752_v32, 16 }
  0x2a   : > { %3308 = vmatmul.mubr.msk.bf16.vlgmr.msra.gmra.mxu0 %vm454_vm3, %v2871_v33  ;;  %v364_v45 = vrot.slane %v363_v35, 4  ;;  %v384_v48 = vshll.u32 %v3752_v32, 16  ;;  %v374_v49 = vrot.slane %v373_v39, 4  ;;  %v291_v50 = vor.u32 %v290_v41, %v287_v36  ;;  %v3805_v33 = vld [vmem:[%s3654_s30 + $0x58] sm:$0xf] }
  0x2b   : > { %3342 = vmatpush3.bf16.msra.mxu0 %v3700_v34  ;;  %v300_v51 = vrot.slane %v298_v42, 4  ;;  %v306_v53 = vrot.slane %v304_v43, 5  ;;  %v383_v56 = vrot.slane %v381_v47, 4  ;;  %v390_v60 = vshll.u32 %v3763_v44, 16 }
  0x2c   : > { %v369_v55 = vsel %vm3695_vm4, %v364_v45, %v368_v22  ;;  %v386_v59 = vrot.slane %v384_v48, 5  ;;  %3474 = vmatprep.subr.msk.bf16.mxu0 %vm479_vm0, %v3758_v38  ;;  %v379_v34 = vsel %vm3695_vm4, %v374_v49, %v378_v27  ;;  %v292_v0 = vrot.slane %v291_v50, 4  ;;  %v744_v50 = vld [vmem:[%s3654_s30] sm:$0xe] }
  0x2d   : > { %v301_v1 = vor.u32 %v300_v51, %v296_v46  ;;  %v394_v2 = vshrl.u32 %v3763_v44, 16  ;;  %v2875_v9 = vcombine.low %v369_v55, %v379_v34  ;;  %v392_v12 = vrot.slane %v390_v60, 5 }
  0x2e   : > { %v387_v10 = vor.u32 %v386_v59, %v383_v56  ;;  %v400_v16 = vshll.u32 %v3770_v54, 16  ;;  %v297_v18 = vsel %vm3695_vm4, %v292_v0, %v296_v46  ;;  %v309_v22 = vshrl.u32 %v3776_v63, 16  ;;  %v3814_v46 = vld [vmem:[%s3654_s30 + $0x5c] sm:$0x1] }
  0x2f   : > { %v302_v20 = vrot.slane %v301_v1, 4  ;;  %v396_v21 = vrot.slane %v394_v2, 4  ;;  %3316 = vmatmul.mubr.msk.bf16.vlgmr.msra.gmra.mxu1 %vm454_vm3, %v2875_v9  ;;  %v312_v27 = vshll.u32 %v3776_v63, 16  ;;  %v318_v31 = vshll.u32 %v3784_v7, 16 }
  0x30   : > { %v388_v25 = vrot.slane %v387_v10, 4  ;;  %v402_v26 = vrot.slane %v400_v16, 5  ;;  %3324 = vmatpush3.bf16.msra.mxu1 %v3680_v15  ;;  %v311_v37 = vrot.slane %v309_v22, 4  ;;  %v322_v39 = vshrl.u32 %v3784_v7, 16 }
  0x31   : > { %v307_v35 = vsel %vm3695_vm4, %v302_v20, %v306_v53  ;;  %v397_v36 = vor.u32 %v396_v21, %v392_v12  ;;  %v314_v43 = vrot.slane %v312_v27, 5  ;;  %v320_v45 = vrot.slane %v318_v31, 5  ;;  %3473 = vmatprep.subr.msk.bf16.mxu1 %vm479_vm0, %v3789_v8 }
  0x32   : > { %v2872_v41 = vcombine.low %v297_v18, %v307_v35  ;;  %v393_v42 = vsel %vm3695_vm4, %v388_v25, %v392_v12  ;;  %v324_v15 = vrot.slane %v322_v39, 4  ;;  %v328_v48 = vshll.u32 %v3793_v17, 16  ;;  %v745_v12 = vld [vmem:[%s3654_s30 + $0xc] sm:$0xe] }
  0x33   : > { %v398_v47 = vrot.slane %v397_v36, 4  ;;  %v405_v49 = vshrl.u32 %v3799_v24, 16  ;;  %v315_v51 = vor.u32 %v314_v43, %v311_v37  ;;  %v408_v53 = vshll.u32 %v3799_v24, 16 }
  0x34   : > { %3311 = vmatprep.mubr.msk.bf16.mxu0 %vm454_vm3, %v2872_v41  ;;  %v414_v55 = vshll.u32 %v3805_v33, 16  ;;  %v418_v56 = vshrl.u32 %v3805_v33, 16  ;;  %v325_v60 = vor.u32 %v324_v15, %v320_v45  ;;  %v330_v34 = vrot.slane %v328_v48, 5  ;;  %v746_v41 = vld [vmem:[%s3654_s30 + $0x18] sm:$0xe] }
  0x35   : > { %v403_v59 = vsel %vm3695_vm4, %v398_v47, %v402_v26  ;;  %v407_v0 = vrot.slane %v405_v49, 4  ;;  %v316_v2 = vrot.slane %v315_v51, 4  ;;  %v410_v9 = vrot.slane %v408_v53, 5 }
  0x36   : > { %v2876_v1 = vcombine.low %v393_v42, %v403_v59  ;;  %v416_v10 = vrot.slane %v414_v55, 5  ;;  %v326_v16 = vrot.slane %v325_v60, 4  ;;  %v420_v18 = vrot.slane %v418_v56, 4  ;;  %v748_v55 = vld [vmem:[%s3654_s30 + $0x30] sm:$0xe] }
  0x37   : > { %v424_v20 = vshll.u32 %v3814_v46, 16  ;;  %v2902_v22 = vrot.slane %v744_v50, 9  ;;  %v783_v25 = vrot.slane %v3703_v40, 5  ;;  %v321_v26 = vsel %vm3695_vm4, %v316_v2, %v320_v45 }
  0x38   : > { %3319 = vmatprep.mubr.msk.bf16.mxu1 %vm454_vm3, %v2876_v1  ;;  %v411_v27 = vor.u32 %v410_v9, %v407_v0  ;;  %v773_v31 = vrot.slane %v3660_v5, 5  ;;  %v331_v35 = vsel %vm3695_vm4, %v326_v16, %v330_v34  ;;  %v421_v36 = vor.u32 %v420_v18, %v416_v10  ;;  %v3050_v1 = vld [vmem:[%s4761_s1 + $0x18] sm:$0xf] }
  0x39   : > { %v426_v37 = vrot.slane %v424_v20, 5  ;;  %v2903_v39 = vrot.slane %v745_v12, 9  ;;  %v2873_v42 = vcombine.low %v321_v26, %v331_v35  ;;  %v2886_v45 = vcombine.low %v3657_v4, %v3660_v5  ;;  %v747_v5 = vld [vmem:[%s3654_s30 + $0x24] sm:$0xe]  ;;  %v749_v12 = vld [vmem:[%s3654_s30 + $0x3c] sm:$0xe] }
  0x3a   : > { %v412_v43 = vrot.slane %v411_v27, 4  ;;  %v774_v40 = vsel %vm3831_vm7, %v2902_v22, %v773_v31  ;;  %v775_v47 = vrot.slane %v773_v31, 4  ;;  %v422_v15 = vrot.slane %v421_v36, 4 }
  0x3b   : > { %v781_v48 = vsel %vm3831_vm7, %v2903_v39, %v780_v61  ;;  %v782_v49 = vrot.slane %v780_v61, 4  ;;  %3312 = vmatmul.mubr.msk.bf16.gmra.mxu0 %vm454_vm3, %v2873_v42  ;;  %v2904_v53 = vrot.slane %v746_v41, 9  ;;  %v787_v4 = vrot.slane %v3739_v19, 5  ;;  %v750_v41 = vld [vmem:[%s3654_s30 + $0x48] sm:$0xe] }
  0x3c   : > { %v417_v50 = vsel %vm3695_vm4, %v412_v43, %v416_v10  ;;  %v777_v51 = vsel %vm3831_vm7, %v775_v47, %v776_v58  ;;  %v427_v56 = vsel %vm3695_vm4, %v422_v15, %v426_v37  ;;  %v790_v60 = vrot.slane %v3745_v23, 5  ;;  %v3909_v42 = vld [vmem:[%s3654_s30 + $0x54] sm:$0xe]  ;;  %v2960_v43 = vld [vmem:[%s3654_s30 + $0xc] sm:$0xf] }
  0x3d   : > { %v2911_v61 = vcombine.low %v774_v40, %v777_v51  ;;  %v784_v59 = vsel %vm3831_vm7, %v782_v49, %v783_v25  ;;  %v2877_v34 = vcombine.low %v417_v50, %v427_v56  ;;  %v1077_v6 = vsel %vm479_vm0, %v3789_v8, 0  ;;  %v3929_v49 = vld [vmem:[%s4761_s1 + $0x14] sm:$0xf] }
  0x3e   : > { %v788_v58 = vsel %vm3831_vm7, %v2904_v53, %v787_v4  ;;  %v789_v0 = vrot.slane %v787_v4, 4  ;;  %v804_v2 = vrot.slane %v3677_v14, 5  ;;  %v2905_v9 = vrot.slane %v747_v5, 9  ;;  %v2963_v5 = vld [vmem:[%s3654_s30 + $0x18] sm:$0xf] }
  0x3f   : > { %3343 = vmatprep.mubr.msk.bf16.mxu0 %vm454_vm3, %v2911_v61  ;;  %v794_v10 = vrot.slane %v3784_v7, 5  ;;  %v797_v23 = vrot.slane %v3793_v17, 5  ;;  %3320 = vmatmul.mubr.msk.bf16.gmra.mxu1 %vm454_vm3, %v2877_v34  ;;  %v2912_v8 = vcombine.low %v781_v48, %v784_v59  ;;  %v2906_v18 = vrot.slane %v748_v55, 9  ;;  %v3924_v48 = vld [vmem:[%s3654_s30 + $0x14] sm:$0x1] }
  0x40   : > { %v791_v16 = vsel %vm3831_vm7, %v789_v0, %v790_v60  ;;  %v801_v20 = vrot.slane %v3674_v13, 5  ;;  %3325 = vmatprep.mubr.msk.bf16.mxu1 %vm454_vm3, %v2886_v45  ;;  %v1459_v14 = vsel %vm479_vm0, %v3758_v38, 0  ;;  %v3888_v17 = vsel %vm479_vm0, %v3050_v1, 0  ;;  %v3940_v60 = vld [vmem:[%s3654_s30 + $0x1c] sm:$0xf] }
  0x41   : > { %v2913_v22 = vcombine.low %v788_v58, %v791_v16  ;;  %v796_v25 = vrot.slane %v794_v10, 4  ;;  %v2887_v26 = vcombine.low %v3688_v28, %v3691_v29  ;;  %v2907_v31 = vrot.slane %v749_v12, 9 }
  0x42   : > { %v803_v27 = vrot.slane %v801_v20, 4  ;;  %v808_v35 = vrot.slane %v3718_v57, 5  ;;  %v2888_v36 = vcombine.low %v3732_v3, %v3739_v19  ;;  %v795_v38 = vsel %vm3831_vm7, %v2905_v9, %v794_v10 }
  0x43   : > { %v798_v37 = vsel %vm3831_vm7, %v796_v25, %v797_v23  ;;  %v802_v39 = vsel %vm3831_vm7, %v2906_v18, %v801_v20  ;;  %3344 = vmatmul.mubr.msk.bf16.vlgmr.msra.gmra.mxu0 %vm454_vm3, %v2912_v8  ;;  %v2889_v28 = vcombine.low %v3776_v63, %v3784_v7  ;;  %v811_v19 = vrot.slane %v3726_v62, 5  ;;  %v3921_v62 = vld [vmem:[%s3654_s30 + $0x10] sm:$0xf] }
  0x44   : > { %v805_v29 = vsel %vm3831_vm7, %v803_v27, %v804_v2  ;;  %v810_v3 = vrot.slane %v808_v35, 4  ;;  %3378 = vmatpush3.bf16.msra.mxu0 %v1459_v14  ;;  %3347 = vmatprep.mubr.msk.bf16.mxu0 %vm454_vm3, %v2913_v22  ;;  %v2890_v40 = vcombine.low %v3670_v11, %v3674_v13  ;;  %v2891_v47 = vcombine.low %v3714_v52, %v3718_v57  ;;  %v2966_v2 = vld [vmem:[%s3654_s30 + $0x24] sm:$0xf]  ;;  %v3963_v22 = vld [vmem:[%s3654_s30 + $0x20] sm:$0x1] }
  0x45   : > { %v2892_v15 = vcombine.low %v3752_v32, %v3763_v44  ;;  %v815_v45 = vrot.slane %v3763_v44, 5  ;;  %v2914_v50 = vcombine.low %v795_v38, %v798_v37  ;;  %v2915_v51 = vcombine.low %v802_v39, %v805_v29  ;;  %3476 = vmatprep.subr.msk.bf16.mxu0 %vm479_vm0, %v3050_v1  ;;  %v2972_v13 = vld [vmem:[%s3654_s30 + $0x3c] sm:$0xf]  ;;  %v4036_v57 = vld [vmem:[%s3654_s30 + $0x4c] sm:$0xf] }
  0x46   : > { %v3933_v53 = vsel %vm3831_vm7, %v2907_v31, %v808_v35  ;;  %v2908_v4 = vrot.slane %v750_v41, 9  ;;  %v818_v56 = vrot.slane %v3770_v54, 5  ;;  %v822_v61 = vrot.slane %v3805_v33, 5  ;;  %v3969_v35 = vld [vmem:[%s3654_s30 + $0x28] sm:$0xf] }
  0x47   : > { %v817_v55 = vrot.slane %v815_v45, 4  ;;  %v1217_v59 = vshrl.u32 %v2960_v43, 16  ;;  %3326 = vmatmul.mubr.msk.bf16.vlgmr.msra.gmra.mxu1 %vm454_vm3, %v2887_v26  ;;  %v3945_v34 = vsel %vm3831_vm7, %v810_v3, %v811_v19  ;;  %v2893_v58 = vcombine.low %v3799_v24, %v3805_v33 }
  0x48   : > { %v1220_v0 = vshll.u32 %v2960_v43, 16  ;;  %v1226_v1 = vshll.u32 %v3921_v62, 16  ;;  %3360 = vmatpush3.bf16.msra.mxu1 %v1077_v6  ;;  %3329 = vmatprep.mubr.msk.bf16.mxu1 %vm454_vm3, %v2888_v36  ;;  %v2909_v54 = vrot.slane %v3909_v42, 9  ;;  %v1230_v10 = vshrl.u32 %v3921_v62, 16  ;;  %v3975_v42 = vld [vmem:[%s3654_s30 + $0x2c] sm:$0x1] }
  0x49   : > { %v1219_v9 = vrot.slane %v1217_v59, 4  ;;  %v1236_v23 = vshll.u32 %v3924_v48, 16  ;;  %v816_v12 = vsel %vm3831_vm7, %v2908_v4, %v815_v45  ;;  %v825_v8 = vrot.slane %v3814_v46, 5  ;;  %3475 = vmatprep.subr.msk.bf16.mxu1 %vm479_vm0, %v3929_v49 }
  0x4a   : > { %v1222_v16 = vrot.slane %v1220_v0, 5  ;;  %v1228_v18 = vrot.slane %v1226_v1, 5  ;;  %v819_v6 = vsel %vm3831_vm7, %v817_v55, %v818_v56  ;;  %v824_v20 = vrot.slane %v822_v61, 4 }
  0x4b   : > { %v1232_v14 = vrot.slane %v1230_v10, 4  ;;  %v1241_v25 = vshrl.u32 %v2963_v5, 16  ;;  %3348 = vmatmul.mubr.msk.bf16.gmra.mxu0 %vm454_vm3, %v2914_v50  ;;  %v1244_v27 = vshll.u32 %v2963_v5, 16  ;;  %v1250_v46 = vshll.u32 %v3940_v60, 16  ;;  %v2969_v5 = vld [vmem:[%s3654_s30 + $0x30] sm:$0xf] }
  0x4c   : > { %v1223_v26 = vor.u32 %v1222_v16, %v1219_v9  ;;  %v1254_v31 = vshrl.u32 %v3940_v60, 16  ;;  %3351 = vmatprep.mubr.msk.bf16.mxu0 %vm454_vm3, %v2915_v51  ;;  %v1238_v38 = vrot.slane %v1236_v23, 5  ;;  %v1265_v39 = vshrl.u32 %v2966_v2, 16  ;;  %v4008_v9 = vld [vmem:[%s3654_s30 + $0x38] sm:$0x1] }
  0x4d   : > { %v1233_v36 = vor.u32 %v1232_v14, %v1228_v18  ;;  %v1243_v37 = vrot.slane %v1241_v25, 4  ;;  %v1246_v29 = vrot.slane %v1244_v27, 5  ;;  %v3972_v3 = vrot.slane %v1250_v46, 5  ;;  %v4015_v25 = vld [vmem:[%s3654_s30 + $0x40] sm:$0xf] }
  0x4e   : > { %v1224_v41 = vrot.slane %v1223_v26, 4  ;;  %v1256_v19 = vrot.slane %v1254_v31, 4  ;;  %v2916_v43 = vcombine.low %v3933_v53, %v3945_v34  ;;  %v1267_v50 = vrot.slane %v1265_v39, 4  ;;  %v3996_v34 = vld [vmem:[%s3654_s30 + $0x34] sm:$0xf] }
  0x4f   : > { %v1234_v45 = vrot.slane %v1233_v36, 4  ;;  %v1268_v4 = vshll.u32 %v2966_v2, 16  ;;  %3330 = vmatmul.mubr.msk.bf16.gmra.mxu1 %vm454_vm3, %v2889_v28  ;;  %v2917_v51 = vcombine.low %v816_v12, %v819_v6  ;;  %v823_v55 = vsel %vm3831_vm7, %v2909_v54, %v822_v61  ;;  %v4021_v36 = vld [vmem:[%s3654_s30 + $0x44] sm:$0x1] }
  0x50   : > { %v1260_v56 = vshll.u32 %v3963_v22, 16  ;;  %v1274_v59 = vshll.u32 %v3969_v35, 16  ;;  %3333 = vmatprep.mubr.msk.bf16.mxu1 %vm454_vm3, %v2890_v40  ;;  %v826_v63 = vsel %vm3831_vm7, %v824_v20, %v825_v8  ;;  %v1247_v7 = vor.u32 %v1246_v29, %v1243_v37 }
  0x51   : > { %v1270_v53 = vrot.slane %v1268_v4, 5  ;;  %v1278_v28 = vshrl.u32 %v3969_v35, 16  ;;  %v1229_v61 = vsel %vm3695_vm4, %v1224_v41, %v1228_v18  ;;  %v1239_v0 = vsel %vm3695_vm4, %v1234_v45, %v1238_v38 }
  0x52   : > { %v1257_v1 = vor.u32 %v1256_v19, %v3972_v3  ;;  %v4003_v11 = vrot.slane %v1274_v59, 5  ;;  %v1284_v54 = vshll.u32 %v3975_v42, 16  ;;  %v1289_v10 = vshrl.u32 %v2969_v5, 16 }
  0x53   : > { %v1271_v40 = vor.u32 %v1270_v53, %v1267_v50  ;;  %v1280_v2 = vrot.slane %v1278_v28, 4  ;;  %3352 = vmatmul.mubr.msk.bf16.gmra.mxu0 %vm454_vm3, %v2916_v43  ;;  %v2918_v23 = vcombine.low %v823_v55, %v826_v63  ;;  %v1262_v12 = vrot.slane %v1260_v56, 5  ;;  %v2975_v50 = vld [vmem:[%s3654_s30 + $0x48] sm:$0xf] }
  0x54   : > { %v1292_v8 = vshll.u32 %v2969_v5, 16  ;;  %v1298_v16 = vshll.u32 %v3996_v34, 16  ;;  %3355 = vmatprep.mubr.msk.bf16.mxu0 %vm454_vm3, %v2917_v51  ;;  %v2985_v18 = vcombine.low %v1229_v61, %v1239_v0  ;;  %v1248_v6 = vrot.slane %v1247_v7, 4  ;;  %v3528_v61 = vld [vmem:[%s3654_s30 + $0xc] sm:$0xff]  }
  0x55   : > { %v1281_v20 = vor.u32 %v1280_v2, %v4003_v11  ;;  %v1291_v14 = vrot.slane %v1289_v10, 4  ;;  %v1258_v26 = vrot.slane %v1257_v1, 4  ;;  %v1302_v31 = vshrl.u32 %v3996_v34, 16  ;;  %v2978_v2 = vld [vmem:[%s3654_s30 + $0x54] sm:$0xf] }
  0x56   : > { %v1294_v27 = vrot.slane %v1292_v8, 5  ;;  %v4017_v46 = vrot.slane %v1298_v16, 5  ;;  %v1272_v38 = vrot.slane %v1271_v40, 4  ;;  %v1286_v37 = vrot.slane %v1284_v54, 5 }
  0x57   : > { %v1313_v39 = vshrl.u32 %v2972_v13, 16  ;;  %v1316_v41 = vshll.u32 %v2972_v13, 16  ;;  %3334 = vmatmul.mubr.msk.bf16.gmra.mxu1 %vm454_vm3, %v2891_v47  ;;  %v1282_v29 = vrot.slane %v1281_v20, 4  ;;  %v1304_v19 = vrot.slane %v1302_v31, 4 }
  0x58   : > { %v1308_v43 = vshll.u32 %v4008_v9, 16  ;;  %v1322_v45 = vshll.u32 %v4015_v25, 16  ;;  %3337 = vmatprep.mubr.msk.bf16.mxu1 %vm454_vm3, %v2892_v15  ;;  %v1295_v4 = vor.u32 %v1294_v27, %v1291_v14  ;;  %v1326_v52 = vshrl.u32 %v4015_v25, 16 }
  0x59   : > { %v1315_v5 = vrot.slane %v1313_v39, 4  ;;  %v1318_v51 = vrot.slane %v1316_v41, 5  ;;  %v1253_v47 = vsel %vm3695_vm4, %v1248_v6, %v3972_v3  ;;  %v1263_v55 = vsel %vm3695_vm4, %v1258_v26, %v1262_v12  ;;  %v4060_v12 = vld [vmem:[%s3654_s30 + $0x58] sm:$0xf]  ;;  %v4078_v39 = vld [vmem:[%s3654_s30 + $0x5c] sm:$0x1] }
  0x5a   : > { %v1305_v56 = vor.u32 %v1304_v19, %v4017_v46  ;;  %v4044_v32 = vrot.slane %v1322_v45, 5  ;;  %v1328_v15 = vrot.slane %v1326_v52, 4  ;;  %v1332_v59 = vshll.u32 %v4021_v36, 16  ;;  %v3529_v52 = vld [vmem:[%s3654_s30 + $0x18] sm:$0xff]  }
  0x5b   : > { %v1319_v44 = vor.u32 %v1318_v51, %v1315_v5  ;;  %v1337_v63 = vshrl.u32 %v2975_v50, 16  ;;  %3356 = vmatmul.mubr.msk.bf16.gmra.mxu0 %vm454_vm3, %v2918_v23  ;;  %v1277_v3 = vsel %vm3695_vm4, %v1272_v38, %v4003_v11  ;;  %v1287_v7 = vsel %vm3695_vm4, %v1282_v29, %v1286_v37  ;;  %v4095_v51 = vld [vmem:[%s4761_s1 + $0x20] sm:$0xf] }
  0x5c   : > { %v1340_v53 = vshll.u32 %v2975_v50, 16  ;;  %v1346_v28 = vshll.u32 %v4036_v57, 16  ;;  %3379 = vmatprep.mubr.msk.bf16.mxu0 %vm454_vm3, %v2985_v18  ;;  %v1296_v0 = vrot.slane %v1295_v4, 4  ;;  %v1306_v1 = vrot.slane %v1305_v56, 4  ;;  %v4063_v18 = vld [vmem:[%s3654_s30 + $0x50] sm:$0x1] }
  0x5d   : > { %v1310_v13 = vrot.slane %v1308_v43, 5  ;;  %v1329_v40 = vor.u32 %v1328_v15, %v4044_v32  ;;  %v1320_v54 = vrot.slane %v1319_v44, 4  ;;  %v1339_v10 = vrot.slane %v1337_v63, 4  ;;  %v4088_v43 = vld [vmem:[%s3654_s30 + $0x64] sm:$0xf] }
  0x5e   : > { %v1342_v23 = vrot.slane %v1340_v53, 5  ;;  %v1350_v11 = vshrl.u32 %v4036_v57, 16  ;;  %v2986_v8 = vcombine.low %v1253_v47, %v1263_v55  ;;  %v2987_v16 = vcombine.low %v1277_v3, %v1287_v7  ;;  %v3530_v44 = vld [vmem:[%s3654_s30 + $0x24] sm:$0xff]  }
  0x5f   : > { %v1330_v6 = vrot.slane %v1329_v40, 4  ;;  %v1334_v20 = vrot.slane %v1332_v59, 5  ;;  %3338 = vmatmul.mubr.msk.bf16.gmra.mxu1 %vm454_vm3, %v2893_v58  ;;  %v4069_v14 = vrot.slane %v1346_v28, 5  ;;  %v1361_v27 = vshrl.u32 %v2978_v2, 16  ;;  %v2981_v58 = vld [vmem:[%s3654_s30 + $0x60] sm:$0xf] }
  0x60   : > { %v1352_v26 = vrot.slane %v1350_v11, 4  ;;  %v1364_v31 = vshll.u32 %v2978_v2, 16  ;;  %3361 = vmatprep.mubr.msk.bf16.mxu1 %vm454_vm3, %v3528_v61  ;;  %v1301_v38 = vsel %vm3695_vm4, %v1296_v0, %v4017_v46  ;;  %v1311_v37 = vsel %vm3695_vm4, %v1306_v1, %v1310_v13  ;;  %v3091_v0 = vld [vmem:[%s4761_s1 + $0x1c] sm:$0xf]  ;;  %v4116_v11 = vld [vmem:[%s3654_s30 + $0x68] sm:$0x1] }
  0x61   : > { %v1370_v24 = vshll.u32 %v4060_v12, 16  ;;  %v1374_v33 = vshrl.u32 %v4060_v12, 16  ;;  %v1325_v41 = vsel %vm3695_vm4, %v1320_v54, %v4044_v32  ;;  %v1343_v29 = vor.u32 %v1342_v23, %v1339_v10 }
  0x62   : > { %v1356_v19 = vshll.u32 %v4063_v18, 16  ;;  %v1363_v46 = vrot.slane %v1361_v27, 4  ;;  %v1335_v45 = vsel %vm3695_vm4, %v1330_v6, %v1334_v20  ;;  %v1366_v50 = vrot.slane %v1364_v31, 5 }
  0x63   : > { %v1372_v4 = vrot.slane %v1370_v24, 5  ;;  %v1376_v5 = vrot.slane %v1374_v33, 4  ;;  %3380 = vmatmul.mubr.msk.bf16.vlgmr.msra.gmra.mxu0 %vm454_vm3, %v2986_v8  ;;  %v1353_v47 = vor.u32 %v1352_v26, %v4069_v14  ;;  %v1380_v55 = vshll.u32 %v4078_v39, 16  ;;  %v3531_v8 = vld [vmem:[%s3654_s30 + $0x30] sm:$0xff]   ;;  %v3532_v26 = vld [vmem:[%s3654_s30 + $0x3c] sm:$0xff]  }
  0x64   : > { %v1385_v56 = vshrl.u32 %v2981_v58, 16  ;;  %v1388_v32 = vshll.u32 %v2981_v58, 16  ;;  %3414 = vmatpush3.bf16.msra.mxu0 %v3888_v17  ;;  %3383 = vmatprep.mubr.msk.bf16.mxu0 %vm454_vm3, %v2987_v16  ;;  %v1367_v15 = vor.u32 %v1366_v50, %v1363_v46  ;;  %v1394_v63 = vshll.u32 %v4088_v43, 16  ;;  %v3001_v33 = vld [vmem:[%s3654_s30 + $0xc] sm:$0xe] }
  0x65   : > { %v1377_v59 = vor.u32 %v1376_v5, %v1372_v4  ;;  %v1713_v3 = vsel %vm479_vm0, %v3929_v49, 0  ;;  %v1398_v7 = vshrl.u32 %v4088_v43, 16  ;;  %3478 = vmatprep.subr.msk.bf16.mxu0 %vm479_vm0, %v4095_v51  ;;  %v2988_v53 = vcombine.low %v1301_v38, %v1311_v37  ;;  %v3002_v46 = vld [vmem:[%s3654_s30 + $0x18] sm:$0xe]  ;;  %v3533_v5 = vld [vmem:[%s3654_s30 + $0x48] sm:$0xff]  }
  0x66   : > { %v2989_v28 = vcombine.low %v1325_v41, %v1335_v45  ;;  %v1344_v61 = vrot.slane %v1343_v29, 4  ;;  %v1358_v17 = vrot.slane %v1356_v19, 5  ;;  %v1354_v1 = vrot.slane %v1353_v47, 4 }
  0x67   : > { %3362 = vmatmul.mubr.msk.bf16.vlgmr.msra.gmra.mxu1 %vm454_vm3, %v3529_v52  ;;  %v1382_v13 = vrot.slane %v1380_v55, 5  ;;  %v1387_v49 = vrot.slane %v1385_v56, 4  ;;  %v1390_v40 = vrot.slane %v1388_v32, 5  ;;  %v1368_v2 = vrot.slane %v1367_v15, 4  ;;  %v3534_v56 = vld [vmem:[%s3654_s30 + $0x54] sm:$0xff]  }
  0x68   : > { %3396 = vmatpush3.bf16.msra.mxu1 %v1713_v3  ;;  %3365 = vmatprep.mubr.msk.bf16.mxu1 %vm454_vm3, %v3530_v44  ;;  %v1378_v54 = vrot.slane %v1377_v59, 4  ;;  %v1396_v10 = vrot.slane %v1394_v63, 5  ;;  %v1400_v23 = vrot.slane %v1398_v7, 4  ;;  %v1349_v16 = vsel %vm3695_vm4, %v1344_v61, %v4069_v14  ;;  %v3004_v63 = vld [vmem:[%s3654_s30 + $0x30] sm:$0xe] }
  0x69   : > { %3477 = vmatprep.subr.msk.bf16.mxu1 %vm479_vm0, %v3091_v0  ;;  %v1359_v6 = vsel %vm3695_vm4, %v1354_v1, %v1358_v17  ;;  %v1391_v20 = vor.u32 %v1390_v40, %v1387_v49  ;;  %v1373_v27 = vsel %vm3695_vm4, %v1368_v2, %v1372_v4  ;;  %v1404_v37 = vshll.u32 %v4116_v11, 16  ;;  %v3003_v4 = vld [vmem:[%s3654_s30 + $0x24] sm:$0xe]  ;;  %v3005_v7 = vld [vmem:[%s3654_s30 + $0x3c] sm:$0xe] }
  0x6a   : > { %v1383_v31 = vsel %vm3695_vm4, %v1378_v54, %v1382_v13  ;;  %v1401_v38 = vor.u32 %v1400_v23, %v1396_v10  ;;  %v2990_v14 = vcombine.low %v1349_v16, %v1359_v6  ;;  %v1608_v58 = vrot.slane %v3921_v62, 5  ;;  %v3006_v13 = vld [vmem:[%s3654_s30 + $0x48] sm:$0xe]  ;;  %v3067_v49 = vld [vmem:[%s3654_s30 + $0x18] sm:$0xf]  ;;  %v3535_v6 = vld [vmem:[%s3654_s30 + $0x60] sm:$0xff]  }
  0x6b   : > { %3384 = vmatmul.mubr.msk.bf16.gmra.mxu0 %vm454_vm3, %v2988_v53  ;;  %v2991_v24 = vcombine.low %v1373_v27, %v1383_v31  ;;  %v1392_v41 = vrot.slane %v1391_v20, 4  ;;  %v1406_v19 = vrot.slane %v1404_v37, 5  ;;  %v1615_v45 = vrot.slane %v3940_v60, 5 }
  0x6c   : > { %3387 = vmatprep.mubr.msk.bf16.mxu0 %vm454_vm3, %v2989_v28  ;;  %v1402_v29 = vrot.slane %v1401_v38, 4  ;;  %v1622_v50 = vrot.slane %v3969_v35, 5  ;;  %v3009_v52 = vrot.slane %v3001_v33, 9  ;;  %v1610_v47 = vrot.slane %v1608_v58, 4 }
  0x6d   : > { %v1611_v62 = vrot.slane %v3924_v48, 5  ;;  %v3010_v55 = vrot.slane %v3002_v46, 9  ;;  %v1397_v32 = vsel %vm3695_vm4, %v1392_v41, %v1396_v10  ;;  %v1617_v35 = vrot.slane %v1615_v45, 4  ;;  %v4186_v10 = vld [vmem:[%s3654_s30 + $0x1c] sm:$0xf] }
  0x6e   : > { %v1407_v60 = vsel %vm3695_vm4, %v1402_v29, %v1406_v19  ;;  %v1618_v44 = vrot.slane %v3963_v22, 5  ;;  %v3011_v15 = vrot.slane %v3003_v4, 9  ;;  %v1624_v59 = vrot.slane %v1622_v50, 4  ;;  %v3070_v29 = vld [vmem:[%s3654_s30 + $0x24] sm:$0xf]  ;;  %v3538_v4 = vld [vmem:[%s3654_s30 + $0x30] sm:$0xff]  }
  0x6f   : > { %3366 = vmatmul.mubr.msk.bf16.gmra.mxu1 %vm454_vm3, %v3531_v8  ;;  %v1625_v48 = vrot.slane %v3975_v42, 5  ;;  %v1629_v3 = vrot.slane %v3996_v34, 5  ;;  %v2992_v53 = vcombine.low %v1397_v32, %v1407_v60  ;;  %v1609_v28 = vsel %vm3831_vm7, %v3009_v52, %v1608_v58  ;;  %v3536_v42 = vld [vmem:[%s3654_s30 + $0x18] sm:$0xff]  }
  0x70   : > { %3369 = vmatprep.mubr.msk.bf16.mxu1 %vm454_vm3, %v3532_v26  ;;  %v1612_v22 = vsel %vm3831_vm7, %v1610_v47, %v1611_v62  ;;  %v4161_v61 = vsel %vm479_vm0, %v3091_v0, 0  ;;  %v4167_v34 = vsel %vm3831_vm7, %v3010_v55, %v1615_v45  ;;  %v4171_v17 = vsel %vm3831_vm7, %v1617_v35, %v1618_v44  ;;  %v4230_v55 = vld [vmem:[%s3654_s30 + $0x28] sm:$0xf] }
  0x71   : > { %v2548_v1 = vsel %vm479_vm0, %v4095_v51, 0  ;;  %v4179_v0 = vsel %vm3831_vm7, %v3011_v15, %v1622_v50  ;;  %v4183_v40 = vsel %vm3831_vm7, %v1624_v59, %v1625_v48  ;;  %v3012_v2 = vrot.slane %v3004_v63, 9  ;;  %v3069_v15 = vld [vmem:[%s3654_s30 + $0x20] sm:$0x1] }
  0x72   : > { %v3013_v54 = vrot.slane %v3005_v7, 9  ;;  %v3018_v23 = vcombine.low %v1609_v28, %v1612_v22  ;;  %v1631_v8 = vrot.slane %v1629_v3, 4  ;;  %v1632_v16 = vrot.slane %v4008_v9, 5 }
  0x73   : > { %3388 = vmatmul.mubr.msk.bf16.gmra.mxu0 %vm454_vm3, %v2990_v14  ;;  %v1636_v51 = vrot.slane %v4015_v25, 5  ;;  %v3019_v20 = vcombine.low %v4167_v34, %v4171_v17  ;;  %v3014_v26 = vrot.slane %v3006_v13, 9  ;;  %v2052_v27 = vshrl.u32 %v3067_v49, 16  ;;  %v3007_v25 = vld [vmem:[%s3654_s30 + $0x54] sm:$0xe] }
  0x74   : > { %3391 = vmatprep.mubr.msk.bf16.mxu0 %vm454_vm3, %v2991_v24  ;;  %v2055_v31 = vshll.u32 %v3067_v49, 16  ;;  %v3020_v38 = vcombine.low %v4179_v0, %v4183_v40  ;;  %v1639_v9 = vrot.slane %v4021_v36, 5  ;;  %v2061_v37 = vshll.u32 %v4186_v10, 16  ;;  %v3537_v36 = vld [vmem:[%s3654_s30 + $0x24] sm:$0xff]  }
  0x75   : > { %v2065_v14 = vshrl.u32 %v4186_v10, 16  ;;  %v4203_v24 = vsel %vm3831_vm7, %v3012_v2, %v1629_v3  ;;  %v4207_v33 = vsel %vm3831_vm7, %v3013_v54, %v1636_v51  ;;  %v1643_v58 = vrot.slane %v4036_v57, 5  ;;  %v3109_v17 = vld [vmem:[%s3654_s30 + $0x24] sm:$0xe] }
  0x76   : > { %v1650_v41 = vrot.slane %v4060_v12, 5  ;;  %v4215_v19 = vsel %vm3831_vm7, %v1631_v8, %v1632_v16  ;;  %v1638_v46 = vrot.slane %v1636_v51, 4  ;;  %v1646_v45 = vrot.slane %v4063_v18, 5 }
  0x77   : > { %3370 = vmatmul.mubr.msk.bf16.gmra.mxu1 %vm454_vm3, %v3533_v5  ;;  %v1657_v50 = vrot.slane %v4088_v43, 5  ;;  %v4223_v57 = vsel %vm3831_vm7, %v3014_v26, %v1643_v58  ;;  %v3015_v12 = vrot.slane %v3007_v25, 9  ;;  %v3008_v5 = vld [vmem:[%s3654_s30 + $0x60] sm:$0xe]  ;;  %v2054_v52 = vrot.slane %v2052_v27, 4 }
  0x78   : > { %3373 = vmatprep.mubr.msk.bf16.mxu1 %vm454_vm3, %v3534_v56  ;;  %v2057_v47 = vrot.slane %v2055_v31, 5  ;;  %v4227_v62 = vrot.slane %v2061_v37, 5  ;;  %v2067_v18 = vrot.slane %v2065_v14, 4  ;;  %v2076_v43 = vshrl.u32 %v3070_v29, 16  ;;  %v3073_v26 = vld [vmem:[%s3654_s30 + $0x30] sm:$0xf] }
  0x79   : > { %v2079_v56 = vshll.u32 %v3070_v29, 16  ;;  %v3021_v32 = vcombine.low %v4203_v24, %v4215_v19  ;;  %v1645_v60 = vrot.slane %v1643_v58, 4  ;;  %v1652_v35 = vrot.slane %v1650_v41, 4  ;;  %v4275_v27 = vld [vmem:[%s3654_s30 + $0x34] sm:$0xf]  ;;  %v3539_v31 = vld [vmem:[%s3654_s30 + $0x3c] sm:$0xff]  }
  0x7a   : > { %v1653_v44 = vrot.slane %v4078_v39, 5  ;;  %v4238_v59 = vsel %vm3831_vm7, %v1638_v46, %v1639_v9  ;;  %v3016_v48 = vrot.slane %v3008_v5, 9  ;;  %v1659_v63 = vrot.slane %v1657_v50, 4 }
  0x7b   : > { %3392 = vmatmul.mubr.msk.bf16.gmra.mxu0 %vm454_vm3, %v2992_v53  ;;  %v1660_v3 = vrot.slane %v4116_v11, 5  ;;  %v2058_v7 = vor.u32 %v2057_v47, %v2054_v52  ;;  %v3108_v53 = vld [vmem:[%s3654_s30 + $0x18] sm:$0xe]  ;;  %v2443_v28 = vrot.slane %v4186_v10, 5  ;;  %v2085_v22 = vshll.u32 %v4230_v55, 16 }
  0x7c   : > { %3415 = vmatprep.mubr.msk.bf16.mxu0 %vm454_vm3, %v3536_v42  ;;  %v2089_v39 = vshrl.u32 %v4230_v55, 16  ;;  %v2068_v42 = vor.u32 %v2067_v18, %v4227_v62  ;;  %v2071_v11 = vshll.u32 %v3069_v15, 16  ;;  %v2078_v13 = vrot.slane %v2076_v43, 4  ;;  %v3076_v52 = vld [vmem:[%s3654_s30 + $0x3c] sm:$0xf] }
  0x7d   : > { %v2081_v49 = vrot.slane %v2079_v56, 5  ;;  %v3022_v2 = vcombine.low %v4207_v33, %v4238_v59  ;;  %v4252_v54 = vsel %vm3831_vm7, %v1645_v60, %v1646_v45  ;;  %v4256_v10 = vsel %vm3831_vm7, %v3015_v12, %v1650_v41  ;;  %v3540_v33 = vld [vmem:[%s3654_s30 + $0x48] sm:$0xff]   ;;  %v3075_v60 = vld [vmem:[%s3654_s30 + $0x38] sm:$0x1] }
  0x7e   : > { %v4267_v8 = vsel %vm3831_vm7, %v3016_v48, %v1657_v50  ;;  %v4271_v16 = vsel %vm3831_vm7, %v1659_v63, %v1660_v3  ;;  %v3116_v51 = vrot.slane %v3108_v53, 9  ;;  %v2059_v9 = vrot.slane %v2058_v7, 4  ;;  %v3110_v48 = vld [vmem:[%s3654_s30 + $0x30] sm:$0xe]  ;;  %v3541_v53 = vld [vmem:[%s3654_s30 + $0x54] sm:$0xff]  }
  0x7f   : > { %3374 = vmatmul.mubr.msk.bf16.gmra.mxu1 %vm454_vm3, %v3535_v6  ;;  %v2446_v6 = vrot.slane %v3069_v15, 5  ;;  %v2445_v25 = vrot.slane %v2443_v28, 4  ;;  %v4282_v37 = vrot.slane %v2085_v22, 5  ;;  %v2091_v14 = vrot.slane %v2089_v39, 4 }
  0x80   : > { %3397 = vmatprep.mubr.msk.bf16.mxu1 %vm454_vm3, %v3018_v23  ;;  %v4263_v23 = vld [vmem:[%s3654_s30 + $0x2c] sm:$0x1]  ;;  %v2069_v58 = vrot.slane %v2068_v42, 4  ;;  %v2073_v41 = vrot.slane %v2071_v11, 5  ;;  %v2082_v29 = vor.u32 %v2081_v49, %v2078_v13  ;;  %v2109_v46 = vshll.u32 %v4275_v27, 16  ;;  %v3542_v11 = vld [vmem:[%s3654_s30 + $0x60] sm:$0xff]  }
  0x81   : > { %v2095_v34 = vshll.u32 %v4263_v23, 16  ;;  %v2113_v45 = vshrl.u32 %v4275_v27, 16  ;;  %v3025_v40 = vcombine.low %v4267_v8, %v4271_v16  ;;  %v2064_v50 = vsel %vm3695_vm4, %v2059_v9, %v4227_v62  ;;  %v4319_v62 = vld [vmem:[%s3654_s30 + $0x40] sm:$0xf] }
  0x82   : > { %v2092_v12 = vor.u32 %v2091_v14, %v4282_v37  ;;  %v2450_v5 = vrot.slane %v4230_v55, 5  ;;  %v2074_v47 = vsel %vm3695_vm4, %v2069_v58, %v2073_v41  ;;  %v2083_v18 = vrot.slane %v2082_v29, 4  ;;  %v3111_v29 = vld [vmem:[%s3654_s30 + $0x3c] sm:$0xe] }
  0x83   : > { %3416 = vmatmul.mubr.msk.bf16.vlgmr.msra.gmra.mxu0 %vm454_vm3, %v3537_v36  ;;  %v2103_v36 = vshll.u32 %v3073_v26, 16  ;;  %v2097_v43 = vrot.slane %v2095_v34, 5  ;;  %v3117_v56 = vrot.slane %v3109_v17, 9  ;;  %v4322_v15 = vrot.slane %v2109_v46, 5 }
  0x84   : > { %3450 = vmatpush3.bf16.msra.mxu0 %v2548_v1  ;;  %3419 = vmatprep.mubr.msk.bf16.mxu0 %vm454_vm3, %v3538_v4  ;;  %v4260_v1 = vsel %vm3831_vm7, %v1652_v35, %v1653_v44  ;;  %v4310_v4 = vsel %vm3831_vm7, %v2445_v25, %v2446_v6  ;;  %v2115_v59 = vrot.slane %v2113_v45, 4  ;;  %v2453_v55 = vrot.slane %v4263_v23, 5  ;;  %v3079_v6 = vld [vmem:[%s3654_s30 + $0x48] sm:$0xf] }
  0x85   : > { %v3024_v0 = vcombine.low %v4256_v10, %v4260_v1  ;;  %v2105_v44 = vrot.slane %v2103_v36, 5  ;;  %v2457_v63 = vrot.slane %v4275_v27, 5  ;;  %v2124_v3 = vshrl.u32 %v3076_v52, 16 }
  0x86   : > { %v2127_v7 = vshll.u32 %v3076_v52, 16  ;;  %v2452_v22 = vrot.slane %v2450_v5, 4  ;;  %v2133_v39 = vshll.u32 %v4319_v62, 16  ;;  %v2137_v42 = vshrl.u32 %v4319_v62, 16 }
  0x87   : > { %3398 = vmatmul.mubr.msk.bf16.vlgmr.msra.gmra.mxu1 %vm454_vm3, %v3019_v20  ;;  %v2100_v20 = vshrl.u32 %v3073_v26, 16  ;;  %v4336_v13 = vcombine.low %v2064_v50, %v2074_v47  ;;  %v2088_v24 = vsel %vm3695_vm4, %v2083_v18, %v4282_v37  ;;  %v4345_v19 = vsel %vm3831_vm7, %v3117_v56, %v2450_v5  ;;  %v4350_v26 = vld [vmem:[%s3654_s30 + $0x4c] sm:$0xf] }
  0x88   : > { %3432 = vmatpush3.bf16.msra.mxu1 %v4161_v61  ;;  %3401 = vmatprep.mubr.msk.bf16.mxu1 %vm454_vm3, %v3020_v38  ;;  %v3023_v61 = vcombine.low %v4223_v57, %v4252_v54  ;;  %v4302_v38 = vsel %vm3831_vm7, %v3116_v51, %v2443_v28  ;;  %v2093_v28 = vrot.slane %v2092_v12, 4  ;;  %v2116_v23 = vor.u32 %v2115_v59, %v4322_v15  ;;  %v3543_v47 = vld [vmem:[%s3654_s30 + $0x6c] sm:$0xff]  }
  0x89   : > { %v2102_v35 = vrot.slane %v2100_v20, 4  ;;  %v3125_v49 = vcombine.low %v4302_v38, %v4310_v4  ;;  %v3118_v51 = vrot.slane %v3110_v48, 9  ;;  %v2459_v27 = vrot.slane %v2457_v63, 4 }
  0x8a   : > { %v2126_v9 = vrot.slane %v2124_v3, 4  ;;  %v2129_v25 = vrot.slane %v2127_v7, 5  ;;  %v2098_v37 = vsel %vm3695_vm4, %v2093_v28, %v2097_v43  ;;  %v4357_v14 = vsel %vm3831_vm7, %v2452_v22, %v2453_v55  ;;  %v3082_v55 = vld [vmem:[%s3654_s30 + $0x54] sm:$0xf] }
  0x8b   : > { %3420 = vmatmul.mubr.msk.bf16.gmra.mxu0 %vm454_vm3, %v3539_v31  ;;  %v2460_v31 = vrot.slane %v3075_v60, 5  ;;  %v4360_v58 = vrot.slane %v2133_v39, 5  ;;  %v2139_v41 = vrot.slane %v2137_v42, 4  ;;  %v2148_v34 = vshrl.u32 %v3079_v6, 16  ;;  %v3085_v42 = vld [vmem:[%s3654_s30 + $0x60] sm:$0xf] }
  0x8c   : > { %3423 = vmatprep.mubr.msk.bf16.mxu0 %vm454_vm3, %v3540_v33  ;;  %v3078_v33 = vld [vmem:[%s3654_s30 + $0x44] sm:$0x1]  ;;  %v2151_v17 = vshll.u32 %v3079_v6, 16  ;;  %v2157_v20 = vshll.u32 %v4350_v26, 16  ;;  %v2161_v36 = vshrl.u32 %v4350_v26, 16  ;;  %v4368_v45 = vrot.slane %v2116_v23, 4 }
  0x8d   : > { %v4374_v50 = vsel %vm3831_vm7, %v3118_v51, %v2457_v63  ;;  %v4378_v4 = vsel %vm3831_vm7, %v2459_v27, %v2460_v31  ;;  %v2130_v12 = vor.u32 %v2129_v25, %v2126_v9  ;;  %v2143_v5 = vshll.u32 %v3078_v33, 16  ;;  %v4423_v23 = vld [vmem:[%s3654_s30 + $0x64] sm:$0xf] }
  0x8e   : > { %v2464_v52 = vrot.slane %v4319_v62, 5  ;;  %v4386_v18 = vcombine.low %v2088_v24, %v2098_v37  ;;  %v3126_v43 = vcombine.low %v4345_v19, %v4357_v14  ;;  %v2140_v56 = vor.u32 %v2139_v41, %v4360_v58 }
  0x8f   : > { %3402 = vmatmul.mubr.msk.bf16.gmra.mxu1 %vm454_vm3, %v3021_v32  ;;  %v2106_v32 = vor.u32 %v2105_v44, %v2102_v35  ;;  %v3081_v35 = vld [vmem:[%s3654_s30 + $0x50] sm:$0x1]  ;;  %v2150_v57 = vrot.slane %v2148_v34, 4  ;;  %v2153_v54 = vrot.slane %v2151_v17, 5  ;;  %v2163_v62 = vrot.slane %v2161_v36, 4 }
  0x90   : > { %3405 = vmatprep.mubr.msk.bf16.mxu1 %vm454_vm3, %v3022_v2  ;;  %v2119_v2 = vshll.u32 %v3075_v60, 16  ;;  %v3119_v60 = vrot.slane %v3111_v29, 9  ;;  %v3112_v44 = vld [vmem:[%s3654_s30 + $0x48] sm:$0xe]  ;;  %v3127_v1 = vcombine.low %v4374_v50, %v4378_v4  ;;  %v2131_v48 = vrot.slane %v2130_v12, 4 }
  0x91   : > { %v4366_v46 = vrot.slane %v2106_v32, 4  ;;  %v2145_v63 = vrot.slane %v2143_v5, 5  ;;  %v2466_v3 = vrot.slane %v2464_v52, 4  ;;  %v2467_v7 = vrot.slane %v3078_v33, 5  ;;  %v3084_v29 = vld [vmem:[%s3654_s30 + $0x5c] sm:$0x1] }
  0x92   : > { %v4370_v38 = vrot.slane %v2119_v2, 5  ;;  %v4417_v28 = vsel %vm3831_vm7, %v3119_v60, %v2464_v52  ;;  %v2167_v22 = vshll.u32 %v3081_v35, 16  ;;  %v3120_v39 = vrot.slane %v3112_v44, 9  ;;  %v3087_v12 = vld [vmem:[%s3654_s30 + $0x68] sm:$0x1] }
  0x93   : > { %3424 = vmatmul.mubr.msk.bf16.gmra.mxu0 %vm454_vm3, %v3541_v53  ;;  %v2112_v59 = vsel %vm3695_vm4, %v4366_v46, %v4322_v15  ;;  %v4412_v53 = vld [vmem:[%s3654_s30 + $0x58] sm:$0xf]  ;;  %v2141_v15 = vrot.slane %v2140_v56, 4  ;;  %v2474_v19 = vrot.slane %v3081_v35, 5  ;;  %v2172_v32 = vshrl.u32 %v3082_v55, 16 }
  0x94   : > { %3427 = vmatprep.mubr.msk.bf16.mxu0 %vm454_vm3, %v3542_v11  ;;  %v2122_v10 = vsel %vm3695_vm4, %v4368_v45, %v4370_v38  ;;  %v2154_v11 = vor.u32 %v2153_v54, %v2150_v57  ;;  %v2175_v51 = vshll.u32 %v3082_v55, 16  ;;  %v2181_v6 = vshll.u32 %v4412_v53, 16  ;;  %v3113_v46 = vld [vmem:[%s3654_s30 + $0x54] sm:$0xe]  ;;  %v3088_v57 = vld [vmem:[%s3654_s30 + $0x6c] sm:$0xf] }
  0x95   : > { %v2136_v27 = vsel %vm3695_vm4, %v2131_v48, %v4360_v58  ;;  %v2196_v31 = vshrl.u32 %v3085_v42, 16  ;;  %v2199_v9 = vshll.u32 %v3085_v42, 16  ;;  %v2146_v25 = vsel %vm3695_vm4, %v2141_v15, %v2145_v63 }
  0x96   : > { %v2169_v37 = vrot.slane %v2167_v22, 5  ;;  %v2205_v14 = vshll.u32 %v4423_v23, 16  ;;  %v2209_v33 = vshrl.u32 %v4423_v23, 16  ;;  %v2155_v58 = vrot.slane %v2154_v11, 4 }
  0x97   : > { %3406 = vmatmul.mubr.msk.bf16.gmra.mxu1 %vm454_vm3, %v3023_v61  ;;  %v4396_v61 = vrot.slane %v2157_v20, 5  ;;  %v2174_v16 = vrot.slane %v2172_v32, 4  ;;  %v2177_v34 = vrot.slane %v2175_v51, 5  ;;  %v4449_v17 = vrot.slane %v2181_v6, 5  ;;  %v3090_v6 = vld [vmem:[%s3654_s30 + $0x74] sm:$0x1] }
  0x98   : > { %3409 = vmatprep.mubr.msk.bf16.mxu1 %vm454_vm3, %v3024_v0  ;;  %v2471_v0 = vrot.slane %v4350_v26, 5  ;;  %v2185_v26 = vshrl.u32 %v4412_v53, 16  ;;  %v3094_v36 = vcombine.low %v2112_v59, %v2122_v10  ;;  %v2198_v45 = vrot.slane %v2196_v31, 4  ;;  %v3089_v10 = vld [vmem:[%s3654_s30 + $0x70] sm:$0xf] }
  0x99   : > { %v2164_v24 = vor.u32 %v2163_v62, %v4396_v61  ;;  %v2201_v38 = vrot.slane %v2199_v9, 5  ;;  %v3095_v50 = vcombine.low %v2136_v27, %v2146_v25  ;;  %v4457_v5 = vrot.slane %v2205_v14, 5  ;;  %v3115_v25 = vld [vmem:[%s3654_s30 + $0x6c] sm:$0xe] }
  0x9a   : > { %v2473_v2 = vrot.slane %v2471_v0, 4  ;;  %v2472_v8 = vsel %vm3831_vm7, %v3120_v39, %v2471_v0  ;;  %v2187_v20 = vrot.slane %v2185_v26, 4  ;;  %v2211_v52 = vrot.slane %v2209_v33, 4 }
  0x9b   : > { %3428 = vmatmul.mubr.msk.bf16.gmra.mxu0 %vm454_vm3, %v3543_v47  ;;  %v2165_v41 = vrot.slane %v2164_v24, 4  ;;  %v2160_v47 = vsel %vm3695_vm4, %v2155_v58, %v4396_v61  ;;  %v2485_v35 = vrot.slane %v4423_v23, 5  ;;  %v2178_v54 = vor.u32 %v2177_v34, %v2174_v16 }
  0x9c   : > { %3451 = vmatprep.mubr.msk.bf16.mxu0 %vm454_vm3, %v3125_v49  ;;  %v4432_v49 = vsel %vm3831_vm7, %v2466_v3, %v2467_v7  ;;  %v2188_v62 = vor.u32 %v2187_v20, %v4449_v17  ;;  %v2191_v44 = vshll.u32 %v3084_v29, 16  ;;  %v3121_v59 = vrot.slane %v3113_v46, 9 }
  0x9d   : > { %v3128_v4 = vcombine.low %v4417_v28, %v4432_v49  ;;  %v2170_v56 = vsel %vm3695_vm4, %v2165_v41, %v2169_v37  ;;  %v2202_v55 = vor.u32 %v2201_v38, %v2198_v45  ;;  %v2215_v48 = vshll.u32 %v3087_v12, 16 }
  0x9e   : > { %v2212_v61 = vor.u32 %v2211_v52, %v4457_v5  ;;  %v2220_v3 = vshrl.u32 %v3088_v57, 16  ;;  %v2223_v7 = vshll.u32 %v3088_v57, 16  ;;  %v2488_v15 = vrot.slane %v3087_v12, 5 }
  0x9f   : > { %3410 = vmatmul.mubr.msk.bf16.gmra.mxu1 %vm454_vm3, %v3025_v40  ;;  %v2475_v40 = vsel %vm3831_vm7, %v2473_v2, %v2474_v19  ;;  %v2229_v28 = vshll.u32 %v3089_v10, 16  ;;  %v2233_v22 = vshrl.u32 %v3089_v10, 16  ;;  %v3096_v39 = vcombine.low %v2160_v47, %v2170_v56 }
  0xa0   : > { %3433 = vmatprep.mubr.msk.bf16.mxu1 %vm454_vm3, %v4336_v13  ;;  %v2478_v13 = vrot.slane %v4412_v53, 5  ;;  %v3129_v60 = vcombine.low %v2472_v8, %v2475_v40  ;;  %v2487_v53 = vrot.slane %v2485_v35, 4  ;;  %v2179_v42 = vrot.slane %v2178_v54, 4 }
  0xa1   : > { %v2189_v11 = vrot.slane %v2188_v62, 4  ;;  %v2193_v24 = vrot.slane %v2191_v44, 5  ;;  %v2203_v32 = vrot.slane %v2202_v55, 4  ;;  %v2217_v23 = vrot.slane %v2215_v48, 5 }
  0xa2   : > { %v2480_v0 = vrot.slane %v2478_v13, 4  ;;  %v2213_v2 = vrot.slane %v2212_v61, 4  ;;  %v2222_v26 = vrot.slane %v2220_v3, 4  ;;  %v2225_v27 = vrot.slane %v2223_v7, 5 }
  0xa3   : > { %3452 = vmatmul.mubr.msk.bf16.vlgmr.msra.gmra.mxu0 %vm454_vm3, %v3126_v43  ;;  %v3114_v43 = vld [vmem:[%s3654_s30 + $0x60] sm:$0xe]  ;;  %v2489_v49 = vsel %vm3831_vm7, %v2487_v53, %v2488_v15  ;;  %v2231_v31 = vrot.slane %v2229_v28, 5  ;;  %v2235_v9 = vrot.slane %v2233_v22, 4  ;;  %v2492_v37 = vrot.slane %v3089_v10, 5 }
  0xa4   : > { %3455 = vmatprep.mubr.msk.bf16.mxu0 %vm454_vm3, %v3127_v1  ;;  %v2481_v1 = vrot.slane %v3084_v29, 5  ;;  %v3122_v63 = vrot.slane %v3114_v43, 9  ;;  %v2184_v14 = vsel %vm3695_vm4, %v2179_v42, %v4449_v17  ;;  %v2194_v33 = vsel %vm3695_vm4, %v2189_v11, %v2193_v24 }
  0xa5   : > { %v2208_v41 = vsel %vm3695_vm4, %v2203_v32, %v4457_v5  ;;  %v2218_v8 = vsel %vm3695_vm4, %v2213_v2, %v2217_v23  ;;  %v2239_v40 = vshll.u32 %v3090_v6, 16  ;;  %v3123_v29 = vrot.slane %v3115_v25, 9 }
  0xa6   : > { %v2482_v19 = vsel %vm3831_vm7, %v2480_v0, %v2481_v1  ;;  %v2486_v51 = vsel %vm3831_vm7, %v3122_v63, %v2485_v35  ;;  %v2226_v34 = vor.u32 %v2225_v27, %v2222_v26  ;;  %v2236_v17 = vor.u32 %v2235_v9, %v2231_v31 }
  0xa7   : > { %3434 = vmatmul.mubr.msk.bf16.vlgmr.msra.gmra.mxu1 %vm454_vm3, %v4386_v18  ;;  %v2479_v18 = vsel %vm3831_vm7, %v3121_v59, %v2478_v13  ;;  %v3131_v16 = vcombine.low %v2486_v51, %v2489_v49  ;;  %v2494_v20 = vrot.slane %v2492_v37, 4  ;;  %v3097_v46 = vcombine.low %v2184_v14, %v2194_v33 }
  0xa8   : > { %3437 = vmatprep.mubr.msk.bf16.mxu1 %vm454_vm3, %v3094_v36  ;;  %v3130_v58 = vcombine.low %v2479_v18, %v2482_v19  ;;  %v2495_v36 = vrot.slane %v3090_v6, 5  ;;  %v3098_v13 = vcombine.low %v2208_v41, %v2218_v8  ;;  %v2241_v45 = vrot.slane %v2239_v40, 5 }
  0xa9   : > { %v2227_v38 = vrot.slane %v2226_v34, 4 }
  0xaa   : > { %v2496_v12 = vsel %vm3831_vm7, %v2494_v20, %v2495_v36 }
  0xab   : > { %3456 = vmatmul.mubr.msk.bf16.gmra.mxu0 %vm454_vm3, %v3128_v4  ;;  %v2493_v4 = vsel %vm3831_vm7, %v3123_v29, %v2492_v37  ;;  %v2232_v52 = vsel %vm3695_vm4, %v2227_v38, %v2231_v31 }
  0xac   : > { %3459 = vmatprep.mubr.msk.bf16.mxu0 %vm454_vm3, %v3129_v60  ;;  %v3132_v5 = vcombine.low %v2493_v4, %v2496_v12 }
  0xaf   : > { %3438 = vmatmul.mubr.msk.bf16.gmra.mxu1 %vm454_vm3, %v3095_v50  ;;  %v2237_v50 = vrot.slane %v2236_v17, 4 }
  0xb0   : > { %3441 = vmatprep.mubr.msk.bf16.mxu1 %vm454_vm3, %v3096_v39 }
  0xb1   : > { %v2242_v47 = vsel %vm3695_vm4, %v2237_v50, %v2241_v45 }
  0xb2   : > { %v3099_v56 = vcombine.low %v2232_v52, %v2242_v47 }
  0xb3   : > { %3460 = vmatmul.mubr.msk.bf16.gmra.mxu0 %vm454_vm3, %v3130_v58 }
  0xb4   : > { %3463 = vmatprep.mubr.msk.bf16.mxu0 %vm454_vm3, %v3131_v16 }
  0xb7   : > { %3442 = vmatmul.mubr.msk.bf16.gmra.mxu1 %vm454_vm3, %v3097_v46 }
  0xb8   : > { %3445 = vmatprep.mubr.msk.bf16.mxu1 %vm454_vm3, %v3098_v13 }
  0xbb   : > { %3464 = vmatmul.mubr.msk.bf16.gmra.mxu0 %vm454_vm3, %v3132_v5 }
  0xbf   : > { %3446 = vmatmul.mubr.msk.bf16.gmra.mxu1 %vm454_vm3, %v3099_v56 }
  0xea   : > { %v3309_v60 = vpop.f32.mrf.mxu0 }
  0xec   : > { %v517_v21 = vpop.f32.mrf.mxu0 }
  0xee   : > { %v3310_v57 = vpop.f32.mrf.mxu0 }
  0xef   : > { %v3317_v43 = vpop.f32.mrf.mxu1 }
  0xf0   : > { %v520_v62 = vpop.f32.mrf.mxu0 }
  0xf1   : > { %v549_v35 = vpop.f32.mrf.mxu1 }
  0xf3   : > { %v3318_v54 = vpop.f32.mrf.mxu1 }
  0xf5   : > { %v552_v44 = vpop.f32.mrf.mxu1 }
  0xfb   : > { %v3313_v59 = vpop.f32.mrf.mxu0 }
  0xfd   : > { %v533_v10 = vpop.f32.mrf.mxu0 }
  0xff   : > { %v3321_v0 = vpop.f32.mrf.mxu1  ;;  %v3314_v1 = vpop.f32.mrf.mxu0 }
 0x101   : > { %v565_v55 = vpop.f32.mrf.mxu1  ;;  %v536_v30 = vpop.f32.mrf.mxu0 }
 0x103   : > { %v3322_v48 = vpop.f32.mrf.mxu1  ;;  %v3345_v61 = vpop.f32.mrf.mxu0 }
 0x105   : > { %v4512_v63 = vpop.f32.mrf.mxu1  ;;  %v914_v3 = vpop.f32.mrf.mxu0 }
 0x107   : > { %v3327_v7 = vpop.f32.mrf.mxu1  ;;  %v3346_v53 = vpop.f32.mrf.mxu0 }
 0x108   : > { %v690_v15 = vadd.f32 %v3327_v7, %v3309_v60 }
 0x109   : > { %v681_v28 = vpop.f32.mrf.mxu1  ;;  %v917_v22 = vpop.f32.mrf.mxu0 }
 0x10a   : > { %v4514_v39 = vadd.f32 %v3345_v61, %v690_v15  ;;  %v682_v42 = vadd.f32 %v681_v28, %v517_v21 }
 0x10b   : > { %v3328_v11 = vpop.f32.mrf.mxu1  ;;  %v3349_v24 = vpop.f32.mrf.mxu0 }
 0x10c   : > { %v4516_v18 = vadd.f32 %v914_v3, %v682_v42  ;;  %v693_v19 = vadd.f32 %v3328_v11, %v3310_v57 }
 0x10d   : > { %v684_v32 = vpop.f32.mrf.mxu1  ;;  %v930_v23 = vpop.f32.mrf.mxu0 }
 0x10e   : > { %v4518_v2 = vadd.f32 %v3346_v53, %v693_v19  ;;  %v685_v51 = vadd.f32 %v684_v32, %v520_v62 }
 0x10f   : > { %v3331_v6 = vpop.f32.mrf.mxu1  ;;  %v3350_v26 = vpop.f32.mrf.mxu0 }
 0x110   : > { %v4520_v27 = vadd.f32 %v917_v22, %v685_v51  ;;  %v706_v49 = vadd.f32 %v3331_v6, %v3313_v59 }
 0x111   : > { %v697_v31 = vpop.f32.mrf.mxu1  ;;  %v933_v9 = vpop.f32.mrf.mxu0 }
 0x112   : > { %v4522_v25 = vadd.f32 %v3349_v24, %v706_v49  ;;  %v698_v37 = vadd.f32 %v697_v31, %v533_v10 }
 0x113   : > { %v3332_v14 = vpop.f32.mrf.mxu1  ;;  %v3353_v33 = vpop.f32.mrf.mxu0 }
 0x114   : > { %v4524_v58 = vadd.f32 %v930_v23, %v698_v37  ;;  %v709_v41 = vadd.f32 %v3332_v14, %v3314_v1 }
 0x115   : > { %v700_v8 = vpop.f32.mrf.mxu1  ;;  %v946_v16 = vpop.f32.mrf.mxu0 }
 0x116   : > { %v4526_v40 = vadd.f32 %v3350_v26, %v709_v41  ;;  %v701_v29 = vadd.f32 %v700_v8, %v536_v30 }
 0x117   : > { %v3335_v34 = vpop.f32.mrf.mxu1  ;;  %v3354_v17 = vpop.f32.mrf.mxu0 }
 0x118   : > { %v4528_v20 = vadd.f32 %v933_v9, %v701_v29  ;;  %v722_v36 = vadd.f32 %v3335_v34, %v3317_v43 }
 0x119   : > { %v713_v46 = vpop.f32.mrf.mxu1  ;;  %v949_v13 = vpop.f32.mrf.mxu0 }
 0x11a   : > { %v4530_v45 = vadd.f32 %v3353_v33, %v722_v36  ;;  %v714_v38 = vadd.f32 %v713_v46, %v549_v35 }
 0x11b   : > { %v3336_v50 = vpop.f32.mrf.mxu1  ;;  %v3357_v4 = vpop.f32.mrf.mxu0 }
 0x11c   : > { %v4532_v12 = vadd.f32 %v946_v16, %v714_v38  ;;  %v725_v5 = vadd.f32 %v3336_v50, %v3318_v54 }
 0x11d   : > { %v716_v52 = vpop.f32.mrf.mxu1  ;;  %v962_v47 = vpop.f32.mrf.mxu0 }
 0x11e   : > { %v4534_v56 = vadd.f32 %v3354_v17, %v725_v5  ;;  %v717_v60 = vadd.f32 %v716_v52, %v552_v44 }
 0x11f   : > { %v3339_v21 = vpop.f32.mrf.mxu1  ;;  %v3358_v57 = vpop.f32.mrf.mxu0 }
 0x120   : > { %v4536_v62 = vadd.f32 %v949_v13, %v717_v60  ;;  %v738_v43 = vadd.f32 %v3339_v21, %v3321_v0 }
 0x121   : > { %v729_v59 = vpop.f32.mrf.mxu1  ;;  %v965_v10 = vpop.f32.mrf.mxu0 }
 0x122   : > { %v4538_v1 = vadd.f32 %v3357_v4, %v738_v43  ;;  %v730_v35 = vadd.f32 %v729_v59, %v565_v55 }
 0x123   : > { %v3340_v30 = vpop.f32.mrf.mxu1  ;;  %v4540_v61 = vpop.f32.mrf.mxu0 }
 0x124   : > { %v4542_v3 = vadd.f32 %v962_v47, %v730_v35  ;;  %v741_v54 = vadd.f32 %v3340_v30, %v3322_v48 }
 0x125   : > { %v732_v7 = vpop.f32.mrf.mxu1  ;;  %v4544_v53 = vpop.f32.mrf.mxu0 }
 0x126   : > { %4768 = vst [vmem:[#allocation2_spill] sm:$0xff] %v4542_v3  ;;  %v4546_v44 = vadd.f32 %v3358_v57, %v741_v54  ;;  %v733_v15 = vadd.f32 %v732_v7, %v4512_v63 }
 0x127   : > { %v3363_v28 = vpop.f32.mrf.mxu1  ;;  %v4549_v0 = vpop.f32.mrf.mxu0 }
 0x128   : > { %4769 = vst [vmem:[#allocation3_spill] sm:$0xff] %v4546_v44  ;;  %v4551_v22 = vadd.f32 %v965_v10, %v733_v15 }
 0x129   : > { %v1113_v42 = vpop.f32.mrf.mxu1  ;;  %v4553_v55 = vpop.f32.mrf.mxu0 }
 0x12a   : > { %4770 = vst [vmem:[#allocation4_spill] sm:$0xff] %v4551_v22 }
 0x12b   : > { %v3364_v11 = vpop.f32.mrf.mxu1  ;;  %v4555_v24 = vpop.f32.mrf.mxu0 }
 0x12d   : > { %v1116_v19 = vpop.f32.mrf.mxu1  ;;  %v4557_v48 = vpop.f32.mrf.mxu0 }
 0x12f   : > { %v3367_v32 = vpop.f32.mrf.mxu1  ;;  %v4559_v23 = vpop.f32.mrf.mxu0 }
 0x131   : > { %v1129_v51 = vpop.f32.mrf.mxu1  ;;  %v4561_v6 = vpop.f32.mrf.mxu0 }
 0x133   : > { %v4563_v63 = vpop.f32.mrf.mxu1  ;;  %v4565_v26 = vpop.f32.mrf.mxu0 }
 0x135   : > { %v4567_v49 = vpop.f32.mrf.mxu1  ;;  %v4569_v31 = vpop.f32.mrf.mxu0 }
 0x137   : > { %v4571_v9 = vpop.f32.mrf.mxu1  ;;  %v4573_v37 = vpop.f32.mrf.mxu0 }
 0x139   : > { %v4575_v14 = vpop.f32.mrf.mxu1  ;;  %v4577_v33 = vpop.f32.mrf.mxu0 }
 0x13a   : > { %4771 = vst [vmem:[#allocation5_spill] sm:$0xff] %v4577_v33 }
 0x13b   : > { %v4579_v41 = vpop.f32.mrf.mxu1  ;;  %v4581_v8 = vpop.f32.mrf.mxu0 }
 0x13c   : > { %4772 = vst [vmem:[#allocation6_spill] sm:$0xff] %v4581_v8 }
 0x13d   : > { %v4583_v16 = vpop.f32.mrf.mxu1  ;;  %v4585_v29 = vpop.f32.mrf.mxu0 }
 0x13e   : > { %4773 = vst [vmem:[#allocation7_spill] sm:$0xff] %v4585_v29 }
 0x13f   : > { %v4587_v34 = vpop.f32.mrf.mxu1  ;;  %v4589_v17 = vpop.f32.mrf.mxu0 }
 0x140   : > { %4774 = vst [vmem:[#allocation8_spill] sm:$0xff] %v4589_v17 }
 0x141   : > { %v4591_v36 = vpop.f32.mrf.mxu1  ;;  %v4593_v46 = vpop.f32.mrf.mxu0 }
 0x142   : > { %4775 = vst [vmem:[#allocation9_spill] sm:$0xff] %v4591_v36  ;;  %4776 = vst [vmem:[#allocation10_spill] sm:$0xff] %v4593_v46  ;;  %v1178_v36 = vadd.f32 %v3363_v28, %v4514_v39  ;;  %v1177_v28 = vadd.f32 %v1116_v19, %v4520_v27 }
 0x143   : > { %v4595_v13 = vpop.f32.mrf.mxu1  ;;  %v3417_v38 = vpop.f32.mrf.mxu0 }
 0x144   : > { %4777 = vst [vmem:[#allocation11_spill] sm:$0xff] %v4595_v13 }
 0x145   : > { %v4597_v50 = vpop.f32.mrf.mxu1  ;;  %v1948_v4 = vpop.f32.mrf.mxu0 }
 0x146   : > { %4778 = vst [vmem:[#allocation12_spill] sm:$0xff] %v4597_v50 }
 0x147   : > { %v3399_v5 = vpop.f32.mrf.mxu1  ;;  %v3418_v52 = vpop.f32.mrf.mxu0 }
 0x149   : > { %v1749_v47 = vpop.f32.mrf.mxu1  ;;  %v4599_v60 = vpop.f32.mrf.mxu0 }
 0x14b   : > { %v3400_v21 = vpop.f32.mrf.mxu1  ;;  %v4601_v57 = vpop.f32.mrf.mxu0 }
 0x14d   : > { %v1752_v43 = vpop.f32.mrf.mxu1  ;;  %v4603_v59 = vpop.f32.mrf.mxu0 }
 0x14f   : > { %v3403_v10 = vpop.f32.mrf.mxu1  ;;  %v4605_v35 = vpop.f32.mrf.mxu0 }
 0x151   : > { %v1765_v30 = vpop.f32.mrf.mxu1  ;;  %v4607_v54 = vpop.f32.mrf.mxu0 }
 0x152   : > { %4779 = vst [vmem:[#allocation13_spill] sm:$0xff] %v4607_v54 }
 0x153   : > { %v4609_v7 = vpop.f32.mrf.mxu1  ;;  %v4611_v15 = vpop.f32.mrf.mxu0 }
 0x154   : > { %4780 = vst [vmem:[#allocation14_spill] sm:$0xff] %v4611_v15 }
 0x155   : > { %v4613_v46 = vpop.f32.mrf.mxu1  ;;  %v4615_v17 = vpop.f32.mrf.mxu0 }
 0x156   : > { %4781 = vst [vmem:[#allocation15_spill] sm:$0xff] %v4615_v17  ;;  %v1176_v17 = vadd.f32 %v1113_v42, %v4516_v18 }
 0x157   : > { %v4617_v29 = vpop.f32.mrf.mxu1  ;;  %v4619_v50 = vpop.f32.mrf.mxu0 }
 0x158   : > { %4782 = vst [vmem:[#allocation16_spill] sm:$0xff] %v4619_v50  ;;  %v1560_v50 = vadd.f32 %v4540_v61, %v1178_v36  ;;  %v1558_v39 = vadd.f32 %v4544_v53, %v1176_v17  ;;  %v1180_v61 = vadd.f32 %v1129_v51, %v4524_v58  ;;  %v1559_v36 = vadd.f32 %v4553_v55, %v1177_v28 }
 0x159   : > { %v4621_v22 = vpop.f32.mrf.mxu1  ;;  %v4623_v13 = vpop.f32.mrf.mxu0  ;;  %v1181_v58 = vadd.f32 %v4567_v49, %v4528_v20  ;;  %v1186_v55 = vadd.f32 %v4571_v9, %v4530_v45 }
 0x15a   : > { %4783 = vst [vmem:[#allocation17_spill] sm:$0xff] %v4621_v22  ;;  %4784 = vst [vmem:[#allocation18_spill] sm:$0xff] %v4623_v13  ;;  %v1179_v13 = vadd.f32 %v3364_v11, %v4518_v2 }
 0x15b   : > { %v4625_v44 = vpop.f32.mrf.mxu1  ;;  %v4627_v8 = vpop.f32.mrf.mxu0 }
 0x15c   : > { %4785 = vst [vmem:[#allocation19_spill] sm:$0xff] %v4625_v44  ;;  %4786 = vst [vmem:[#allocation20_spill] sm:$0xff] %v4627_v8  ;;  %v1814_v8 = vadd.f32 %v3399_v5, %v1560_v50  ;;  %v1561_v42 = vadd.f32 %v4549_v0, %v1179_v13  ;;  %v1813_v5 = vadd.f32 %v1752_v43, %v1559_v36 }
 0x15d   : > { %v4630_v3 = vpop.f32.mrf.mxu1  ;;  %v4632_v15 = vpop.f32.mrf.mxu0  ;;  %v1562_v0 = vadd.f32 %v4557_v48, %v1180_v61 }
 0x15e   : > { %4787 = vst [vmem:[#allocation21_spill] sm:$0xff] %v4632_v15  ;;  %v1815_v53 = vadd.f32 %v3400_v21, %v1561_v42 }
 0x15f   : > { %v4635_v33 = vpop.f32.mrf.mxu1  ;;  %v4637_v54 = vpop.f32.mrf.mxu0 }
 0x160   : > { %4788 = vst [vmem:[#allocation22_spill] sm:$0xff] %v4635_v33  ;;  %4789 = vst [vmem:[#allocation23_spill] sm:$0xff] %v4637_v54  ;;  %v1182_v54 = vadd.f32 %v3367_v32, %v4522_v25  ;;  %v1812_v33 = vadd.f32 %v1749_v47, %v1558_v39  ;;  %v1183_v25 = vadd.f32 %v4563_v63, %v4526_v40  ;;  %v4668_v40 = vld [vmem:[%s4762_s2] ss:$0 sm:$0xff] }
 0x161   : > { %v4641_v22 = vpop.f32.mrf.mxu1  ;;  %v4643_v44 = vpop.f32.mrf.mxu0  ;;  %v2012_v63 = vadd.f32 %v4599_v60, %v1813_v5 }
 0x162   : > { %4790 = vst [vmem:[#allocation24_spill] sm:$0xff] %v4643_v44  ;;  %v2013_v44 = vadd.f32 %v3417_v38, %v1814_v8  ;;  %v1564_v19 = vadd.f32 %v4555_v24, %v1182_v54  ;;  %v2011_v50 = vadd.f32 %v1948_v4, %v1812_v33  ;;  %v2014_v8 = vadd.f32 %v3418_v52, %v1815_v53 }
 0x163   : > { %v4647_v15 = vpop.f32.mrf.mxu1  ;;  %v3453_v18 = vpop.f32.mrf.mxu0  ;;  %v1816_v33 = vadd.f32 %v1765_v30, %v1562_v0  ;;  %v1565_v9 = vadd.f32 %v4559_v23, %v1183_v25  ;;  %v1563_v4 = vadd.f32 %v4561_v6, %v1181_v58  ;;  %v1568_v52 = vadd.f32 %v4565_v26, %v1186_v55  ;;  %v4794_v0 = vld [vmem:[#allocation5_spill] sm:$0xff] }
 0x164   : > { %4791 = vst [vmem:[#allocation25_spill] sm:$0xff] %v4647_v15  ;;  %v1818_v13 = vadd.f32 %v3403_v10, %v1564_v19  ;;  %v4796_v58 = vld [vmem:[#allocation9_spill] sm:$0xff] }
 0x165   : > { %v4652_v2 = vpop.f32.mrf.mxu1  ;;  %v2584_v11 = vpop.f32.mrf.mxu0  ;;  %v2015_v23 = vadd.f32 %v4603_v59, %v1816_v33  ;;  %v1819_v6 = vadd.f32 %v4609_v7, %v1565_v9  ;;  %v1817_v54 = vadd.f32 %v4613_v46, %v1563_v4  ;;  %v1190_v59 = vadd.f32 %v4587_v34, %v4538_v1  ;;  %v4799_v33 = vld [vmem:[#allocation14_spill] sm:$0xff]  ;;  %v4802_v4 = vld [vmem:[#allocation4_spill] sm:$0xff] }
 0x166   : > { %v2017_v21 = vadd.f32 %v4601_v57, %v1818_v13  ;;  %v1822_v7 = vadd.f32 %v4617_v29, %v1568_v52  ;;  %v4803_v52 = vld [vmem:[#allocation12_spill] sm:$0xff] }
 0x167   : > { %v3435_v17 = vpop.f32.mrf.mxu1  ;;  %v3454_v27 = vpop.f32.mrf.mxu0  ;;  %v2018_v53 = vadd.f32 %v4605_v35, %v1819_v6  ;;  %v4795_v35 = vld [vmem:[#allocation2_spill] sm:$0xff] }
 0x168   : > { %v2395_v15 = vadd.f32 %v3435_v17, %v2013_v44  ;;  %v1184_v44 = vadd.f32 %v4575_v14, %v4532_v12  ;;  %v1187_v12 = vadd.f32 %v4579_v41, %v4534_v56  ;;  %v4792_v17 = vld [vmem:[#allocation13_spill] sm:$0xff]  ;;  %v1188_v55 = vadd.f32 %v4796_v58, %v4795_v35  ;;  %v4812_v35 = vld [vmem:[#allocation20_spill] sm:$0xff] }
 0x169   : > { %v2330_v32 = vpop.f32.mrf.mxu1  ;;  %v2587_v51 = vpop.f32.mrf.mxu0 }
 0x16a   : > { %v2649_v38 = vadd.f32 %v3453_v18, %v2395_v15  ;;  %v2393_v24 = vadd.f32 %v2330_v32, %v2011_v50  ;;  %v1566_v30 = vadd.f32 %v4569_v31, %v1184_v44  ;;  %v1569_v28 = vadd.f32 %v4573_v37, %v1187_v12  ;;  %v4793_v37 = vld [vmem:[#allocation17_spill] sm:$0xff]  ;;  %v4797_v32 = vld [vmem:[#allocation19_spill] sm:$0xff] }
 0x16b   : > { %v3436_v48 = vpop.f32.mrf.mxu1  ;;  %v3457_v20 = vpop.f32.mrf.mxu0  ;;  %v1185_v31 = vadd.f32 %v4583_v16, %v4536_v62  ;;  %v1189_v12 = vadd.f32 %v4803_v52, %v4802_v4 }
 0x16c   : > { %v2647_v45 = vadd.f32 %v2584_v11, %v2393_v24  ;;  %v2396_v49 = vadd.f32 %v3436_v48, %v2014_v8  ;;  %v2672_v43 = vadd.f32 %v4668_v40, %v2649_v38  ;;  %v1820_v19 = vadd.f32 %v4793_v37, %v1566_v30  ;;  %v4798_v24 = vld [vmem:[#allocation6_spill] sm:$0xff] }
 0x16d   : > { %v2333_v14 = vpop.f32.mrf.mxu1  ;;  %v2600_v47 = vpop.f32.mrf.mxu0  ;;  %v1567_v25 = vadd.f32 %v4794_v0, %v1185_v31  ;;  %v1572_v44 = vadd.f32 %v4798_v24, %v1190_v59  ;;  %v2021_v48 = vadd.f32 %v4799_v33, %v1822_v7  ;;  %v4813_v24 = vld [vmem:[#allocation21_spill] sm:$0xff] }
 0x16e   : > { %v2650_v10 = vadd.f32 %v3454_v27, %v2396_v49  ;;  %v2394_v60 = vadd.f32 %v2333_v14, %v2012_v63  ;;  %v2670_v56 = vadd.f32 %v4668_v40, %v2647_v45  ;;  %v2688_v42 = vmax.f32 %v2672_v43, 0.0  ;;  %v4800_v45 = vld [vmem:[#allocation3_spill] sm:$0xff] }
 0x16f   : > { %v3439_v26 = vpop.f32.mrf.mxu1  ;;  %v3458_v15 = vpop.f32.mrf.mxu0  ;;  %v2016_v27 = vadd.f32 %v4792_v17, %v1817_v54  ;;  %v4801_v49 = vld [vmem:[#allocation11_spill] sm:$0xff] }
 0x170   : > { %v2673_v41 = vadd.f32 %v4668_v40, %v2650_v10  ;;  %v2648_v57 = vadd.f32 %v2587_v51, %v2394_v60  ;;  %v2399_v39 = vadd.f32 %v3439_v26, %v2017_v21  ;;  %v2686_v29 = vmax.f32 %v2670_v56, 0.0  ;;  %v4804_v10 = vld [vmem:[#allocation15_spill] sm:$0xff]  ;;  %v4806_v56 = vld [vmem:[#allocation16_spill] sm:$0xff] }
 0x171   : > { %v2346_v46 = vpop.f32.mrf.mxu1  ;;  %v2603_v18 = vpop.f32.mrf.mxu0  ;;  %v1823_v51 = vadd.f32 %v4797_v32, %v1569_v28  ;;  %v1191_v9 = vadd.f32 %v4801_v49, %v4800_v45  ;;  %v2019_v60 = vadd.f32 %v4804_v10, %v1820_v19  ;;  %v4805_v54 = vld [vmem:[#allocation7_spill] sm:$0xff] }
 0x172   : > { %v2689_v61 = vmax.f32 %v2673_v41, 0.0  ;;  %v2671_v11 = vadd.f32 %v4668_v40, %v2648_v57  ;;  %v2397_v36 = vadd.f32 %v2346_v46, %v2015_v23  ;;  %v2653_v62 = vadd.f32 %v3457_v20, %v2399_v39 }
 0x173   : > { %v3440_v1 = vpop.f32.mrf.mxu1  ;;  %v3461_v16 = vpop.f32.mrf.mxu0  ;;  %v1570_v26 = vadd.f32 %v4805_v54, %v1188_v55  ;;  %v2022_v41 = vadd.f32 %v4806_v56, %v1823_v51  ;;  %v1821_v57 = vadd.f32 %v4630_v3, %v1567_v25 }
 0x174   : > { %v3185_v34 = vpack.c.bf16 %v2689_v61, %v2688_v42  ;;  %v2687_v50 = vmax.f32 %v2671_v11, 0.0  ;;  %v2651_v5 = vadd.f32 %v2600_v47, %v2397_v36  ;;  %v2400_v8 = vadd.f32 %v3440_v1, %v2018_v53  ;;  %v4808_v61 = vld [vmem:[#allocation8_spill] sm:$0xff] }
 0x175   : > { %v2349_v13 = vpop.f32.mrf.mxu1  ;;  %v2616_v38 = vpop.f32.mrf.mxu0  ;;  %v2676_v14 = vadd.f32 %v4668_v40, %v2653_v62  ;;  %v1573_v11 = vadd.f32 %v4808_v61, %v1191_v9  ;;  %v1824_v3 = vadd.f32 %v4641_v22, %v1570_v26 }
 0x176   : > { %3217 = vst [vmem:[%s4698_s26 + $0x8] sm:$0xff] %v3185_v34   ;;  %v3180_v20 = vpack.c.bf16 %v2687_v50, %v2686_v29  ;;  %v2398_v63 = vadd.f32 %v2349_v13, %v2016_v27  ;;  %v2654_v47 = vadd.f32 %v3458_v15, %v2400_v8  ;;  %v2674_v30 = vadd.f32 %v4668_v40, %v2651_v5  ;;  %v4807_v15 = vld [vmem:[#allocation22_spill] sm:$0xff]  ;;  %v4811_v50 = vld [vmem:[#allocation25_spill] sm:$0xff] }
 0x177   : > { %v3443_v21 = vpop.f32.mrf.mxu1  ;;  %v3462_v43 = vpop.f32.mrf.mxu0  ;;  %v1826_v59 = vadd.f32 %v4807_v15, %v1572_v44  ;;  %v2692_v53 = vmax.f32 %v2676_v14, 0.0  ;;  %v4810_v29 = vld [vmem:[#allocation18_spill] sm:$0xff]  ;;  %v2023_v44 = vadd.f32 %v4813_v24, %v1824_v3 }
 0x178   : > { %3181 = vst [vmem:[%s4698_s26] sm:$0xff] %v3180_v20   ;;  %v2652_v23 = vadd.f32 %v2603_v18, %v2398_v63  ;;  %v2403_v6 = vadd.f32 %v3443_v21, %v2021_v48  ;;  %v2677_v39 = vadd.f32 %v4668_v40, %v2654_v47  ;;  %v4809_v18 = vld [vmem:[#allocation10_spill] sm:$0xff]  ;;  %v2690_v19 = vmax.f32 %v2674_v30, 0.0 }
 0x179   : > { %v2362_v28 = vpop.f32.mrf.mxu1  ;;  %v2619_v31 = vpop.f32.mrf.mxu0  ;;  %v1571_v36 = vadd.f32 %v4809_v18, %v1189_v12  ;;  %v2020_v34 = vadd.f32 %v4810_v29, %v1821_v57  ;;  %v2025_v58 = vadd.f32 %v4812_v35, %v1826_v59 }
 0x17a   : > { %v2675_v7 = vadd.f32 %v4668_v40, %v2652_v23  ;;  %v2657_v46 = vadd.f32 %v3461_v16, %v2403_v6  ;;  %v2401_v42 = vadd.f32 %v2362_v28, %v2019_v60  ;;  %v2693_v17 = vmax.f32 %v2677_v39, 0.0 }
 0x17b   : > { %v3444_v27 = vpop.f32.mrf.mxu1  ;;  %v3465_v37 = vpop.f32.mrf.mxu0  ;;  %v1827_v16 = vadd.f32 %v4811_v50, %v1573_v11  ;;  %v1825_v33 = vadd.f32 %v4652_v2, %v1571_v36  ;;  %v4815_v2 = vld [vmem:[#allocation24_spill] sm:$0xff] }
 0x17c   : > { %v2691_v62 = vmax.f32 %v2675_v7, 0.0  ;;  %v2404_v1 = vadd.f32 %v3444_v27, %v2022_v41  ;;  %v3195_v5 = vpack.c.bf16 %v2693_v17, %v2692_v53  ;;  %v2655_v0 = vadd.f32 %v2616_v38, %v2401_v42  ;;  %v4814_v38 = vld [vmem:[#allocation23_spill] sm:$0xff] }
 0x17d   : > { %v2365_v25 = vpop.f32.mrf.mxu1  ;;  %v2680_v32 = vadd.f32 %v4668_v40, %v2657_v46  ;;  %v2632_v13 = vpop.f32.mrf.mxu0  ;;  %v2026_v63 = vadd.f32 %v4814_v38, %v1827_v16  ;;  %v2024_v10 = vadd.f32 %v4815_v2, %v1825_v33 }
 0x17e   : > { %v3190_v55 = vpack.c.bf16 %v2691_v62, %v2690_v19  ;;  %v2658_v51 = vadd.f32 %v3462_v43, %v2404_v1  ;;  %3219 = vst [vmem:[%s4698_s26 + $0x18] sm:$0xff] %v3195_v5   ;;  %v2402_v8 = vadd.f32 %v2365_v25, %v2020_v34  ;;  %v2678_v45 = vadd.f32 %v4668_v40, %v2655_v0 }
 0x17f   : > { %v3447_v22 = vpop.f32.mrf.mxu1  ;;  %v2696_v4 = vmax.f32 %v2680_v32, 0.0  ;;  %v3466_v43 = vpop.f32.mrf.mxu0 }
 0x180   : > { %3218 = vst [vmem:[%s4698_s26 + $0x10] sm:$0xff] %v3190_v55   ;;  %v2681_v48 = vadd.f32 %v4668_v40, %v2658_v51  ;;  %v2407_v20 = vadd.f32 %v3447_v22, %v2025_v58  ;;  %v2656_v49 = vadd.f32 %v2619_v31, %v2402_v8  ;;  %v2694_v6 = vmax.f32 %v2678_v45, 0.0 }
 0x181   : > { %v2378_v9 = vpop.f32.mrf.mxu1  ;;  %v2635_v28 = vpop.f32.mrf.mxu0 }
 0x182   : > { %v2697_v52 = vmax.f32 %v2681_v48, 0.0  ;;  %v2661_v12 = vadd.f32 %v3465_v37, %v2407_v20  ;;  %v2405_v14 = vadd.f32 %v2378_v9, %v2023_v44  ;;  %v2679_v47 = vadd.f32 %v4668_v40, %v2656_v49 }
 0x183   : > { %v3448_v21 = vpop.f32.mrf.mxu1 }
 0x184   : > { %v3205_v60 = vpack.c.bf16 %v2697_v52, %v2696_v4  ;;  %v2659_v30 = vadd.f32 %v2632_v13, %v2405_v14  ;;  %v2408_v23 = vadd.f32 %v3448_v21, %v2026_v63  ;;  %v2695_v54 = vmax.f32 %v2679_v47, 0.0 }
 0x185   : > { %v2381_v26 = vpop.f32.mrf.mxu1  ;;  %v2684_v56 = vadd.f32 %v4668_v40, %v2661_v12 }
 0x186   : > { %3221 = vst [vmem:[%s4698_s26 + $0x28] sm:$0xff] %v3205_v60   ;;  %v2662_v41 = vadd.f32 %v3466_v43, %v2408_v23  ;;  %v2406_v57 = vadd.f32 %v2381_v26, %v2024_v10  ;;  %v3200_v39 = vpack.c.bf16 %v2695_v54, %v2694_v6  ;;  %v2682_v31 = vadd.f32 %v4668_v40, %v2659_v30 }
 0x187   : > { %v2700_v7 = vmax.f32 %v2684_v56, 0.0 }
 0x188   : > { %v2685_v15 = vadd.f32 %v4668_v40, %v2662_v41  ;;  %v2660_v59 = vadd.f32 %v2635_v28, %v2406_v57  ;;  %3220 = vst [vmem:[%s4698_s26 + $0x20] sm:$0xff] %v3200_v39   ;;  %v2698_v61 = vmax.f32 %v2682_v31, 0.0 }
 0x18a   : > { %v2701_v46 = vmax.f32 %v2685_v15, 0.0  ;;  %v2683_v42 = vadd.f32 %v4668_v40, %v2660_v59 }
 0x18c   : > { %v3215_v11 = vpack.c.bf16 %v2701_v46, %v2700_v7  ;;  %v2699_v18 = vmax.f32 %v2683_v42, 0.0 }
 0x18e   : > { %3223 = vst [vmem:[%s4698_s26 + $0x38] sm:$0xff] %v3215_v11   ;;  %v3210_v36 = vpack.c.bf16 %v2699_v18, %v2698_v61 }
 0x190   : > { %3222 = vst [vmem:[%s4698_s26 + $0x30] sm:$0xff] %v3210_v36  }
 0x191 PF: > { %s13_s16 = sadd.s32 1, %s3582_s16   ;;  %s4816_s12 = smov %s3574_s14 }
 0x192   : > { %p10_p6 = scmp.ge.s32.totalorder %s13_s16, 6   ;;  %s4817_s13 = smov %s3578_s15 }
 0x193   : > { %s4818_s14 = smov %s4821_s17  ;;  %s4819_s15 = smov %s4825_s18 }
 0x194   :  { %12 = sbr.rel (!%p10_p6) target bundleno = 3 (0x3), region = 72 }

// kernel: aad_forward.3
= control target key start
LH: loop header
LB: loop body
LE: loop exit
PB: predicated region body
PF: predicated region fallthrough
CT: control target
= control target key end

     0   :  { %s7175_s26 = smov 0   ;;  %s7177_s27 = smov 0   ;;  %s10365_s0 = inlined_call_operand.vmem [shape: f32[4,10,18,4], index: 0, kind: input, shape index: {}]   ;;  %s10366_s1 = inlined_call_operand.vmem [shape: bf16[4,10,18,128], index: 1, kind: input, shape index: {}]   ;;  %s10367_s2 = inlined_call_operand.vmem [shape: f32[2,1,8], index: 2, kind: input, shape index: {}]   ;;  %s10368_s3 = inlined_call_operand.vmem [shape: bf16[9,128,8], index: 3, kind: input, shape index: {}]   ;;  %s10369_s4 = inlined_call_operand.vmem [shape: f32[1,8], index: 4, kind: input, shape index: {}]   ;;  %s10370_s5 = inlined_call_operand.vmem [shape: f32[9,1,4], index: 5, kind: input, shape index: {}]   ;;  %s10371_s6 = inlined_call_operand.<no memory space> [shape: f32[1,1], index: 6, kind: input, shape index: {}]   ;;  %s10372_s7 = inlined_call_operand.vmem [shape: f32[4,8,16,4], index: 7, kind: output, shape index: {}]  }
   0x1   :  { %v12_v0 = vstv %s10371_s6  ;;  %s7179_s28 = smov 0   ;;  %s7181_s29 = smov 0  }
   0x2   :  { %13 = vst [vmem:[#allocation2] sm:$0x1] %v12_v0  ;;  %s7183_s30 = smov 0  }
   0x3 LB: > { %s28_s6 = sadd.s32 1, %s7120_s28  ;;  %s31_s8 = sadd.s32 1, %s7124_s29  ;;  %s7128_s30 = sphi %s7183_s30, %s19_s30   ;;  %s7124_s29 = sphi %s7181_s29, %s10776_s29   ;;  %s7120_s28 = sphi %s7179_s28, %s10775_s28   ;;  %s7116_s27 = sphi %s7177_s27, %s10774_s27   ;;  %s7112_s26 = sphi %s7175_s26, %s10773_s26  }
   0x4   : > { %p29_p0 = scmp.ge.s32.totalorder %s28_s6, 2  ;;  %p5906_p1 = scmp.ge.s32.totalorder %s7128_s30, 1 }
   0x5   : > { %p289_p2 = scmp.lt.s32.totalorder %s7128_s30, 5 }
   0x6   : > { %s10778_s6 = smov (%p29_p0, %s28_s6), 0  ;;  %s10780_s8 = smov (!%p29_p0, %s31_s8), %s7124_s29 }
   0x7   : > { %p290_p3 = pnand %p5906_p1, %p289_p2  ;;  %p33_p4 = scmp.ge.s32.totalorder %s10780_s8, 2 }
   0x9   : > { %s10782_s8 = smov (%p33_p4, %s10780_s8), 0  ;;  %293 = sbr.rel (%p290_p3) target bundleno = 1084 (0x43c), region = 48 }
   0xe   : > { %v6839_v1 = vld [vmem:[%s10368_s3 + $0x78] sm:$0xff]   ;;  %s5907_s11 = sshll.u32 %s7116_s27, 1  ;;  %v6841_v3 = vld [vmem:[%s10368_s3 + $0x70] sm:$0xff]   ;;  %v6843_v5 = vld [vmem:[%s10368_s3 + $0x68] sm:$0xff]   ;;  %vm396_vm0 = vcmask 31744   ;;  %vm403_vm1 = vcmask 25600  }
   0xf   : > { %v6840_v2 = vld [vmem:[%s10368_s3 + $0x38] sm:$0xff]   ;;  %s336_s14 = sadd.s32 %s7112_s26, %s5907_s11  ;;  %6489 = vmatprep.subr.bf16.mxu0 %v6839_v1  ;;  %v6842_v4 = vld [vmem:[%s10368_s3 + $0x30] sm:$0xff]   ;;  %v6844_v6 = vld [vmem:[%s10368_s3 + $0x28] sm:$0xff]   ;;  %vm916_vm2 = vsmask.f32 3328  ;;  %vm1725_vm5 = vcmask 1042432  }
  0x10   : > { %p337_p5 = scmp.lt.s32.totalorder %s336_s14, 3  ;;  %6521 = vmatprep.subr.bf16.mxu1 %v6840_v2  ;;  %6490 = vmatpush3.bf16.msra.mxu0 %v6839_v1  ;;  %v6845_v7 = vld [vmem:[%s10368_s3 + $0x60] sm:$0xff]   ;;  %v6847_v14 = vld [vmem:[%s10368_s3 + $0x58] sm:$0xff]   ;;  %v6849_v20 = vld [vmem:[%s10368_s3 + $0x50] sm:$0xff]   ;;  %vm917_vm3 = vsmask.f32 7440 }
  0x11   : > { %6522 = vmatpush3.bf16.msra.mxu1 %v6840_v2  ;;  %6491 = vmatprep.subr.bf16.mxu0 %v6841_v3  ;;  %v6846_v8 = vld [vmem:[%s10368_s3 + $0x20] sm:$0xff]   ;;  %v6848_v17 = vld [vmem:[%s10368_s3 + $0x18] sm:$0xff]   ;;  %v6850_v23 = vld [vmem:[%s10368_s3 + $0x10] sm:$0xff]   ;;  %vm1726_vm6 = vcmask 1046532   ;;  %vm1530_vm8 = vcmask 31745   ;;  %vm1537_vm9 = vcmask 24576  }
  0x12   : > { %s10784_s14 = smov (!%p337_p5, %s336_s14), 3  ;;  %6523 = vmatprep.subr.bf16.mxu1 %v6842_v4  ;;  %v6851_v28 = vld [vmem:[%s10368_s3 + $0x48] sm:$0xff]   ;;  %v6853_v39 = vld [vmem:[%s10368_s3 + $0x40] sm:$0xff]   ;;  %v7321_v0 = vld [vmem:[%s10368_s3 + $0xb8] sm:$0xff]   ;;  %vm2026_vm10 = vcmask 31746   ;;  %vm1628_vm11 = vcmask 1046528  }
  0x13   : > { %s6793_s23 = smul.u32 240, %s10784_s14  ;;  %v6852_v30 = vld [vmem:[%s10368_s3 + $0x8] sm:$0xff]   ;;  %v6854_v45 = vld [vmem:[%s10368_s3] sm:$0xff]   ;;  %vm7325_vm4 = vmor %vm916_vm2, %vm917_vm3  ;;  %vm2123_vm12 = vcmask 1045504   ;;  %s7130_s9 = smov 124  }
  0x14   : > { %6492 = vmatpush3.bf16.msra.mxu0 %v6841_v3  ;;  %s6794_s18 = smul.u32 120, %s10784_s14  ;;  %vm7500_vm7 = vmor %vm1725_vm5, %vm1726_vm6  ;;  %p353_p6 = scmp.lt.s32.totalorder %s7116_s27, 1 }
  0x15   : > { %6524 = vmatpush3.bf16.msra.mxu1 %v6842_v4  ;;  %6493 = vmatprep.subr.bf16.mxu0 %v6843_v5  ;;  %s7235_s10 = scalar_lea.vmem %s10365_s0, %s6793_s23 }
  0x16   : > { %6525 = vmatprep.subr.bf16.mxu1 %v6844_v6  ;;  %v366_v9 = vld [vmem:[%s7235_s10] sm:$0xff]  ;;  %v368_v10 = vld [vmem:[%s7235_s10 + $0x10] sm:$0x3]  ;;  %v367_v11 = vld [vmem:[%s7235_s10 + $0x8] sm:$0xff]  ;;  %s7270_s25 = scalar_lea.vmem %s10366_s1, %s6794_s18  ;;  %s10786_s27 = smov (!%p353_p6, %s7116_s27), 1 }
  0x17   : > { %v397_v12 = vsel %vm396_vm0, %v366_v9, 0.0  ;;  %v404_v13 = vsel %vm403_vm1, %v368_v10, 0.0  ;;  %v369_v15 = vld [vmem:[%s7235_s10 + $0x18] sm:$0xff]  ;;  %v400_v16 = vsel %vm396_vm0, %v367_v11, 0.0  ;;  %v370_v18 = vld [vmem:[%s7235_s10 + $0x20] sm:$0xff]  ;;  %v372_v24 = vld [vmem:[%s7235_s10 + $0x30] sm:$0xff]  ;;  %s9720_s13 = scalar_lea.vmem %s10367_s2, %s10786_s27 }
  0x18   : > { %398 = vadd.xlane.f32.xlu0 %v397_v12  ;;  %6494 = vmatpush3.bf16.msra.mxu0 %v6843_v5  ;;  %v407_v19 = vsel %vm396_vm0, %v369_v15, 0.0  ;;  %v371_v21 = vld [vmem:[%s7235_s10 + $0x28] sm:$0x3]  ;;  %v410_v22 = vsel %vm396_vm0, %v370_v18, 0.0  ;;  %v373_v25 = vld [vmem:[%s7235_s10 + $0x38] sm:$0xff]  ;;  %v416_v29 = vsel %vm396_vm0, %v372_v24, 0.0 }
  0x19   : > { %6526 = vmatpush3.bf16.msra.mxu1 %v6844_v6  ;;  %6495 = vmatprep.subr.bf16.mxu0 %v6845_v7  ;;  %v374_v26 = vld [vmem:[%s7235_s10 + $0x40] sm:$0x3]  ;;  %v413_v27 = vsel %vm403_vm1, %v371_v21, 0.0  ;;  %v419_v31 = vsel %vm396_vm0, %v373_v25, 0.0  ;;  %v375_v33 = vld [vmem:[%s7235_s10 + $0x48] sm:$0xff]  ;;  %v376_v34 = vld [vmem:[%s7235_s10 + $0x50] sm:$0xff] }
  0x1a   : > { %6527 = vmatprep.subr.bf16.mxu1 %v6846_v8  ;;  %405 = vadd.xlane.f32.xlu1 %v404_v13  ;;  %v422_v32 = vsel %vm403_vm1, %v374_v26, 0.0  ;;  %v425_v35 = vsel %vm396_vm0, %v375_v33, 0.0  ;;  %v428_v36 = vsel %vm396_vm0, %v376_v34, 0.0  ;;  %v789_v37 = vld [vmem:[%s7270_s25] sm:$0xf]  ;;  %v6858_v6 = vld [vmem:[%s10368_s3 + $0xf8] sm:$0xff]  }
  0x1b   : > { %v7288_v38 = vld [vmem:[%s7270_s25 + $0x4] sm:$0xf]  ;;  %v7294_v40 = vld [vmem:[%s7270_s25 + $0x8] sm:$0x1]  ;;  %v920_v41 = vshrl.u32 %v789_v37, 16  ;;  %v923_v42 = vshll.u32 %v789_v37, 16 }
  0x1c   : > { %401 = vadd.xlane.f32.xlu0 %v400_v16  ;;  %6496 = vmatpush3.bf16.msra.mxu0 %v6845_v7  ;;  %v929_v43 = vshll.u32 %v7288_v38, 16  ;;  %v933_v44 = vshrl.u32 %v7288_v38, 16  ;;  %v939_v46 = vshll.u32 %v7294_v40, 16  ;;  %v1733_v47 = vrot.slane %v7294_v40, 5  ;;  %v7305_v49 = vld [vmem:[%s7270_s25 + $0xc] sm:$0xf] }
  0x1d   : > { %6528 = vmatpush3.bf16.msra.mxu1 %v6846_v8  ;;  %6497 = vmatprep.subr.bf16.mxu0 %v6847_v14  ;;  %v5947_v48 = vcombine.low %v789_v37, %v7288_v38  ;;  %v7308_v50 = vld [vmem:[%s7270_s25 + $0x10] sm:$0xf]  ;;  %v922_v51 = vrot.slane %v920_v41, 4  ;;  %v925_v52 = vrot.slane %v923_v42, 5  ;;  %v7311_v55 = vld [vmem:[%s7270_s25 + $0x14] sm:$0x1] }
  0x1e   : > { %6529 = vmatprep.subr.bf16.mxu1 %v6848_v17  ;;  %408 = vadd.xlane.f32.xlu1 %v407_v19  ;;  %v931_v53 = vrot.slane %v929_v43, 5  ;;  %v935_v54 = vrot.slane %v933_v44, 4  ;;  %v941_v56 = vrot.slane %v939_v46, 5  ;;  %v944_v57 = vshrl.u32 %v7305_v49, 16  ;;  %v377_v12 = vld [vmem:[%s7235_s10 + $0x58] sm:$0x3] }
  0x1f   : > { %v947_v58 = vshll.u32 %v7305_v49, 16  ;;  %v953_v59 = vshll.u32 %v7308_v50, 16  ;;  %v926_v60 = vor.u32 %v925_v52, %v922_v51  ;;  %6537 = vmatprep.mubr.bf16.mxu1 %v5947_v48  ;;  %v957_v62 = vshrl.u32 %v7308_v50, 16  ;;  %v378_v13 = vld [vmem:[%s7235_s10 + $0x60] sm:$0xff]  ;;  %v379_v24 = vld [vmem:[%s7235_s10 + $0x68] sm:$0xff]  ;;  %s6344_s27 = sshll.u32 %s10784_s14, 7 }
  0x20   : > { %411 = vadd.xlane.f32.xlu0 %v410_v22  ;;  %6498 = vmatpush3.bf16.msra.mxu0 %v6847_v14  ;;  %v936_v61 = vor.u32 %v935_v54, %v931_v53  ;;  %v963_v63 = vshll.u32 %v7311_v55, 16  ;;  %v946_v2 = vrot.slane %v944_v57, 4  ;;  %v1740_v5 = vrot.slane %v7311_v55, 5  ;;  %v795_v41 = vld [vmem:[%s7270_s25 + $0x24] sm:$0xf]  ;;  %s10231_s16 = scalar_lea.vmem %s10372_s7, %s6344_s27 }
  0x21   : > { %6530 = vmatpush3.bf16.msra.mxu1 %v6848_v17  ;;  %6499 = vmatprep.subr.bf16.mxu0 %v6849_v20  ;;  %v949_v3 = vrot.slane %v947_v58, 5  ;;  %v955_v4 = vrot.slane %v953_v59, 5  ;;  %v927_v7 = vrot.slane %v926_v60, 4  ;;  %v959_v9 = vrot.slane %v957_v62, 4  ;;  %v7372_v46 = vld [vmem:[%s7270_s25 + $0x28] sm:$0xf] }
  0x22   : > { %6531 = vmatprep.subr.bf16.mxu1 %v6850_v23  ;;  %414 = vadd.xlane.f32.xlu1 %v413_v27  ;;  %v937_v8 = vrot.slane %v936_v61, 4  ;;  %v965_v10 = vrot.slane %v963_v63, 5  ;;  %v1730_v14 = vrot.slane %v7288_v38, 5  ;;  %v431_v18 = vsel %vm403_vm1, %v377_v12, 0.0  ;;  %v380_v27 = vld [vmem:[%s7235_s10 + $0x70] sm:$0x3] }
  0x23   : > { %v950_v11 = vor.u32 %v949_v3, %v946_v2  ;;  %v932_v15 = vsel %vm7325_vm4, %v927_v7, %v931_v53  ;;  %v960_v17 = vor.u32 %v959_v9, %v955_v4  ;;  %v5948_v21 = vcombine.low %v7305_v49, %v7308_v50  ;;  %v7375_v48 = vld [vmem:[%s7270_s25 + $0x2c] sm:$0x1]  ;;  %v382_v9 = vld [vmem:[%s7235_s10 + $0x80] sm:$0xff]  ;;  %v6882_v38 = vld [vmem:[%s10368_s3 + $0x178] sm:$0xff]  }
  0x24   : > { %417 = vadd.xlane.f32.xlu0 %v416_v29  ;;  %6500 = vmatpush3.bf16.msra.mxu0 %v6849_v20  ;;  %v942_v16 = vsel %vm7325_vm4, %v937_v8, %v941_v56  ;;  %v434_v22 = vsel %vm396_vm0, %v378_v13, 0.0  ;;  %v437_v26 = vsel %vm396_vm0, %v379_v24, 0.0  ;;  %v992_v53 = vshrl.u32 %v795_v41, 16  ;;  %v6863_v59 = vld [vmem:[%s10368_s3 + $0xa8] sm:$0xff]   ;;  %v381_v8 = vld [vmem:[%s7235_s10 + $0x78] sm:$0xff] }
  0x25   : > { %6532 = vmatpush3.bf16.msra.mxu1 %v6850_v23  ;;  %6501 = vmatprep.subr.bf16.mxu0 %v6851_v28  ;;  %v5931_v19 = vcombine.low %v932_v15, %v942_v16  ;;  %v951_v20 = vrot.slane %v950_v11, 4  ;;  %v6860_v23 = vld [vmem:[%s10368_s3 + $0xf0] sm:$0xff]   ;;  %v961_v25 = vrot.slane %v960_v17, 4  ;;  %v995_v56 = vshll.u32 %v795_v41, 16  ;;  %v6864_v7 = vld [vmem:[%s10368_s3 + $0xe8] sm:$0xff]   ;;  %v6865_v17 = vld [vmem:[%s10368_s3 + $0xa0] sm:$0xff]  }
  0x26   : > { %6533 = vmatprep.subr.bf16.mxu1 %v6852_v30  ;;  %420 = vadd.xlane.f32.xlu1 %v419_v31  ;;  %v7356_v31 = vld [vmem:[%s7270_s25 + $0x1c] sm:$0xf]  ;;  %v1001_v57 = vshll.u32 %v7372_v46, 16  ;;  %v1005_v58 = vshrl.u32 %v7372_v46, 16  ;;  %v994_v62 = vrot.slane %v992_v53, 4  ;;  %v1011_v63 = vshll.u32 %v7375_v48, 16 }
  0x27   : > { %6505 = vmatprep.mubr.bf16.mxu0 %v5931_v19  ;;  %v956_v29 = vsel %vm7325_vm4, %v951_v20, %v955_v4  ;;  %v966_v34 = vsel %vm7325_vm4, %v961_v25, %v965_v10  ;;  %v977_v37 = vshll.u32 %v7356_v31, 16  ;;  %v997_v2 = vrot.slane %v995_v56, 5  ;;  %v6866_v20 = vld [vmem:[%s10368_s3 + $0xe0] sm:$0xff]  }
  0x28   : > { %423 = vadd.xlane.f32.xlu0 %v422_v32  ;;  %6502 = vmatpush3.bf16.msra.mxu0 %v6851_v28  ;;  %v793_v28 = vld [vmem:[%s7270_s25 + $0x18] sm:$0xf]  ;;  %v7359_v32 = vld [vmem:[%s7270_s25 + $0x20] sm:$0x1]  ;;  %v5932_v42 = vcombine.low %v956_v29, %v966_v34  ;;  %v1003_v3 = vrot.slane %v1001_v57, 5  ;;  %v1007_v4 = vrot.slane %v1005_v58, 4 }
  0x29   : > { %6534 = vmatpush3.bf16.msra.mxu1 %v6852_v30  ;;  %6503 = vmatprep.subr.bf16.mxu0 %v6853_v39  ;;  %v440_v30 = vsel %vm403_vm1, %v380_v27, 0.0  ;;  %v968_v33 = vshrl.u32 %v793_v28, 16  ;;  %v987_v44 = vshll.u32 %v7359_v32, 16  ;;  %v979_v51 = vrot.slane %v977_v37, 5  ;;  %v384_v27 = vld [vmem:[%s7235_s10 + $0x90] sm:$0xff]  ;;  %v6870_v58 = vld [vmem:[%s10368_s3 + $0xd8] sm:$0xff]  }
  0x2a   : > { %6535 = vmatprep.subr.bf16.mxu1 %v6854_v45  ;;  %426 = vadd.xlane.f32.xlu1 %v425_v35  ;;  %v6859_v35 = vld [vmem:[%s10368_s3 + $0xb0] sm:$0xff]   ;;  %v1013_v11 = vrot.slane %v1011_v63, 5  ;;  %v443_v12 = vsel %vm396_vm0, %v381_v8, 0.0  ;;  %v998_v13 = vor.u32 %v997_v2, %v994_v62  ;;  %v1008_v15 = vor.u32 %v1007_v4, %v1003_v3 }
  0x2b   : > { %v970_v43 = vrot.slane %v968_v33, 4  ;;  %v989_v54 = vrot.slane %v987_v44, 5  ;;  %v446_v16 = vsel %vm396_vm0, %v382_v9, 0.0  ;;  %v452_v29 = vsel %vm396_vm0, %v384_v27, 0.0  ;;  %v7415_v33 = vld [vmem:[%s7270_s25 + $0x38] sm:$0x1] }
  0x2c   : > { %429 = vadd.xlane.f32.xlu0 %v428_v36  ;;  %6504 = vmatpush3.bf16.msra.mxu0 %v6853_v39  ;;  %v971_v36 = vshll.u32 %v793_v28, 16  ;;  %v981_v39 = vshrl.u32 %v7356_v31, 16  ;;  %v999_v24 = vrot.slane %v998_v13, 4  ;;  %v1009_v25 = vrot.slane %v1008_v15, 4 }
  0x2d   : > { %6536 = vmatpush3.bf16.msra.mxu1 %v6854_v45  ;;  %6553 = vmatprep.subr.bf16.mxu0 %v7321_v0  ;;  %v5949_v45 = vcombine.low %v793_v28, %v7356_v31  ;;  %v797_v28 = vld [vmem:[%s7270_s25 + $0x30] sm:$0xf] }
  0x2e   : > { %6585 = vmatprep.subr.bf16.mxu1 %v6858_v6  ;;  %432 = vadd.xlane.f32.xlu1 %v431_v18  ;;  %v973_v49 = vrot.slane %v971_v36, 5  ;;  %v983_v52 = vrot.slane %v981_v39, 4  ;;  %v1016_v34 = vshrl.u32 %v797_v28, 16  ;;  %v1014_v36 = vsel %vm7325_vm4, %v1009_v25, %v1013_v11 }
  0x2f   : > { %6506 = vmatmul.mubr.bf16.vlgmr.msra.gmra.mxu0 %v5932_v42  ;;  %v1019_v37 = vshll.u32 %v797_v28, 16  ;;  %v7424_v42 = vld [vmem:[%s7270_s25 + $0x40] sm:$0xf]  ;;  %v1737_v25 = vrot.slane %v7308_v50, 5  ;;  %v6884_v50 = vld [vmem:[%s10368_s3 + $0x170] sm:$0xff]  }
  0x30   : > { %6538 = vmatmul.mubr.bf16.vlgmr.msra.gmra.mxu1 %v5948_v21  ;;  %435 = vadd.xlane.f32.xlu0 %v434_v22  ;;  %v974_v60 = vor.u32 %v973_v49, %v970_v43  ;;  %v984_v61 = vor.u32 %v983_v52, %v979_v51  ;;  %v383_v21 = vld [vmem:[%s7235_s10 + $0x88] sm:$0x3]  ;;  %v7405_v22 = vrot.slane %v1730_v14, 4  ;;  %v1018_v44 = vrot.slane %v1016_v34, 4  ;;  %v6869_v52 = vld [vmem:[%s10368_s3 + $0x98] sm:$0xff]  }
  0x31   : > { %6586 = vmatpush3.bf16.msra.mxu1 %v6858_v6  ;;  %6554 = vmatpush3.bf16.msra.mxu0 %v7321_v0  ;;  %v5950_v6 = vcombine.low %v795_v41, %v7372_v46  ;;  %v799_v41 = vld [vmem:[%s7270_s25 + $0x3c] sm:$0xf]  ;;  %v1035_v49 = vshll.u32 %v7415_v33, 16  ;;  %v1021_v53 = vrot.slane %v1019_v37, 5  ;;  %v1049_v62 = vshll.u32 %v7424_v42, 16 }
  0x32   : > { %6587 = vmatprep.subr.bf16.mxu1 %v6860_v23  ;;  %438 = vadd.xlane.f32.xlu1 %v437_v26  ;;  %v975_v0 = vrot.slane %v974_v60, 4  ;;  %v985_v10 = vrot.slane %v984_v61, 4  ;;  %v449_v26 = vsel %vm403_vm1, %v383_v21, 0.0  ;;  %v1040_v57 = vshrl.u32 %v799_v41, 16  ;;  %v801_v34 = vld [vmem:[%s7270_s25 + $0x48] sm:$0xf] }
  0x33   : > { %6555 = vmatprep.subr.bf16.mxu0 %v6859_v35  ;;  %6541 = vmatprep.mubr.bf16.mxu1 %v5949_v45  ;;  %v1037_v60 = vrot.slane %v1035_v49, 5  ;;  %v1043_v61 = vshll.u32 %v799_v41, 16  ;;  %v1022_v63 = vor.u32 %v1021_v53, %v1018_v44  ;;  %v1051_v9 = vrot.slane %v1049_v62, 5  ;;  %v803_v53 = vld [vmem:[%s7270_s25 + $0x54] sm:$0xf] }
  0x34   : > { %441 = vadd.xlane.f32.xlu0 %v440_v30  ;;  %v980_v18 = vsel %vm7325_vm4, %v975_v0, %v979_v51  ;;  %v990_v19 = vsel %vm7325_vm4, %v985_v10, %v989_v54  ;;  %v7412_v30 = vld [vmem:[%s7270_s25 + $0x34] sm:$0xf]  ;;  %v7429_v51 = vld [vmem:[%s7270_s25 + $0x44] sm:$0x1]  ;;  %v1042_v2 = vrot.slane %v1040_v57, 4  ;;  %v5952_v0 = vcombine.low %v799_v41, %v7424_v42 }
  0x35   : > { %6588 = vmatpush3.bf16.msra.mxu1 %v6860_v23  ;;  %6556 = vmatpush3.bf16.msra.mxu0 %v6859_v35  ;;  %v5933_v23 = vcombine.low %v980_v18, %v990_v19  ;;  %v1004_v35 = vsel %vm7325_vm4, %v999_v24, %v1003_v3  ;;  %v1025_v39 = vshll.u32 %v7412_v30, 16  ;;  %v1029_v45 = vshrl.u32 %v7412_v30, 16  ;;  %v386_v10 = vld [vmem:[%s7235_s10 + $0xa0] sm:$0x3]  ;;  %v6871_v19 = vld [vmem:[%s10368_s3 + $0x90] sm:$0xff]   ;;  %v387_v24 = vld [vmem:[%s7235_s10 + $0xa8] sm:$0xff] }
  0x36   : > { %6589 = vmatprep.subr.bf16.mxu1 %v6864_v7  ;;  %444 = vadd.xlane.f32.xlu1 %v443_v12  ;;  %v5934_v43 = vcombine.low %v1004_v35, %v1014_v36  ;;  %v5951_v56 = vcombine.low %v797_v28, %v7412_v30  ;;  %v1053_v3 = vshrl.u32 %v7424_v42, 16  ;;  %v1059_v4 = vshll.u32 %v7429_v51, 16  ;;  %v6875_v35 = vld [vmem:[%s10368_s3 + $0x88] sm:$0xff]  }
  0x37   : > { %6557 = vmatprep.subr.bf16.mxu0 %v6863_v59  ;;  %6509 = vmatprep.mubr.bf16.mxu0 %v5933_v23  ;;  %v1027_v54 = vrot.slane %v1025_v39, 5  ;;  %v1045_v8 = vrot.slane %v1043_v61, 5  ;;  %v1023_v11 = vrot.slane %v1022_v63, 4  ;;  %v461_v28 = vsel %vm396_vm0, %v387_v24, 0.0  ;;  %v7466_v41 = vld [vmem:[%s7270_s25 + $0x4c] sm:$0xf] }
  0x38   : > { %6542 = vmatmul.mubr.bf16.gmra.mxu1 %v5950_v6  ;;  %447 = vadd.xlane.f32.xlu0 %v446_v16  ;;  %v385_v6 = vld [vmem:[%s7235_s10 + $0x98] sm:$0xff]  ;;  %v1055_v12 = vrot.slane %v1053_v3, 4  ;;  %v1061_v13 = vrot.slane %v1059_v4, 5  ;;  %v1067_v49 = vshll.u32 %v801_v34, 16  ;;  %v1077_v57 = vshrl.u32 %v7466_v41, 16  ;;  %v390_v4 = vld [vmem:[%s7235_s10 + $0xc0] sm:$0xff] }
  0x39   : > { %6590 = vmatpush3.bf16.msra.mxu1 %v6864_v7  ;;  %6558 = vmatpush3.bf16.msra.mxu0 %v6863_v59  ;;  %v1031_v59 = vrot.slane %v1029_v45, 4  ;;  %v455_v15 = vsel %vm396_vm0, %v385_v6, 0.0  ;;  %v1046_v18 = vor.u32 %v1045_v8, %v1042_v2  ;;  %v1028_v21 = vsel %vm7325_vm4, %v1023_v11, %v1027_v54  ;;  %v7487_v61 = vld [vmem:[%s7270_s25 + $0x5c] sm:$0x1] }
  0x3a   : > { %6591 = vmatprep.subr.bf16.mxu1 %v6866_v20  ;;  %450 = vadd.xlane.f32.xlu1 %v449_v26  ;;  %v1056_v23 = vor.u32 %v1055_v12, %v1051_v9  ;;  %v1064_v45 = vshrl.u32 %v801_v34, 16  ;;  %v1069_v2 = vrot.slane %v1067_v49, 5  ;;  %v1079_v6 = vrot.slane %v1077_v57, 4 }
  0x3b   : > { %6559 = vmatprep.subr.bf16.mxu0 %v6865_v17  ;;  %6510 = vmatmul.mubr.bf16.gmra.mxu0 %v5934_v43  ;;  %v1032_v7 = vor.u32 %v1031_v59, %v1027_v54  ;;  %v1047_v27 = vrot.slane %v1046_v18, 4  ;;  %v7469_v43 = vld [vmem:[%s7270_s25 + $0x50] sm:$0x1]  ;;  %v6876_v54 = vld [vmem:[%s10368_s3 + $0xc8] sm:$0xff]   ;;  %v5953_v59 = vcombine.low %v801_v34, %v7466_v41  ;;  %v1088_v8 = vshrl.u32 %v803_v53, 16 }
  0x3c   : > { %453 = vadd.xlane.f32.xlu0 %v452_v29  ;;  %6545 = vmatprep.mubr.bf16.mxu1 %v5951_v56  ;;  %v388_v29 = vld [vmem:[%s7235_s10 + $0xb0] sm:$0xff]  ;;  %v1057_v37 = vrot.slane %v1056_v23, 4  ;;  %v1066_v63 = vrot.slane %v1064_v45, 4  ;;  %v1107_v12 = vshll.u32 %v7487_v61, 16  ;;  %v470_v34 = vsel %vm396_vm0, %v390_v4, 0.0  ;;  %v6880_v4 = vld [vmem:[%s7270_s25 + $0x18] sm:$0xff]  }
  0x3d   : > { %6592 = vmatpush3.bf16.msra.mxu1 %v6866_v20  ;;  %6560 = vmatpush3.bf16.msra.mxu0 %v6865_v17  ;;  %v1033_v16 = vrot.slane %v1032_v7, 4  ;;  %v458_v17 = vsel %vm403_vm1, %v386_v10, 0.0  ;;  %v6872_v20 = vld [vmem:[%s10368_s3 + $0xd0] sm:$0xff]   ;;  %v464_v39 = vsel %vm396_vm0, %v388_v29, 0.0  ;;  %v1052_v44 = vsel %vm7325_vm4, %v1047_v27, %v1051_v9 }
  0x3e   : > { %6593 = vmatprep.subr.bf16.mxu1 %v6870_v58  ;;  %6561 = vmatprep.subr.bf16.mxu0 %v6869_v52  ;;  %v1062_v56 = vsel %vm7325_vm4, %v1057_v37, %v1061_v13  ;;  %v1091_v9 = vshll.u32 %v803_v53, 16  ;;  %v6877_v13 = vld [vmem:[%s10368_s3 + $0x80] sm:$0xff]   ;;  %v1109_v24 = vrot.slane %v1107_v12, 5 }
  0x3f   : > { %456 = vadd.xlane.f32.xlu1 %v455_v15  ;;  %v1038_v26 = vsel %vm7325_vm4, %v1033_v16, %v1037_v60  ;;  %v7484_v60 = vld [vmem:[%s7270_s25 + $0x58] sm:$0xf]  ;;  %v5936_v62 = vcombine.low %v1052_v44, %v1062_v56  ;;  %v1090_v16 = vrot.slane %v1088_v8, 4  ;;  %v1739_v44 = vrot.slane %v1737_v25, 4  ;;  %v394_v12 = vld [vmem:[%s7235_s10 + $0xe0] sm:$0xff] }
  0x40   : > { %6546 = vmatmul.mubr.bf16.gmra.mxu1 %v5952_v0  ;;  %459 = vadd.xlane.f32.xlu0 %v458_v17  ;;  %v5935_v36 = vcombine.low %v1028_v21, %v1038_v26  ;;  %v1070_v0 = vor.u32 %v1069_v2, %v1066_v63  ;;  %v1097_v10 = vshll.u32 %v7484_v60, 16  ;;  %v1101_v11 = vshrl.u32 %v7484_v60, 16  ;;  %v6879_v63 = vld [vmem:[%s7270_s25 + $0xc] sm:$0xff]   ;;  %v6881_v8 = vld [vmem:[%s10368_s3 + $0x138] sm:$0xff]  }
  0x41   : > { %6594 = vmatpush3.bf16.msra.mxu1 %v6870_v58  ;;  %6562 = vmatpush3.bf16.msra.mxu0 %v6869_v52  ;;  %v1073_v52 = vshll.u32 %v7466_v41, 16  ;;  %v1083_v58 = vshll.u32 %v7469_v43, 16  ;;  %v1093_v18 = vrot.slane %v1091_v9, 5  ;;  %v5954_v17 = vcombine.low %v803_v53, %v7484_v60  ;;  %v392_v53 = vld [vmem:[%s7235_s10 + $0xd0] sm:$0x3] }
  0x42   : > { %6595 = vmatprep.subr.bf16.mxu1 %v6872_v20  ;;  %6563 = vmatprep.subr.bf16.mxu0 %v6871_v19  ;;  %v1099_v21 = vrot.slane %v1097_v10, 5  ;;  %v1103_v23 = vrot.slane %v1101_v11, 4  ;;  %v1734_v56 = vsel %vm7500_vm7, %v7405_v22, %v1733_v47  ;;  %v1744_v9 = vrot.slane %v7356_v31, 5 }
  0x43   : > { %462 = vadd.xlane.f32.xlu1 %v461_v28  ;;  %6513 = vmatprep.mubr.bf16.mxu0 %v5935_v36  ;;  %v1075_v3 = vrot.slane %v1073_v52, 5  ;;  %v1085_v7 = vrot.slane %v1083_v58, 5  ;;  %v1094_v28 = vor.u32 %v1093_v18, %v1090_v16  ;;  %v1751_v10 = vrot.slane %v7372_v46, 5  ;;  %v395_v46 = vld [vmem:[%s7235_s10 + $0xe8] sm:$0x3]  ;;  %v6883_v18 = vld [vmem:[%s10368_s3 + $0x130] sm:$0xff]  }
  0x44   : > { %465 = vadd.xlane.f32.xlu0 %v464_v39  ;;  %6549 = vmatprep.mubr.bf16.mxu1 %v5953_v59  ;;  %v1104_v37 = vor.u32 %v1103_v23, %v1099_v21  ;;  %v391_v39 = vld [vmem:[%s7235_s10 + $0xc8] sm:$0xff]  ;;  %v476_v59 = vsel %vm403_vm1, %v392_v53, 0.0  ;;  %v485_v55 = vsel %vm403_vm1, %v395_v46, 0.0  ;;  %v6886_v23 = vld [vmem:[%s7270_s25 + $0x30] sm:$0xff]   ;;  %v1706_v53 = vld [vmem:[%s7270_s25 + $0x3c] sm:$0xe] }
  0x45   : > { %6564 = vmatpush3.bf16.msra.mxu0 %v6871_v19  ;;  %6596 = vmatpush3.bf16.msra.mxu1 %v6872_v20  ;;  %v1080_v15 = vor.u32 %v1079_v6, %v1075_v3  ;;  %v389_v19 = vld [vmem:[%s7235_s10 + $0xb8] sm:$0x3]  ;;  %v1071_v20 = vrot.slane %v1070_v0, 4  ;;  %v1095_v49 = vrot.slane %v1094_v28, 4  ;;  %v473_v52 = vsel %vm396_vm0, %v391_v39, 0.0  ;;  %v6900_v46 = vld [vmem:[%s10368_s3 + $0x148] sm:$0xff]  }
  0x46   : > { %6565 = vmatprep.subr.bf16.mxu0 %v6875_v35  ;;  %6514 = vmatmul.mubr.bf16.gmra.mxu0 %v5936_v62  ;;  %v467_v29 = vsel %vm403_vm1, %v389_v19, 0.0  ;;  %v1105_v58 = vrot.slane %v1104_v37, 4  ;;  %v393_v0 = vld [vmem:[%s7235_s10 + $0xd8] sm:$0xff]  ;;  %v6885_v19 = vld [vmem:[%s7270_s25 + $0x24] sm:$0xff]   ;;  %v1754_v28 = vrot.slane %v7375_v48, 5  ;;  %v1761_v48 = vrot.slane %v7415_v33, 5 }
  0x47   : > { %6597 = vmatprep.subr.bf16.mxu1 %v6876_v54  ;;  %v1081_v27 = vrot.slane %v1080_v15, 4  ;;  %v1076_v36 = vsel %vm7325_vm4, %v1071_v20, %v1075_v3  ;;  %468 = vadd.xlane.f32.xlu1 %v467_v29  ;;  %v1100_v2 = vsel %vm7325_vm4, %v1095_v49, %v1099_v21  ;;  %v1702_v3 = vld [vmem:[%s7270_s25 + $0xc] sm:$0xe]  ;;  %v479_v11 = vsel %vm396_vm0, %v393_v0, 0.0  ;;  %v1703_v15 = vld [vmem:[%s7270_s25 + $0x18] sm:$0xe] }
  0x48   : > { %6550 = vmatmul.mubr.bf16.gmra.mxu1 %v5954_v17  ;;  %471 = vadd.xlane.f32.xlu0 %v470_v34  ;;  %v1110_v40 = vsel %vm7325_vm4, %v1105_v58, %v1109_v24  ;;  %v5966_v22 = vrot.slane %v1702_v3, 9  ;;  %v1704_v20 = vld [vmem:[%s7270_s25 + $0x24] sm:$0xe]  ;;  %v1753_v21 = vrot.slane %v1751_v10, 4  ;;  %v6888_v34 = vld [vmem:[%s10368_s3 + $0x168] sm:$0xff]   ;;  %v1779_v0 = vrot.slane %v7484_v60, 5 }
  0x49   : > { %6566 = vmatpush3.bf16.msra.mxu0 %v6875_v35  ;;  %6598 = vmatpush3.bf16.msra.mxu1 %v6876_v54  ;;  %v6878_v35 = vld [vmem:[%s10368_s3 + $0xc0] sm:$0xff]   ;;  %v1086_v45 = vsel %vm7325_vm4, %v1081_v27, %v1085_v7  ;;  %v5938_v6 = vcombine.low %v1100_v2, %v1110_v40  ;;  %v5968_v27 = vrot.slane %v1704_v20, 9  ;;  %v5970_v2 = vrot.slane %v1706_v53, 9  ;;  %v6895_v60 = vld [vmem:[%s10368_s3 + $0x110] sm:$0xff]  }
  0x4a   : > { %6567 = vmatprep.subr.bf16.mxu0 %v6877_v13  ;;  %6599 = vmatprep.subr.bf16.mxu1 %v6878_v35  ;;  %v1701_v54 = vld [vmem:[%s7270_s25] sm:$0xe]  ;;  %v5937_v57 = vcombine.low %v1076_v36, %v1086_v45  ;;  %v1738_v31 = vsel %vm7500_vm7, %v5966_v22, %v1737_v25  ;;  %v1746_v25 = vrot.slane %v1744_v9, 4  ;;  %v6887_v36 = vld [vmem:[%s10368_s3 + $0x128] sm:$0xff]   ;;  %v1755_v39 = vsel %vm7500_vm7, %v1753_v21, %v1754_v28  ;;  %v6896_v22 = vld [vmem:[%s10368_s3 + $0x150] sm:$0xff]  }
  0x4b   : > { %v5965_v62 = vrot.slane %v1701_v54, 9  ;;  %474 = vadd.xlane.f32.xlu1 %v473_v52  ;;  %6601 = vmatprep.mubr.bf16.mxu1 %v6879_v63  ;;  %v1752_v37 = vsel %vm7500_vm7, %v5968_v27, %v1751_v10  ;;  %v6891_v52 = vld [vmem:[%s7270_s25 + $0x3c] sm:$0xff]   ;;  %v1765_v54 = vrot.slane %v7424_v42, 5  ;;  %v1772_v40 = vrot.slane %v7466_v41, 5 }
  0x4c   : > { %6517 = vmatprep.mubr.bf16.mxu0 %v5937_v57  ;;  %477 = vadd.xlane.f32.xlu0 %v476_v59  ;;  %v6889_v57 = vld [vmem:[%s10368_s3 + $0x120] sm:$0xff]   ;;  %v1768_v59 = vrot.slane %v7429_v51, 5  ;;  %v6894_v42 = vld [vmem:[%s10368_s3 + $0x158] sm:$0xff]  }
  0x4d   : > { %6568 = vmatpush3.bf16.msra.mxu0 %v6877_v13  ;;  %6600 = vmatpush3.bf16.msra.mxu1 %v6878_v35  ;;  %v1731_v47 = vsel %vm7500_vm7, %v5965_v62, %v1730_v14  ;;  %v1747_v14 = vrot.slane %v7359_v32, 5  ;;  %v1741_v13 = vsel %vm7500_vm7, %v1739_v44, %v1740_v5  ;;  %v482_v32 = vsel %vm396_vm0, %v394_v12, 0.0  ;;  %v1705_v44 = vld [vmem:[%s7270_s25 + $0x30] sm:$0xe]  ;;  %v6892_v62 = vld [vmem:[%s7270_s25 + $0x48] sm:$0xff]   ;;  %v6893_v51 = vld [vmem:[%s10368_s3 + $0x118] sm:$0xff]  }
  0x4e   : > { %v5989_v7 = vcombine.low %v1731_v47, %v1734_v56  ;;  %6518 = vmatmul.mubr.bf16.gmra.mxu0 %v5938_v6  ;;  %6617 = vmatprep.subr.bf16.mxu0 %v6881_v8  ;;  %v5967_v5 = vrot.slane %v1703_v15, 9  ;;  %v5990_v16 = vcombine.low %v1738_v31, %v1741_v13  ;;  %v1758_v35 = vrot.slane %v7412_v30, 5  ;;  %v6890_v30 = vld [vmem:[%s10368_s3 + $0x160] sm:$0xff]  }
  0x4f   : > { %6649 = vmatprep.subr.bf16.mxu1 %v6882_v38  ;;  %480 = vadd.xlane.f32.xlu1 %v479_v11  ;;  %v1748_v17 = vsel %vm7500_vm7, %v1746_v25, %v1747_v14  ;;  %v5969_v49 = vrot.slane %v1705_v44, 9  ;;  %v5992_v56 = vcombine.low %v1752_v37, %v1755_v39  ;;  %v1767_v3 = vrot.slane %v1765_v54, 4  ;;  %v6898_v13 = vld [vmem:[%s7270_s25 + $0x60] sm:$0xff]   ;;  %v6057_v25 = vld [vmem:[%s7270_s25 + $0xc] sm:$0xf] }
  0x50   : > { %6602 = vmatmul.mubr.bf16.vlgmr.msra.gmra.mxu1 %v6880_v4  ;;  %6569 = vmatprep.mubr.bf16.mxu0 %v5989_v7  ;;  %v1745_v24 = vsel %vm7500_vm7, %v5967_v5, %v1744_v9  ;;  %v1760_v45 = vrot.slane %v1758_v35, 4  ;;  %v1775_v47 = vrot.slane %v7469_v43, 5  ;;  %v1707_v4 = vld [vmem:[%s7270_s25 + $0x48] sm:$0xe]  ;;  %v1774_v6 = vrot.slane %v1772_v40, 4  ;;  %v6902_v15 = vld [vmem:[%s10368_s3 + $0x140] sm:$0xff]  }
  0x51   : > { %483 = vadd.xlane.f32.xlu0 %v482_v32  ;;  %6650 = vmatpush3.bf16.msra.mxu1 %v6882_v38  ;;  %v5991_v29 = vcombine.low %v1745_v24, %v1748_v17  ;;  %v1759_v58 = vsel %vm7500_vm7, %v5969_v49, %v1758_v35  ;;  %v1766_v41 = vsel %vm7500_vm7, %v5970_v2, %v1765_v54  ;;  %v5971_v7 = vrot.slane %v1707_v4, 9  ;;  %v1708_v38 = vld [vmem:[%s7270_s25 + $0x54] sm:$0xe]  ;;  %v6899_v5 = vld [vmem:[%s10368_s3 + $0x108] sm:$0xff]   ;;  %v6061_v44 = vld [vmem:[%s7270_s25 + $0x1c] sm:$0xf] }
  0x52   : > { %6651 = vmatprep.subr.bf16.mxu1 %v6884_v50  ;;  %6605 = vmatprep.mubr.bf16.mxu1 %v6885_v19  ;;  %v1762_v33 = vsel %vm7500_vm7, %v1760_v45, %v1761_v48  ;;  %v1769_v43 = vsel %vm7500_vm7, %v1767_v3, %v1768_v59  ;;  %v1776_v9 = vsel %vm7500_vm7, %v1774_v6, %v1775_v47  ;;  %v1782_v14 = vrot.slane %v7487_v61, 5  ;;  %v6115_v24 = vld [vmem:[%s7270_s25 + $0xc] sm:$0xe]  ;;  %v6116_v54 = vld [vmem:[%s7270_s25 + $0x18] sm:$0xe] }
  0x53   : > { %486 = vadd.xlane.f32.xlu1 %v485_v55  ;;  %v5993_v63 = vcombine.low %v1759_v58, %v1762_v33  ;;  %v1773_v10 = vsel %vm7500_vm7, %v5971_v7, %v1772_v40  ;;  %v5972_v11 = vrot.slane %v1708_v38, 9  ;;  %v5994_v12 = vcombine.low %v1766_v41, %v1769_v43  ;;  %v6904_v7 = vld [vmem:[%s10368_s3 + $0x1f8] sm:$0xff]  }
  0x54   : > { %v1781_v31 = vrot.slane %v1779_v0, 4  ;;  %v5995_v32 = vcombine.low %v1773_v10, %v1776_v9  ;;  %v2552_v17 = vshrl.u32 %v6057_v25, 16  ;;  %v2555_v19 = vshll.u32 %v6057_v25, 16 }
  0x55   : > { %6652 = vmatpush3.bf16.msra.mxu1 %v6884_v50  ;;  %v1780_v61 = vsel %vm7500_vm7, %v5972_v11, %v1779_v0  ;;  %v2585_v58 = vshll.u32 %v6061_v44, 16  ;;  %v2589_v59 = vshrl.u32 %v6061_v44, 16  ;;  %v6124_v41 = vrot.slane %v6116_v54, 9 }
  0x56   : > { %6570 = vmatmul.mubr.bf16.vlgmr.msra.gmra.mxu0 %v5990_v16  ;;  %6653 = vmatprep.subr.bf16.mxu1 %v6888_v34  ;;  %v1783_v50 = vsel %vm7500_vm7, %v1781_v31, %v1782_v14  ;;  %v6058_v16 = vld [vmem:[%s7270_s25 + $0x10] sm:$0xf]  ;;  %v2554_v28 = vrot.slane %v2552_v17, 4  ;;  %v3194_v43 = vrot.slane %v6061_v44, 5  ;;  %v6903_v31 = vld [vmem:[%s10368_s3 + $0x1b8] sm:$0xff]  }
  0x57   : > { %6618 = vmatpush3.bf16.msra.mxu0 %v6881_v8  ;;  %6573 = vmatprep.mubr.bf16.mxu0 %v5991_v29  ;;  %v6897_v8 = vld [vmem:[%s7270_s25 + $0x54] sm:$0xff]   ;;  %v5996_v55 = vcombine.low %v1780_v61, %v1783_v50  ;;  %v2561_v20 = vshll.u32 %v6058_v16, 16  ;;  %v2565_v21 = vshrl.u32 %v6058_v16, 16  ;;  %v3187_v27 = vrot.slane %v6058_v16, 5 }
  0x58   : > { %6606 = vmatmul.mubr.bf16.gmra.mxu1 %v6886_v23  ;;  %6619 = vmatprep.subr.bf16.mxu0 %v6883_v18  ;;  %v2557_v29 = vrot.slane %v2555_v19, 5  ;;  %v2587_v47 = vrot.slane %v2585_v58, 5  ;;  %v3195_v11 = vsel %vm7500_vm7, %v6124_v41, %v3194_v43 }
  0x59   : > { %6654 = vmatpush3.bf16.msra.mxu1 %v6888_v34  ;;  %6609 = vmatprep.mubr.bf16.mxu1 %v6891_v52  ;;  %v6123_v34 = vrot.slane %v6115_v24, 9  ;;  %v2563_v48 = vrot.slane %v2561_v20, 5  ;;  %v2567_v37 = vrot.slane %v2565_v21, 4  ;;  %v6062_v52 = vld [vmem:[%s7270_s25 + $0x20] sm:$0x1] }
  0x5a   : > { %6655 = vmatprep.subr.bf16.mxu1 %v6890_v30  ;;  %v2558_v45 = vor.u32 %v2557_v29, %v2554_v28  ;;  %v3197_v0 = vrot.slane %v6062_v52, 5  ;;  %v6066_v20 = vld [vmem:[%s7270_s25 + $0x30] sm:$0xf]  ;;  %v6067_v29 = vld [vmem:[%s7270_s25 + $0x34] sm:$0xf] }
  0x5b   : > { %6620 = vmatpush3.bf16.msra.mxu0 %v6883_v18  ;;  %v6059_v18 = vld [vmem:[%s7270_s25 + $0x14] sm:$0x1]  ;;  %v3188_v49 = vsel %vm7500_vm7, %v6123_v34, %v3187_v27 }
  0x5c   : > { %6621 = vmatprep.subr.bf16.mxu0 %v6887_v36  ;;  %v2571_v23 = vshll.u32 %v6059_v18, 16  ;;  %v3190_v35 = vrot.slane %v6059_v18, 5  ;;  %v6906_v18 = vld [vmem:[%s10368_s3 + $0x1f0] sm:$0xff]  }
  0x5d   : > { %6656 = vmatpush3.bf16.msra.mxu1 %v6890_v30  ;;  %v3189_v30 = vrot.slane %v3187_v27, 4 }
  0x5e   : > { %6574 = vmatmul.mubr.bf16.gmra.mxu0 %v5992_v56  ;;  %6657 = vmatprep.subr.bf16.mxu1 %v6894_v42  ;;  %v2573_v39 = vrot.slane %v2571_v23, 5  ;;  %v2568_v56 = vor.u32 %v2567_v37, %v2563_v48  ;;  %v6905_v23 = vld [vmem:[%s10368_s3 + $0x1b0] sm:$0xff]   ;;  %v7689_v37 = vld [vmem:[%s7270_s25 + $0x38] sm:$0x1] }
  0x5f   : > { %6622 = vmatpush3.bf16.msra.mxu0 %v6887_v36  ;;  %6577 = vmatprep.mubr.bf16.mxu0 %v5993_v63  ;;  %v6060_v36 = vld [vmem:[%s7270_s25 + $0x18] sm:$0xf]  ;;  %v2559_v63 = vrot.slane %v2558_v45, 4  ;;  %v2624_v45 = vshrl.u32 %v6066_v20, 16 }
  0x60   : > { %6610 = vmatmul.mubr.bf16.gmra.mxu1 %v6892_v62  ;;  %6623 = vmatprep.subr.bf16.mxu0 %v6889_v57  ;;  %v2576_v33 = vshrl.u32 %v6060_v36, 16  ;;  %v2579_v53 = vshll.u32 %v6060_v36, 16  ;;  %v6901_v62 = vld [vmem:[%s10368_s3 + $0x100] sm:$0xff]   ;;  %v2569_v40 = vrot.slane %v2568_v56, 4 }
  0x61   : > { %6658 = vmatpush3.bf16.msra.mxu1 %v6894_v42  ;;  %6613 = vmatprep.mubr.bf16.mxu1 %v6897_v8  ;;  %v2564_v4 = vsel %vm7325_vm4, %v2559_v63, %v2563_v48  ;;  %v2637_v63 = vshrl.u32 %v6067_v29, 16 }
  0x62   : > { %6659 = vmatprep.subr.bf16.mxu1 %v6896_v22  ;;  %v2578_v3 = vrot.slane %v2576_v33, 4  ;;  %v2581_v42 = vrot.slane %v2579_v53, 5  ;;  %v2574_v8 = vsel %vm7325_vm4, %v2569_v40, %v2573_v39  ;;  %v6908_v33 = vld [vmem:[%s10368_s3 + $0x1e8] sm:$0xff]   ;;  %v2643_v40 = vshll.u32 %v7689_v37, 16 }
  0x63   : > { %6624 = vmatpush3.bf16.msra.mxu0 %v6889_v57  ;;  %v3191_v57 = vsel %vm7500_vm7, %v3189_v30, %v3190_v35  ;;  %v6097_v14 = vcombine.low %v2564_v4, %v2574_v8 }
  0x64   : > { %6625 = vmatprep.subr.bf16.mxu0 %v6893_v51  ;;  %v6147_v2 = vcombine.low %v3188_v49, %v3191_v57  ;;  %v2582_v6 = vor.u32 %v2581_v42, %v2578_v3  ;;  %v6118_v49 = vld [vmem:[%s7270_s25 + $0x30] sm:$0xe]  ;;  %v2627_v57 = vshll.u32 %v6066_v20, 16 }
  0x65   : > { %6660 = vmatpush3.bf16.msra.mxu1 %v6896_v22  ;;  %v2595_v22 = vshll.u32 %v6062_v52, 16  ;;  %v6907_v52 = vld [vmem:[%s10368_s3 + $0x1a8] sm:$0xff]   ;;  %v6126_v8 = vrot.slane %v6118_v49, 9 }
  0x66   : > { %6578 = vmatmul.mubr.bf16.gmra.mxu0 %v5994_v12  ;;  %6661 = vmatprep.subr.bf16.mxu1 %v6900_v46  ;;  %v2583_v10 = vrot.slane %v2582_v6, 4  ;;  %v3196_v12 = vrot.slane %v3194_v43, 4  ;;  %v2629_v42 = vrot.slane %v2627_v57, 5  ;;  %v2639_v6 = vrot.slane %v2637_v63, 4  ;;  %v6120_v49 = vld [vmem:[%s7270_s25 + $0x48] sm:$0xe] }
  0x67   : > { %6626 = vmatpush3.bf16.msra.mxu0 %v6893_v51  ;;  %6581 = vmatprep.mubr.bf16.mxu0 %v5995_v32  ;;  %v2591_v51 = vrot.slane %v2589_v59, 4  ;;  %v2597_v38 = vrot.slane %v2595_v22, 5  ;;  %v6064_v32 = vld [vmem:[%s7270_s25 + $0x28] sm:$0xf]  ;;  %v2626_v59 = vrot.slane %v2624_v45, 4 }
  0x68   : > { %6614 = vmatmul.mubr.bf16.gmra.mxu1 %v6898_v13  ;;  %6627 = vmatprep.subr.bf16.mxu0 %v6895_v60  ;;  %v2588_v61 = vsel %vm7325_vm4, %v2583_v10, %v2587_v47  ;;  %v3198_v50 = vsel %vm7500_vm7, %v3196_v12, %v3197_v0  ;;  %v2609_v17 = vshll.u32 %v6064_v32, 16  ;;  %v2613_v19 = vshrl.u32 %v6064_v32, 16  ;;  %v6070_v12 = vld [vmem:[%s7270_s25 + $0x40] sm:$0xf] }
  0x69   : > { %6662 = vmatpush3.bf16.msra.mxu1 %v6900_v46  ;;  %6665 = vmatprep.mubr.bf16.mxu1 %v6147_v2  ;;  %v2592_v9 = vor.u32 %v2591_v51, %v2587_v47  ;;  %v6065_v46 = vld [vmem:[%s7270_s25 + $0x2c] sm:$0x1]  ;;  %v6148_v16 = vcombine.low %v3195_v11, %v3198_v50  ;;  %v3201_v48 = vrot.slane %v6064_v32, 5  ;;  %v6910_v47 = vld [vmem:[%s10368_s3 + $0x1e0] sm:$0xff]   ;;  %v2630_v43 = vor.u32 %v2629_v42, %v2626_v59 }
  0x6a   : > { %6663 = vmatprep.subr.bf16.mxu1 %v6902_v15  ;;  %v2619_v28 = vshll.u32 %v6065_v46, 16  ;;  %v2611_v34 = vrot.slane %v2609_v17, 5  ;;  %v2615_v35 = vrot.slane %v2613_v19, 4  ;;  %v3204_v44 = vrot.slane %v6065_v46, 5  ;;  %v6909_v11 = vld [vmem:[%s10368_s3 + $0x1a0] sm:$0xff]  }
  0x6b   : > { %6628 = vmatpush3.bf16.msra.mxu0 %v6895_v60  ;;  %v2593_v13 = vrot.slane %v2592_v9, 4  ;;  %v6063_v60 = vld [vmem:[%s7270_s25 + $0x24] sm:$0xf]  ;;  %v3203_v56 = vrot.slane %v3201_v48, 4  ;;  %v6069_v9 = vld [vmem:[%s7270_s25 + $0x3c] sm:$0xf] }
  0x6c   : > { %6629 = vmatprep.subr.bf16.mxu0 %v6899_v5  ;;  %v2603_v25 = vshll.u32 %v6063_v60, 16  ;;  %v2621_v30 = vrot.slane %v2619_v28, 5  ;;  %v2616_v53 = vor.u32 %v2615_v35, %v2611_v34  ;;  %v3211_v10 = vrot.slane %v7689_v37, 5  ;;  %v6072_v19 = vld [vmem:[%s7270_s25 + $0x48] sm:$0xf]  ;;  %v6912_v28 = vld [vmem:[%s10368_s3 + $0x1d8] sm:$0xff]  }
  0x6d   : > { %6664 = vmatpush3.bf16.msra.mxu1 %v6902_v15  ;;  %v2600_v15 = vshrl.u32 %v6063_v60, 16  ;;  %v3205_v3 = vsel %vm7500_vm7, %v3203_v56, %v3204_v44  ;;  %v2648_v60 = vshrl.u32 %v6069_v9, 16  ;;  %v2651_v32 = vshll.u32 %v6069_v9, 16  ;;  %v6911_v37 = vld [vmem:[%s10368_s3 + $0x198] sm:$0xff]  }
  0x6e   : > { %6582 = vmatmul.mubr.bf16.gmra.mxu0 %v5996_v55  ;;  %6713 = vmatprep.subr.bf16.mxu1 %v6904_v7  ;;  %v6117_v55 = vld [vmem:[%s7270_s25 + $0x24] sm:$0xe]  ;;  %v2605_v27 = vrot.slane %v2603_v25, 5  ;;  %v2617_v2 = vrot.slane %v2616_v53, 4  ;;  %v2661_v25 = vshrl.u32 %v6070_v12, 16  ;;  %v3215_v44 = vrot.slane %v6070_v12, 5 }
  0x6f   : > { %6630 = vmatpush3.bf16.msra.mxu0 %v6899_v5  ;;  %6633 = vmatprep.mubr.bf16.mxu0 %v6097_v14  ;;  %v2598_v5 = vsel %vm7325_vm4, %v2593_v13, %v2597_v38  ;;  %v2602_v24 = vrot.slane %v2600_v15, 4  ;;  %v6125_v36 = vrot.slane %v6117_v55, 9  ;;  %v3208_v14 = vrot.slane %v6067_v29, 5  ;;  %v6071_v13 = vld [vmem:[%s7270_s25 + $0x44] sm:$0x1] }
  0x70   : > { %6631 = vmatprep.subr.bf16.mxu0 %v6901_v62  ;;  %v6098_v21 = vcombine.low %v2588_v61, %v2598_v5  ;;  %6666 = vmatmul.mubr.bf16.vlgmr.msra.gmra.mxu1 %v6148_v16  ;;  %v2622_v41 = vsel %vm7325_vm4, %v2617_v2, %v2621_v30  ;;  %v2657_v61 = vshll.u32 %v6070_v12, 16  ;;  %v6119_v55 = vld [vmem:[%s7270_s25 + $0x3c] sm:$0xe]  ;;  %v2650_v16 = vrot.slane %v2648_v60, 4  ;;  %v6076_v9 = vld [vmem:[%s7270_s25 + $0x58] sm:$0xf] }
  0x71   : > { %6714 = vmatpush3.bf16.msra.mxu1 %v6904_v7  ;;  %v2606_v39 = vor.u32 %v2605_v27, %v2602_v24  ;;  %v3202_v54 = vsel %vm7500_vm7, %v6125_v36, %v3201_v48  ;;  %v2645_v7 = vrot.slane %v2643_v40, 5  ;;  %v3209_v46 = vsel %vm7500_vm7, %v6126_v8, %v3208_v14  ;;  %v6073_v27 = vld [vmem:[%s7270_s25 + $0x4c] sm:$0xf]  ;;  %v7732_v48 = vld [vmem:[%s7270_s25 + $0x50] sm:$0x1] }
  0x72   : > { %6715 = vmatprep.subr.bf16.mxu1 %v6906_v18  ;;  %v6149_v22 = vcombine.low %v3202_v54, %v3205_v3  ;;  %v3210_v15 = vrot.slane %v3208_v14, 4  ;;  %v2659_v17 = vrot.slane %v2657_v61, 5  ;;  %v2667_v24 = vshll.u32 %v6071_v13, 16  ;;  %v6913_v40 = vld [vmem:[%s10368_s3 + $0x190] sm:$0xff]   ;;  %v6915_v12 = vld [vmem:[%s10368_s3 + $0x188] sm:$0xff]  }
  0x73   : > { %6632 = vmatpush3.bf16.msra.mxu0 %v6901_v62  ;;  %v2607_v58 = vrot.slane %v2606_v39, 4  ;;  %v2633_v62 = vshll.u32 %v6067_v29, 16  ;;  %v6127_v36 = vrot.slane %v6119_v55, 9  ;;  %v3218_v45 = vrot.slane %v6071_v13, 5  ;;  %v6075_v8 = vld [vmem:[%s7270_s25 + $0x54] sm:$0xf] }
  0x74   : > { %6681 = vmatprep.subr.bf16.mxu0 %v6903_v31  ;;  %6669 = vmatprep.mubr.bf16.mxu1 %v6149_v22  ;;  %v2669_v30 = vrot.slane %v2667_v24, 5  ;;  %v2672_v53 = vshrl.u32 %v6072_v19, 16  ;;  %v2675_v54 = vshll.u32 %v6072_v19, 16  ;;  %v2681_v56 = vshll.u32 %v6073_v27, 16  ;;  %v6077_v13 = vld [vmem:[%s7270_s25 + $0x5c] sm:$0x1] }
  0x75   : > { %6716 = vmatpush3.bf16.msra.mxu1 %v6906_v18  ;;  %v2612_v51 = vsel %vm7325_vm4, %v2607_v58, %v2611_v34  ;;  %v2635_v4 = vrot.slane %v2633_v62, 5  ;;  %v2653_v18 = vrot.slane %v2651_v32, 5  ;;  %v3216_v58 = vsel %vm7500_vm7, %v6127_v36, %v3215_v44  ;;  %v6121_v55 = vld [vmem:[%s7270_s25 + $0x54] sm:$0xe]  ;;  %v6918_v19 = vld [vmem:[%s10368_s3 + $0x1c0] sm:$0xff]  }
  0x76   : > { %6634 = vmatmul.mubr.bf16.vlgmr.msra.gmra.mxu0 %v6098_v21  ;;  %6717 = vmatprep.subr.bf16.mxu1 %v6908_v33  ;;  %v6099_v38 = vcombine.low %v2612_v51, %v2622_v41  ;;  %v3212_v21 = vsel %vm7500_vm7, %v3210_v15, %v3211_v10  ;;  %v3217_v59 = vrot.slane %v3215_v44, 4  ;;  %v2685_v62 = vshrl.u32 %v6073_v27, 16 }
  0x77   : > { %6682 = vmatpush3.bf16.msra.mxu0 %v6903_v31  ;;  %v2640_v0 = vor.u32 %v2639_v6, %v2635_v4  ;;  %v2631_v31 = vrot.slane %v2630_v43, 4  ;;  %v6150_v34 = vcombine.low %v3209_v46, %v3212_v21  ;;  %v2654_v35 = vor.u32 %v2653_v18, %v2650_v16 }
  0x78   : > { %6683 = vmatprep.subr.bf16.mxu0 %v6905_v23  ;;  %6637 = vmatprep.mubr.bf16.mxu0 %v6099_v38  ;;  %v2674_v2 = vrot.slane %v2672_v53, 4  ;;  %v2677_v3 = vrot.slane %v2675_v54, 5  ;;  %v2683_v42 = vrot.slane %v2681_v56, 5  ;;  %v3219_v51 = vsel %vm7500_vm7, %v3217_v59, %v3218_v45  ;;  %v6916_v38 = vld [vmem:[%s10368_s3 + $0x1c8] sm:$0xff]  }
  0x79   : > { %v2641_v50 = vrot.slane %v2640_v0, 4  ;;  %6718 = vmatpush3.bf16.msra.mxu1 %v6908_v33  ;;  %v2636_v5 = vsel %vm7325_vm4, %v2631_v31, %v2635_v4  ;;  %v2655_v33 = vrot.slane %v2654_v35, 4  ;;  %v2687_v22 = vrot.slane %v2685_v62, 4 }
  0x7a   : > { %6719 = vmatprep.subr.bf16.mxu1 %v6910_v47  ;;  %6670 = vmatmul.mubr.bf16.gmra.mxu1 %v6150_v34  ;;  %v2691_v4 = vshll.u32 %v7732_v48, 16  ;;  %v6151_v41 = vcombine.low %v3216_v58, %v3219_v51  ;;  %v2678_v43 = vor.u32 %v2677_v3, %v2674_v2  ;;  %v3222_v10 = vrot.slane %v6073_v27, 5  ;;  %v6078_v27 = vld [vmem:[%s7270_s25 + $0x60] sm:$0xf] }
  0x7b   : > { %6684 = vmatpush3.bf16.msra.mxu0 %v6905_v23  ;;  %v2646_v20 = vsel %vm7325_vm4, %v2641_v50, %v2645_v7  ;;  %v2663_v23 = vrot.slane %v2661_v25, 4  ;;  %v2660_v63 = vsel %vm7325_vm4, %v2655_v33, %v2659_v17  ;;  %v6128_v7 = vrot.slane %v6120_v49, 9  ;;  %v6122_v49 = vld [vmem:[%s7270_s25 + $0x60] sm:$0xe] }
  0x7c   : > { %6685 = vmatprep.subr.bf16.mxu0 %v6907_v52  ;;  %v6100_v29 = vcombine.low %v2636_v5, %v2646_v20  ;;  %v2688_v0 = vor.u32 %v2687_v22, %v2683_v42  ;;  %v2693_v14 = vrot.slane %v2691_v4, 5  ;;  %6673 = vmatprep.mubr.bf16.mxu1 %v6151_v41  ;;  %v2679_v31 = vrot.slane %v2678_v43, 4 }
  0x7d   : > { %6720 = vmatpush3.bf16.msra.mxu1 %v6910_v47  ;;  %v2664_v39 = vor.u32 %v2663_v23, %v2659_v17  ;;  %v2696_v60 = vshrl.u32 %v6075_v8, 16  ;;  %v2699_v32 = vshll.u32 %v6075_v8, 16  ;;  %v2705_v61 = vshll.u32 %v6076_v9, 16 }
  0x7e   : > { %6638 = vmatmul.mubr.bf16.gmra.mxu0 %v6100_v29  ;;  %6721 = vmatprep.subr.bf16.mxu1 %v6912_v28  ;;  %v2689_v50 = vrot.slane %v2688_v0, 4  ;;  %v3223_v46 = vsel %vm7500_vm7, %v6128_v7, %v3222_v10  ;;  %v3224_v15 = vrot.slane %v3222_v10, 4  ;;  %v2709_v25 = vshrl.u32 %v6076_v9, 16  ;;  %v6215_v0 = vld [vmem:[%s7270_s25 + $0x18] sm:$0xf] }
  0x7f   : > { %6686 = vmatpush3.bf16.msra.mxu0 %v6907_v52  ;;  %v6914_v52 = vld [vmem:[%s10368_s3 + $0x1d0] sm:$0xff]   ;;  %v2665_v57 = vrot.slane %v2664_v39, 4  ;;  %v2684_v5 = vsel %vm7325_vm4, %v2679_v31, %v2683_v42  ;;  %v2698_v16 = vrot.slane %v2696_v60, 4  ;;  %v2701_v18 = vrot.slane %v2699_v32, 5  ;;  %v7798_v10 = vld [vmem:[%s7270_s25 + $0x1c] sm:$0xf] }
  0x80   : > { %6687 = vmatprep.subr.bf16.mxu0 %v6909_v11  ;;  %v2707_v17 = vrot.slane %v2705_v61, 5  ;;  %v2694_v20 = vsel %vm7325_vm4, %v2689_v50, %v2693_v14  ;;  %v2711_v23 = vrot.slane %v2709_v25, 4  ;;  %v2715_v24 = vshll.u32 %v6077_v13, 16  ;;  %v6919_v50 = vld [vmem:[%s7270_s25 + $0x18] sm:$0xff]  }
  0x81   : > { %v2670_v47 = vsel %vm7325_vm4, %v2665_v57, %v2669_v30  ;;  %6722 = vmatpush3.bf16.msra.mxu1 %v6912_v28  ;;  %v6079_v28 = vld [vmem:[%s7270_s25 + $0x64] sm:$0xf]  ;;  %v6102_v29 = vcombine.low %v2684_v5, %v2694_v20  ;;  %v2702_v35 = vor.u32 %v2701_v18, %v2698_v16  ;;  %v6129_v36 = vrot.slane %v6121_v55, 9 }
  0x82   : > { %v6101_v6 = vcombine.low %v2660_v63, %v2670_v47  ;;  %6723 = vmatprep.subr.bf16.mxu1 %v6914_v52  ;;  %v2712_v39 = vor.u32 %v2711_v23, %v2707_v17  ;;  %v2717_v30 = vrot.slane %v2715_v24, 5  ;;  %v3229_v44 = vrot.slane %v6076_v9, 5 }
  0x83   : > { %6688 = vmatpush3.bf16.msra.mxu0 %v6909_v11  ;;  %v3225_v11 = vrot.slane %v7732_v48, 5  ;;  %v6080_v48 = vld [vmem:[%s7270_s25 + $0x68] sm:$0x1]  ;;  %v3232_v45 = vrot.slane %v6077_v13, 5  ;;  %v2703_v33 = vrot.slane %v2702_v35, 4  ;;  %v2720_v53 = vshrl.u32 %v6078_v27, 16 }
  0x84   : > { %6689 = vmatprep.subr.bf16.mxu0 %v6911_v37  ;;  %6641 = vmatprep.mubr.bf16.mxu0 %v6101_v6  ;;  %v2723_v54 = vshll.u32 %v6078_v27, 16  ;;  %v2729_v56 = vshll.u32 %v6079_v28, 16  ;;  %v2713_v57 = vrot.slane %v2712_v39, 4  ;;  %v3230_v58 = vsel %vm7500_vm7, %v6129_v36, %v3229_v44  ;;  %v7821_v27 = vld [vmem:[%s7270_s25 + $0x2c] sm:$0x1] }
  0x85   : > { %6724 = vmatpush3.bf16.msra.mxu1 %v6914_v52  ;;  %v3226_v21 = vsel %vm7500_vm7, %v3224_v15, %v3225_v11  ;;  %v7785_v52 = vld [vmem:[%s10368_s3 + $0x238] sm:$0xff]   ;;  %v3231_v59 = vrot.slane %v3229_v44, 4  ;;  %v2733_v62 = vshrl.u32 %v6079_v28, 16  ;;  %v2708_v63 = vsel %vm7325_vm4, %v2703_v33, %v2707_v17  ;;  %v7801_v11 = vld [vmem:[%s7270_s25 + $0x20] sm:$0x1] }
  0x86   : > { %6725 = vmatprep.subr.bf16.mxu1 %v6916_v38  ;;  %v6152_v34 = vcombine.low %v3223_v46, %v3226_v21  ;;  %6642 = vmatmul.mubr.bf16.gmra.mxu0 %v6102_v29  ;;  %v2722_v2 = vrot.slane %v2720_v53, 4  ;;  %v2725_v3 = vrot.slane %v2723_v54, 5  ;;  %v2731_v42 = vrot.slane %v2729_v56, 5  ;;  %v6218_v17 = vld [vmem:[%s7270_s25 + $0x24] sm:$0xf] }
  0x87   : > { %6690 = vmatpush3.bf16.msra.mxu0 %v6911_v37  ;;  %v6917_v37 = vld [vmem:[%s10368_s3 + $0x180] sm:$0xff]   ;;  %v3233_v47 = vsel %vm7500_vm7, %v3231_v59, %v3232_v45  ;;  %v2735_v51 = vrot.slane %v2733_v62, 4  ;;  %v2739_v22 = vshll.u32 %v6080_v48, 16  ;;  %v6130_v43 = vrot.slane %v6122_v49, 9 }
  0x88   : > { %6691 = vmatprep.subr.bf16.mxu0 %v6913_v40  ;;  %6674 = vmatmul.mubr.bf16.gmra.mxu1 %v6152_v34  ;;  %v6153_v6 = vcombine.low %v3230_v58, %v3233_v47  ;;  %v2726_v41 = vor.u32 %v2725_v3, %v2722_v2  ;;  %v3236_v9 = vrot.slane %v6079_v28, 5  ;;  %v4010_v32 = vshll.u32 %v6215_v0, 16  ;;  %v6920_v54 = vld [vmem:[%s7270_s25 + $0x24] sm:$0xff]   ;;  %v6221_v2 = vld [vmem:[%s7270_s25 + $0x30] sm:$0xf] }
  0x89   : > { %6726 = vmatpush3.bf16.msra.mxu1 %v6916_v38  ;;  %v2736_v7 = vor.u32 %v2735_v51, %v2731_v42  ;;  %v2741_v8 = vrot.slane %v2739_v22, 5  ;;  %v3239_v38 = vrot.slane %v6080_v48, 5  ;;  %v4016_v15 = vshll.u32 %v7798_v10, 16  ;;  %v7831_v3 = vld [vmem:[%s7270_s25 + $0x34] sm:$0xf] }
  0x8a   : > { %6727 = vmatprep.subr.bf16.mxu1 %v6918_v19  ;;  %6677 = vmatprep.mubr.bf16.mxu1 %v6153_v6  ;;  %v2727_v14 = vrot.slane %v2726_v41, 4  ;;  %v3237_v13 = vsel %vm7500_vm7, %v6130_v43, %v3236_v9  ;;  %v3238_v60 = vrot.slane %v3236_v9, 4  ;;  %v4020_v25 = vshrl.u32 %v7798_v10, 16  ;;  %v7838_v47 = vld [vmem:[%s10368_s3 + $0x230] sm:$0xff]   ;;  %v7841_v51 = vld [vmem:[%s7270_s25 + $0x38] sm:$0x1] }
  0x8b   : > { %6692 = vmatpush3.bf16.msra.mxu0 %v6913_v40  ;;  %v2718_v40 = vsel %vm7325_vm4, %v2713_v57, %v2717_v30  ;;  %v2737_v31 = vrot.slane %v2736_v7, 4  ;;  %v4012_v16 = vrot.slane %v4010_v32, 5  ;;  %v4026_v18 = vshll.u32 %v7801_v11, 16  ;;  %v6923_v7 = vld [vmem:[%s7270_s25 + $0x30] sm:$0xff]  }
  0x8c   : > { %6693 = vmatprep.subr.bf16.mxu0 %v6915_v12  ;;  %v6103_v4 = vcombine.low %v2708_v63, %v2718_v40  ;;  %v2732_v61 = vsel %vm7325_vm4, %v2727_v14, %v2731_v42  ;;  %v3240_v5 = vsel %vm7500_vm7, %v3238_v60, %v3239_v38  ;;  %v4018_v23 = vrot.slane %v4016_v15, 5  ;;  %v7059_v15 = vld [vmem:[%s7235_s10] sm:$0xff] }
  0x8d   : > { %6728 = vmatpush3.bf16.msra.mxu1 %v6918_v19  ;;  %v2742_v55 = vsel %vm7325_vm4, %v2737_v31, %v2741_v8  ;;  %v7818_v19 = vld [vmem:[%s7270_s25 + $0x28] sm:$0xf]  ;;  %v6154_v21 = vcombine.low %v3237_v13, %v3240_v5  ;;  %v4022_v24 = vrot.slane %v4020_v25, 4  ;;  %v4028_v29 = vrot.slane %v4026_v18, 5  ;;  %v6224_v31 = vld [vmem:[%s7270_s25 + $0x3c] sm:$0xf] }
  0x8e   : > { %6777 = vmatprep.subr.bf16.mxu1 %v7785_v52  ;;  %6645 = vmatprep.mubr.bf16.mxu0 %v6103_v4  ;;  %v6104_v20 = vcombine.low %v2732_v61, %v2742_v55  ;;  %v4031_v34 = vshrl.u32 %v6218_v17, 16  ;;  %v4034_v35 = vshll.u32 %v6218_v17, 16  ;;  %v4040_v48 = vshll.u32 %v7818_v19, 16  ;;  %v7868_v17 = vld [vmem:[%s10368_s3 + $0x228] sm:$0xff]  }
  0x8f   : > { %6694 = vmatpush3.bf16.msra.mxu0 %v6915_v12  ;;  %v4007_v12 = vshrl.u32 %v6215_v0, 16  ;;  %v4023_v36 = vor.u32 %v4022_v24, %v4018_v23  ;;  %v4050_v39 = vshll.u32 %v7821_v27, 16  ;;  %v4055_v22 = vshrl.u32 %v6221_v2, 16 }
  0x90   : > { %6695 = vmatprep.subr.bf16.mxu0 %v6917_v37  ;;  %6646 = vmatmul.mubr.bf16.gmra.mxu0 %v6104_v20  ;;  %v4033_v45 = vrot.slane %v4031_v34, 4  ;;  %v4036_v49 = vrot.slane %v4034_v35, 5  ;;  %v4042_v56 = vrot.slane %v4040_v48, 5  ;;  %v4058_v4 = vshll.u32 %v6221_v2, 16 }
  0x91   : > { %v4009_v46 = vrot.slane %v4007_v12, 4  ;;  %6678 = vmatmul.mubr.bf16.gmra.mxu1 %v6154_v21  ;;  %6697 = vmatprep.mubr.bf16.mxu0 %v6919_v50  ;;  %v4024_v53 = vrot.slane %v4023_v36, 4  ;;  %v4052_v58 = vrot.slane %v4050_v39, 5  ;;  %v4064_v8 = vshll.u32 %v7831_v3, 16  ;;  %v7855_v50 = vld [vmem:[%s7270_s25 + $0x40] sm:$0xf] }
  0x92   : > { %v4037_v63 = vor.u32 %v4036_v49, %v4033_v45  ;;  %v4068_v9 = vshrl.u32 %v7831_v3, 16  ;;  %v4057_v0 = vrot.slane %v4055_v22, 4  ;;  %v4060_v14 = vrot.slane %v4058_v4, 5  ;;  %v6924_v39 = vld [vmem:[%s7270_s25 + $0x3c] sm:$0xff]  }
  0x93   : > { %6696 = vmatpush3.bf16.msra.mxu0 %v6917_v37  ;;  %v4013_v28 = vor.u32 %v4012_v16, %v4009_v46  ;;  %v4044_v37 = vshrl.u32 %v7818_v19, 16  ;;  %v4029_v42 = vsel %vm7325_vm4, %v4024_v53, %v4028_v29  ;;  %v4074_v12 = vshll.u32 %v7841_v51, 16  ;;  %v7858_v46 = vld [vmem:[%s7270_s25 + $0x44] sm:$0x1] }
  0x94   : > { %6745 = vmatprep.subr.bf16.mxu0 %v7785_v52  ;;  %v4038_v43 = vrot.slane %v4037_v63, 4  ;;  %v4066_v32 = vrot.slane %v4064_v8, 5  ;;  %v4070_v61 = vrot.slane %v4068_v9, 4  ;;  %v4061_v5 = vor.u32 %v4060_v14, %v4057_v0  ;;  %v7904_v63 = vld [vmem:[%s7270_s25 + $0x50] sm:$0x1] }
  0x95   : > { %v4014_v44 = vrot.slane %v4013_v28, 4  ;;  %v4046_v57 = vrot.slane %v4044_v37, 4  ;;  %v4076_v16 = vrot.slane %v4074_v12, 5  ;;  %v4079_v18 = vshrl.u32 %v6224_v31, 16  ;;  %v7916_v12 = vld [vmem:[%s7270_s25 + $0x58] sm:$0xf] }
  0x96   : > { %v4043_v60 = vsel %vm7325_vm4, %v4038_v43, %v4042_v56  ;;  %v4082_v24 = vshll.u32 %v6224_v31, 16  ;;  %v4088_v28 = vshll.u32 %v7855_v50, 16  ;;  %v4062_v29 = vrot.slane %v4061_v5, 4 }
  0x97   : > { %v4019_v62 = vsel %vm7325_vm4, %v4014_v44, %v4018_v23  ;;  %v4047_v40 = vor.u32 %v4046_v57, %v4042_v56  ;;  %v4071_v23 = vor.u32 %v4070_v61, %v4066_v32  ;;  %v4081_v34 = vrot.slane %v4079_v18, 4  ;;  %v6227_v56 = vld [vmem:[%s7270_s25 + $0x48] sm:$0xf]  ;;  %v7888_v57 = vld [vmem:[%s7270_s25 + $0x4c] sm:$0xf] }
  0x98   : > { %v6255_v41 = vcombine.low %v4019_v62, %v4029_v42  ;;  %6698 = vmatmul.mubr.bf16.vlgmr.msra.gmra.mxu0 %v6920_v54  ;;  %v4092_v35 = vshrl.u32 %v7855_v50, 16  ;;  %v4098_v36 = vshll.u32 %v7858_v46, 16  ;;  %v4090_v44 = vrot.slane %v4088_v28, 5  ;;  %v6927_v54 = vld [vmem:[%s7270_s25 + $0x48] sm:$0xff]   ;;  %v7901_v62 = vld [vmem:[%s10368_s3 + $0x220] sm:$0xff]  }
  0x99   : > { %v4048_v38 = vrot.slane %v4047_v40, 4  ;;  %6746 = vmatpush3.bf16.msra.mxu0 %v7785_v52  ;;  %6701 = vmatprep.mubr.bf16.mxu0 %v6923_v7  ;;  %v4072_v37 = vrot.slane %v4071_v23, 4  ;;  %v4067_v49 = vsel %vm7325_vm4, %v4062_v29, %v4066_v32  ;;  %v4103_v2 = vshrl.u32 %v6227_v56, 16  ;;  %v6230_v7 = vld [vmem:[%s7270_s25 + $0x54] sm:$0xf] }
  0x9a   : > { %6729 = vmatprep.mubr.bf16.mxu1 %v6255_v41  ;;  %6747 = vmatprep.subr.bf16.mxu0 %v7838_v47  ;;  %v4100_v53 = vrot.slane %v4098_v36, 5  ;;  %v4106_v42 = vshll.u32 %v6227_v56, 16  ;;  %v4112_v41 = vshll.u32 %v7888_v57, 16  ;;  %v4116_v43 = vshrl.u32 %v7888_v57, 16  ;;  %v7920_v61 = vld [vmem:[%s7270_s25 + $0x5c] sm:$0x1] }
  0x9b   : > { %v4053_v55 = vsel %vm7325_vm4, %v4048_v38, %v4052_v58  ;;  %v4105_v38 = vrot.slane %v4103_v2, 4  ;;  %v4122_v14 = vshll.u32 %v7904_v63, 16  ;;  %v4130_v18 = vshll.u32 %v6230_v7, 16  ;;  %v6931_v2 = vld [vmem:[%s7270_s25 + $0x60] sm:$0xff]  }
  0x9c   : > { %v6256_v21 = vcombine.low %v4043_v60, %v4053_v55  ;;  %v4108_v0 = vrot.slane %v4106_v42, 5  ;;  %v4114_v60 = vrot.slane %v4112_v41, 5  ;;  %v4118_v32 = vrot.slane %v4116_v43, 4  ;;  %v6233_v42 = vld [vmem:[%s7270_s25 + $0x60] sm:$0xf] }
  0x9d   : > { %6748 = vmatpush3.bf16.msra.mxu0 %v7838_v47  ;;  %v4140_v36 = vshrl.u32 %v7916_v12, 16 }
  0x9e   : > { %6730 = vmatmul.mubr.bf16.vlgmr.msra.gmra.mxu1 %v6256_v21  ;;  %6749 = vmatprep.subr.bf16.mxu0 %v7868_v17  ;;  %v4109_v5 = vor.u32 %v4108_v0, %v4105_v38  ;;  %v4119_v21 = vor.u32 %v4118_v32, %v4114_v60  ;;  %v7968_v38 = vld [vmem:[%s7270_s25 + $0x68] sm:$0x1]  ;;  %v6236_v32 = vld [vmem:[%s7270_s25 + $0x6c] sm:$0xf] }
  0x9f   : > { %6785 = vmatpush3.bf16.msra.mxu1 %v7785_v52  ;;  %v4077_v52 = vsel %vm7325_vm4, %v4072_v37, %v4076_v16  ;;  %v4124_v16 = vrot.slane %v4122_v14, 5  ;;  %v6929_v37 = vld [vmem:[%s10368_s3 + $0x218] sm:$0xff]  }
  0xa0   : > { %6778 = vmatprep.subr.bf16.mxu1 %v7838_v47  ;;  %v6257_v22 = vcombine.low %v4067_v49, %v4077_v52  ;;  %6702 = vmatmul.mubr.bf16.gmra.mxu0 %v6924_v39  ;;  %v4110_v29 = vrot.slane %v4109_v5, 4  ;;  %v4146_v49 = vshll.u32 %v7920_v61, 16  ;;  %v4142_v52 = vrot.slane %v4140_v36, 4 }
  0xa1   : > { %v399_v30 = vpop.xlane.xlu0 %398  ;;  %6750 = vmatpush3.bf16.msra.mxu0 %v7868_v17  ;;  %6705 = vmatprep.mubr.bf16.mxu0 %v6927_v54 }
  0xa2   : > { %v489_v33 = vmul.f32 0.25, %v399_v30  ;;  %v4084_v30 = vrot.slane %v4082_v24, 5  ;;  %6733 = vmatprep.mubr.bf16.mxu1 %v6257_v22  ;;  %v4136_v24 = vshll.u32 %v7916_v12, 16  ;;  %6751 = vmatprep.subr.bf16.mxu0 %v7901_v62  ;;  %v4115_v54 = vsel %vm7325_vm4, %v4110_v29, %v4114_v60  ;;  %v7954_v22 = vld [vmem:[%s7270_s25 + $0x64] sm:$0xf] }
  0xa3   : > { %v406_v59 = vpop.xlane.xlu1 %405  ;;  %6786 = vmatpush3.bf16.msra.mxu1 %v7838_v47  ;;  %v4148_v41 = vrot.slane %v4146_v49, 5  ;;  %v4160_v5 = vshll.u32 %v7954_v22, 16  ;;  %v4175_v49 = vshrl.u32 %v6236_v32, 16 }
  0xa4   : > { %v7861_v25 = vsub.f32 %v7059_v15, %v489_v33  ;;  %v7880_v45 = vmul.f32 0.25, %v406_v59  ;;  %v4094_v33 = vrot.slane %v4092_v35, 4  ;;  %v4085_v59 = vor.u32 %v4084_v30, %v4081_v34  ;;  %6779 = vmatprep.subr.bf16.mxu1 %v7868_v17  ;;  %v6928_v34 = vld [vmem:[%s7270_s25 + $0x54] sm:$0xff]  }
  0xa5   : > { %v7843_v6 = vpop.xlane.xlu0 %401  ;;  %v4127_v15 = vshrl.u32 %v6230_v7, 16  ;;  %v4132_v35 = vrot.slane %v4130_v18, 5  ;;  %v4120_v30 = vrot.slane %v4119_v21, 4  ;;  %6752 = vmatpush3.bf16.msra.mxu0 %v7901_v62  ;;  %v7060_v7 = vld [vmem:[%s7235_s10 + $0x10] sm:$0x3]  ;;  %v7061_v21 = vld [vmem:[%s7235_s10 + $0x8] sm:$0xff] }
  0xa6   : > { %v7892_v58 = vmul.f32 %v7861_v25, %v7861_v25  ;;  %v4095_v4 = vor.u32 %v4094_v33, %v4090_v44  ;;  %v4086_v9 = vrot.slane %v4085_v59, 4  ;;  %v4677_v33 = vrot.slane %v7916_v12, 5  ;;  %v7949_v59 = vld [vmem:[%s10368_s3 + $0x210] sm:$0xff]   ;;  %6753 = vmatprep.subr.bf16.mxu0 %v6929_v37 }
  0xa7   : > { %v7850_v13 = vpop.xlane.xlu1 %408  ;;  %v4129_v23 = vrot.slane %v4127_v15, 4  ;;  %6787 = vmatpush3.bf16.msra.mxu1 %v7868_v17  ;;  %v4680_v17 = vrot.slane %v7920_v61, 5  ;;  %v490_v60 = vmul.f32 0.25, %v7843_v6  ;;  %v4151_v15 = vshrl.u32 %v6233_v42, 16 }
  0xa8   : > { %v4096_v31 = vrot.slane %v4095_v4, 4  ;;  %v4091_v55 = vsel %vm7325_vm4, %v4086_v9, %v4090_v44  ;;  %v4138_v44 = vrot.slane %v4136_v24, 5  ;;  %6780 = vmatprep.subr.bf16.mxu1 %v7901_v62  ;;  %v4125_v4 = vsel %vm7325_vm4, %v4120_v30, %v4124_v16  ;;  %v7976_v16 = vld [vmem:[%s7270_s25 + $0x70] sm:$0xf]  ;;  %6706 = vmatmul.mubr.bf16.gmra.mxu0 %v6928_v34 }
  0xa9   : > { %v7870_v20 = vpop.xlane.xlu0 %411  ;;  %v4133_v56 = vor.u32 %v4132_v35, %v4129_v23  ;;  %v7961_v43 = vrot.slane %v4677_v33, 4  ;;  %v7965_v9 = vsub.f32 %v7060_v7, %v7880_v45  ;;  %v6259_v0 = vcombine.low %v4115_v54, %v4125_v4  ;;  %6754 = vmatpush3.bf16.msra.mxu0 %v6929_v37  ;;  %6709 = vmatprep.mubr.bf16.mxu0 %v6931_v2 }
  0xaa   : > { %v4101_v47 = vsel %vm7325_vm4, %v4096_v31, %v4100_v53  ;;  %v4143_v31 = vor.u32 %v4142_v52, %v4138_v44  ;;  %v4164_v45 = vshrl.u32 %v7954_v22, 16  ;;  %v7981_v23 = vsub.f32 %v7061_v21, %v490_v60  ;;  %6755 = vmatprep.subr.bf16.mxu0 %v7949_v59 }
  0xab   : > { %v7877_v48 = vpop.xlane.xlu1 %414  ;;  %v6258_v28 = vcombine.low %v4091_v55, %v4101_v47  ;;  %v4134_v14 = vrot.slane %v4133_v56, 4  ;;  %6788 = vmatpush3.bf16.msra.mxu1 %v7901_v62  ;;  %v4154_v55 = vshll.u32 %v6233_v42, 16  ;;  %v4170_v6 = vshll.u32 %v7968_v38, 16  ;;  %v7985_v62 = vld [vmem:[%s7270_s25 + $0x74] sm:$0x1]  ;;  %v6933_v56 = vld [vmem:[%s10368_s3 + $0x208] sm:$0xff]  }
  0xac   : > { %v4144_v47 = vrot.slane %v4143_v31, 4  ;;  %6781 = vmatprep.subr.bf16.mxu1 %v6929_v37  ;;  %v4162_v35 = vrot.slane %v4160_v5, 5  ;;  %v4166_v34 = vrot.slane %v4164_v45, 4  ;;  %v4178_v54 = vshll.u32 %v6236_v32, 16 }
  0xad   : > { %v7906_v40 = vpop.xlane.xlu0 %417  ;;  %6734 = vmatmul.mubr.bf16.gmra.mxu1 %v6258_v28  ;;  %v4139_v18 = vsel %vm7325_vm4, %v4134_v14, %v4138_v44  ;;  %v4153_v28 = vrot.slane %v4151_v15, 4  ;;  %v4156_v29 = vrot.slane %v4154_v55, 5  ;;  %v4172_v44 = vrot.slane %v4170_v6, 5  ;;  %6756 = vmatpush3.bf16.msra.mxu0 %v7949_v59 }
  0xae   : > { %6737 = vmatprep.mubr.bf16.mxu1 %v6259_v0  ;;  %v4149_v30 = vsel %vm7325_vm4, %v4144_v47, %v4148_v41  ;;  %v4167_v4 = vor.u32 %v4166_v34, %v4162_v35  ;;  %v4184_v7 = vshll.u32 %v7976_v16, 16  ;;  %v6932_v0 = vld [vmem:[%s7270_s25 + $0x6c] sm:$0xff]   ;;  %v4177_v41 = vrot.slane %v4175_v49, 4  ;;  %6757 = vmatprep.subr.bf16.mxu0 %v6933_v56  ;;  %v8009_v47 = vld [vmem:[%s10368_s3 + $0x200] sm:$0xff]   ;;  %v6273_v34 = vld [vmem:[%s7270_s25 + $0x18] sm:$0xe] }
  0xaf   : > { %v7912_v8 = vpop.xlane.xlu1 %420  ;;  %v6260_v52 = vcombine.low %v4139_v18, %v4149_v30  ;;  %6789 = vmatpush3.bf16.msra.mxu1 %v6929_v37  ;;  %v4157_v42 = vor.u32 %v4156_v29, %v4153_v28  ;;  %v4180_v14 = vrot.slane %v4178_v54, 5  ;;  %v4188_v2 = vshrl.u32 %v7976_v16, 16  ;;  %v7062_v28 = vld [vmem:[%s7235_s10 + $0x18] sm:$0xff] }
  0xb0   : > { %6782 = vmatprep.subr.bf16.mxu1 %v7949_v59  ;;  %v4194_v31 = vshll.u32 %v7985_v62, 16  ;;  %v4168_v32 = vrot.slane %v4167_v4, 4  ;;  %v4186_v37 = vrot.slane %v4184_v7, 5  ;;  %v492_v15 = vmul.f32 0.25, %v7850_v13  ;;  %6710 = vmatmul.mubr.bf16.gmra.mxu0 %v6932_v0  ;;  %v6277_v7 = vld [vmem:[%s7270_s25 + $0x48] sm:$0xe] }
  0xb1   : > { %v7935_v39 = vpop.xlane.xlu0 %423  ;;  %v4158_v60 = vrot.slane %v4157_v42, 4  ;;  %v4181_v55 = vor.u32 %v4180_v14, %v4177_v41  ;;  %v4190_v5 = vrot.slane %v4188_v2, 4  ;;  %v579_v18 = vsel %vm396_vm0, %v7892_v58, 0.0  ;;  %6758 = vmatpush3.bf16.msra.mxu0 %v6933_v56  ;;  %v7064_v41 = vld [vmem:[%s7235_s10 + $0x28] sm:$0x3] }
  0xb2   : > { %v4196_v45 = vrot.slane %v4194_v31, 5  ;;  %v4173_v6 = vsel %vm7325_vm4, %v4168_v32, %v4172_v44  ;;  %v8019_v29 = vsub.f32 %v7062_v28, %v492_v15  ;;  %580 = vadd.xlane.f32.xlu0 %v579_v18  ;;  %v493_v58 = vmul.f32 0.25, %v7870_v20  ;;  %v7063_v44 = vld [vmem:[%s7235_s10 + $0x20] sm:$0xff]  ;;  %6759 = vmatprep.subr.bf16.mxu0 %v8009_v47  ;;  %v7065_v32 = vld [vmem:[%s7235_s10 + $0x30] sm:$0xff] }
  0xb3   : > { %v7940_v53 = vpop.xlane.xlu1 %426  ;;  %6790 = vmatpush3.bf16.msra.mxu1 %v7949_v59  ;;  %v4163_v13 = vsel %vm7325_vm4, %v4158_v60, %v4162_v35  ;;  %v4182_v59 = vrot.slane %v4181_v55, 4  ;;  %v4191_v54 = vor.u32 %v4190_v5, %v4186_v37  ;;  %v494_v35 = vmul.f32 0.25, %v7877_v48  ;;  %v6274_v55 = vld [vmem:[%s7270_s25 + $0x24] sm:$0xe] }
  0xb4   : > { %v6261_v49 = vcombine.low %v4163_v13, %v4173_v6  ;;  %6783 = vmatprep.subr.bf16.mxu1 %v6933_v56  ;;  %v551_v42 = vmul.f32 %v7965_v9, %v7965_v9  ;;  %v550_v20 = vmul.f32 %v7981_v23, %v7981_v23  ;;  %v495_v4 = vmul.f32 0.25, %v7906_v40  ;;  %v6278_v13 = vld [vmem:[%s7270_s25 + $0x54] sm:$0xe] }
  0xb5   : > { %v7987_v24 = vpop.xlane.xlu0 %429  ;;  %6738 = vmatmul.mubr.bf16.gmra.mxu1 %v6260_v52  ;;  %v8027_v52 = vsub.f32 %v7063_v44, %v493_v58  ;;  %v4187_v0 = vsel %vm7325_vm4, %v4182_v59, %v4186_v37  ;;  %v4192_v48 = vrot.slane %v4191_v54, 4  ;;  %v8039_v14 = vsub.f32 %v7064_v41, %v494_v35  ;;  %6760 = vmatpush3.bf16.msra.mxu0 %v8009_v47 }
  0xb6   : > { %6741 = vmatprep.mubr.bf16.mxu1 %v6261_v49  ;;  %v6281_v2 = vrot.slane %v6273_v34, 9  ;;  %v585_v31 = vsel %vm403_vm1, %v551_v42, 0.0  ;;  %v582_v60 = vsel %vm396_vm0, %v550_v20, 0.0  ;;  %v8044_v40 = vsub.f32 %v7065_v32, %v495_v4 }
  0xb7   : > { %v7989_v36 = vpop.xlane.xlu1 %432  ;;  %6791 = vmatpush3.bf16.msra.mxu1 %v6933_v56  ;;  %v4642_v15 = vrot.slane %v7798_v10, 5  ;;  %v4197_v37 = vsel %vm7325_vm4, %v4192_v48, %v4196_v45  ;;  %586 = vadd.xlane.f32.xlu0 %v585_v31  ;;  %v4645_v5 = vrot.slane %v7801_v11, 5  ;;  %v6285_v18 = vrot.slane %v6277_v7, 9 }
  0xb8   : > { %6784 = vmatprep.subr.bf16.mxu1 %v8009_v47  ;;  %v4670_v56 = vrot.slane %v7888_v57, 5  ;;  %v6262_v28 = vcombine.low %v4187_v0, %v4197_v37  ;;  %583 = vadd.xlane.f32.xlu1 %v582_v60  ;;  %v4673_v45 = vrot.slane %v7904_v63, 5  ;;  %v6282_v57 = vrot.slane %v6274_v55, 9  ;;  %v6275_v0 = vld [vmem:[%s7270_s25 + $0x30] sm:$0xe] }
  0xb9   : > { %v8011_v21 = vpop.xlane.xlu0 %435  ;;  %v4643_v10 = vsel %vm7500_vm7, %v6281_v2, %v4642_v15  ;;  %v4644_v1 = vrot.slane %v4642_v15, 4  ;;  %v4649_v49 = vrot.slane %v7818_v19, 5  ;;  %v4652_v54 = vrot.slane %v7821_v27, 5  ;;  %v6279_v60 = vld [vmem:[%s7270_s25 + $0x60] sm:$0xe] }
  0xba   : > { %v4671_v11 = vsel %vm7500_vm7, %v6285_v18, %v4670_v56  ;;  %v4672_v34 = vrot.slane %v4670_v56, 4  ;;  %v6286_v35 = vrot.slane %v6278_v13, 9  ;;  %v4681_v63 = vsel %vm7500_vm7, %v7961_v43, %v4680_v17  ;;  %v7067_v15 = vld [vmem:[%s7235_s10 + $0x40] sm:$0x3] }
  0xbb   : > { %v8023_v30 = vpop.xlane.xlu1 %438  ;;  %v4646_v59 = vsel %vm7500_vm7, %v4644_v1, %v4645_v5  ;;  %6792 = vmatpush3.bf16.msra.mxu1 %v8009_v47  ;;  %v4650_v42 = vsel %vm7500_vm7, %v6282_v57, %v4649_v49  ;;  %v4651_v20 = vrot.slane %v4649_v49, 4  ;;  %v496_v17 = vmul.f32 0.25, %v7912_v8  ;;  %v6280_v57 = vld [vmem:[%s7270_s25 + $0x6c] sm:$0xe]  ;;  %v7069_v49 = vld [vmem:[%s7235_s10 + $0x50] sm:$0xff] }
  0xbc   : > { %v6305_v44 = vcombine.low %v4643_v10, %v4646_v59  ;;  %v4674_v19 = vsel %vm7500_vm7, %v4672_v34, %v4673_v45  ;;  %v4678_v61 = vsel %vm7500_vm7, %v6286_v35, %v4677_v33  ;;  %v552_v43 = vmul.f32 %v8019_v29, %v8019_v29  ;;  %v7066_v33 = vld [vmem:[%s7235_s10 + $0x38] sm:$0xff] }
  0xbd   : > { %v8054_v6 = vpop.xlane.xlu0 %441  ;;  %6742 = vmatmul.mubr.bf16.gmra.mxu1 %v6262_v28  ;;  %v6309_v27 = vcombine.low %v4671_v11, %v4674_v19  ;;  %v4653_v47 = vsel %vm7500_vm7, %v4651_v20, %v4652_v54  ;;  %v6310_v4 = vcombine.low %v4678_v61, %v4681_v63  ;;  %v553_v7 = vmul.f32 %v8027_v52, %v8027_v52  ;;  %v6276_v10 = vld [vmem:[%s7270_s25 + $0x3c] sm:$0xe] }
  0xbe   : > { %6761 = vmatprep.mubr.bf16.mxu0 %v6305_v44  ;;  %v497_v12 = vmul.f32 0.25, %v7935_v39  ;;  %v6306_v8 = vcombine.low %v4650_v42, %v4653_v47  ;;  %v8094_v41 = vsub.f32 %v7066_v33, %v496_v17  ;;  %v588_v2 = vsel %vm396_vm0, %v552_v43, 0.0 }
  0xbf   : > { %v8060_v58 = vpop.xlane.xlu1 %444  ;;  %6769 = vmatprep.mubr.bf16.mxu1 %v6309_v27  ;;  %v498_v31 = vmul.f32 0.25, %v7940_v53  ;;  %589 = vadd.xlane.f32.xlu1 %v588_v2  ;;  %v591_v39 = vsel %vm396_vm0, %v553_v7, 0.0  ;;  %v554_v37 = vmul.f32 %v8039_v14, %v8039_v14  ;;  %v555_v5 = vmul.f32 %v8044_v40, %v8044_v40  ;;  %v7068_v53 = vld [vmem:[%s7235_s10 + $0x48] sm:$0xff]  ;;  %v7070_v2 = vld [vmem:[%s7235_s10 + $0x58] sm:$0x3] }
  0xc0   : > { %v8103_v55 = vsub.f32 %v7067_v15, %v497_v12  ;;  %6762 = vmatmul.mubr.bf16.vlgmr.msra.gmra.mxu0 %v6306_v8  ;;  %592 = vadd.xlane.f32.xlu0 %v591_v39  ;;  %v499_v56 = vmul.f32 0.25, %v7987_v24  ;;  %v6283_v13 = vrot.slane %v6275_v0, 9  ;;  %v4656_v28 = vrot.slane %v7831_v3, 5 }
  0xc1   : > { %v8091_v48 = vpop.xlane.xlu0 %447  ;;  %v8110_v18 = vsub.f32 %v7068_v53, %v498_v31  ;;  %v594_v1 = vsel %vm403_vm1, %v554_v37, 0.0  ;;  %v597_v45 = vsel %vm396_vm0, %v555_v5, 0.0  ;;  %v4659_v11 = vrot.slane %v7841_v51, 5 }
  0xc2   : > { %v6287_v34 = vrot.slane %v6279_v60, 9  ;;  %v8120_v59 = vsub.f32 %v7069_v49, %v499_v56  ;;  %v4657_v54 = vsel %vm7500_vm7, %v6283_v13, %v4656_v28  ;;  %v4658_v24 = vrot.slane %v4656_v28, 4 }
  0xc3   : > { %v8099_v32 = vpop.xlane.xlu1 %450  ;;  %v4684_v35 = vrot.slane %v7954_v22, 5  ;;  %595 = vadd.xlane.f32.xlu1 %v594_v1  ;;  %v4687_v3 = vrot.slane %v7968_v38, 5  ;;  %v6284_v63 = vrot.slane %v6276_v10, 9  ;;  %v4663_v44 = vrot.slane %v7855_v50, 5 }
  0xc4   : > { %v4666_v51 = vrot.slane %v7858_v46, 5  ;;  %598 = vadd.xlane.f32.xlu0 %v597_v45  ;;  %v4660_v42 = vsel %vm7500_vm7, %v4658_v24, %v4659_v11  ;;  %v6288_v61 = vrot.slane %v6280_v57, 9  ;;  %v4691_v46 = vrot.slane %v7976_v16, 5  ;;  %v7073_v57 = vld [vmem:[%s7235_s10 + $0x70] sm:$0x3] }
  0xc5   : > { %6770 = vmatmul.mubr.bf16.vlgmr.msra.gmra.mxu1 %v6310_v4  ;;  %v8128_v19 = vpop.xlane.xlu0 %453  ;;  %v4685_v20 = vsel %vm7500_vm7, %v6287_v34, %v4684_v35  ;;  %v4686_v27 = vrot.slane %v4684_v35, 4  ;;  %v6307_v38 = vcombine.low %v4657_v54, %v4660_v42  ;;  %v4664_v50 = vsel %vm7500_vm7, %v6284_v63, %v4663_v44  ;;  %v7074_v35 = vld [vmem:[%s7235_s10 + $0x78] sm:$0xff]  ;;  %v7075_v42 = vld [vmem:[%s7235_s10 + $0x80] sm:$0xff] }
  0xc6   : > { %v4665_v17 = vrot.slane %v4663_v44, 4  ;;  %v4694_v47 = vrot.slane %v7985_v62, 5  ;;  %v500_v4 = vmul.f32 0.25, %v7989_v36  ;;  %v556_v7 = vmul.f32 %v8094_v41, %v8094_v41 }
  0xc7   : > { %v4688_v43 = vsel %vm7500_vm7, %v4686_v27, %v4687_v3  ;;  %6765 = vmatprep.mubr.bf16.mxu0 %v6307_v38  ;;  %v4692_v8 = vsel %vm7500_vm7, %v6288_v61, %v4691_v46  ;;  %v4693_v33 = vrot.slane %v4691_v46, 4  ;;  %v557_v36 = vmul.f32 %v8103_v55, %v8103_v55 }
  0xc8   : > { %v8134_v22 = vpop.xlane.xlu1 %456  ;;  %v6311_v12 = vcombine.low %v4685_v20, %v4688_v43  ;;  %v4667_v0 = vsel %vm7500_vm7, %v4665_v17, %v4666_v51  ;;  %v8150_v31 = vsub.f32 %v7070_v2, %v500_v4  ;;  %v600_v62 = vsel %vm396_vm0, %v556_v7, 0.0  ;;  %v7077_v4 = vld [vmem:[%s7235_s10 + $0x90] sm:$0xff] }
  0xc9   : > { %v6308_v16 = vcombine.low %v4664_v50, %v4667_v0  ;;  %v4695_v60 = vsel %vm7500_vm7, %v4693_v33, %v4694_v47  ;;  %601 = vadd.xlane.f32.xlu1 %v600_v62  ;;  %v501_v39 = vmul.f32 0.25, %v8011_v21  ;;  %v502_v15 = vmul.f32 0.25, %v8023_v30  ;;  %v460_v5 = vpop.xlane.xlu0 %459  ;;  %v7071_v21 = vld [vmem:[%s7235_s10 + $0x60] sm:$0xff]  ;;  %v7072_v30 = vld [vmem:[%s7235_s10 + $0x68] sm:$0xff] }
  0xca   : > { %6773 = vmatprep.mubr.bf16.mxu1 %v6311_v12  ;;  %v558_v37 = vmul.f32 %v8110_v18, %v8110_v18  ;;  %v6312_v53 = vcombine.low %v4692_v8, %v4695_v60  ;;  %v603_v56 = vsel %vm403_vm1, %v557_v36, 0.0  ;;  %v559_v13 = vmul.f32 %v8120_v59, %v8120_v59  ;;  %v7078_v8 = vld [vmem:[%s7235_s10 + $0x98] sm:$0xff] }
  0xcb   : > { %6766 = vmatmul.mubr.bf16.gmra.mxu0 %v6308_v16  ;;  %v503_v26 = vmul.f32 0.25, %v8054_v6  ;;  %604 = vadd.xlane.f32.xlu0 %v603_v56  ;;  %v8166_v10 = vsub.f32 %v7071_v21, %v501_v39  ;;  %v8169_v1 = vsub.f32 %v7072_v30, %v502_v15  ;;  %v504_v11 = vmul.f32 0.25, %v8060_v58  ;;  %v7079_v39 = vld [vmem:[%s7235_s10 + $0xa0] sm:$0x3] }
  0xcc   : > { %v463_v28 = vpop.xlane.xlu1 %462  ;;  %v606_v45 = vsel %vm396_vm0, %v558_v37, 0.0  ;;  %v609_v34 = vsel %vm396_vm0, %v559_v13, 0.0  ;;  %v560_v6 = vmul.f32 %v8150_v31, %v8150_v31  ;;  %v505_v54 = vmul.f32 0.25, %v8091_v48 }
  0xcd   : > { %6774 = vmatmul.mubr.bf16.gmra.mxu1 %v6312_v53  ;;  %v8175_v49 = vsub.f32 %v7073_v57, %v503_v26  ;;  %607 = vadd.xlane.f32.xlu1 %v606_v45  ;;  %v561_v24 = vmul.f32 %v8166_v10, %v8166_v10  ;;  %v8183_v3 = vsub.f32 %v7074_v35, %v504_v11  ;;  %v506_v63 = vmul.f32 0.25, %v8099_v32  ;;  %v466_v51 = vpop.xlane.xlu0 %465  ;;  %v7076_v32 = vld [vmem:[%s7235_s10 + $0x88] sm:$0x3] }
  0xce   : > { %v612_v58 = vsel %vm403_vm1, %v560_v6, 0.0  ;;  %v562_v44 = vmul.f32 %v8169_v1, %v8169_v1  ;;  %v8191_v20 = vsub.f32 %v7075_v42, %v505_v54  ;;  %v507_v61 = vmul.f32 0.25, %v8128_v19  ;;  %v7082_v6 = vld [vmem:[%s7235_s10 + $0xb8] sm:$0x3] }
  0xcf   : > { %610 = vadd.xlane.f32.xlu0 %v609_v34  ;;  %v615_v48 = vsel %vm396_vm0, %v561_v24, 0.0  ;;  %v563_v27 = vmul.f32 %v8175_v49, %v8175_v49  ;;  %v8197_v50 = vsub.f32 %v7076_v32, %v506_v63  ;;  %v508_v46 = vmul.f32 0.25, %v8134_v22  ;;  %v7084_v32 = vld [vmem:[%s7235_s10 + $0xc8] sm:$0xff] }
  0xd0   : > { %v469_v38 = vpop.xlane.xlu1 %468  ;;  %v618_v17 = vsel %vm396_vm0, %v562_v44, 0.0  ;;  %v564_v43 = vmul.f32 %v8183_v3, %v8183_v3  ;;  %v8205_v7 = vsub.f32 %v7077_v4, %v507_v61  ;;  %v565_v19 = vmul.f32 %v8191_v20, %v8191_v20 }
  0xd1   : > { %613 = vadd.xlane.f32.xlu1 %v612_v58  ;;  %v621_v47 = vsel %vm403_vm1, %v563_v27, 0.0  ;;  %v509_v12 = vmul.f32 0.25, %v460_v5  ;;  %v472_v0 = vpop.xlane.xlu0 %471  ;;  %v8210_v33 = vsub.f32 %v7078_v8, %v508_v46  ;;  %v510_v16 = vmul.f32 0.25, %v463_v28  ;;  %v7080_v5 = vld [vmem:[%s7235_s10 + $0xa8] sm:$0xff]  ;;  %v7081_v28 = vld [vmem:[%s7235_s10 + $0xb0] sm:$0xff] }
  0xd2   : > { %v624_v22 = vsel %vm396_vm0, %v564_v43, 0.0  ;;  %v566_v2 = vmul.f32 %v8197_v50, %v8197_v50  ;;  %v511_v36 = vmul.f32 0.25, %v466_v51  ;;  %v627_v60 = vsel %vm396_vm0, %v565_v19, 0.0  ;;  %v7083_v51 = vld [vmem:[%s7235_s10 + $0xc0] sm:$0xff] }
  0xd3   : > { %616 = vadd.xlane.f32.xlu0 %v615_v48  ;;  %v8217_v15 = vsub.f32 %v7079_v39, %v509_v12  ;;  %v567_v37 = vmul.f32 %v8205_v7, %v8205_v7  ;;  %v8222_v53 = vsub.f32 %v7080_v5, %v510_v16  ;;  %v512_v13 = vmul.f32 0.25, %v469_v38 }
  0xd4   : > { %v475_v62 = vpop.xlane.xlu1 %474  ;;  %v630_v56 = vsel %vm403_vm1, %v566_v2, 0.0  ;;  %v568_v26 = vmul.f32 %v8210_v33, %v8210_v33  ;;  %v8228_v21 = vsub.f32 %v7081_v28, %v511_v36  ;;  %v513_v34 = vmul.f32 0.25, %v472_v0  ;;  %v7085_v0 = vld [vmem:[%s7235_s10 + $0xd0] sm:$0x3] }
  0xd5   : > { %619 = vadd.xlane.f32.xlu1 %v618_v17  ;;  %v478_v30 = vpop.xlane.xlu0 %477  ;;  %v633_v45 = vsel %vm396_vm0, %v567_v37, 0.0  ;;  %v569_v11 = vmul.f32 %v8217_v15, %v8217_v15  ;;  %v8234_v54 = vsub.f32 %v7082_v6, %v512_v13  ;;  %v514_v35 = vmul.f32 0.25, %v475_v62  ;;  %v7086_v62 = vld [vmem:[%s7235_s10 + $0xd8] sm:$0xff] }
  0xd6   : > { %v636_v24 = vsel %vm396_vm0, %v568_v26, 0.0  ;;  %v570_v58 = vmul.f32 %v8222_v53, %v8222_v53  ;;  %v571_v63 = vmul.f32 %v8228_v21, %v8228_v21  ;;  %v8243_v48 = vsub.f32 %v7083_v51, %v513_v34 }
  0xd7   : > { %622 = vadd.xlane.f32.xlu0 %v621_v47  ;;  %v639_v44 = vsel %vm403_vm1, %v569_v11, 0.0  ;;  %v515_v42 = vmul.f32 0.25, %v478_v30  ;;  %v8246_v17 = vsub.f32 %v7084_v32, %v514_v35  ;;  %v572_v43 = vmul.f32 %v8234_v54, %v8234_v54  ;;  %v7088_v35 = vld [vmem:[%s7235_s10 + $0xe8] sm:$0x3] }
  0xd8   : > { %v481_v57 = vpop.xlane.xlu1 %480  ;;  %v642_v46 = vsel %vm396_vm0, %v570_v58, 0.0  ;;  %v645_v4 = vsel %vm396_vm0, %v571_v63, 0.0 }
  0xd9   : > { %625 = vadd.xlane.f32.xlu1 %v624_v22  ;;  %v516_v27 = vmul.f32 0.25, %v481_v57  ;;  %10455 = vst [vmem:[#allocation3_spill] sm:$0xff] %v8246_v17  ;;  %v8253_v8 = vsub.f32 %v7085_v0, %v515_v42  ;;  %v573_v22 = vmul.f32 %v8243_v48, %v8243_v48  ;;  %v648_v37 = vsel %vm403_vm1, %v572_v43, 0.0 }
  0xda   : > { %v484_v61 = vpop.xlane.xlu0 %483 }
  0xdb   : > { %628 = vadd.xlane.f32.xlu0 %v627_v60  ;;  %10456 = vst [vmem:[#allocation4_spill] sm:$0xff] %v8253_v8  ;;  %v517_v16 = vmul.f32 0.25, %v484_v61  ;;  %v8260_v36 = vsub.f32 %v7086_v62, %v516_v27  ;;  %v651_v30 = vsel %vm396_vm0, %v573_v22, 0.0  ;;  %v575_v34 = vmul.f32 %v8253_v8, %v8253_v8 }
  0xdc   : > { %v487_v47 = vpop.xlane.xlu1 %486 }
  0xdd   : > { %631 = vadd.xlane.f32.xlu1 %v630_v56  ;;  %10457 = vst [vmem:[#allocation5_spill] sm:$0xff] %v8260_v36  ;;  %v518_v5 = vmul.f32 0.25, %v487_v47  ;;  %v574_v56 = vmul.f32 %v8246_v17, %v8246_v17  ;;  %v657_v27 = vsel %vm403_vm1, %v575_v34, 0.0 }
  0xdf   : > { %634 = vadd.xlane.f32.xlu0 %v633_v45  ;;  %v7087_v45 = vld [vmem:[%s7235_s10 + $0xe0] sm:$0xff]  ;;  %v8276_v58 = vsub.f32 %v7088_v35, %v518_v5  ;;  %v654_v63 = vsel %vm396_vm0, %v574_v56, 0.0 }
  0xe0   : > { %v8269_v11 = vsub.f32 %v7087_v45, %v517_v16 }
  0xe1   : > { %637 = vadd.xlane.f32.xlu1 %v636_v24  ;;  %10459 = vst [vmem:[#allocation7_spill] sm:$0xff] %v8276_v58 }
  0xe2   : > { %10458 = vst [vmem:[#allocation6_spill] sm:$0xff] %v8269_v11  ;;  %v577_v61 = vmul.f32 %v8269_v11, %v8269_v11 }
  0xe3   : > { %640 = vadd.xlane.f32.xlu0 %v639_v44  ;;  %v576_v44 = vmul.f32 %v8260_v36, %v8260_v36 }
  0xe5   : > { %643 = vadd.xlane.f32.xlu1 %v642_v46  ;;  %v660_v32 = vsel %vm396_vm0, %v576_v44, 0.0  ;;  %v578_v46 = vmul.f32 %v8276_v58, %v8276_v58 }
  0xe7   : > { %646 = vadd.xlane.f32.xlu0 %v645_v4  ;;  %v666_v22 = vsel %vm403_vm1, %v578_v46, 0.0 }
  0xe9   : > { %649 = vadd.xlane.f32.xlu1 %v648_v37 }
  0xeb   : > { %652 = vadd.xlane.f32.xlu0 %v651_v30 }
  0xed   : > { %655 = vadd.xlane.f32.xlu1 %v654_v63 }
  0xef   : > { %v6507_v19 = vpop.f32.mrf.mxu0  ;;  %658 = vadd.xlane.f32.xlu0 %v657_v27 }
  0xf0   : > { %v6539_v38 = vpop.f32.mrf.mxu1 }
  0xf1   : > { %v8257_v2 = vadd.f32 %v6539_v38, %v6507_v19  ;;  %v1242_v60 = vpop.f32.mrf.mxu0  ;;  %v663_v19 = vsel %vm396_vm0, %v577_v61, 0.0  ;;  %661 = vadd.xlane.f32.xlu1 %v660_v32 }
  0xf2   : > { %v1435_v12 = vpop.f32.mrf.mxu1 }
  0xf3   : > { %v8265_v13 = vadd.f32 %v1435_v12, %v1242_v60  ;;  %v6508_v26 = vpop.f32.mrf.mxu0  ;;  %664 = vadd.xlane.f32.xlu0 %v663_v19 }
  0xf4   : > { %v6540_v39 = vpop.f32.mrf.mxu1 }
  0xf5   : > { %v8273_v57 = vadd.f32 %v6540_v39, %v6508_v26  ;;  %v1245_v6 = vpop.f32.mrf.mxu0  ;;  %667 = vadd.xlane.f32.xlu1 %v666_v22 }
  0xf6   : > { %v1438_v28 = vpop.f32.mrf.mxu1 }
  0xf7   : > { %v8281_v51 = vadd.f32 %v1438_v28, %v1245_v6 }
  0xf8   : > { %v6543_v24 = vpop.f32.mrf.mxu1 }
  0xfa   : > { %v1451_v42 = vpop.f32.mrf.mxu1 }
  0xfb   : > { %v6511_v43 = vpop.f32.mrf.mxu0 }
  0xfc   : > { %v6544_v38 = vpop.f32.mrf.mxu1  ;;  %v1460_v47 = vadd.f32 %v6543_v24, %v6511_v43 }
  0xfd   : > { %v1258_v12 = vpop.f32.mrf.mxu0 }
  0xfe   : > { %v1454_v4 = vpop.f32.mrf.mxu1  ;;  %v1452_v0 = vadd.f32 %v1451_v42, %v1258_v12 }
  0xff   : > { %v6512_v16 = vpop.f32.mrf.mxu0 }
 0x100   : > { %v6547_v62 = vpop.f32.mrf.mxu1  ;;  %v1463_v60 = vadd.f32 %v6544_v38, %v6512_v16 }
 0x101   : > { %v1261_v39 = vpop.f32.mrf.mxu0 }
 0x102   : > { %v1467_v37 = vpop.f32.mrf.mxu1  ;;  %v1455_v5 = vadd.f32 %v1454_v4, %v1261_v39 }
 0x104   : > { %v6548_v56 = vpop.f32.mrf.mxu1 }
 0x106   : > { %v1470_v26 = vpop.f32.mrf.mxu1  ;;  %v6515_v28 = vpop.f32.mrf.mxu0 }
 0x107   : > { %v1476_v30 = vadd.f32 %v6547_v62, %v6515_v28 }
 0x108   : > { %v1274_v45 = vpop.f32.mrf.mxu0  ;;  %v6551_v6 = vpop.f32.mrf.mxu1 }
 0x109   : > { %v1468_v34 = vadd.f32 %v1467_v37, %v1274_v45 }
 0x10a   : > { %v6516_v24 = vpop.f32.mrf.mxu0  ;;  %v1483_v63 = vpop.f32.mrf.mxu1 }
 0x10b   : > { %v1479_v35 = vadd.f32 %v6548_v56, %v6516_v24 }
 0x10c   : > { %v1277_v44 = vpop.f32.mrf.mxu0  ;;  %v6552_v27 = vpop.f32.mrf.mxu1 }
 0x10d   : > { %v1471_v42 = vadd.f32 %v1470_v26, %v1277_v44 }
 0x10e   : > { %v1486_v61 = vpop.f32.mrf.mxu1  ;;  %v6519_v32 = vpop.f32.mrf.mxu0 }
 0x10f   : > { %v1492_v46 = vadd.f32 %v6551_v6, %v6519_v32 }
 0x110   : > { %v6603_v38 = vpop.f32.mrf.mxu1  ;;  %v1290_v43 = vpop.f32.mrf.mxu0 }
 0x111   : > { %v1484_v4 = vadd.f32 %v1483_v63, %v1290_v43 }
 0x112   : > { %v2360_v19 = vpop.f32.mrf.mxu1  ;;  %v6520_v12 = vpop.f32.mrf.mxu0 }
 0x113   : > { %v1495_v16 = vadd.f32 %v6552_v27, %v6520_v12 }
 0x114   : > { %v6604_v22 = vpop.f32.mrf.mxu1  ;;  %v1293_v62 = vpop.f32.mrf.mxu0 }
 0x115   : > { %v1487_v37 = vadd.f32 %v1486_v61, %v1293_v62 }
 0x116   : > { %v2363_v39 = vpop.f32.mrf.mxu1  ;;  %v6571_v28 = vpop.f32.mrf.mxu0 }
 0x117   : > { %v1980_v56 = vadd.f32 %v6571_v28, %v8257_v2 }
 0x118   : > { %v6607_v45 = vpop.f32.mrf.mxu1  ;;  %v1915_v24 = vpop.f32.mrf.mxu0 }
 0x119   : > { %v2425_v44 = vadd.f32 %v6603_v38, %v1980_v56  ;;  %v1978_v58 = vadd.f32 %v1915_v24, %v8265_v13 }
 0x11a   : > { %v2376_v26 = vpop.f32.mrf.mxu1  ;;  %v6572_v11 = vpop.f32.mrf.mxu0 }
 0x11b   : > { %v8293_v32 = vadd.f32 %v2360_v19, %v1978_v58  ;;  %v1981_v63 = vadd.f32 %v6572_v11, %v8273_v57 }
 0x11c   : > { %v6608_v6 = vpop.f32.mrf.mxu1  ;;  %v1918_v43 = vpop.f32.mrf.mxu0 }
 0x11d   : > { %10460 = vst [vmem:[#allocation8_spill] sm:$0xff] %v8293_v32  ;;  %v2426_v12 = vadd.f32 %v6604_v22, %v1981_v63  ;;  %v1979_v61 = vadd.f32 %v1918_v43, %v8281_v51 }
 0x11e   : > { %v2379_v27 = vpop.f32.mrf.mxu1  ;;  %v6575_v62 = vpop.f32.mrf.mxu0 }
 0x11f   : > { %v8297_v8 = vadd.f32 %v2363_v39, %v1979_v61  ;;  %v1984_v2 = vadd.f32 %v6575_v62, %v1460_v47 }
 0x120   : > { %v6611_v36 = vpop.f32.mrf.mxu1  ;;  %v1931_v28 = vpop.f32.mrf.mxu0 }
 0x121   : > { %10461 = vst [vmem:[#allocation9_spill] sm:$0xff] %v8297_v8  ;;  %v2429_v56 = vadd.f32 %v6607_v45, %v1984_v2  ;;  %v1982_v13 = vadd.f32 %v1931_v28, %v1452_v0 }
 0x122   : > { %v2392_v38 = vpop.f32.mrf.mxu1  ;;  %v6576_v24 = vpop.f32.mrf.mxu0 }
 0x123   : > { %v8299_v58 = vadd.f32 %v2376_v26, %v1982_v13  ;;  %v1985_v19 = vadd.f32 %v6576_v24, %v1463_v60 }
 0x124   : > { %v6612_v17 = vpop.f32.mrf.mxu1  ;;  %v1934_v11 = vpop.f32.mrf.mxu0 }
 0x125   : > { %10462 = vst [vmem:[#allocation10_spill] sm:$0xff] %v8299_v58  ;;  %v2430_v57 = vadd.f32 %v6608_v6, %v1985_v19  ;;  %v1983_v32 = vadd.f32 %v1934_v11, %v1455_v5 }
 0x126   : > { %v6579_v22 = vpop.f32.mrf.mxu0  ;;  %v2395_v63 = vpop.f32.mrf.mxu1 }
 0x127   : > { %v8301_v51 = vadd.f32 %v2379_v27, %v1983_v32  ;;  %v1988_v43 = vadd.f32 %v6579_v22, %v1476_v30 }
 0x128   : > { %v1947_v39 = vpop.f32.mrf.mxu0  ;;  %v6615_v8 = vpop.f32.mrf.mxu1 }
 0x129   : > { %10463 = vst [vmem:[#allocation11_spill] sm:$0xff] %v8301_v51  ;;  %v2433_v61 = vadd.f32 %v6611_v36, %v1988_v43  ;;  %v1986_v47 = vadd.f32 %v1947_v39, %v1468_v34 }
 0x12a   : > { %v6580_v62 = vpop.f32.mrf.mxu0  ;;  %v2408_v13 = vpop.f32.mrf.mxu1 }
 0x12b   : > { %v8303_v45 = vadd.f32 %v2392_v38, %v1986_v47  ;;  %v1989_v0 = vadd.f32 %v6580_v62, %v1479_v35 }
 0x12c   : > { %v1950_v2 = vpop.f32.mrf.mxu0  ;;  %v6616_v19 = vpop.f32.mrf.mxu1 }
 0x12d   : > { %10464 = vst [vmem:[#allocation12_spill] sm:$0xff] %v8303_v45  ;;  %v2434_v26 = vadd.f32 %v6612_v17, %v1989_v0  ;;  %v1987_v28 = vadd.f32 %v1950_v2, %v1471_v42 }
 0x12e   : > { %v6583_v60 = vpop.f32.mrf.mxu0  ;;  %v2411_v22 = vpop.f32.mrf.mxu1 }
 0x12f   : > { %v8305_v6 = vadd.f32 %v2395_v63, %v1987_v28  ;;  %v1992_v5 = vadd.f32 %v6583_v60, %v1492_v46 }
 0x130   : > { %v1963_v24 = vpop.f32.mrf.mxu0 }
 0x131   : > { %10465 = vst [vmem:[#allocation13_spill] sm:$0xff] %v8305_v6  ;;  %v2437_v32 = vadd.f32 %v6615_v8, %v1992_v5  ;;  %v1990_v27 = vadd.f32 %v1963_v24, %v1484_v4 }
 0x132   : > { %v6584_v30 = vpop.f32.mrf.mxu0 }
 0x133   : > { %v8307_v36 = vadd.f32 %v2408_v13, %v1990_v27  ;;  %v1993_v34 = vadd.f32 %v6584_v30, %v1495_v16 }
 0x134   : > { %v1966_v11 = vpop.f32.mrf.mxu0 }
 0x135   : > { %10466 = vst [vmem:[#allocation14_spill] sm:$0xff] %v8307_v36  ;;  %v8309_v38 = vadd.f32 %v6616_v19, %v1993_v34  ;;  %v1991_v35 = vadd.f32 %v1966_v11, %v1487_v37 }
 0x136   : > { %v6635_v17 = vpop.f32.mrf.mxu0 }
 0x137   : > { %v8311_v42 = vadd.f32 %v2411_v22, %v1991_v35  ;;  %v8313_v43 = vadd.f32 %v6635_v17, %v2425_v44 }
 0x138   : > { %v8315_v63 = vpop.f32.mrf.mxu0 }
 0x139   : > { %10467 = vst [vmem:[#allocation15_spill] sm:$0xff] %v8311_v42  ;;  %10468 = vst [vmem:[#allocation16_spill] sm:$0xff] %v8313_v43 }
 0x13a   : > { %10469 = vst [vmem:[#allocation17_spill] sm:$0xff] %v8315_v63  ;;  %v6636_v46 = vpop.f32.mrf.mxu0 }
 0x13b   : > { %v8317_v8 = vadd.f32 %v6636_v46, %v2426_v12  ;;  %v581_v47 = vpop.xlane.xlu0 %580 }
 0x13c   : > { %v8319_v4 = vpop.f32.mrf.mxu0  ;;  %v669_v62 = vmul.f32 0.33333334, %v581_v47 }
 0x13d   : > { %10470 = vst [vmem:[#allocation18_spill] sm:$0xff] %v8317_v8  ;;  %10471 = vst [vmem:[#allocation19_spill] sm:$0xff] %v8319_v4 }
 0x13e   : > { %v6639_v39 = vpop.f32.mrf.mxu0  ;;  %v699_v37 = vadd.f32 1e-05, %v669_v62 }
 0x13f   : > { %v8321_v16 = vadd.f32 %v6639_v39, %v2429_v56 }
 0x140   : > { %v8323_v0 = vpop.f32.mrf.mxu0  ;;  %6935 = vrsqrt.f32 %v699_v37  ;;  %v8329_v12 = vpop.xlane.xlu0 %586 }
 0x141   : > { %10472 = vst [vmem:[#allocation20_spill] sm:$0xff] %v8321_v16  ;;  %10473 = vst [vmem:[#allocation21_spill] sm:$0xff] %v8323_v0  ;;  %v584_v44 = vpop.xlane.xlu1 %583 }
 0x142   : > { %v6640_v2 = vpop.f32.mrf.mxu0  ;;  %v670_v60 = vmul.f32 0.33333334, %v584_v44 }
 0x143   : > { %v8325_v28 = vadd.f32 %v6640_v2, %v2430_v57 }
 0x144   : > { %v8327_v13 = vpop.f32.mrf.mxu0  ;;  %v700_v5 = vadd.f32 1e-05, %v670_v60 }
 0x145   : > { %10474 = vst [vmem:[#allocation22_spill] sm:$0xff] %v8325_v28  ;;  %10475 = vst [vmem:[#allocation23_spill] sm:$0xff] %v8327_v13 }
 0x146   : > { %6937 = vrsqrt.f32 %v700_v5  ;;  %v6643_v24 = vpop.f32.mrf.mxu0 }
 0x147   : > { %v8331_v27 = vadd.f32 %v6643_v24, %v2433_v61  ;;  %v8342_v61 = vld [vmem:[%s10370_s5] ss:$0 sm:$0xff] }
 0x148   : > { %v590_v56 = vpop.xlane.xlu1 %589  ;;  %v8333_v30 = vpop.f32.mrf.mxu0 }
 0x149   : > { %10476 = vst [vmem:[#allocation24_spill] sm:$0xff] %v8331_v27  ;;  %10477 = vst [vmem:[#allocation25_spill] sm:$0xff] %v8333_v30  ;;  %v672_v19 = vmul.f32 0.33333334, %v590_v56  ;;  %v593_v34 = vpop.xlane.xlu0 %592 }
 0x14a   : > { %v673_v11 = vmul.f32 0.33333334, %v593_v34  ;;  %v6644_v57 = vpop.f32.mrf.mxu0 }
 0x14b   : > { %v702_v35 = vadd.f32 1e-05, %v672_v19  ;;  %v8335_v22 = vadd.f32 %v6644_v57, %v2434_v26 }
 0x14c   : > { %v703_v17 = vadd.f32 1e-05, %v673_v11  ;;  %v8337_v46 = vpop.xlane.xlu1 %595  ;;  %v8344_v37 = vpop.f32.mrf.mxu0 }
 0x14d   : > { %10478 = vst [vmem:[#allocation26_spill] sm:$0xff] %v8335_v22  ;;  %v6936_v39 = vpop.eup %6935  ;;  %6939 = vrsqrt.f32 %v702_v35  ;;  %v599_v47 = vpop.xlane.xlu0 %598  ;;  %10479 = vst [vmem:[#allocation27_spill] sm:$0xff] %v8344_v37 }
 0x14e   : > { %6941 = vrsqrt.f32 %v703_v17  ;;  %v675_v62 = vmul.f32 0.33333334, %v599_v47  ;;  %v8347_v2 = vmul.f32 %v6936_v39, %v7861_v25 }
 0x150   : > { %v705_v26 = vadd.f32 1e-05, %v675_v62  ;;  %v828_v44 = vmul.f32 %v8342_v61, %v8347_v2  ;;  %v6647_v5 = vpop.f32.mrf.mxu0 }
 0x151   : > { %v8352_v34 = vadd.f32 %v6647_v5, %v2437_v32 }
 0x152   : > { %6943 = vrsqrt.f32 %v705_v26  ;;  %v602_v60 = vpop.xlane.xlu1 %601  ;;  %v844_v24 = vsel %vm396_vm0, %v828_v44, 0.0  ;;  %v8356_v57 = vpop.f32.mrf.mxu0 }
 0x153   : > { %v6938_v56 = vpop.eup %6937  ;;  %v676_v19 = vmul.f32 0.33333334, %v602_v60  ;;  %10480 = vst [vmem:[#allocation28_spill] sm:$0xff] %v8352_v34  ;;  %845 = vadd.xlane.f32.xlu0 %v844_v24  ;;  %10481 = vst [vmem:[#allocation29_spill] sm:$0xff] %v8356_v57 }
 0x154   : > { %v8354_v11 = vpop.xlane.xlu0 %604  ;;  %v8359_v25 = vmul.f32 %v6938_v56, %v7981_v23  ;;  %v6648_v62 = vpop.f32.mrf.mxu0 }
 0x155   : > { %v706_v35 = vadd.f32 1e-05, %v676_v19  ;;  %v8364_v32 = vadd.f32 %v6648_v62, %v8309_v38 }
 0x156   : > { %v608_v17 = vpop.xlane.xlu1 %607  ;;  %v829_v39 = vmul.f32 %v8342_v61, %v8359_v25 }
 0x157   : > { %6945 = vrsqrt.f32 %v706_v35  ;;  %v678_v47 = vmul.f32 0.33333334, %v608_v17  ;;  %10482 = vst [vmem:[#allocation30_spill] sm:$0xff] %v8364_v32 }
 0x158   : > { %v611_v26 = vpop.xlane.xlu0 %610  ;;  %v847_v44 = vsel %vm396_vm0, %v829_v39, 0.0 }
 0x159   : > { %v708_v60 = vadd.f32 1e-05, %v678_v47  ;;  %v679_v5 = vmul.f32 0.33333334, %v611_v26  ;;  %848 = vadd.xlane.f32.xlu1 %v847_v44 }
 0x15a   : > { %v6940_v24 = vpop.eup %6939  ;;  %v8367_v23 = vpop.xlane.xlu1 %613 }
 0x15b   : > { %v6942_v56 = vpop.eup %6941  ;;  %v8370_v19 = vmul.f32 %v6940_v24, %v8019_v29  ;;  %6947 = vrsqrt.f32 %v708_v60  ;;  %v709_v35 = vadd.f32 1e-05, %v679_v5 }
 0x15c   : > { %v8373_v17 = vmul.f32 %v6942_v56, %v8027_v52  ;;  %v617_v34 = vpop.xlane.xlu0 %616 }
 0x15d   : > { %10483 = vst [vmem:[#allocation31_spill] sm:$0xff] %v8370_v19  ;;  %6949 = vrsqrt.f32 %v709_v35  ;;  %v681_v38 = vmul.f32 0.33333334, %v617_v34  ;;  %v830_v39 = vmul.f32 %v8342_v61, %v8370_v19 }
 0x15e   : > { %10484 = vst [vmem:[#allocation32_spill] sm:$0xff] %v8373_v17  ;;  %v620_v62 = vpop.xlane.xlu1 %619  ;;  %v831_v47 = vmul.f32 %v8342_v61, %v8373_v17 }
 0x15f   : > { %v6944_v26 = vpop.eup %6943  ;;  %v711_v44 = vadd.f32 1e-05, %v681_v38  ;;  %v682_v32 = vmul.f32 0.33333334, %v620_v62  ;;  %v850_v52 = vsel %vm396_vm0, %v830_v39, 0.0 }
 0x160   : > { %v8380_v29 = vmul.f32 %v6944_v26, %v8044_v40  ;;  %v8382_v60 = vpop.xlane.xlu0 %622  ;;  %v853_v5 = vsel %vm396_vm0, %v831_v47, 0.0  ;;  %851 = vadd.xlane.f32.xlu0 %v850_v52 }
 0x161   : > { %6951 = vrsqrt.f32 %v711_v44  ;;  %v712_v34 = vadd.f32 1e-05, %v682_v32  ;;  %854 = vadd.xlane.f32.xlu1 %v853_v5 }
 0x162   : > { %10485 = vst [vmem:[#allocation33_spill] sm:$0xff] %v8380_v29  ;;  %v626_v24 = vpop.xlane.xlu1 %625  ;;  %v832_v56 = vmul.f32 %v8342_v61, %v8380_v29 }
 0x163   : > { %6953 = vrsqrt.f32 %v712_v34  ;;  %v684_v35 = vmul.f32 0.33333334, %v626_v24 }
 0x164   : > { %v6946_v38 = vpop.eup %6945  ;;  %v629_v62 = vpop.xlane.xlu0 %628  ;;  %v856_v40 = vsel %vm396_vm0, %v832_v56, 0.0 }
 0x165   : > { %v8390_v26 = vmul.f32 %v6946_v38, %v8094_v41  ;;  %v714_v39 = vadd.f32 1e-05, %v684_v35  ;;  %v685_v42 = vmul.f32 0.33333334, %v629_v62  ;;  %857 = vadd.xlane.f32.xlu0 %v856_v40 }
 0x166   : > { %v8392_v47 = vpop.xlane.xlu1 %631 }
 0x167   : > { %10486 = vst [vmem:[#allocation34_spill] sm:$0xff] %v8390_v26  ;;  %6955 = vrsqrt.f32 %v714_v39  ;;  %v715_v32 = vadd.f32 1e-05, %v685_v42  ;;  %v833_v5 = vmul.f32 %v8342_v61, %v8390_v26 }
 0x168   : > { %v6948_v44 = vpop.eup %6947  ;;  %v635_v52 = vpop.xlane.xlu0 %634 }
 0x169   : > { %v8397_v34 = vmul.f32 %v6948_v44, %v8110_v18  ;;  %6957 = vrsqrt.f32 %v715_v32  ;;  %v687_v24 = vmul.f32 0.33333334, %v635_v52  ;;  %v859_v35 = vsel %vm396_vm0, %v833_v5, 0.0 }
 0x16a   : > { %v6950_v56 = vpop.eup %6949  ;;  %v638_v41 = vpop.xlane.xlu1 %637  ;;  %860 = vadd.xlane.f32.xlu1 %v859_v35  ;;  %v671_v32 = vmul.f32 0.33333334, %v8329_v12 }
 0x16b   : > { %10487 = vst [vmem:[#allocation35_spill] sm:$0xff] %v8397_v34  ;;  %v8401_v38 = vmul.f32 %v6950_v56, %v8120_v59  ;;  %v717_v62 = vadd.f32 1e-05, %v687_v24  ;;  %v688_v40 = vmul.f32 0.33333334, %v638_v41  ;;  %v834_v39 = vmul.f32 %v8342_v61, %v8397_v34 }
 0x16c   : > { %v8403_v42 = vpop.xlane.xlu0 %640 }
 0x16d   : > { %10488 = vst [vmem:[#allocation36_spill] sm:$0xff] %v8401_v38  ;;  %6959 = vrsqrt.f32 %v717_v62  ;;  %v718_v18 = vadd.f32 1e-05, %v688_v40  ;;  %v862_v22 = vsel %vm396_vm0, %v834_v39, 0.0  ;;  %v835_v59 = vmul.f32 %v8342_v61, %v8401_v38 }
 0x16e   : > { %v6952_v44 = vpop.eup %6951  ;;  %v644_v52 = vpop.xlane.xlu1 %643  ;;  %863 = vadd.xlane.f32.xlu0 %v862_v22  ;;  %v701_v39 = vadd.f32 1e-05, %v671_v32 }
 0x16f   : > { %v8412_v5 = vmul.f32 %v6952_v44, %v8166_v10  ;;  %6961 = vrsqrt.f32 %v718_v18  ;;  %v690_v24 = vmul.f32 0.33333334, %v644_v52  ;;  %v865_v41 = vsel %vm396_vm0, %v835_v59, 0.0 }
 0x170   : > { %v6954_v56 = vpop.eup %6953  ;;  %v647_v35 = vpop.xlane.xlu0 %646  ;;  %866 = vadd.xlane.f32.xlu1 %v865_v41  ;;  %v674_v18 = vmul.f32 0.33333334, %v8337_v46  ;;  %v677_v41 = vmul.f32 0.33333334, %v8354_v11 }
 0x171   : > { %10489 = vst [vmem:[#allocation37_spill] sm:$0xff] %v8412_v5  ;;  %v8416_v62 = vmul.f32 %v6954_v56, %v8169_v1  ;;  %v720_v12 = vadd.f32 1e-05, %v690_v24  ;;  %v691_v40 = vmul.f32 0.33333334, %v647_v35  ;;  %v836_v57 = vmul.f32 %v8342_v61, %v8412_v5 }
 0x172   : > { %v704_v56 = vadd.f32 1e-05, %v674_v18  ;;  %v680_v18 = vmul.f32 0.33333334, %v8367_v23 }
 0x173   : > { %10490 = vst [vmem:[#allocation38_spill] sm:$0xff] %v8416_v62  ;;  %6963 = vrsqrt.f32 %v720_v12  ;;  %v721_v10 = vadd.f32 1e-05, %v691_v40  ;;  %v868_v22 = vsel %vm396_vm0, %v836_v57, 0.0  ;;  %v837_v52 = vmul.f32 %v8342_v61, %v8416_v62 }
 0x174   : > { %v6956_v44 = vpop.eup %6955  ;;  %869 = vadd.xlane.f32.xlu0 %v868_v22 }
 0x175   : > { %v8425_v1 = vmul.f32 %v6956_v44, %v8183_v3  ;;  %6965 = vrsqrt.f32 %v721_v10  ;;  %v871_v32 = vsel %vm396_vm0, %v837_v52, 0.0  ;;  %v707_v10 = vadd.f32 1e-05, %v677_v41 }
 0x176   : > { %v6958_v59 = vpop.eup %6957  ;;  %6967 = vrsqrt.f32 %v701_v39  ;;  %872 = vadd.xlane.f32.xlu1 %v871_v32  ;;  %v8457_v32 = vld [vmem:[%s10370_s5 + $0x1] ss:$0 sm:$0xff]  ;;  %v683_v41 = vmul.f32 0.33333334, %v8382_v60 }
 0x177   : > { %10491 = vst [vmem:[#allocation39_spill] sm:$0xff] %v8425_v1  ;;  %v8429_v24 = vmul.f32 %v6958_v59, %v8191_v20  ;;  %v838_v46 = vmul.f32 %v8342_v61, %v8425_v1  ;;  %6969 = vrsqrt.f32 %v704_v56 }
 0x178   : > { %6971 = vrsqrt.f32 %v707_v10 }
 0x179   : > { %10492 = vst [vmem:[#allocation40_spill] sm:$0xff] %v8429_v24  ;;  %v874_v3 = vsel %vm396_vm0, %v838_v46, 0.0  ;;  %v839_v35 = vmul.f32 %v8342_v61, %v8429_v24  ;;  %v710_v46 = vadd.f32 1e-05, %v680_v18 }
 0x17a   : > { %v6960_v57 = vpop.eup %6959  ;;  %875 = vadd.xlane.f32.xlu0 %v874_v3 }
 0x17b   : > { %v8438_v12 = vmul.f32 %v6960_v57, %v8205_v7  ;;  %v877_v20 = vsel %vm396_vm0, %v839_v35, 0.0  ;;  %v1506_v57 = vmul.f32 %v8457_v32, %v8347_v2  ;;  %6973 = vrsqrt.f32 %v710_v46 }
 0x17c   : > { %v6962_v40 = vpop.eup %6961  ;;  %878 = vadd.xlane.f32.xlu1 %v877_v20  ;;  %v1507_v20 = vmul.f32 %v8457_v32, %v8359_v25 }
 0x17d   : > { %10493 = vst [vmem:[#allocation41_spill] sm:$0xff] %v8438_v12  ;;  %v8442_v39 = vmul.f32 %v6962_v40, %v8210_v33  ;;  %v840_v11 = vmul.f32 %v8342_v61, %v8438_v12  ;;  %v1531_v60 = vsel %vm1530_vm8, %v1506_v57, 0.0 }
 0x17e   : > { %v1534_v18 = vsel %vm396_vm0, %v1507_v20, 0.0  ;;  %v650_v20 = vpop.xlane.xlu1 %649 }
 0x17f   : > { %10494 = vst [vmem:[#allocation42_spill] sm:$0xff] %v8442_v39  ;;  %v880_v22 = vsel %vm396_vm0, %v840_v11, 0.0  ;;  %v841_v7 = vmul.f32 %v8342_v61, %v8442_v39  ;;  %v713_v11 = vadd.f32 1e-05, %v683_v41  ;;  %v1512_v41 = vmul.f32 %v8457_v32, %v8380_v29 }
 0x180   : > { %v6964_v44 = vpop.eup %6963  ;;  %881 = vadd.xlane.f32.xlu0 %v880_v22  ;;  %v1509_v22 = vmul.f32 %v8457_v32, %v8370_v19 }
 0x181   : > { %v8451_v52 = vmul.f32 %v6964_v44, %v8222_v53  ;;  %v883_v33 = vsel %vm396_vm0, %v841_v7, 0.0  ;;  %6975 = vrsqrt.f32 %v713_v11 }
 0x182   : > { %v6966_v59 = vpop.eup %6965  ;;  %884 = vadd.xlane.f32.xlu1 %v883_v33 }
 0x183   : > { %10495 = vst [vmem:[#allocation43_spill] sm:$0xff] %v8451_v52  ;;  %v6968_v56 = vpop.eup %6967  ;;  %v8460_v23 = vmul.f32 %v6966_v59, %v8228_v21  ;;  %v842_v53 = vmul.f32 %v8342_v61, %v8451_v52  ;;  %v1510_v59 = vmul.f32 %v8457_v32, %v8373_v17 }
 0x184   : > { %v8471_v40 = vmul.f32 %v6968_v56, %v7965_v9  ;;  %v6970_v10 = vpop.eup %6969 }
 0x185   : > { %10496 = vst [vmem:[#allocation44_spill] sm:$0xff] %v8460_v23  ;;  %v886_v3 = vsel %vm396_vm0, %v842_v53, 0.0  ;;  %v843_v35 = vmul.f32 %v8342_v61, %v8460_v23  ;;  %v8480_v9 = vmul.f32 %v6970_v10, %v8039_v14  ;;  %v686_v61 = vmul.f32 0.33333334, %v8392_v47  ;;  %v6972_v33 = vpop.eup %6971 }
 0x186   : > { %887 = vadd.xlane.f32.xlu0 %v886_v3  ;;  %v1508_v44 = vmul.f32 %v8457_v32, %v8471_v40  ;;  %v1541_v14 = vsel %vm1530_vm8, %v1509_v22, 0.0  ;;  %v8493_v46 = vmul.f32 %v6972_v33, %v8103_v55  ;;  %v689_v53 = vmul.f32 0.33333334, %v8403_v42 }
 0x187   : > { %v889_v21 = vsel %vm396_vm0, %v843_v35, 0.0  ;;  %10497 = vst [vmem:[#allocation45_spill] sm:$0xff] %v8480_v9  ;;  %v716_v56 = vadd.f32 1e-05, %v686_v61  ;;  %v1511_v47 = vmul.f32 %v8457_v32, %v8480_v9  ;;  %v1544_v57 = vsel %vm396_vm0, %v1510_v59, 0.0 }
 0x188   : > { %890 = vadd.xlane.f32.xlu1 %v889_v21  ;;  %v1538_v7 = vsel %vm1537_vm9, %v1508_v44, 0.0  ;;  %10498 = vst [vmem:[#allocation46_spill] sm:$0xff] %v8493_v46  ;;  %v1513_v35 = vmul.f32 %v8457_v32, %v8390_v26  ;;  %v6974_v21 = vpop.eup %6973  ;;  %v719_v10 = vadd.f32 1e-05, %v689_v53  ;;  %v1550_v55 = vsel %vm1530_vm8, %v1512_v41, 0.0 }
 0x189   : > { %6977 = vrsqrt.f32 %v716_v56  ;;  %v1547_v3 = vsel %vm1537_vm9, %v1511_v47, 0.0  ;;  %v1514_v42 = vmul.f32 %v8457_v32, %v8493_v46  ;;  %v8506_v11 = vmul.f32 %v6974_v21, %v8150_v31 }
 0x18a   : > { %1532 = vadd.xlane.f32.xlu0 %v1531_v60  ;;  %v692_v60 = vmul.f32 0.33333334, %v650_v20  ;;  %v1553_v44 = vsel %vm396_vm0, %v1513_v35, 0.0  ;;  %v1515_v61 = vmul.f32 %v8457_v32, %v8397_v34  ;;  %6979 = vrsqrt.f32 %v719_v10 }
 0x18b   : > { %10499 = vst [vmem:[#allocation47_spill] sm:$0xff] %v8506_v11  ;;  %v1516_v22 = vmul.f32 %v8457_v32, %v8401_v38  ;;  %v1517_v31 = vmul.f32 %v8457_v32, %v8506_v11  ;;  %v1518_v47 = vmul.f32 %v8457_v32, %v8412_v5  ;;  %v1521_v20 = vmul.f32 %v8457_v32, %v8425_v1 }
 0x18c   : > { %1535 = vadd.xlane.f32.xlu1 %v1534_v18  ;;  %v1556_v18 = vsel %vm1537_vm9, %v1514_v42, 0.0  ;;  %v722_v59 = vadd.f32 1e-05, %v692_v60  ;;  %v1559_v33 = vsel %vm1530_vm8, %v1515_v61, 0.0 }
 0x18d   : > { %v1565_v53 = vsel %vm1537_vm9, %v1517_v31, 0.0  ;;  %v1577_v60 = vsel %vm1530_vm8, %v1521_v20, 0.0 }
 0x18e   : > { %1539 = vadd.xlane.f32.xlu0 %v1538_v7  ;;  %v6976_v7 = vpop.eup %6975  ;;  %6981 = vrsqrt.f32 %v722_v59 }
 0x18f   : > { %v8518_v56 = vmul.f32 %v6976_v7, %v8175_v49  ;;  %v1525_v7 = vmul.f32 %v8457_v32, %v8442_v39 }
 0x190   : > { %1542 = vadd.xlane.f32.xlu1 %v1541_v14  ;;  %v1562_v14 = vsel %vm396_vm0, %v1516_v22, 0.0 }
 0x191   : > { %10500 = vst [vmem:[#allocation48_spill] sm:$0xff] %v8518_v56  ;;  %v1520_v49 = vmul.f32 %v8457_v32, %v8518_v56 }
 0x192   : > { %1545 = vadd.xlane.f32.xlu0 %v1544_v57  ;;  %v1519_v57 = vmul.f32 %v8457_v32, %v8416_v62 }
 0x193   : > { %v1574_v10 = vsel %vm1537_vm9, %v1520_v49, 0.0 }
 0x194   : > { %1548 = vadd.xlane.f32.xlu1 %v1547_v3  ;;  %v1568_v3 = vsel %vm1530_vm8, %v1518_v47, 0.0  ;;  %v1571_v21 = vsel %vm396_vm0, %v1519_v57, 0.0  ;;  %v1527_v47 = vmul.f32 %v8457_v32, %v8451_v52  ;;  %v1528_v57 = vmul.f32 %v8457_v32, %v8460_v23 }
 0x196   : > { %1551 = vadd.xlane.f32.xlu0 %v1550_v55  ;;  %v6978_v41 = vpop.eup %6977  ;;  %v1522_v55 = vmul.f32 %v8457_v32, %v8429_v24  ;;  %v1598_v49 = vsel %vm396_vm0, %v1528_v57, 0.0 }
 0x197   : > { %v8530_v35 = vmul.f32 %v6978_v41, %v8197_v50  ;;  %v6980_v42 = vpop.eup %6979  ;;  %v8565_v41 = vld [vmem:[%s10370_s5 + $0x2] ss:$0 sm:$0xff] }
 0x198   : > { %1554 = vadd.xlane.f32.xlu1 %v1553_v44  ;;  %v8542_v50 = vmul.f32 %v6980_v42, %v8217_v15  ;;  %v1580_v61 = vsel %vm396_vm0, %v1522_v55, 0.0  ;;  %v2004_v42 = vmul.f32 %v8565_v41, %v8471_v40 }
 0x199   : > { %10501 = vst [vmem:[#allocation49_spill] sm:$0xff] %v8530_v35  ;;  %v1523_v44 = vmul.f32 %v8457_v32, %v8530_v35 }
 0x19a   : > { %1557 = vadd.xlane.f32.xlu0 %v1556_v18  ;;  %10502 = vst [vmem:[#allocation50_spill] sm:$0xff] %v8542_v50  ;;  %v1524_v18 = vmul.f32 %v8457_v32, %v8438_v12  ;;  %v1526_v31 = vmul.f32 %v8457_v32, %v8542_v50 }
 0x19b   : > { %v1583_v22 = vsel %vm1537_vm9, %v1523_v44, 0.0  ;;  %v6982_v59 = vpop.eup %6981  ;;  %v2006_v44 = vmul.f32 %v8565_v41, %v8373_v17 }
 0x19c   : > { %1560 = vadd.xlane.f32.xlu1 %v1559_v33  ;;  %v1586_v33 = vsel %vm1530_vm8, %v1524_v18, 0.0  ;;  %v8554_v15 = vmul.f32 %v6982_v59, %v8234_v54  ;;  %v1595_v54 = vsel %vm1530_vm8, %v1527_v47, 0.0  ;;  %v2008_v18 = vmul.f32 %v8565_v41, %v8380_v29 }
 0x19d   : > { %v2039_v40 = vsel %vm396_vm0, %v2006_v44, 0.0 }
 0x19e   : > { %1563 = vadd.xlane.f32.xlu0 %v1562_v14  ;;  %10503 = vst [vmem:[#allocation51_spill] sm:$0xff] %v8554_v15  ;;  %v1589_v14 = vsel %vm396_vm0, %v1525_v7, 0.0  ;;  %v2009_v7 = vmul.f32 %v8565_v41, %v8390_v26  ;;  %v2045_v59 = vsel %vm2026_vm10, %v2008_v18, 0.0 }
 0x1a0   : > { %1566 = vadd.xlane.f32.xlu1 %v1565_v53  ;;  %v1592_v53 = vsel %vm1537_vm9, %v1526_v31, 0.0  ;;  %v2048_v31 = vsel %vm396_vm0, %v2009_v7, 0.0  ;;  %v653_v7 = vpop.xlane.xlu0 %652 }
 0x1a2   : > { %1569 = vadd.xlane.f32.xlu0 %v1568_v3  ;;  %v1529_v3 = vmul.f32 %v8457_v32, %v8554_v15 }
 0x1a4   : > { %1572 = vadd.xlane.f32.xlu1 %v1571_v21  ;;  %v2002_v21 = vmul.f32 %v8565_v41, %v8347_v2  ;;  %v1601_v20 = vsel %vm1537_vm9, %v1529_v3, 0.0  ;;  %v2033_v2 = vsel %vm403_vm1, %v2004_v42, 0.0 }
 0x1a6   : > { %1575 = vadd.xlane.f32.xlu0 %v1574_v10  ;;  %v2003_v10 = vmul.f32 %v8565_v41, %v8359_v25  ;;  %v2027_v55 = vsel %vm2026_vm10, %v2002_v21, 0.0 }
 0x1a8   : > { %1578 = vadd.xlane.f32.xlu1 %v1577_v60  ;;  %v2030_v32 = vsel %vm396_vm0, %v2003_v10, 0.0  ;;  %v2005_v60 = vmul.f32 %v8565_v41, %v8370_v19 }
 0x1aa   : > { %1581 = vadd.xlane.f32.xlu0 %v1580_v61  ;;  %v2036_v25 = vsel %vm2026_vm10, %v2005_v60, 0.0  ;;  %v2007_v61 = vmul.f32 %v8565_v41, %v8480_v9 }
 0x1ac   : > { %1584 = vadd.xlane.f32.xlu1 %v1583_v22  ;;  %v2042_v22 = vsel %vm403_vm1, %v2007_v61, 0.0 }
 0x1ae   : > { %1587 = vadd.xlane.f32.xlu0 %v1586_v33  ;;  %v2010_v33 = vmul.f32 %v8565_v41, %v8493_v46 }
 0x1b0   : > { %1590 = vadd.xlane.f32.xlu1 %v1589_v14  ;;  %v2011_v14 = vmul.f32 %v8565_v41, %v8397_v34  ;;  %v2051_v47 = vsel %vm403_vm1, %v2010_v33, 0.0 }
 0x1b2   : > { %1593 = vadd.xlane.f32.xlu0 %v1592_v53  ;;  %v2012_v53 = vmul.f32 %v8565_v41, %v8401_v38  ;;  %v2054_v57 = vsel %vm2026_vm10, %v2011_v14, 0.0 }
 0x1b4   : > { %1596 = vadd.xlane.f32.xlu1 %v1595_v54  ;;  %v2013_v54 = vmul.f32 %v8565_v41, %v8506_v11  ;;  %v2057_v3 = vsel %vm396_vm0, %v2012_v53, 0.0 }
 0x1b6   : > { %1599 = vadd.xlane.f32.xlu0 %v1598_v49  ;;  %v2014_v49 = vmul.f32 %v8565_v41, %v8412_v5  ;;  %v2060_v21 = vsel %vm403_vm1, %v2013_v54, 0.0  ;;  %v8642_v54 = vld [vmem:[%s10370_s5 + $0x3] ss:$0 sm:$0xff] }
 0x1b8   : > { %1602 = vadd.xlane.f32.xlu1 %v1601_v20  ;;  %v2015_v20 = vmul.f32 %v8565_v41, %v8416_v62  ;;  %v2063_v10 = vsel %vm2026_vm10, %v2014_v49, 0.0 }
 0x1ba   : > { %2028 = vadd.xlane.f32.xlu0 %v2027_v55  ;;  %v2016_v55 = vmul.f32 %v8565_v41, %v8518_v56  ;;  %v2066_v42 = vsel %vm396_vm0, %v2015_v20, 0.0  ;;  %v2025_v20 = vmul.f32 %v8565_v41, %v8554_v15 }
 0x1bc   : > { %2031 = vadd.xlane.f32.xlu1 %v2030_v32  ;;  %v2017_v32 = vmul.f32 %v8565_v41, %v8425_v1  ;;  %v2069_v60 = vsel %vm403_vm1, %v2016_v55, 0.0 }
 0x1be   : > { %2034 = vadd.xlane.f32.xlu0 %v2033_v2  ;;  %v2018_v2 = vmul.f32 %v8565_v41, %v8429_v24  ;;  %v2072_v44 = vsel %vm2026_vm10, %v2017_v32, 0.0 }
 0x1c0   : > { %2037 = vadd.xlane.f32.xlu1 %v2036_v25  ;;  %v2019_v25 = vmul.f32 %v8565_v41, %v8530_v35  ;;  %v2075_v61 = vsel %vm396_vm0, %v2018_v2, 0.0  ;;  %v2448_v2 = vmul.f32 %v8642_v54, %v8373_v17 }
 0x1c2   : > { %2040 = vadd.xlane.f32.xlu0 %v2039_v40  ;;  %v2020_v40 = vmul.f32 %v8565_v41, %v8438_v12  ;;  %v2078_v18 = vsel %vm403_vm1, %v2019_v25, 0.0 }
 0x1c4   : > { %2043 = vadd.xlane.f32.xlu1 %v2042_v22  ;;  %v2021_v22 = vmul.f32 %v8565_v41, %v8442_v39  ;;  %v2081_v33 = vsel %vm2026_vm10, %v2020_v40, 0.0  ;;  %v2449_v40 = vmul.f32 %v8642_v54, %v8380_v29 }
 0x1c6   : > { %2046 = vadd.xlane.f32.xlu0 %v2045_v59  ;;  %v656_v59 = vpop.xlane.xlu1 %655  ;;  %v2084_v14 = vsel %vm396_vm0, %v2021_v22, 0.0  ;;  %v2466_v22 = vsel %vm396_vm0, %v2448_v2, 0.0 }
 0x1c7   : > { %v694_v32 = vmul.f32 0.33333334, %v656_v59 }
 0x1c8   : > { %2049 = vadd.xlane.f32.xlu1 %v2048_v31  ;;  %v2022_v31 = vmul.f32 %v8565_v41, %v8542_v50 }
 0x1ca   : > { %2052 = vadd.xlane.f32.xlu0 %v2051_v47  ;;  %v2023_v47 = vmul.f32 %v8565_v41, %v8451_v52  ;;  %v2087_v53 = vsel %vm403_vm1, %v2022_v31, 0.0  ;;  %v8646_v49 = vpop.xlane.xlu1 %661  ;;  %v2469_v31 = vsel %vm396_vm0, %v2449_v40, 0.0  ;;  %v2456_v40 = vmul.f32 %v8642_v54, %v8429_v24 }
 0x1cc   : > { %2055 = vadd.xlane.f32.xlu1 %v2054_v57  ;;  %v2024_v57 = vmul.f32 %v8565_v41, %v8460_v23 }
 0x1ce   : > { %2058 = vadd.xlane.f32.xlu0 %v2057_v3  ;;  %v8644_v3 = vpop.xlane.xlu0 %658  ;;  %v2093_v55 = vsel %vm396_vm0, %v2024_v57, 0.0 }
 0x1d0   : > { %2061 = vadd.xlane.f32.xlu1 %v2060_v21  ;;  %v2090_v21 = vsel %vm2026_vm10, %v2023_v47, 0.0 }
 0x1d2   : > { %2064 = vadd.xlane.f32.xlu0 %v2063_v10  ;;  %v693_v10 = vmul.f32 0.33333334, %v653_v7  ;;  %v8657_v25 = vpop.xlane.xlu0 %664  ;;  %v2450_v7 = vmul.f32 %v8642_v54, %v8390_v26 }
 0x1d4   : > { %2067 = vadd.xlane.f32.xlu1 %v2066_v42  ;;  %v2447_v42 = vmul.f32 %v8642_v54, %v8370_v19  ;;  %v2472_v47 = vsel %vm396_vm0, %v2450_v7, 0.0 }
 0x1d6   : > { %2070 = vadd.xlane.f32.xlu0 %v2069_v60  ;;  %v2096_v60 = vsel %vm403_vm1, %v2025_v20, 0.0  ;;  %v2463_v41 = vsel %vm396_vm0, %v2447_v42, 0.0  ;;  %v2453_v20 = vmul.f32 %v8642_v54, %v8412_v5  ;;  %v2454_v42 = vmul.f32 %v8642_v54, %v8416_v62 }
 0x1d8   : > { %2073 = vadd.xlane.f32.xlu1 %v2072_v44  ;;  %v723_v44 = vadd.f32 1e-05, %v693_v10 }
 0x1da   : > { %2076 = vadd.xlane.f32.xlu0 %v2075_v61  ;;  %v8659_v61 = vpop.xlane.xlu1 %667  ;;  %6983 = vrsqrt.f32 %v723_v44 }
 0x1db   : > { %10504 = vst [vmem:[#allocation52_spill] sm:$0xff] %v8659_v61 }
 0x1dc   : > { %2079 = vadd.xlane.f32.xlu1 %v2078_v18  ;;  %v724_v18 = vadd.f32 1e-05, %v694_v32  ;;  %v8667_v59 = vpop.xlane.xlu0 %845  ;;  %v2481_v32 = vsel %vm396_vm0, %v2453_v20, 0.0 }
 0x1de   : > { %2082 = vadd.xlane.f32.xlu0 %v2081_v33  ;;  %6985 = vrsqrt.f32 %v724_v18 }
 0x1e0   : > { %2085 = vadd.xlane.f32.xlu1 %v2084_v14  ;;  %v2451_v14 = vmul.f32 %v8642_v54, %v8397_v34 }
 0x1e2   : > { %2088 = vadd.xlane.f32.xlu0 %v2087_v53  ;;  %v8669_v33 = vpop.xlane.xlu1 %848  ;;  %v2452_v53 = vmul.f32 %v8642_v54, %v8401_v38 }
 0x1e4   : > { %2091 = vadd.xlane.f32.xlu1 %v2090_v21  ;;  %v2475_v21 = vsel %vm396_vm0, %v2451_v14, 0.0  ;;  %v2490_v14 = vsel %vm396_vm0, %v2456_v40, 0.0  ;;  %v2460_v40 = vmul.f32 %v8642_v54, %v8460_v23 }
 0x1e6   : > { %2094 = vadd.xlane.f32.xlu0 %v2093_v55  ;;  %v2478_v55 = vsel %vm396_vm0, %v2452_v53, 0.0 }
 0x1e7   : > { %v6984_v7 = vpop.eup %6983 }
 0x1e8   : > { %2097 = vadd.xlane.f32.xlu1 %v2096_v60  ;;  %v2455_v60 = vmul.f32 %v8642_v54, %v8425_v1 }
 0x1e9   : > { %v8677_v57 = vpop.xlane.xlu0 %851 }
 0x1ea   : > { %2464 = vadd.xlane.f32.xlu0 %v2463_v41  ;;  %v8682_v10 = vpop.xlane.xlu1 %854  ;;  %v2484_v41 = vsel %vm396_vm0, %v2454_v42, 0.0  ;;  %v2487_v18 = vsel %vm396_vm0, %v2455_v60, 0.0  ;;  %v2459_v42 = vmul.f32 %v8642_v54, %v8451_v52 }
 0x1eb   : > { %v6986_v53 = vpop.eup %6985 }
 0x1ec   : > { %2467 = vadd.xlane.f32.xlu1 %v2466_v22  ;;  %v2457_v22 = vmul.f32 %v8642_v54, %v8438_v12 }
 0x1ee   : > { %2470 = vadd.xlane.f32.xlu0 %v2469_v31  ;;  %v8690_v2 = vpop.xlane.xlu0 %857 }
 0x1f0   : > { %2473 = vadd.xlane.f32.xlu1 %v2472_v47  ;;  %v2458_v47 = vmul.f32 %v8642_v54, %v8442_v39 }
 0x1f2   : > { %2476 = vadd.xlane.f32.xlu0 %v2475_v21  ;;  %v8706_v21 = vmul.f32 %v6984_v7, %v8243_v48  ;;  %v2499_v7 = vsel %vm396_vm0, %v2459_v42, 0.0 }
 0x1f3   : > { %v8692_v44 = vpop.xlane.xlu1 %860 }
 0x1f4   : > { %2479 = vadd.xlane.f32.xlu1 %v2478_v55  ;;  %10505 = vst [vmem:[#allocation53_spill] sm:$0xff] %v8706_v21  ;;  %v2493_v55 = vsel %vm396_vm0, %v2457_v22, 0.0  ;;  %v2461_v22 = vmul.f32 %v8642_v54, %v8706_v21 }
 0x1f6   : > { %2482 = vadd.xlane.f32.xlu0 %v2481_v32  ;;  %v10506_v32 = vld [vmem:[#allocation3_spill] sm:$0xff] }
 0x1f7   : > { %v8700_v31 = vpop.xlane.xlu0 %863  ;;  %v8714_v60 = vmul.f32 %v6986_v53, %v10506_v32  ;;  %v2505_v32 = vsel %vm396_vm0, %v2461_v22, 0.0 }
 0x1f8   : > { %2485 = vadd.xlane.f32.xlu1 %v2484_v41  ;;  %v2496_v41 = vsel %vm396_vm0, %v2458_v47, 0.0  ;;  %v2502_v47 = vsel %vm396_vm0, %v2460_v40, 0.0 }
 0x1f9   : > { %v8708_v20 = vpop.xlane.xlu1 %866  ;;  %10507 = vst [vmem:[#allocation3_spill] sm:$0xff] %v8714_v60  ;;  %v2462_v53 = vmul.f32 %v8642_v54, %v8714_v60 }
 0x1fa   : > { %2488 = vadd.xlane.f32.xlu0 %v2487_v18 }
 0x1fc   : > { %2491 = vadd.xlane.f32.xlu1 %v2490_v14  ;;  %v8729_v14 = vld [vmem:[%s10370_s5 + $0x4] ss:$0 sm:$0xff] }
 0x1fd   : > { %v8719_v18 = vpop.xlane.xlu0 %869  ;;  %v2961_v42 = vmul.f32 %v8729_v14, %v8370_v19  ;;  %v2962_v36 = vmul.f32 %v8729_v14, %v8373_v17  ;;  %v2963_v54 = vmul.f32 %v8729_v14, %v8480_v9  ;;  %v2970_v13 = vmul.f32 %v8729_v14, %v8412_v5 }
 0x1fe   : > { %2494 = vadd.xlane.f32.xlu0 %v2493_v55  ;;  %v2973_v0 = vmul.f32 %v8729_v14, %v8425_v1 }
 0x1ff   : > { %v8721_v48 = vpop.xlane.xlu1 %872  ;;  %v2985_v40 = vsel %vm1530_vm8, %v2961_v42, 0.0  ;;  %v2988_v22 = vsel %vm396_vm0, %v2962_v36, 0.0 }
 0x200   : > { %2497 = vadd.xlane.f32.xlu1 %v2496_v41 }
 0x202   : > { %2500 = vadd.xlane.f32.xlu0 %v2499_v7  ;;  %v2508_v7 = vsel %vm396_vm0, %v2462_v53, 0.0  ;;  %v2991_v53 = vsel %vm1537_vm9, %v2963_v54, 0.0 }
 0x203   : > { %v8734_v55 = vpop.xlane.xlu0 %875 }
 0x204   : > { %2503 = vadd.xlane.f32.xlu1 %v2502_v47 }
 0x205   : > { %v8739_v41 = vpop.xlane.xlu1 %878 }
 0x206   : > { %2506 = vadd.xlane.f32.xlu0 %v2505_v32  ;;  %v2964_v32 = vmul.f32 %v8729_v14, %v8380_v29 }
 0x208   : > { %2509 = vadd.xlane.f32.xlu1 %v2508_v7  ;;  %v2965_v7 = vmul.f32 %v8729_v14, %v8390_v26  ;;  %v2994_v42 = vsel %vm1530_vm8, %v2964_v32, 0.0  ;;  %v2968_v32 = vmul.f32 %v8729_v14, %v8401_v38 }
 0x209   : > { %v8747_v47 = vpop.xlane.xlu0 %881 }
 0x20a   : > { %2986 = vadd.xlane.f32.xlu0 %v2985_v40  ;;  %v2966_v40 = vmul.f32 %v8729_v14, %v8493_v46  ;;  %v2997_v6 = vsel %vm396_vm0, %v2965_v7, 0.0  ;;  %v695_v7 = vmul.f32 0.33333334, %v8644_v3 }
 0x20b   : > { %v8750_v27 = vpop.xlane.xlu1 %884 }
 0x20c   : > { %2989 = vadd.xlane.f32.xlu1 %v2988_v22  ;;  %v2967_v22 = vmul.f32 %v8729_v14, %v8397_v34  ;;  %v3000_v54 = vsel %vm1537_vm9, %v2966_v40, 0.0  ;;  %v725_v3 = vadd.f32 1e-05, %v695_v7  ;;  %v2974_v7 = vmul.f32 %v8729_v14, %v8429_v24 }
 0x20e   : > { %2992 = vadd.xlane.f32.xlu0 %v2991_v53  ;;  %v3003_v45 = vsel %vm1530_vm8, %v2967_v22, 0.0  ;;  %6987 = vrsqrt.f32 %v725_v3  ;;  %v3024_v3 = vsel %vm396_vm0, %v2974_v7, 0.0 }
 0x20f   : > { %v8758_v37 = vpop.xlane.xlu0 %887 }
 0x210   : > { %2995 = vadd.xlane.f32.xlu1 %v2994_v42  ;;  %v2969_v42 = vmul.f32 %v8729_v14, %v8506_v11 }
 0x211   : > { %v8762_v36 = vpop.xlane.xlu1 %890 }
 0x212   : > { %2998 = vadd.xlane.f32.xlu0 %v2997_v6  ;;  %v3006_v6 = vsel %vm396_vm0, %v2968_v32, 0.0  ;;  %v3009_v51 = vsel %vm1537_vm9, %v2969_v42, 0.0  ;;  %v3012_v32 = vsel %vm1530_vm8, %v2970_v13, 0.0 }
 0x213   : > { %v1533_v28 = vpop.xlane.xlu0 %1532 }
 0x214   : > { %3001 = vadd.xlane.f32.xlu1 %v3000_v54  ;;  %v1629_v53 = vrot.slane %v1533_v28, 1 }
 0x215   : > { %v1536_v30 = vpop.xlane.xlu1 %1535 }
 0x216   : > { %v1630_v16 = vrot.slane %v1536_v30, 1  ;;  %3004 = vadd.xlane.f32.xlu0 %v3003_v45  ;;  %v2971_v45 = vmul.f32 %v8729_v14, %v8416_v62 }
 0x217   : > { %v1540_v40 = vpop.xlane.xlu0 %1539 }
 0x218   : > { %v8778_v54 = vsel %vm1628_vm11, %v1629_v53, %v1630_v16  ;;  %3007 = vadd.xlane.f32.xlu1 %v3006_v6  ;;  %v1632_v28 = vrot.slane %v1540_v40, 1  ;;  %v2972_v53 = vmul.f32 %v8729_v14, %v8518_v56  ;;  %v3015_v42 = vsel %vm396_vm0, %v2971_v45, 0.0 }
 0x219   : > { %v1543_v22 = vpop.xlane.xlu1 %1542  ;;  %v3021_v45 = vsel %vm1530_vm8, %v2973_v0, 0.0  ;;  %v2977_v0 = vmul.f32 %v8729_v14, %v8442_v39 }
 0x21a   : > { %v8784_v30 = vsel %vm1628_vm11, %v1630_v16, %v1632_v28  ;;  %3010 = vadd.xlane.f32.xlu0 %v3009_v51  ;;  %v1634_v43 = vrot.slane %v1543_v22, 1  ;;  %v3018_v51 = vsel %vm1537_vm9, %v2972_v53, 0.0 }
 0x21b   : > { %v1546_v8 = vpop.xlane.xlu0 %1545  ;;  %v3033_v4 = vsel %vm396_vm0, %v2977_v0, 0.0 }
 0x21c   : > { %3013 = vadd.xlane.f32.xlu1 %v3012_v32  ;;  %v1635_v6 = vrot.slane %v1546_v8, 1 }
 0x21d   : > { %v1549_v40 = vpop.xlane.xlu1 %1548 }
 0x21e   : > { %v1637_v58 = vrot.slane %v1549_v40, 1  ;;  %v8793_v16 = vsel %vm1628_vm11, %v1634_v43, %v1635_v6  ;;  %3016 = vadd.xlane.f32.xlu0 %v3015_v42  ;;  %v2975_v43 = vmul.f32 %v8729_v14, %v8530_v35  ;;  %v2976_v40 = vmul.f32 %v8729_v14, %v8438_v12 }
 0x21f   : > { %v1552_v13 = vpop.xlane.xlu0 %1551 }
 0x220   : > { %v8799_v8 = vsel %vm1628_vm11, %v1635_v6, %v1637_v58  ;;  %3019 = vadd.xlane.f32.xlu1 %v3018_v51  ;;  %v1639_v28 = vrot.slane %v1552_v13, 1  ;;  %v3027_v51 = vsel %vm1537_vm9, %v2975_v43, 0.0  ;;  %v3030_v7 = vsel %vm1530_vm8, %v2976_v40, 0.0 }
 0x221   : > { %v1555_v22 = vpop.xlane.xlu1 %1554 }
 0x222   : > { %v1640_v32 = vrot.slane %v1555_v22, 1  ;;  %3022 = vadd.xlane.f32.xlu0 %v3021_v45 }
 0x223   : > { %v1558_v53 = vpop.xlane.xlu0 %1557 }
 0x224   : > { %v1641_v42 = vsel %vm1628_vm11, %v1639_v28, %v1640_v32  ;;  %3025 = vadd.xlane.f32.xlu1 %v3024_v3  ;;  %v1642_v58 = vrot.slane %v1558_v53, 1  ;;  %v2978_v28 = vmul.f32 %v8729_v14, %v8542_v50 }
 0x225   : > { %v1561_v6 = vpop.xlane.xlu1 %1560  ;;  %v8812_v13 = vadd.f32 %v1641_v42, %v8690_v2  ;;  %v2979_v2 = vmul.f32 %v8729_v14, %v8451_v52 }
 0x226   : > { %v1643_v22 = vsel %vm1628_vm11, %v1640_v32, %v1642_v58  ;;  %3028 = vadd.xlane.f32.xlu0 %v3027_v51  ;;  %v1644_v53 = vrot.slane %v1561_v6, 1  ;;  %v3036_v40 = vsel %vm1537_vm9, %v2978_v28, 0.0  ;;  %v6988_v51 = vpop.eup %6987 }
 0x227   : > { %v1564_v45 = vpop.xlane.xlu0 %1563  ;;  %v8819_v3 = vadd.f32 %v1643_v22, %v8692_v44  ;;  %v2980_v44 = vmul.f32 %v8729_v14, %v8460_v23 }
 0x228   : > { %3031 = vadd.xlane.f32.xlu1 %v3030_v7  ;;  %v1645_v43 = vrot.slane %v1564_v45, 1 }
 0x229   : > { %v1567_v63 = vpop.xlane.xlu1 %1566 }
 0x22a   : > { %v1647_v32 = vrot.slane %v1567_v63, 1  ;;  %v1646_v42 = vsel %vm1628_vm11, %v1644_v53, %v1645_v43  ;;  %3034 = vadd.xlane.f32.xlu0 %v3033_v4  ;;  %v3039_v63 = vsel %vm1530_vm8, %v2979_v2, 0.0  ;;  %v2981_v4 = vmul.f32 %v8729_v14, %v8554_v15  ;;  %v10508_v53 = vld [vmem:[#allocation4_spill] sm:$0xff] }
 0x22b   : > { %v1570_v58 = vpop.xlane.xlu0 %1569  ;;  %v8829_v6 = vadd.f32 %v1646_v42, %v8700_v31  ;;  %v8839_v61 = vmul.f32 %v6988_v51, %v10508_v53  ;;  %v3042_v31 = vsel %vm396_vm0, %v2980_v44, 0.0  ;;  %v8855_v44 = vld [vmem:[%s10370_s5 + $0x5] ss:$0 sm:$0xff] }
 0x22c   : > { %v1648_v22 = vsel %vm1628_vm11, %v1645_v43, %v1647_v32  ;;  %3037 = vadd.xlane.f32.xlu1 %v3036_v40  ;;  %v1649_v0 = vrot.slane %v1570_v58, 1  ;;  %v2982_v43 = vmul.f32 %v8729_v14, %v8706_v21  ;;  %v3045_v58 = vsel %vm1537_vm9, %v2981_v4, 0.0 }
 0x22d   : > { %v1573_v7 = vpop.xlane.xlu1 %1572  ;;  %v8836_v45 = vadd.f32 %v1648_v22, %v8708_v20  ;;  %10509 = vst [vmem:[#allocation4_spill] sm:$0xff] %v8839_v61  ;;  %v2983_v20 = vmul.f32 %v8729_v14, %v8714_v60 }
 0x22e   : > { %v1650_v28 = vrot.slane %v1573_v7, 1  ;;  %3040 = vadd.xlane.f32.xlu0 %v3039_v63  ;;  %v2984_v63 = vmul.f32 %v8729_v14, %v8839_v61 }
 0x22f   : > { %v1576_v42 = vpop.xlane.xlu0 %1575 }
 0x230   : > { %v1651_v32 = vsel %vm1628_vm11, %v1649_v0, %v1650_v28  ;;  %3043 = vadd.xlane.f32.xlu1 %v3042_v31  ;;  %v1652_v2 = vrot.slane %v1576_v42, 1  ;;  %v3048_v0 = vsel %vm1530_vm8, %v2982_v43, 0.0  ;;  %v3459_v42 = vmul.f32 %v8855_v44, %v8370_v19 }
 0x231   : > { %v1579_v40 = vpop.xlane.xlu1 %1578  ;;  %v8849_v22 = vadd.f32 %v1651_v32, %v8719_v18  ;;  %v3054_v43 = vsel %vm1537_vm9, %v2984_v63, 0.0 }
 0x232   : > { %v1653_v51 = vsel %vm1628_vm11, %v1650_v28, %v1652_v2  ;;  %3046 = vadd.xlane.f32.xlu0 %v3045_v58  ;;  %v1654_v53 = vrot.slane %v1579_v40, 1  ;;  %v3051_v28 = vsel %vm396_vm0, %v2983_v20, 0.0 }
 0x233   : > { %v1582_v7 = vpop.xlane.xlu0 %1581  ;;  %v8861_v4 = vadd.f32 %v1653_v51, %v8721_v48  ;;  %v3460_v48 = vmul.f32 %v8855_v44, %v8373_v17 }
 0x234   : > { %3049 = vadd.xlane.f32.xlu1 %v3048_v0  ;;  %v1655_v18 = vrot.slane %v1582_v7, 1  ;;  %v3483_v0 = vsel %vm2026_vm10, %v3459_v42, 0.0  ;;  %v3461_v7 = vmul.f32 %v8855_v44, %v8480_v9 }
 0x235   : > { %v1585_v31 = vpop.xlane.xlu1 %1584 }
 0x236   : > { %v1657_v32 = vrot.slane %v1585_v31, 1  ;;  %v1656_v2 = vsel %vm1628_vm11, %v1654_v53, %v1655_v18  ;;  %3052 = vadd.xlane.f32.xlu0 %v3051_v28  ;;  %v3486_v31 = vsel %vm396_vm0, %v3460_v48, 0.0  ;;  %v3489_v42 = vsel %vm403_vm1, %v3461_v7, 0.0 }
 0x237   : > { %v1588_v58 = vpop.xlane.xlu0 %1587  ;;  %v8871_v14 = vadd.f32 %v1656_v2, %v8734_v55  ;;  %v3462_v55 = vmul.f32 %v8855_v44, %v8380_v29 }
 0x238   : > { %v1658_v40 = vsel %vm1628_vm11, %v1655_v18, %v1657_v32  ;;  %3055 = vadd.xlane.f32.xlu1 %v3054_v43  ;;  %v1659_v20 = vrot.slane %v1588_v58, 1  ;;  %v3463_v43 = vmul.f32 %v8855_v44, %v8390_v26 }
 0x239   : > { %v1591_v51 = vpop.xlane.xlu1 %1590  ;;  %v8878_v53 = vadd.f32 %v1658_v40, %v8739_v41  ;;  %v3492_v48 = vsel %vm2026_vm10, %v3462_v55, 0.0 }
 0x23a   : > { %v1660_v63 = vrot.slane %v1591_v51, 1  ;;  %3484 = vadd.xlane.f32.xlu0 %v3483_v0 }
 0x23b   : > { %v1594_v28 = vpop.xlane.xlu0 %1593 }
 0x23c   : > { %v1661_v18 = vsel %vm1628_vm11, %v1659_v20, %v1660_v63  ;;  %3487 = vadd.xlane.f32.xlu1 %v3486_v31  ;;  %v1662_v32 = vrot.slane %v1594_v28, 1  ;;  %v3464_v20 = vmul.f32 %v8855_v44, %v8493_v46  ;;  %v3495_v28 = vsel %vm396_vm0, %v3463_v43, 0.0 }
 0x23d   : > { %v1597_v2 = vpop.xlane.xlu1 %1596  ;;  %v8888_v41 = vadd.f32 %v1661_v18, %v8747_v47  ;;  %v3465_v47 = vmul.f32 %v8855_v44, %v8397_v34 }
 0x23e   : > { %v1663_v58 = vsel %vm1628_vm11, %v1660_v63, %v1662_v32  ;;  %3490 = vadd.xlane.f32.xlu0 %v3489_v42  ;;  %v1664_v0 = vrot.slane %v1597_v2, 1  ;;  %v3498_v55 = vsel %vm403_vm1, %v3464_v20, 0.0 }
 0x23f   : > { %v1600_v40 = vpop.xlane.xlu0 %1599  ;;  %v8895_v51 = vadd.f32 %v1663_v58, %v8750_v27  ;;  %v3466_v27 = vmul.f32 %v8855_v44, %v8401_v38 }
 0x240   : > { %3493 = vadd.xlane.f32.xlu1 %v3492_v48  ;;  %v1665_v7 = vrot.slane %v1600_v40, 1  ;;  %v3501_v48 = vsel %vm2026_vm10, %v3465_v47, 0.0  ;;  %v3467_v40 = vmul.f32 %v8855_v44, %v8506_v11 }
 0x241   : > { %v1603_v31 = vpop.xlane.xlu1 %1602 }
 0x242   : > { %v1667_v63 = vrot.slane %v1603_v31, 1  ;;  %v1666_v18 = vsel %vm1628_vm11, %v1664_v0, %v1665_v7  ;;  %3496 = vadd.xlane.f32.xlu0 %v3495_v28  ;;  %v3504_v31 = vsel %vm396_vm0, %v3466_v27, 0.0  ;;  %v1685_v28 = vadd.f32 %v8778_v54, %v8667_v59 }
 0x243   : > { %v2029_v32 = vpop.xlane.xlu0 %2028  ;;  %v8905_v2 = vadd.f32 %v1666_v18, %v8758_v37 }
 0x244   : > { %v1668_v42 = vsel %vm1628_vm11, %v1665_v7, %v1667_v63  ;;  %3499 = vadd.xlane.f32.xlu1 %v3498_v55  ;;  %v2124_v43 = vrot.slane %v2029_v32, 2  ;;  %v3468_v7 = vmul.f32 %v8855_v44, %v8412_v5  ;;  %v3507_v55 = vsel %vm403_vm1, %v3467_v40, 0.0 }
 0x245   : > { %v2032_v58 = vpop.xlane.xlu1 %2031  ;;  %v8912_v20 = vadd.f32 %v1668_v42, %v8762_v36  ;;  %v3469_v36 = vmul.f32 %v8855_v44, %v8416_v62  ;;  %v1686_v32 = vadd.f32 %v8784_v30, %v8669_v33  ;;  %v3471_v33 = vmul.f32 %v8855_v44, %v8425_v1 }
 0x246   : > { %v2125_v0 = vrot.slane %v2032_v58, 2  ;;  %3502 = vadd.xlane.f32.xlu0 %v3501_v48  ;;  %v3510_v59 = vsel %vm2026_vm10, %v3468_v7, 0.0  ;;  %v1687_v30 = vadd.f32 %v8793_v16, %v8677_v57 }
 0x247   : > { %v2035_v37 = vpop.xlane.xlu0 %2034  ;;  %v3519_v16 = vsel %vm2026_vm10, %v3471_v33, 0.0  ;;  %v3475_v33 = vmul.f32 %v8855_v44, %v8442_v39 }
 0x248   : > { %3505 = vadd.xlane.f32.xlu1 %v3504_v31  ;;  %v2127_v47 = vrot.slane %v2035_v37, 2  ;;  %v2126_v63 = vsel %vm2123_vm12, %v2124_v43, %v2125_v0  ;;  %v3470_v43 = vmul.f32 %v8855_v44, %v8518_v56  ;;  %v3513_v37 = vsel %vm396_vm0, %v3469_v36, 0.0 }
 0x249   : > { %v2038_v18 = vpop.xlane.xlu1 %2037  ;;  %v8925_v27 = vadd.f32 %v2126_v63, %v1685_v28  ;;  %v3472_v63 = vmul.f32 %v8855_v44, %v8429_v24 }
 0x24a   : > { %3508 = vadd.xlane.f32.xlu0 %v3507_v55  ;;  %v2128_v42 = vsel %vm2123_vm12, %v2125_v0, %v2127_v47  ;;  %v2129_v48 = vrot.slane %v2038_v18, 2  ;;  %v3516_v28 = vsel %vm403_vm1, %v3470_v43, 0.0  ;;  %v1688_v18 = vadd.f32 %v8799_v8, %v8682_v10 }
 0x24b   : > { %v2041_v54 = vpop.xlane.xlu0 %2040  ;;  %v8931_v58 = vadd.f32 %v2128_v42, %v1686_v32  ;;  %v3473_v42 = vmul.f32 %v8855_v44, %v8530_v35  ;;  %v3522_v43 = vsel %vm396_vm0, %v3472_v63, 0.0  ;;  %v3474_v10 = vmul.f32 %v8855_v44, %v8438_v12 }
 0x24c   : > { %3511 = vadd.xlane.f32.xlu1 %v3510_v59  ;;  %v2130_v40 = vrot.slane %v2041_v54, 2 }
 0x24d   : > { %v2044_v31 = vpop.xlane.xlu1 %2043 }
 0x24e   : > { %v2132_v0 = vrot.slane %v2044_v31, 2  ;;  %3514 = vadd.xlane.f32.xlu0 %v3513_v37  ;;  %v2131_v7 = vsel %vm2123_vm12, %v2129_v48, %v2130_v40  ;;  %v3525_v37 = vsel %vm403_vm1, %v3473_v42, 0.0 }
 0x24f   : > { %v2047_v47 = vpop.xlane.xlu0 %2046  ;;  %v8944_v55 = vadd.f32 %v2131_v7, %v1687_v30  ;;  %v3528_v7 = vsel %vm2026_vm10, %v3474_v10, 0.0 }
 0x250   : > { %3517 = vadd.xlane.f32.xlu1 %v3516_v28  ;;  %v2134_v36 = vrot.slane %v2047_v47, 2  ;;  %v2133_v32 = vsel %vm2123_vm12, %v2130_v40, %v2132_v0  ;;  %v3476_v47 = vmul.f32 %v8855_v44, %v8542_v50 }
 0x251   : > { %v2050_v57 = vpop.xlane.xlu1 %2049  ;;  %v8950_v59 = vadd.f32 %v2133_v32, %v1688_v18 }
 0x252   : > { %v2135_v54 = vrot.slane %v2050_v57, 2  ;;  %3520 = vadd.xlane.f32.xlu0 %v3519_v16  ;;  %v3531_v57 = vsel %vm396_vm0, %v3475_v33, 0.0 }
 0x253   : > { %v2053_v48 = vpop.xlane.xlu0 %2052 }
 0x254   : > { %3523 = vadd.xlane.f32.xlu1 %v3522_v43  ;;  %v2137_v8 = vrot.slane %v2053_v48, 2  ;;  %v2136_v40 = vsel %vm2123_vm12, %v2134_v36, %v2135_v54 }
 0x255   : > { %v2056_v31 = vpop.xlane.xlu1 %2055  ;;  %v8960_v30 = vadd.f32 %v2136_v40, %v8812_v13  ;;  %v3477_v13 = vmul.f32 %v8855_v44, %v8451_v52 }
 0x256   : > { %3526 = vadd.xlane.f32.xlu0 %v3525_v37  ;;  %v2138_v0 = vsel %vm2123_vm12, %v2135_v54, %v2137_v8  ;;  %v2139_v18 = vrot.slane %v2056_v31, 2  ;;  %v3534_v54 = vsel %vm403_vm1, %v3476_v47, 0.0  ;;  %v3479_v37 = vmul.f32 %v8855_v44, %v8554_v15 }
 0x257   : > { %v2059_v28 = vpop.xlane.xlu0 %2058  ;;  %v8967_v63 = vadd.f32 %v2138_v0, %v8819_v3  ;;  %v3478_v3 = vmul.f32 %v8855_v44, %v8460_v23  ;;  %v3537_v31 = vsel %vm2026_vm10, %v3477_v13, 0.0  ;;  %v8999_v13 = vld [vmem:[%s10370_s5 + $0x6] ss:$0 sm:$0xff] }
 0x258   : > { %3529 = vadd.xlane.f32.xlu1 %v3528_v7  ;;  %v2140_v36 = vrot.slane %v2059_v28, 2 }
 0x259   : > { %v2062_v32 = vpop.xlane.xlu1 %2061  ;;  %v3540_v7 = vsel %vm396_vm0, %v3478_v3, 0.0 }
 0x25a   : > { %v2142_v16 = vrot.slane %v2062_v32, 2  ;;  %3532 = vadd.xlane.f32.xlu0 %v3531_v57  ;;  %v2141_v42 = vsel %vm2123_vm12, %v2139_v18, %v2140_v36  ;;  %v3543_v32 = vsel %vm403_vm1, %v3479_v37, 0.0  ;;  %v3481_v57 = vmul.f32 %v8855_v44, %v8714_v60 }
 0x25b   : > { %v2065_v43 = vpop.xlane.xlu0 %2064  ;;  %v8977_v48 = vadd.f32 %v2141_v42, %v8829_v6  ;;  %v3480_v6 = vmul.f32 %v8855_v44, %v8706_v21  ;;  %v3902_v37 = vmul.f32 %v8999_v13, %v8380_v29 }
 0x25c   : > { %3535 = vadd.xlane.f32.xlu1 %v3534_v54  ;;  %v2144_v10 = vrot.slane %v2065_v43, 2  ;;  %v2143_v8 = vsel %vm2123_vm12, %v2140_v36, %v2142_v16  ;;  %v3482_v43 = vmul.f32 %v8855_v44, %v8839_v61  ;;  %v697_v44 = vmul.f32 0.33333334, %v8657_v25 }
 0x25d   : > { %v2068_v40 = vpop.xlane.xlu1 %2067  ;;  %v8984_v33 = vadd.f32 %v2143_v8, %v8836_v45  ;;  %v3546_v42 = vsel %vm2026_vm10, %v3480_v6, 0.0  ;;  %v696_v8 = vmul.f32 0.33333334, %v8646_v49  ;;  %v3903_v6 = vmul.f32 %v8999_v13, %v8390_v26 }
 0x25e   : > { %v2145_v0 = vrot.slane %v2068_v40, 2  ;;  %3538 = vadd.xlane.f32.xlu0 %v3537_v31  ;;  %v3549_v31 = vsel %vm396_vm0, %v3481_v57, 0.0  ;;  %v3918_v57 = vsel %vm396_vm0, %v3902_v37, 0.0  ;;  %v3904_v25 = vmul.f32 %v8999_v13, %v8397_v34 }
 0x25f   : > { %v2071_v28 = vpop.xlane.xlu0 %2070 }
 0x260   : > { %3541 = vadd.xlane.f32.xlu1 %v3540_v7  ;;  %v2147_v47 = vrot.slane %v2071_v28, 2  ;;  %v2146_v18 = vsel %vm2123_vm12, %v2144_v10, %v2145_v0 }
 0x261   : > { %v2074_v36 = vpop.xlane.xlu1 %2073  ;;  %v8994_v45 = vadd.f32 %v2146_v18, %v8849_v22 }
 0x262   : > { %3544 = vadd.xlane.f32.xlu0 %v3543_v32  ;;  %v2148_v16 = vsel %vm2123_vm12, %v2145_v0, %v2147_v47  ;;  %v2149_v10 = vrot.slane %v2074_v36, 2  ;;  %v726_v36 = vadd.f32 1e-05, %v696_v8 }
 0x263   : > { %v2077_v54 = vpop.xlane.xlu0 %2076  ;;  %v9006_v3 = vadd.f32 %v2148_v16, %v8861_v4  ;;  %v3552_v4 = vsel %vm403_vm1, %v3482_v43, 0.0 }
 0x264   : > { %3547 = vadd.xlane.f32.xlu1 %v3546_v42  ;;  %v2150_v22 = vrot.slane %v2077_v54, 2  ;;  %v727_v54 = vadd.f32 1e-05, %v697_v44  ;;  %6989 = vrsqrt.f32 %v726_v36 }
 0x265   : > { %v2080_v40 = vpop.xlane.xlu1 %2079 }
 0x266   : > { %v2152_v0 = vrot.slane %v2080_v40, 2  ;;  %3550 = vadd.xlane.f32.xlu0 %v3549_v31  ;;  %v2151_v7 = vsel %vm2123_vm12, %v2149_v10, %v2150_v22  ;;  %v3905_v10 = vmul.f32 %v8999_v13, %v8401_v38  ;;  %v3924_v31 = vsel %vm396_vm0, %v3904_v25, 0.0 }
 0x267   : > { %v2083_v28 = vpop.xlane.xlu0 %2082  ;;  %v9018_v49 = vadd.f32 %v2151_v7, %v8871_v14  ;;  %v3921_v14 = vsel %vm396_vm0, %v3903_v6, 0.0  ;;  %6991 = vrsqrt.f32 %v727_v54  ;;  %v9044_v6 = vpop.f32.mrf.mxu1 }
 0x268   : > { %3553 = vadd.xlane.f32.xlu1 %v3552_v4  ;;  %v2154_v47 = vrot.slane %v2083_v28, 2  ;;  %v2153_v18 = vsel %vm2123_vm12, %v2150_v22, %v2152_v0  ;;  %v3927_v7 = vsel %vm396_vm0, %v3905_v10, 0.0  ;;  %v3907_v4 = vmul.f32 %v8999_v13, %v8416_v62 }
 0x269   : > { %v2086_v32 = vpop.xlane.xlu1 %2085  ;;  %v9025_v16 = vadd.f32 %v2153_v18, %v8878_v53  ;;  %v3906_v53 = vmul.f32 %v8999_v13, %v8412_v5 }
 0x26a   : > { %v2155_v42 = vrot.slane %v2086_v32, 2  ;;  %3919 = vadd.xlane.f32.xlu0 %v3918_v57  ;;  %v3908_v32 = vmul.f32 %v8999_v13, %v8425_v1 }
 0x26b   : > { %v2089_v43 = vpop.xlane.xlu0 %2088  ;;  %v3930_v36 = vsel %vm396_vm0, %v3906_v53, 0.0 }
 0x26c   : > { %3922 = vadd.xlane.f32.xlu1 %v3921_v14  ;;  %v2157_v22 = vrot.slane %v2089_v43, 2  ;;  %v2156_v8 = vsel %vm2123_vm12, %v2154_v47, %v2155_v42  ;;  %v9056_v43 = vpop.f32.mrf.mxu1 }
 0x26d   : > { %v2092_v40 = vpop.xlane.xlu1 %2091  ;;  %v9035_v37 = vadd.f32 %v2156_v8, %v8888_v41 }
 0x26e   : > { %3925 = vadd.xlane.f32.xlu0 %v3924_v31  ;;  %v2158_v0 = vsel %vm2123_vm12, %v2155_v42, %v2157_v22  ;;  %v2159_v47 = vrot.slane %v2092_v40, 2  ;;  %v3933_v42 = vsel %vm396_vm0, %v3907_v4, 0.0  ;;  %v3936_v40 = vsel %vm396_vm0, %v3908_v32, 0.0 }
 0x26f   : > { %v2095_v44 = vpop.xlane.xlu0 %2094  ;;  %v9042_v28 = vadd.f32 %v2158_v0, %v8895_v51  ;;  %v3909_v51 = vmul.f32 %v8999_v13, %v8429_v24  ;;  %v3910_v31 = vmul.f32 %v8999_v13, %v8438_v12 }
 0x270   : > { %3928 = vadd.xlane.f32.xlu1 %v3927_v7  ;;  %v2160_v18 = vrot.slane %v2095_v44, 2  ;;  %v9074_v44 = vpop.f32.mrf.mxu1 }
 0x271   : > { %v2098_v41 = vpop.xlane.xlu1 %2097  ;;  %v3939_v0 = vsel %vm396_vm0, %v3909_v51, 0.0 }
 0x272   : > { %v2162_v57 = vrot.slane %v2098_v41, 2  ;;  %3931 = vadd.xlane.f32.xlu0 %v3930_v36  ;;  %v2161_v25 = vsel %vm2123_vm12, %v2159_v47, %v2160_v18 }
 0x273   : > { %v2465_v54 = vpop.xlane.xlu0 %2464  ;;  %v9054_v14 = vadd.f32 %v2161_v25, %v8905_v2 }
 0x274   : > { %3934 = vadd.xlane.f32.xlu1 %v3933_v42  ;;  %v9059_v10 = vadd.f32 %v2465_v54, %v8925_v27  ;;  %v2163_v22 = vsel %vm2123_vm12, %v2160_v18, %v2162_v57  ;;  %v3911_v27 = vmul.f32 %v8999_v13, %v8442_v39  ;;  %v6990_v18 = vpop.eup %6989  ;;  %v3913_v57 = vmul.f32 %v8999_v13, %v8460_v23 }
 0x275   : > { %v2468_v8 = vpop.xlane.xlu1 %2467  ;;  %v9066_v53 = vadd.f32 %v2163_v22, %v8912_v20  ;;  %v3942_v20 = vsel %vm396_vm0, %v3910_v31, 0.0  ;;  %v6992_v25 = vpop.eup %6991  ;;  %v10510_v22 = vld [vmem:[#allocation5_spill] sm:$0xff] }
 0x276   : > { %v9069_v2 = vadd.f32 %v2468_v8, %v8931_v58  ;;  %3937 = vadd.xlane.f32.xlu0 %v3936_v40  ;;  %v3912_v58 = vmul.f32 %v8999_v13, %v8451_v52  ;;  %v3945_v36 = vsel %vm396_vm0, %v3911_v27, 0.0  ;;  %v9097_v8 = vmul.f32 %v6990_v18, %v10510_v22 }
 0x277   : > { %v2471_v7 = vpop.xlane.xlu0 %2470  ;;  %v3951_v31 = vsel %vm396_vm0, %v3913_v57, 0.0 }
 0x278   : > { %3940 = vadd.xlane.f32.xlu1 %v3939_v0  ;;  %v9077_v4 = vadd.f32 %v2471_v7, %v8944_v55  ;;  %v9088_v55 = vpop.f32.mrf.mxu1  ;;  %v3948_v51 = vsel %vm396_vm0, %v3912_v58, 0.0  ;;  %v10511_v7 = vld [vmem:[#allocation6_spill] sm:$0xff]  ;;  %v3916_v18 = vmul.f32 %v8999_v13, %v9097_v8 }
 0x279   : > { %v2474_v47 = vpop.xlane.xlu1 %2473  ;;  %v9106_v27 = vmul.f32 %v6992_v25, %v10511_v7 }
 0x27a   : > { %v9083_v41 = vadd.f32 %v2474_v47, %v8950_v59  ;;  %3943 = vadd.xlane.f32.xlu0 %v3942_v20  ;;  %v3914_v59 = vmul.f32 %v8999_v13, %v8706_v21  ;;  %v9108_v47 = vpop.f32.mrf.mxu1 }
 0x27b   : > { %v2477_v32 = vpop.xlane.xlu0 %2476 }
 0x27c   : > { %3946 = vadd.xlane.f32.xlu1 %v3945_v36  ;;  %v9091_v42 = vadd.f32 %v2477_v32, %v8960_v30  ;;  %v3915_v30 = vmul.f32 %v8999_v13, %v8714_v60  ;;  %v9122_v32 = vld [vmem:[%s10370_s5 + $0x7] ss:$0 sm:$0xff] }
 0x27d   : > { %v2480_v54 = vpop.xlane.xlu1 %2479  ;;  %v4416_v22 = vmul.f32 %v9122_v32, %v8380_v29  ;;  %v4424_v19 = vmul.f32 %v9122_v32, %v8518_v56  ;;  %v4425_v9 = vmul.f32 %v9122_v32, %v8425_v1 }
 0x27e   : > { %v9100_v40 = vadd.f32 %v2480_v54, %v8967_v63  ;;  %3949 = vadd.xlane.f32.xlu0 %v3948_v51  ;;  %v3954_v63 = vsel %vm396_vm0, %v3914_v59, 0.0  ;;  %v3957_v57 = vsel %vm396_vm0, %v3915_v30, 0.0  ;;  %v9127_v54 = vpop.f32.mrf.mxu1  ;;  %v3960_v59 = vsel %vm396_vm0, %v3916_v18, 0.0 }
 0x27f   : > { %v2483_v0 = vpop.xlane.xlu0 %2482 }
 0x280   : > { %3952 = vadd.xlane.f32.xlu1 %v3951_v31  ;;  %v9111_v20 = vadd.f32 %v2483_v0, %v8977_v48  ;;  %v3917_v48 = vmul.f32 %v8999_v13, %v9106_v27  ;;  %v4417_v13 = vmul.f32 %v9122_v32, %v8390_v26  ;;  %v9141_v7 = vpop.f32.mrf.mxu1 }
 0x281   : > { %v2486_v58 = vpop.xlane.xlu1 %2485 }
 0x282   : > { %v9117_v36 = vadd.f32 %v2486_v58, %v8984_v33  ;;  %3955 = vadd.xlane.f32.xlu0 %v3954_v63  ;;  %v3963_v0 = vsel %vm396_vm0, %v3917_v48, 0.0  ;;  %v4440_v63 = vsel %vm1530_vm8, %v4416_v22, 0.0  ;;  %v4419_v48 = vmul.f32 %v9122_v32, %v8397_v34 }
 0x283   : > { %v2489_v25 = vpop.xlane.xlu0 %2488 }
 0x284   : > { %3958 = vadd.xlane.f32.xlu1 %v3957_v57  ;;  %v9130_v51 = vadd.f32 %v2489_v25, %v8994_v45  ;;  %v4443_v57 = vsel %vm396_vm0, %v4417_v13, 0.0 }
 0x285   : > { %v2492_v33 = vpop.xlane.xlu1 %2491 }
 0x286   : > { %v9136_v31 = vadd.f32 %v2492_v33, %v9006_v3  ;;  %3961 = vadd.xlane.f32.xlu0 %v3960_v59  ;;  %v4418_v3 = vmul.f32 %v9122_v32, %v8493_v46  ;;  %v9155_v33 = vpop.f32.mrf.mxu1 }
 0x287   : > { %v2495_v30 = vpop.xlane.xlu0 %2494 }
 0x288   : > { %3964 = vadd.xlane.f32.xlu1 %v3963_v0  ;;  %v9144_v45 = vadd.f32 %v2495_v30, %v9018_v49  ;;  %v4446_v22 = vsel %vm1537_vm9, %v4418_v3, 0.0  ;;  %v4449_v30 = vsel %vm1530_vm8, %v4419_v48, 0.0 }
 0x289   : > { %v2498_v58 = vpop.xlane.xlu1 %2497 }
 0x28a   : > { %10512 = vst [vmem:[#allocation5_spill] sm:$0xff] %v9144_v45  ;;  %v9150_v18 = vadd.f32 %v2498_v58, %v9025_v16  ;;  %4441 = vadd.xlane.f32.xlu0 %v4440_v63  ;;  %v4420_v16 = vmul.f32 %v9122_v32, %v8401_v38  ;;  %v4421_v58 = vmul.f32 %v9122_v32, %v8506_v11  ;;  %v9169_v63 = vpop.f32.mrf.mxu1  ;;  %v4467_v45 = vsel %vm1530_vm8, %v4425_v9, 0.0 }
 0x28b   : > { %v2501_v25 = vpop.xlane.xlu0 %2500  ;;  %v4428_v9 = vmul.f32 %v9122_v32, %v8438_v12 }
 0x28c   : > { %10513 = vst [vmem:[#allocation6_spill] sm:$0xff] %v9150_v18  ;;  %4444 = vadd.xlane.f32.xlu1 %v4443_v57  ;;  %v9158_v49 = vadd.f32 %v2501_v25, %v9035_v37  ;;  %v4452_v57 = vsel %vm396_vm0, %v4420_v16, 0.0  ;;  %v4455_v48 = vsel %vm1537_vm9, %v4421_v58, 0.0 }
 0x28d   : > { %v2504_v59 = vpop.xlane.xlu1 %2503 }
 0x28e   : > { %10514 = vst [vmem:[#allocation54_spill] sm:$0xff] %v9158_v49  ;;  %v9164_v0 = vadd.f32 %v2504_v59, %v9042_v28  ;;  %4447 = vadd.xlane.f32.xlu0 %v4446_v22  ;;  %v4422_v28 = vmul.f32 %v9122_v32, %v8412_v5  ;;  %v4423_v22 = vmul.f32 %v9122_v32, %v8416_v62 }
 0x28f   : > { %v2507_v13 = vpop.xlane.xlu0 %2506 }
 0x290   : > { %10515 = vst [vmem:[#allocation55_spill] sm:$0xff] %v9164_v0  ;;  %4450 = vadd.xlane.f32.xlu1 %v4449_v30  ;;  %v9172_v37 = vadd.f32 %v2507_v13, %v9054_v14  ;;  %v9183_v30 = vpop.f32.mrf.mxu1  ;;  %v4458_v16 = vsel %vm1530_vm8, %v4422_v28, 0.0  ;;  %v4461_v58 = vsel %vm396_vm0, %v4423_v22, 0.0  ;;  %v4464_v0 = vsel %vm1537_vm9, %v4424_v19, 0.0 }
 0x291   : > { %v2510_v3 = vpop.xlane.xlu1 %2509 }
 0x292   : > { %10516 = vst [vmem:[#allocation56_spill] sm:$0xff] %v9172_v37  ;;  %v9178_v25 = vadd.f32 %v2510_v3, %v9066_v53  ;;  %4453 = vadd.xlane.f32.xlu0 %v4452_v57  ;;  %v10518_v53 = vld [vmem:[#allocation52_spill] sm:$0xff] }
 0x293   : > { %v2987_v59 = vpop.xlane.xlu0 %2986  ;;  %v698_v3 = vmul.f32 0.33333334, %v10518_v53 }
 0x294   : > { %10517 = vst [vmem:[#allocation57_spill] sm:$0xff] %v9178_v25  ;;  %4456 = vadd.xlane.f32.xlu1 %v4455_v48  ;;  %v3081_v14 = vrot.slane %v2987_v59, 1  ;;  %v9192_v25 = vpop.f32.mrf.mxu1 }
 0x295   : > { %v2990_v13 = vpop.xlane.xlu1 %2989  ;;  %v728_v53 = vadd.f32 1e-05, %v698_v3 }
 0x296   : > { %v3082_v17 = vrot.slane %v2990_v13, 1  ;;  %4459 = vadd.xlane.f32.xlu0 %v4458_v16  ;;  %v4426_v13 = vmul.f32 %v9122_v32, %v8429_v24  ;;  %v9208_v19 = vpop.f32.mrf.mxu1 }
 0x297   : > { %v2993_v57 = vpop.xlane.xlu0 %2992  ;;  %6993 = vrsqrt.f32 %v728_v53  ;;  %v4476_v53 = vsel %vm1530_vm8, %v4428_v9, 0.0 }
 0x298   : > { %v3083_v48 = vsel %vm1628_vm11, %v3081_v14, %v3082_v17  ;;  %4462 = vadd.xlane.f32.xlu1 %v4461_v58  ;;  %v3084_v59 = vrot.slane %v2993_v57, 1  ;;  %v4427_v14 = vmul.f32 %v9122_v32, %v8530_v35  ;;  %v9210_v57 = vpop.f32.mrf.mxu0 }
 0x299   : > { %v2996_v28 = vpop.xlane.xlu1 %2995  ;;  %v9199_v16 = vadd.f32 %v3083_v48, %v9059_v10 }
 0x29a   : > { %v3085_v22 = vsel %vm1628_vm11, %v3082_v17, %v3084_v59  ;;  %4465 = vadd.xlane.f32.xlu0 %v4464_v0  ;;  %v3086_v37 = vrot.slane %v2996_v28, 1  ;;  %v4470_v17 = vsel %vm396_vm0, %v4426_v13, 0.0  ;;  %v9224_v28 = vpop.f32.mrf.mxu0 }
 0x29b   : > { %10519 = vst [vmem:[#allocation52_spill] sm:$0xff] %v9199_v16  ;;  %v2999_v18 = vpop.xlane.xlu0 %2998  ;;  %v9206_v58 = vadd.f32 %v3085_v22, %v9069_v2  ;;  %v4473_v2 = vsel %vm1537_vm9, %v4427_v14, 0.0  ;;  %v4429_v22 = vmul.f32 %v9122_v32, %v8442_v39  ;;  %v4430_v14 = vmul.f32 %v9122_v32, %v8542_v50 }
 0x29c   : > { %4468 = vadd.xlane.f32.xlu1 %v4467_v45  ;;  %v3087_v10 = vrot.slane %v2999_v18, 1  ;;  %v9222_v18 = vpop.f32.mrf.mxu1 }
 0x29d   : > { %10520 = vst [vmem:[#allocation58_spill] sm:$0xff] %v9206_v58  ;;  %v3002_v48 = vpop.xlane.xlu1 %3001 }
 0x29e   : > { %v3089_v0 = vrot.slane %v3002_v48, 1  ;;  %v3088_v3 = vsel %vm1628_vm11, %v3086_v37, %v3087_v10  ;;  %4471 = vadd.xlane.f32.xlu0 %v4470_v17 }
 0x29f   : > { %v3005_v59 = vpop.xlane.xlu0 %3004  ;;  %v9220_v45 = vadd.f32 %v3088_v3, %v9077_v4  ;;  %v4479_v4 = vsel %vm396_vm0, %v4429_v22, 0.0 }
 0x2a0   : > { %v3090_v13 = vsel %vm1628_vm11, %v3087_v10, %v3089_v0  ;;  %4474 = vadd.xlane.f32.xlu1 %v4473_v2  ;;  %v3091_v48 = vrot.slane %v3005_v59, 1  ;;  %v9236_v10 = vpop.f32.mrf.mxu1  ;;  %v9238_v0 = vpop.f32.mrf.mxu0 }
 0x2a1   : > { %10521 = vst [vmem:[#allocation59_spill] sm:$0xff] %v9220_v45  ;;  %v3008_v37 = vpop.xlane.xlu1 %3007  ;;  %v9231_v17 = vadd.f32 %v3090_v13, %v9083_v41  ;;  %v4431_v45 = vmul.f32 %v9122_v32, %v8451_v52  ;;  %v4482_v41 = vsel %vm1537_vm9, %v4430_v14, 0.0  ;;  %v4432_v13 = vmul.f32 %v9122_v32, %v8460_v23 }
 0x2a2   : > { %v3092_v16 = vrot.slane %v3008_v37, 1  ;;  %4477 = vadd.xlane.f32.xlu0 %v4476_v53  ;;  %v9256_v14 = vpop.f32.mrf.mxu0 }
 0x2a3   : > { %10522 = vst [vmem:[#allocation60_spill] sm:$0xff] %v9231_v17  ;;  %v3011_v3 = vpop.xlane.xlu0 %3010  ;;  %v4485_v53 = vsel %vm1530_vm8, %v4431_v45, 0.0  ;;  %v4434_v45 = vmul.f32 %v9122_v32, %v8706_v21 }
 0x2a4   : > { %v3093_v9 = vsel %vm1628_vm11, %v3091_v48, %v3092_v16  ;;  %4480 = vadd.xlane.f32.xlu1 %v4479_v4  ;;  %v3094_v2 = vrot.slane %v3011_v3, 1  ;;  %v4433_v48 = vmul.f32 %v9122_v32, %v8554_v15  ;;  %v9254_v3 = vpop.f32.mrf.mxu1 }
 0x2a5   : > { %v3014_v59 = vpop.xlane.xlu1 %3013  ;;  %v9245_v22 = vadd.f32 %v3093_v9, %v9091_v42  ;;  %10525 = vst [vmem:[#allocation63_spill] sm:$0xff] %v9254_v3  ;;  %v4437_v3 = vmul.f32 %v9122_v32, %v9097_v8 }
 0x2a6   : > { %v3095_v37 = vsel %vm1628_vm11, %v3092_v16, %v3094_v2  ;;  %4483 = vadd.xlane.f32.xlu0 %v4482_v41  ;;  %v3096_v58 = vrot.slane %v3014_v59, 1  ;;  %v4488_v16 = vsel %vm396_vm0, %v4432_v13, 0.0  ;;  %v9270_v13 = vpop.f32.mrf.mxu0 }
 0x2a7   : > { %10523 = vst [vmem:[#allocation61_spill] sm:$0xff] %v9245_v22  ;;  %v3017_v17 = vpop.xlane.xlu0 %3016  ;;  %v9252_v4 = vadd.f32 %v3095_v37, %v9100_v40  ;;  %v4491_v40 = vsel %vm1537_vm9, %v4433_v48, 0.0  ;;  %v4436_v48 = vmul.f32 %v9122_v32, %v8839_v61 }
 0x2a8   : > { %4486 = vadd.xlane.f32.xlu1 %v4485_v53  ;;  %v3097_v42 = vrot.slane %v3017_v17, 1  ;;  %v6994_v17 = vpop.eup %6993  ;;  %v9268_v53 = vpop.f32.mrf.mxu1 }
 0x2a9   : > { %10524 = vst [vmem:[#allocation62_spill] sm:$0xff] %v9252_v4  ;;  %v3020_v9 = vpop.xlane.xlu1 %3019  ;;  %v4435_v4 = vmul.f32 %v9122_v32, %v8714_v60 }
 0x2aa   : > { %v3099_v2 = vrot.slane %v3020_v9, 1  ;;  %v3098_v41 = vsel %vm1628_vm11, %v3096_v58, %v3097_v42  ;;  %4489 = vadd.xlane.f32.xlu0 %v4488_v16  ;;  %v4494_v16 = vsel %vm1530_vm8, %v4434_v45, 0.0  ;;  %v9287_v45 = vpop.f32.mrf.mxu0 }
 0x2ab   : > { %v3023_v37 = vpop.xlane.xlu0 %3022  ;;  %v9266_v59 = vadd.f32 %v3098_v41, %v9111_v20  ;;  %v4497_v41 = vsel %vm396_vm0, %v4435_v4, 0.0  ;;  %v4438_v4 = vmul.f32 %v9122_v32, %v9106_v27 }
 0x2ac   : > { %v3100_v22 = vsel %vm1628_vm11, %v3097_v42, %v3099_v2  ;;  %4492 = vadd.xlane.f32.xlu1 %v4491_v40  ;;  %v3101_v9 = vrot.slane %v3023_v37, 1  ;;  %v10528_v42 = vld [vmem:[#allocation7_spill] sm:$0xff]  ;;  %v9285_v40 = vpop.f32.mrf.mxu1 }
 0x2ad   : > { %10526 = vst [vmem:[#allocation64_spill] sm:$0xff] %v9266_v59  ;;  %v3026_v58 = vpop.xlane.xlu1 %3025  ;;  %v9277_v49 = vadd.f32 %v3100_v22, %v9117_v36  ;;  %v9283_v2 = vmul.f32 %v6994_v17, %v10528_v42  ;;  %v9302_v42 = vld [vmem:[%s10370_s5 + $0x8] ss:$0 sm:$0xff] }
 0x2ae   : > { %v3102_v20 = vrot.slane %v3026_v58, 1  ;;  %4495 = vadd.xlane.f32.xlu0 %v4494_v16  ;;  %v4500_v58 = vsel %vm1537_vm9, %v4436_v48, 0.0 }
 0x2af   : > { %10527 = vst [vmem:[#allocation65_spill] sm:$0xff] %v9277_v49  ;;  %v3029_v59 = vpop.xlane.xlu0 %3028  ;;  %v4439_v48 = vmul.f32 %v9122_v32, %v9283_v2  ;;  %v4915_v32 = vmul.f32 %v9302_v42, %v8390_v26  ;;  %v4917_v26 = vmul.f32 %v9302_v42, %v8397_v34  ;;  %v4919_v34 = vmul.f32 %v9302_v42, %v8506_v11 }
 0x2b0   : > { %v3103_v37 = vsel %vm1628_vm11, %v3101_v9, %v3102_v20  ;;  %4498 = vadd.xlane.f32.xlu1 %v4497_v41  ;;  %v3104_v36 = vrot.slane %v3029_v59, 1  ;;  %v4503_v59 = vsel %vm1530_vm8, %v4437_v3, 0.0  ;;  %v4914_v3 = vmul.f32 %v9302_v42, %v8380_v29 }
 0x2b1   : > { %v9290_v22 = vpop.xlane.xlu1 %3031  ;;  %v9296_v16 = vadd.f32 %v3103_v37, %v9130_v51  ;;  %v9312_v51 = vpop.f32.mrf.mxu1  ;;  %v4916_v29 = vmul.f32 %v9302_v42, %v8493_v46  ;;  %v4918_v46 = vmul.f32 %v9302_v42, %v8401_v38  ;;  %v4920_v38 = vmul.f32 %v9302_v42, %v8412_v5 }
 0x2b2   : > { %10529 = vst [vmem:[#allocation7_spill] sm:$0xff] %v9290_v22  ;;  %v3105_v17 = vsel %vm1628_vm11, %v3102_v20, %v3104_v36  ;;  %4501 = vadd.xlane.f32.xlu0 %v4500_v58  ;;  %v9314_v37 = vpop.f32.mrf.mxu0  ;;  %v4506_v36 = vsel %vm396_vm0, %v4438_v4, 0.0  ;;  %v4509_v58 = vsel %vm1537_vm9, %v4439_v48, 0.0  ;;  %v4938_v4 = vsel %vm2026_vm10, %v4914_v3, 0.0 }
 0x2b3   : > { %10530 = vst [vmem:[#allocation66_spill] sm:$0xff] %v9296_v16  ;;  %v9305_v9 = vpop.xlane.xlu0 %3034  ;;  %v9310_v41 = vadd.f32 %v3105_v17, %v9136_v31  ;;  %v9326_v31 = vpop.f32.mrf.mxu1  ;;  %v4941_v48 = vsel %vm396_vm0, %v4915_v32, 0.0  ;;  %v4944_v3 = vsel %vm403_vm1, %v4916_v29, 0.0  ;;  %v4947_v32 = vsel %vm2026_vm10, %v4917_v26, 0.0 }
 0x2b4   : > { %10531 = vst [vmem:[#allocation67_spill] sm:$0xff] %v9305_v9  ;;  %4504 = vadd.xlane.f32.xlu1 %v4503_v59  ;;  %v9328_v17 = vpop.f32.mrf.mxu0  ;;  %v4950_v29 = vsel %vm396_vm0, %v4918_v46, 0.0  ;;  %v4953_v26 = vsel %vm403_vm1, %v4919_v34, 0.0  ;;  %v4921_v11 = vmul.f32 %v9302_v42, %v8416_v62  ;;  %v4956_v46 = vsel %vm2026_vm10, %v4920_v38, 0.0 }
 0x2b5   : > { %10532 = vst [vmem:[#allocation68_spill] sm:$0xff] %v9310_v41  ;;  %v9316_v20 = vpop.xlane.xlu1 %3037  ;;  %v9340_v41 = vpop.f32.mrf.mxu1  ;;  %v4922_v5 = vmul.f32 %v9302_v42, %v8518_v56  ;;  %v4923_v62 = vmul.f32 %v9302_v42, %v8425_v1  ;;  %v4924_v56 = vmul.f32 %v9302_v42, %v8429_v24  ;;  %v4925_v1 = vmul.f32 %v9302_v42, %v8530_v35 }
 0x2b6   : > { %10533 = vst [vmem:[#allocation69_spill] sm:$0xff] %v9316_v20  ;;  %4507 = vadd.xlane.f32.xlu0 %v4506_v36  ;;  %v9342_v49 = vpop.f32.mrf.mxu0  ;;  %v4959_v34 = vsel %vm396_vm0, %v4921_v11, 0.0  ;;  %v4926_v24 = vmul.f32 %v9302_v42, %v8438_v12  ;;  %v4927_v35 = vmul.f32 %v9302_v42, %v8442_v39  ;;  %v4928_v12 = vmul.f32 %v9302_v42, %v8542_v50 }
 0x2b7   : > { %v9322_v16 = vpop.xlane.xlu0 %3040  ;;  %v9354_v22 = vpop.f32.mrf.mxu1  ;;  %v4962_v38 = vsel %vm403_vm1, %v4922_v5, 0.0  ;;  %v4965_v11 = vsel %vm2026_vm10, %v4923_v62, 0.0  ;;  %v4968_v5 = vsel %vm396_vm0, %v4924_v56, 0.0  ;;  %v4971_v62 = vsel %vm403_vm1, %v4925_v1, 0.0 }
 0x2b8   : > { %4510 = vadd.xlane.f32.xlu1 %v4509_v58  ;;  %v4974_v56 = vsel %vm2026_vm10, %v4926_v24, 0.0  ;;  %v4977_v1 = vsel %vm396_vm0, %v4927_v35, 0.0  ;;  %v4929_v39 = vmul.f32 %v9302_v42, %v8451_v52  ;;  %v4980_v24 = vsel %vm403_vm1, %v4928_v12, 0.0 }
 0x2b9   : > { %v9330_v59 = vpop.xlane.xlu1 %3043  ;;  %v9368_v9 = vpop.f32.mrf.mxu1  ;;  %v4930_v50 = vmul.f32 %v9302_v42, %v8460_v23  ;;  %v4931_v52 = vmul.f32 %v9302_v42, %v8554_v15  ;;  %v4932_v23 = vmul.f32 %v9302_v42, %v8706_v21  ;;  %v4933_v15 = vmul.f32 %v9302_v42, %v8714_v60 }
 0x2ba   : > { %4939 = vadd.xlane.f32.xlu0 %v4938_v4  ;;  %v4983_v35 = vsel %vm2026_vm10, %v4929_v39, 0.0  ;;  %v4934_v21 = vmul.f32 %v9302_v42, %v8839_v61  ;;  %v4935_v60 = vmul.f32 %v9302_v42, %v9097_v8  ;;  %v4936_v61 = vmul.f32 %v9302_v42, %v9106_v27  ;;  %v10562_v27 = vld [vmem:[#allocation8_spill] sm:$0xff] }
 0x2bb   : > { %v9336_v36 = vpop.xlane.xlu0 %3046  ;;  %v4986_v12 = vsel %vm396_vm0, %v4930_v50, 0.0  ;;  %v4989_v39 = vsel %vm403_vm1, %v4931_v52, 0.0  ;;  %v4992_v50 = vsel %vm2026_vm10, %v4932_v23, 0.0  ;;  %v4995_v52 = vsel %vm396_vm0, %v4933_v15, 0.0  ;;  %v10558_v15 = vld [vmem:[#allocation19_spill] sm:$0xff] }
 0x2bc   : > { %10534 = vst [vmem:[#allocation70_spill] sm:$0xff] %v9336_v36  ;;  %4942 = vadd.xlane.f32.xlu1 %v4941_v48  ;;  %v9356_v36 = vpop.f32.mrf.mxu0  ;;  %v4998_v23 = vsel %vm403_vm1, %v4934_v21, 0.0  ;;  %v4937_v8 = vmul.f32 %v9302_v42, %v9283_v2  ;;  %v5004_v21 = vsel %vm396_vm0, %v4936_v61, 0.0  ;;  %v10566_v61 = vld [vmem:[#allocation21_spill] sm:$0xff] }
 0x2bd   : > { %v9344_v58 = vpop.xlane.xlu1 %3049 }
 0x2be   : > { %10535 = vst [vmem:[#allocation71_spill] sm:$0xff] %v9344_v58  ;;  %4945 = vadd.xlane.f32.xlu0 %v4944_v3  ;;  %v9370_v20 = vpop.f32.mrf.mxu0 }
 0x2bf   : > { %v9350_v4 = vpop.xlane.xlu0 %3052 }
 0x2c0   : > { %10536 = vst [vmem:[#allocation72_spill] sm:$0xff] %v9350_v4  ;;  %4948 = vadd.xlane.f32.xlu1 %v4947_v32 }
 0x2c1   : > { %v9358_v48 = vpop.xlane.xlu1 %3055 }
 0x2c2   : > { %10537 = vst [vmem:[#allocation73_spill] sm:$0xff] %v9358_v48  ;;  %4951 = vadd.xlane.f32.xlu0 %v4950_v29  ;;  %v9384_v48 = vpop.f32.mrf.mxu0 }
 0x2c3   : > { %v9364_v3 = vpop.xlane.xlu0 %3484 }
 0x2c4   : > { %10538 = vst [vmem:[#allocation74_spill] sm:$0xff] %v9364_v3  ;;  %4954 = vadd.xlane.f32.xlu1 %v4953_v26  ;;  %v9382_v3 = vpop.f32.mrf.mxu1 }
 0x2c5   : > { %v9372_v32 = vpop.xlane.xlu1 %3487 }
 0x2c6   : > { %10539 = vst [vmem:[#allocation75_spill] sm:$0xff] %v9372_v32  ;;  %4957 = vadd.xlane.f32.xlu0 %v4956_v46  ;;  %v9398_v32 = vpop.f32.mrf.mxu0 }
 0x2c7   : > { %v9378_v29 = vpop.xlane.xlu0 %3490 }
 0x2c8   : > { %10540 = vst [vmem:[#allocation76_spill] sm:$0xff] %v9378_v29  ;;  %4960 = vadd.xlane.f32.xlu1 %v4959_v34  ;;  %v9396_v29 = vpop.f32.mrf.mxu1 }
 0x2c9   : > { %v9386_v26 = vpop.xlane.xlu1 %3493 }
 0x2ca   : > { %10541 = vst [vmem:[#allocation77_spill] sm:$0xff] %v9386_v26  ;;  %4963 = vadd.xlane.f32.xlu0 %v4962_v38  ;;  %v9410_v26 = vpop.f32.mrf.mxu1 }
 0x2cb   : > { %v9392_v46 = vpop.xlane.xlu0 %3496 }
 0x2cc   : > { %10542 = vst [vmem:[#allocation78_spill] sm:$0xff] %v9392_v46  ;;  %4966 = vadd.xlane.f32.xlu1 %v4965_v11  ;;  %v9412_v46 = vpop.f32.mrf.mxu0 }
 0x2cd   : > { %v9400_v34 = vpop.xlane.xlu1 %3499 }
 0x2ce   : > { %10543 = vst [vmem:[#allocation79_spill] sm:$0xff] %v9400_v34  ;;  %4969 = vadd.xlane.f32.xlu0 %v4968_v5  ;;  %v9426_v34 = vpop.f32.mrf.mxu0 }
 0x2cf   : > { %v9406_v38 = vpop.xlane.xlu0 %3502 }
 0x2d0   : > { %10544 = vst [vmem:[#allocation80_spill] sm:$0xff] %v9406_v38  ;;  %4972 = vadd.xlane.f32.xlu1 %v4971_v62  ;;  %v9424_v38 = vpop.f32.mrf.mxu1 }
 0x2d1   : > { %v9414_v11 = vpop.xlane.xlu1 %3505 }
 0x2d2   : > { %10545 = vst [vmem:[#allocation81_spill] sm:$0xff] %v9414_v11  ;;  %4975 = vadd.xlane.f32.xlu0 %v4974_v56  ;;  %v9440_v11 = vpop.f32.mrf.mxu0 }
 0x2d3   : > { %v9420_v5 = vpop.xlane.xlu0 %3508  ;;  %10549 = vst [vmem:[#allocation85_spill] sm:$0xff] %v9440_v11 }
 0x2d4   : > { %10546 = vst [vmem:[#allocation82_spill] sm:$0xff] %v9420_v5  ;;  %4978 = vadd.xlane.f32.xlu1 %v4977_v1  ;;  %v9438_v5 = vpop.f32.mrf.mxu1 }
 0x2d5   : > { %v9428_v62 = vpop.xlane.xlu1 %3511 }
 0x2d6   : > { %10547 = vst [vmem:[#allocation83_spill] sm:$0xff] %v9428_v62  ;;  %4981 = vadd.xlane.f32.xlu0 %v4980_v24  ;;  %v9452_v62 = vpop.f32.mrf.mxu1 }
 0x2d7   : > { %v9434_v56 = vpop.xlane.xlu0 %3514 }
 0x2d8   : > { %10548 = vst [vmem:[#allocation84_spill] sm:$0xff] %v9434_v56  ;;  %4984 = vadd.xlane.f32.xlu1 %v4983_v35  ;;  %v9454_v56 = vpop.f32.mrf.mxu0 }
 0x2d9   : > { %v9442_v1 = vpop.xlane.xlu1 %3517  ;;  %10552 = vst [vmem:[#allocation88_spill] sm:$0xff] %v9454_v56 }
 0x2da   : > { %10550 = vst [vmem:[#allocation86_spill] sm:$0xff] %v9442_v1  ;;  %4987 = vadd.xlane.f32.xlu0 %v4986_v12  ;;  %v9468_v1 = vpop.f32.mrf.mxu0 }
 0x2db   : > { %v9448_v24 = vpop.xlane.xlu0 %3520 }
 0x2dc   : > { %10551 = vst [vmem:[#allocation87_spill] sm:$0xff] %v9448_v24  ;;  %4990 = vadd.xlane.f32.xlu1 %v4989_v39  ;;  %v9466_v24 = vpop.f32.mrf.mxu1 }
 0x2dd   : > { %v9456_v35 = vpop.xlane.xlu1 %3523  ;;  %10555 = vst [vmem:[#allocation91_spill] sm:$0xff] %v9466_v24 }
 0x2de   : > { %10553 = vst [vmem:[#allocation89_spill] sm:$0xff] %v9456_v35  ;;  %4993 = vadd.xlane.f32.xlu0 %v4992_v50  ;;  %v10557_v50 = vld [vmem:[#allocation9_spill] sm:$0xff]  ;;  %v9482_v24 = vpop.f32.mrf.mxu1 }
 0x2df   : > { %v9462_v12 = vpop.xlane.xlu0 %3526  ;;  %v2938_v35 = vadd.f32 %v10558_v15, %v10557_v50  ;;  %10560 = vst [vmem:[#allocation19_spill] sm:$0xff] %v9482_v24  ;;  %v10567_v24 = vld [vmem:[#allocation16_spill] sm:$0xff] }
 0x2e0   : > { %10554 = vst [vmem:[#allocation90_spill] sm:$0xff] %v9462_v12  ;;  %4996 = vadd.xlane.f32.xlu1 %v4995_v52  ;;  %v5001_v12 = vsel %vm2026_vm10, %v4935_v60, 0.0  ;;  %v4827_v52 = vpop.f32.mrf.mxu0  ;;  %v5007_v60 = vsel %vm403_vm1, %v4937_v8, 0.0 }
 0x2e1   : > { %v9470_v39 = vpop.xlane.xlu1 %3529  ;;  %v3436_v50 = vadd.f32 %v9088_v55, %v2938_v35 }
 0x2e2   : > { %10556 = vst [vmem:[#allocation92_spill] sm:$0xff] %v9470_v39  ;;  %4999 = vadd.xlane.f32.xlu0 %v4998_v23  ;;  %v10563_v23 = vld [vmem:[#allocation17_spill] sm:$0xff]  ;;  %v6764_v2 = vpop.f32.mrf.mxu0 }
 0x2e3   : > { %v9478_v11 = vpop.xlane.xlu0 %3532  ;;  %v2937_v58 = vadd.f32 %v10563_v23, %v10562_v27  ;;  %v3879_v55 = vadd.f32 %v9270_v13, %v3436_v50 }
 0x2e4   : > { %10559 = vst [vmem:[#allocation9_spill] sm:$0xff] %v9478_v11  ;;  %5002 = vadd.xlane.f32.xlu1 %v5001_v12  ;;  %v9493_v11 = vpop.f32.mrf.mxu1  ;;  %v4830_v27 = vpop.f32.mrf.mxu0 }
 0x2e5   : > { %v9484_v39 = vpop.xlane.xlu1 %3535  ;;  %10564 = vst [vmem:[#allocation8_spill] sm:$0xff] %v9493_v11  ;;  %v3435_v12 = vadd.f32 %v9056_v43, %v2937_v58  ;;  %v10571_v43 = vld [vmem:[#allocation18_spill] sm:$0xff]  ;;  %v4393_v13 = vadd.f32 %v9340_v41, %v3879_v55 }
 0x2e6   : > { %10561 = vst [vmem:[#allocation93_spill] sm:$0xff] %v9484_v39  ;;  %5005 = vadd.xlane.f32.xlu0 %v5004_v21  ;;  %v10565_v39 = vld [vmem:[#allocation10_spill] sm:$0xff]  ;;  %v3437_v21 = vadd.f32 %v9044_v6, %v10567_v24  ;;  %v9505_v8 = vpop.f32.mrf.mxu1  ;;  %v3438_v58 = vadd.f32 %v9074_v44, %v10571_v43 }
 0x2e7   : > { %v9491_v15 = vpop.xlane.xlu0 %3538  ;;  %v2941_v4 = vadd.f32 %v10566_v61, %v10565_v39  ;;  %10569 = vst [vmem:[#allocation10_spill] sm:$0xff] %v9505_v8  ;;  %v3878_v11 = vadd.f32 %v9238_v0, %v3435_v12  ;;  %v10572_v39 = vld [vmem:[#allocation11_spill] sm:$0xff]  ;;  %v10578_v12 = vld [vmem:[#allocation25_spill] sm:$0xff]  ;;  %v4891_v55 = vadd.f32 %v4830_v27, %v4393_v13 }
 0x2e8   : > { %5008 = vadd.xlane.f32.xlu1 %v5007_v60  ;;  %v10573_v61 = vld [vmem:[#allocation23_spill] sm:$0xff]  ;;  %v3880_v6 = vadd.f32 %v9224_v28, %v3437_v21  ;;  %v9519_v50 = vpop.f32.mrf.mxu1  ;;  %v3881_v21 = vadd.f32 %v9256_v14, %v3438_v58  ;;  %v9546_v14 = vld [vmem:[%s10369_s4] ss:$0 sm:$0xff]  ;;  %v10583_v58 = vld [vmem:[#allocation24_spill] sm:$0xff] }
 0x2e9   : > { %v9495_v42 = vpop.xlane.xlu1 %3541  ;;  %v3439_v60 = vadd.f32 %v9127_v54, %v2941_v4  ;;  %v2942_v56 = vadd.f32 %v10573_v61, %v10572_v39  ;;  %v10576_v54 = vld [vmem:[#allocation20_spill] sm:$0xff]  ;;  %v4392_v43 = vadd.f32 %v9312_v51, %v3878_v11 }
 0x2ea   : > { %v3441_v0 = vadd.f32 %v9108_v47, %v10576_v54  ;;  %v10577_v4 = vld [vmem:[#allocation12_spill] sm:$0xff]  ;;  %v4394_v41 = vadd.f32 %v9285_v40, %v3880_v6  ;;  %v10580_v54 = vld [vmem:[#allocation13_spill] sm:$0xff]  ;;  %v3445_v6 = vadd.f32 %v9169_v63, %v10583_v58 }
 0x2eb   : > { %v9503_v35 = vpop.xlane.xlu0 %3544  ;;  %v2945_v44 = vadd.f32 %v10578_v12, %v10577_v4  ;;  %v3882_v39 = vadd.f32 %v9314_v37, %v3439_v60  ;;  %v3440_v28 = vadd.f32 %v9155_v33, %v2942_v56  ;;  %v10581_v4 = vld [vmem:[#allocation27_spill] sm:$0xff]  ;;  %v4890_v11 = vadd.f32 %v4827_v52, %v4392_v43  ;;  %v10584_v52 = vld [vmem:[#allocation14_spill] sm:$0xff] }
 0x2ec   : > { %10568 = vst [vmem:[#allocation17_spill] sm:$0xff] %v9503_v35  ;;  %v6767_v35 = vpop.f32.mrf.mxu0  ;;  %v2946_v12 = vadd.f32 %v10581_v4, %v10580_v54  ;;  %v3884_v33 = vadd.f32 %v9287_v45, %v3441_v0  ;;  %v4395_v56 = vadd.f32 %v9326_v31, %v3881_v21  ;;  %v4892_v27 = vadd.f32 %v9468_v1, %v4394_v41  ;;  %v10588_v21 = vld [vmem:[#allocation26_spill] sm:$0xff] }
 0x2ed   : > { %v9507_v23 = vpop.xlane.xlu1 %3547  ;;  %v3443_v37 = vadd.f32 %v9183_v30, %v2945_v44  ;;  %v4396_v40 = vadd.f32 %v9368_v9, %v3882_v39  ;;  %v9552_v60 = vadd.f32 %v9546_v14, %v4891_v55  ;;  %v9570_v44 = vadd.f32 %v9546_v14, %v4890_v11 }
 0x2ee   : > { %10570 = vst [vmem:[#allocation21_spill] sm:$0xff] %v9507_v23  ;;  %v4843_v23 = vpop.f32.mrf.mxu0  ;;  %v3444_v13 = vadd.f32 %v9208_v19, %v2946_v12  ;;  %v9575_v39 = vadd.f32 %v9546_v14, %v4892_v27  ;;  %v3446_v55 = vadd.f32 %v9192_v25, %v10588_v21 }
 0x2ef   : > { %v9517_v24 = vpop.xlane.xlu0 %3550  ;;  %10582 = vst [vmem:[#allocation11_spill] sm:$0xff] %v9552_v60  ;;  %v3886_v1 = vadd.f32 %v9370_v20, %v3443_v37  ;;  %10586 = vst [vmem:[#allocation23_spill] sm:$0xff] %v9570_v44  ;;  %v4894_v43 = vadd.f32 %v4843_v23, %v4396_v40 }
 0x2f0   : > { %10574 = vst [vmem:[#allocation16_spill] sm:$0xff] %v9517_v24  ;;  %v10579_v24 = vld [vmem:[#allocation22_spill] sm:$0xff]  ;;  %v6768_v9 = vpop.f32.mrf.mxu0  ;;  %10587 = vst [vmem:[#allocation20_spill] sm:$0xff] %v9575_v39  ;;  %v3887_v25 = vadd.f32 %v9398_v32, %v3444_v13 }
 0x2f1   : > { %v9521_v8 = vpop.xlane.xlu1 %3553  ;;  %v3442_v47 = vadd.f32 %v9141_v7, %v10579_v24  ;;  %v3883_v7 = vadd.f32 %v9342_v49, %v3440_v28  ;;  %v10585_v24 = vld [vmem:[#allocation29_spill] sm:$0xff]  ;;  %v4398_v49 = vadd.f32 %v9354_v22, %v3884_v33  ;;  %v4893_v28 = vadd.f32 %v6764_v2, %v4395_v56  ;;  %v10589_v22 = vld [vmem:[#allocation15_spill] sm:$0xff]  ;;  %v10592_v33 = vld [vmem:[#allocation28_spill] sm:$0xff] }
 0x2f2   : > { %10575 = vst [vmem:[#allocation18_spill] sm:$0xff] %v9521_v8  ;;  %v4859_v8 = vpop.f32.mrf.mxu1  ;;  %v2949_v31 = vadd.f32 %v10585_v24, %v10584_v52  ;;  %v2950_v20 = vadd.f32 %v9210_v57, %v10589_v22  ;;  %v4846_v4 = vpop.f32.mrf.mxu0  ;;  %v4400_v2 = vadd.f32 %v9424_v38, %v3886_v1  ;;  %v9594_v57 = vadd.f32 %v9546_v14, %v4894_v43  ;;  %v10595_v52 = vld [vmem:[#allocation30_spill] sm:$0xff]  ;;  %v10596_v24 = vld [vmem:[#allocation63_spill] sm:$0xff] }
 0x2f3   : > { %v9532_v61 = vpop.xlane.xlu0 %3919  ;;  %v3885_v63 = vadd.f32 %v9328_v17, %v3442_v47  ;;  %v4397_v19 = vadd.f32 %v9396_v29, %v3883_v7  ;;  %v3888_v29 = vadd.f32 %v9356_v36, %v3445_v6  ;;  %v4896_v47 = vadd.f32 %v6767_v35, %v4398_v49 }
 0x2f4   : > { %v9556_v45 = vpop.f32.mrf.mxu1  ;;  %v3447_v17 = vadd.f32 %v9236_v10, %v2949_v31  ;;  %10590 = vst [vmem:[#allocation12_spill] sm:$0xff] %v9594_v57  ;;  %v9598_v37 = vadd.f32 %v9546_v14, %v4893_v28  ;;  %v3449_v40 = vadd.f32 %v9222_v18, %v10592_v33  ;;  %v3448_v11 = vadd.f32 %v9268_v53, %v2950_v20  ;;  %v10602_v20 = vld [vmem:[#allocation71_spill] sm:$0xff] }
 0x2f5   : > { %v9538_v51 = vpop.xlane.xlu1 %3922  ;;  %v4399_v12 = vadd.f32 %v9382_v3, %v3885_v63  ;;  %v4895_v10 = vadd.f32 %v4846_v4, %v4397_v19  ;;  %v3889_v38 = vadd.f32 %v9384_v48, %v3446_v55  ;;  %v10431_v3 = vrot.slane %v9330_v59, 1  ;;  %v10599_v63 = vld [vmem:[#allocation72_spill] sm:$0xff]  ;;  %v10606_v33 = vld [vmem:[#allocation21_spill] sm:$0xff] }
 0x2f6   : > { %v4862_v54 = vpop.f32.mrf.mxu1  ;;  %10591 = vst [vmem:[#allocation25_spill] sm:$0xff] %v9598_v37  ;;  %v3890_v35 = vadd.f32 %v9426_v34, %v3447_v17  ;;  %v3111_v56 = vrot.slane %v9322_v16, 1  ;;  %v4402_v18 = vadd.f32 %v9410_v26, %v3888_v29  ;;  %v4401_v53 = vadd.f32 %v9452_v62, %v3887_v25 }
 0x2f7   : > { %v9554_v30 = vpop.xlane.xlu0 %3925  ;;  %v4898_v48 = vadd.f32 %v4859_v8, %v4400_v2  ;;  %v9618_v27 = vadd.f32 %v9546_v14, %v4896_v47  ;;  %v4897_v58 = vadd.f32 %v6768_v9, %v4399_v12  ;;  %v9621_v34 = vadd.f32 %v9546_v14, %v4895_v10  ;;  %v10597_v8 = vld [vmem:[#allocation88_spill] sm:$0xff]  ;;  %v10598_v9 = vld [vmem:[#allocation19_spill] sm:$0xff]  ;;  %v10605_v12 = vld [vmem:[#allocation85_spill] sm:$0xff] }
 0x2f8   : > { %v6775_v32 = vpop.f32.mrf.mxu1  ;;  %v10429_v6 = vrot.slane %v9495_v42, 2  ;;  %v3609_v16 = vrot.slane %v9491_v15, 2  ;;  %v3450_v31 = vadd.f32 %v10596_v24, %v10595_v52  ;;  %v4403_v26 = vadd.f32 %v9438_v5, %v3889_v38  ;;  %v10603_v17 = vld [vmem:[#allocation16_spill] sm:$0xff] }
 0x2f9   : > { %v9563_v0 = vpop.xlane.xlu1 %3928  ;;  %5244 = vrot.lane.b32.xlu1 %v9552_v60, %s7130_s9  ;;  %10593 = vst [vmem:[#allocation22_spill] sm:$0xff] %v9618_v27  ;;  %10594 = vst [vmem:[#allocation13_spill] sm:$0xff] %v9621_v34  ;;  %v3892_v62 = vadd.f32 %v9412_v46, %v3449_v40  ;;  %v3891_v49 = vadd.f32 %v10597_v8, %v3448_v11  ;;  %v4404_v43 = vadd.f32 %v10598_v9, %v3890_v35  ;;  %v7131_v55 = vmov 0   ;;  %v10608_v35 = vld [vmem:[#allocation91_spill] sm:$0xff]  ;;  %v10646_v60 = vld [vmem:[#allocation6_spill] sm:$0xff] }
 0x2fa   : > { %v4875_v1 = vpop.f32.mrf.mxu1  ;;  %v10430_v19 = vrot.slane %v10599_v63, 1  ;;  %v3113_v5 = vsel %vm1628_vm11, %v3111_v56, %v10431_v3  ;;  %v4900_v46 = vadd.f32 %v9519_v50, %v4402_v18  ;;  %v9645_v28 = vadd.f32 %v9546_v14, %v4898_v48  ;;  %6837 = vset.pattern.permute.xlu1 %v7131_v55  ;;  %6838 = vset.pattern.permute.xlu0 %v7131_v55  ;;  %v10629_v3 = vld [vmem:[#allocation75_spill] sm:$0xff] }
 0x2fb   : > { %v9577_v41 = vpop.xlane.xlu0 %3931  ;;  %v4899_v21 = vadd.f32 %v4862_v54, %v4401_v53  ;;  %v9648_v22 = vadd.f32 %v9546_v14, %v4897_v58  ;;  %v3116_v4 = vrot.slane %v10602_v20, 1  ;;  %v10428_v29 = vrot.slane %v10603_v17, 2  ;;  %v10604_v54 = vld [vmem:[#allocation54_spill] sm:$0xff] }
 0x2fc   : > { %5242 = vrot.lane.b32.xlu0 %v9570_v44, %s7130_s9  ;;  %10600 = vst [vmem:[#allocation27_spill] sm:$0xff] %v9645_v28  ;;  %v3611_v50 = vsel %vm2123_vm12, %v3609_v16, %v10429_v6  ;;  %v6776_v25 = vpop.f32.mrf.mxu1  ;;  %v3149_v47 = vadd.f32 %v3113_v5, %v10604_v54  ;;  %v3893_v10 = vadd.f32 %v10605_v12, %v3450_v31  ;;  %v3614_v40 = vrot.slane %v10606_v33, 2  ;;  %v10610_v58 = vld [vmem:[#allocation10_spill] sm:$0xff] }
 0x2fd   : > { %v9587_v23 = vpop.xlane.xlu1 %3934  ;;  %5246 = vrot.lane.b32.xlu1 %v9575_v39, %s7130_s9  ;;  %10601 = vst [vmem:[#allocation24_spill] sm:$0xff] %v9648_v22  ;;  %v3118_v38 = vsel %vm1628_vm11, %v3116_v4, %v10430_v19  ;;  %v4406_v56 = vadd.f32 %v10608_v35, %v3892_v62  ;;  %v9671_v18 = vadd.f32 %v9546_v14, %v4900_v46  ;;  %v10616_v46 = vld [vmem:[#allocation8_spill] sm:$0xff]  ;;  %v10645_v44 = vld [vmem:[#allocation86_spill] sm:$0xff] }
 0x2fe   : > { %v4902_v53 = vadd.f32 %v4875_v1, %v4404_v43  ;;  %v3647_v48 = vadd.f32 %v3611_v50, %v3149_v47  ;;  %v4405_v16 = vadd.f32 %v10610_v58, %v3891_v49  ;;  %v4901_v52 = vadd.f32 %v9556_v45, %v4403_v26  ;;  %v4878_v9 = vpop.f32.mrf.mxu1  ;;  %v10613_v1 = vld [vmem:[#allocation56_spill] sm:$0xff] }
 0x2ff   : > { %v9600_v36 = vpop.xlane.xlu0 %3937  ;;  %10609 = vst [vmem:[#allocation29_spill] sm:$0xff] %v9671_v18  ;;  %v9676_v24 = vadd.f32 %v9546_v14, %v4899_v21  ;;  %v3616_v8 = vsel %vm2123_vm12, %v3614_v40, %v10428_v29  ;;  %v3151_v43 = vadd.f32 %v3118_v38, %v10613_v1  ;;  %v4904_v45 = vadd.f32 %v6775_v32, %v4406_v56  ;;  %v9732_v38 = vld [vmem:[%s9720_s13] ss:$0 sm:$0xff]  ;;  %v10628_v29 = vld [vmem:[#allocation73_spill] sm:$0xff] }
 0x300   : > { %5250 = vrot.lane.b32.xlu0 %v9594_v57, %s7130_s9  ;;  %v9692_v26 = vadd.f32 %v9546_v14, %v4902_v53  ;;  %v4407_v21 = vadd.f32 %v10616_v46, %v3893_v10  ;;  %v9696_v55 = vadd.f32 %v9546_v14, %v4901_v52  ;;  %v4903_v20 = vadd.f32 %v4878_v9, %v4405_v16  ;;  %v10641_v57 = vld [vmem:[#allocation82_spill] sm:$0xff] }
 0x301   : > { %v9611_v7 = vpop.xlane.xlu1 %3940  ;;  %5248 = vrot.lane.b32.xlu1 %v9598_v37, %s7130_s9  ;;  %10611 = vst [vmem:[#allocation26_spill] sm:$0xff] %v9676_v24  ;;  %v3649_v5 = vadd.f32 %v3616_v8, %v3151_v43  ;;  %v9708_v54 = vadd.f32 %v9546_v14, %v4904_v45  ;;  %10623 = vst [vmem:[#allocation54_spill] sm:$0xff] %v9732_v38  ;;  %v3119_v6 = vrot.slane %v10628_v29, 1  ;;  %v10639_v37 = vld [vmem:[#allocation81_spill] sm:$0xff] }
 0x302   : > { %10615 = vst [vmem:[#allocation30_spill] sm:$0xff] %v9692_v26  ;;  %10617 = vst [vmem:[#allocation63_spill] sm:$0xff] %v9696_v55  ;;  %v4905_v47 = vadd.f32 %v6776_v25, %v4407_v21  ;;  %v9711_v12 = vadd.f32 %v9546_v14, %v4903_v20  ;;  %v10626_v21 = vld [vmem:[#allocation67_spill] sm:$0xff] }
 0x303   : > { %v9625_v13 = vpop.xlane.xlu0 %3943  ;;  %10620 = vst [vmem:[#allocation72_spill] sm:$0xff] %v9708_v54  ;;  %v3107_v20 = vrot.slane %v10626_v21, 1 }
 0x304   : > { %5254 = vrot.lane.b32.xlu0 %v9618_v27, %s7130_s9  ;;  %10621 = vst [vmem:[#allocation71_spill] sm:$0xff] %v9711_v12  ;;  %v9727_v25 = vadd.f32 %v9546_v14, %v4905_v47 }
 0x305   : > { %v9636_v15 = vpop.xlane.xlu1 %3946  ;;  %5252 = vrot.lane.b32.xlu1 %v9621_v34, %s7130_s9  ;;  %v10638_v34 = vld [vmem:[#allocation78_spill] sm:$0xff] }
 0x306   : > { %10622 = vst [vmem:[#allocation16_spill] sm:$0xff] %v9727_v25 }
 0x307   : > { %v9652_v2 = vpop.xlane.xlu0 %3949 }
 0x308   : > { %5258 = vrot.lane.b32.xlu0 %v9645_v28, %s7130_s9 }
 0x309   : > { %v9662_v11 = vpop.xlane.xlu1 %3952  ;;  %5256 = vrot.lane.b32.xlu1 %v9648_v22, %s7130_s9  ;;  %v10635_v22 = vrot.slane %v10599_v63, 1 }
 0x30a   : > { %10607 = vst [vmem:[#allocation14_spill] sm:$0xff] %v9662_v11 }
 0x30b   : > { %v3956_v31 = vpop.xlane.xlu0 %3955 }
 0x30c   : > { %v9681_v62 = vadd.f32 %v3956_v31, %v3647_v48  ;;  %5262 = vrot.lane.b32.xlu0 %v9671_v18, %s7130_s9 }
 0x30d   : > { %v9687_v49 = vpop.xlane.xlu1 %3958  ;;  %5260 = vrot.lane.b32.xlu1 %v9676_v24, %s7130_s9 }
 0x30e   : > { %10612 = vst [vmem:[#allocation15_spill] sm:$0xff] %v9681_v62  ;;  %10614 = vst [vmem:[#allocation28_spill] sm:$0xff] %v9687_v49  ;;  %v10650_v62 = vld [vmem:[#allocation87_spill] sm:$0xff] }
 0x30f   : > { %v3962_v4 = vpop.xlane.xlu0 %3961  ;;  %v10651_v49 = vld [vmem:[#allocation55_spill] sm:$0xff] }
 0x310   : > { %v9698_v50 = vadd.f32 %v3962_v4, %v3649_v5  ;;  %5266 = vrot.lane.b32.xlu0 %v9692_v26, %s7130_s9  ;;  %v10625_v5 = vld [vmem:[#allocation69_spill] sm:$0xff]  ;;  %v10627_v4 = vld [vmem:[#allocation70_spill] sm:$0xff] }
 0x311   : > { %5264 = vrot.lane.b32.xlu1 %v9696_v55, %s7130_s9  ;;  %v9705_v32 = vpop.xlane.xlu1 %3964  ;;  %v3109_v46 = vrot.slane %v10625_v5, 1  ;;  %v3114_v47 = vrot.slane %v10627_v4, 1  ;;  %v10631_v55 = vld [vmem:[#allocation76_spill] sm:$0xff]  ;;  %v10634_v4 = vrot.slane %v9330_v59, 1 }
 0x312   : > { %10618 = vst [vmem:[#allocation88_spill] sm:$0xff] %v9698_v50  ;;  %10619 = vst [vmem:[#allocation19_spill] sm:$0xff] %v9705_v32  ;;  %v3582_v26 = vrot.slane %v10631_v55, 2  ;;  %v10647_v50 = vld [vmem:[#allocation5_spill] sm:$0xff]  ;;  %v10648_v32 = vld [vmem:[#allocation83_spill] sm:$0xff] }
 0x313   : > { %v9713_v10 = vpop.xlane.xlu0 %4441  ;;  %v3110_v21 = vsel %vm1628_vm11, %v3107_v20, %v3109_v46  ;;  %v3115_v29 = vsel %vm1628_vm11, %v10634_v4, %v3114_v47  ;;  %v3590_v46 = vrot.slane %v10639_v37, 2  ;;  %v3592_v47 = vrot.slane %v10641_v57, 2  ;;  %v10642_v4 = vld [vmem:[#allocation84_spill] sm:$0xff] }
 0x314   : > { %5270 = vrot.lane.b32.xlu0 %v9708_v54, %s7130_s9  ;;  %v10630_v54 = vld [vmem:[#allocation74_spill] sm:$0xff]  ;;  %v3595_v63 = vrot.slane %v10642_v4, 2  ;;  %v3150_v57 = vadd.f32 %v3115_v29, %v10651_v49 }
 0x315   : > { %5268 = vrot.lane.b32.xlu1 %v9711_v12, %s7130_s9  ;;  %v9724_v33 = vpop.xlane.xlu1 %4444  ;;  %v3579_v12 = vrot.slane %v10630_v54, 2  ;;  %v10637_v54 = vld [vmem:[#allocation79_spill] sm:$0xff]  ;;  %v10653_v4 = vld [vmem:[#allocation58_spill] sm:$0xff] }
 0x316   : > { %v3587_v55 = vrot.slane %v10637_v54, 2  ;;  %v3597_v54 = vrot.slane %v10645_v44, 2 }
 0x317   : > { %v9729_v40 = vpop.xlane.xlu0 %4447 }
 0x318   : > { %5336 = vrot.lane.b32.xlu0 %v9732_v38, %s7130_s9  ;;  %v10632_v38 = vld [vmem:[#allocation7_spill] sm:$0xff] }
 0x319   : > { %5272 = vrot.lane.b32.xlu1 %v9727_v25, %s7130_s9  ;;  %v9738_v35 = vpop.xlane.xlu1 %4450  ;;  %v3580_v25 = vrot.slane %v10629_v3, 2  ;;  %v3106_v24 = vrot.slane %v10632_v38, 1  ;;  %v3120_v3 = vsel %vm1628_vm11, %v10635_v22, %v3119_v6  ;;  %v3585_v38 = vrot.slane %v10638_v34, 2  ;;  %v10644_v6 = vld [vmem:[#allocation77_spill] sm:$0xff] }
 0x31a   : > { %v3584_v22 = vrot.slane %v10644_v6, 2  ;;  %v3148_v34 = vadd.f32 %v3110_v21, %v10646_v60  ;;  %v10657_v21 = vld [vmem:[#allocation90_spill] sm:$0xff] }
 0x31b   : > { %v9740_v56 = vpop.xlane.xlu0 %4453  ;;  %v3108_v5 = vsel %vm1628_vm11, %v3106_v24, %v3107_v20  ;;  %v3583_v27 = vsel %vm2123_vm12, %v3580_v25, %v3582_v26  ;;  %v3581_v24 = vsel %vm2123_vm12, %v3579_v12, %v3580_v25  ;;  %v10640_v20 = vld [vmem:[#allocation80_spill] sm:$0xff]  ;;  %v3594_v12 = vrot.slane %v10648_v32, 2  ;;  %v10649_v25 = vld [vmem:[#allocation89_spill] sm:$0xff] }
 0x31c   : > { %v3589_v59 = vrot.slane %v10640_v20, 2  ;;  %v3147_v26 = vadd.f32 %v3108_v5, %v10647_v50  ;;  %v3600_v37 = vrot.slane %v10649_v25, 2  ;;  %v3599_v20 = vrot.slane %v10650_v62, 2 }
 0x31d   : > { %v9742_v53 = vpop.xlane.xlu1 %4456  ;;  %v3586_v44 = vsel %vm2123_vm12, %v3584_v22, %v3585_v38  ;;  %v3588_v50 = vsel %vm2123_vm12, %v3585_v38, %v3587_v55  ;;  %v3593_v32 = vsel %vm2123_vm12, %v3590_v46, %v3592_v47  ;;  %v3596_v62 = vsel %vm2123_vm12, %v3594_v12, %v3595_v63  ;;  %v10659_v22 = vld [vmem:[#allocation9_spill] sm:$0xff]  ;;  %v10662_v12 = vld [vmem:[#allocation60_spill] sm:$0xff] }
 0x31e   : > { %v3591_v5 = vsel %vm2123_vm12, %v3589_v59, %v3590_v46  ;;  %v3602_v29 = vrot.slane %v10657_v21, 2  ;;  %v3605_v55 = vrot.slane %v10659_v22, 2  ;;  %v10660_v38 = vld [vmem:[#allocation17_spill] sm:$0xff]  ;;  %v3601_v46 = vsel %vm2123_vm12, %v3599_v20, %v3600_v37 }
 0x31f   : > { %v9744_v48 = vpop.xlane.xlu0 %4459  ;;  %v3612_v47 = vrot.slane %v10660_v38, 2  ;;  %v3638_v25 = vadd.f32 %v3588_v50, %v10662_v12  ;;  %v10667_v22 = vld [vmem:[#allocation65_spill] sm:$0xff]  ;;  %v10668_v38 = vld [vmem:[#allocation64_spill] sm:$0xff]  ;;  %v10669_v12 = vld [vmem:[#allocation66_spill] sm:$0xff] }
 0x320   : > { %v9842_v20 = vadd.f32 %v3596_v62, %v10668_v38  ;;  %v3603_v50 = vsel %vm2123_vm12, %v3600_v37, %v3602_v29  ;;  %v4542_v29 = vrot.slane %v9740_v56, 1 }
 0x321   : > { %v9746_v14 = vpop.xlane.xlu1 %4462 }
 0x323   : > { %v9748_v58 = vpop.xlane.xlu0 %4465 }
 0x325   : > { %v9750_v16 = vpop.xlane.xlu1 %4468 }
 0x327   : > { %v9752_v52 = vpop.xlane.xlu0 %4471 }
 0x329   : > { %v9754_v31 = vpop.xlane.xlu1 %4474 }
 0x32b   : > { %v9756_v8 = vpop.xlane.xlu0 %4477 }
 0x32d   : > { %v9758_v9 = vpop.xlane.xlu1 %4480 }
 0x32f   : > { %v9760_v1 = vpop.xlane.xlu0 %4483 }
 0x331   : > { %v9762_v43 = vpop.xlane.xlu1 %4486 }
 0x332   : > { %10624 = vst [vmem:[#allocation85_spill] sm:$0xff] %v9762_v43  ;;  %v10655_v43 = vld [vmem:[#allocation57_spill] sm:$0xff] }
 0x333   : > { %v9764_v45 = vpop.xlane.xlu0 %4489  ;;  %v9812_v60 = vadd.f32 %v3120_v3, %v10655_v43  ;;  %v10658_v43 = vld [vmem:[#allocation93_spill] sm:$0xff] }
 0x334   : > { %v3607_v3 = vrot.slane %v10658_v43, 2 }
 0x335   : > { %v9770_v19 = vpop.xlane.xlu1 %4492 }
 0x337   : > { %v9776_v18 = vpop.xlane.xlu0 %4495 }
 0x338   : > { %10633 = vst [vmem:[#allocation21_spill] sm:$0xff] %v9776_v18 }
 0x339   : > { %v9786_v28 = vpop.xlane.xlu1 %4498 }
 0x33a   : > { %10636 = vst [vmem:[#allocation91_spill] sm:$0xff] %v9786_v28  ;;  %v10654_v28 = vld [vmem:[#allocation52_spill] sm:$0xff] }
 0x33b   : > { %v9796_v39 = vpop.xlane.xlu0 %4501  ;;  %v3635_v6 = vadd.f32 %v3581_v24, %v10654_v28  ;;  %v4537_v28 = vrot.slane %v9724_v33, 1  ;;  %v4536_v24 = vrot.slane %v9713_v10, 1  ;;  %v4539_v33 = vrot.slane %v9729_v40, 1 }
 0x33c   : > { %10643 = vst [vmem:[#allocation10_spill] sm:$0xff] %v9796_v39  ;;  %v3636_v39 = vadd.f32 %v3583_v27, %v10653_v4  ;;  %v3598_v27 = vsel %vm2123_vm12, %v3595_v63, %v3597_v54  ;;  %v10663_v4 = vld [vmem:[#allocation59_spill] sm:$0xff]  ;;  %v10665_v54 = vld [vmem:[#allocation92_spill] sm:$0xff] }
 0x33d   : > { %v9806_v18 = vpop.xlane.xlu1 %4504  ;;  %v3637_v21 = vadd.f32 %v3586_v44, %v10663_v4  ;;  %v3604_v10 = vrot.slane %v10665_v54, 2  ;;  %v9839_v11 = vadd.f32 %v3598_v27, %v10667_v22  ;;  %v9846_v44 = vadd.f32 %v3601_v46, %v10669_v12  ;;  %v10671_v54 = vld [vmem:[#allocation18_spill] sm:$0xff] }
 0x33e   : > { %10652 = vst [vmem:[#allocation56_spill] sm:$0xff] %v9806_v18  ;;  %v10664_v18 = vld [vmem:[#allocation61_spill] sm:$0xff]  ;;  %v10670_v27 = vrot.slane %v9495_v42, 2  ;;  %v3617_v22 = vrot.slane %v10671_v54, 2  ;;  %v4540_v37 = vsel %vm1628_vm11, %v4537_v28, %v4539_v33 }
 0x33f   : > { %v9818_v49 = vpop.xlane.xlu0 %4507  ;;  %v3639_v63 = vadd.f32 %v3591_v5, %v10664_v18  ;;  %v4538_v18 = vsel %vm1628_vm11, %v4536_v24, %v4537_v28  ;;  %v3966_v5 = vadd.f32 %v9532_v61, %v3635_v6  ;;  %v3967_v24 = vadd.f32 %v9538_v51, %v3636_v39 }
 0x340   : > { %10656 = vst [vmem:[#allocation8_spill] sm:$0xff] %v9818_v49  ;;  %v10666_v49 = vld [vmem:[#allocation62_spill] sm:$0xff]  ;;  %v3613_v62 = vsel %vm2123_vm12, %v10670_v27, %v3612_v47  ;;  %v4541_v47 = vrot.slane %v9738_v35, 1  ;;  %v3968_v12 = vadd.f32 %v9554_v30, %v3637_v21  ;;  %v4549_v30 = vrot.slane %v9748_v58, 1 }
 0x341   : > { %v9828_v59 = vpop.xlane.xlu1 %4510  ;;  %v9836_v43 = vadd.f32 %v3593_v32, %v10666_v49  ;;  %v3608_v32 = vsel %vm2123_vm12, %v3605_v55, %v3607_v3  ;;  %v3606_v49 = vsel %vm2123_vm12, %v3604_v10, %v3605_v55  ;;  %v4592_v6 = vadd.f32 %v4538_v18, %v3966_v5  ;;  %v9866_v10 = vld [vmem:[#allocation2] ss:$0 sm:$0xff] }
 0x342   : > { %10661 = vst [vmem:[#allocation69_spill] sm:$0xff] %v9828_v59  ;;  %v4544_v3 = vrot.slane %v9742_v53, 1  ;;  %v9863_v42 = vadd.f32 %v3606_v49, %v3147_v26  ;;  %v9869_v56 = vadd.f32 %v3608_v32, %v3148_v34  ;;  %v9871_v38 = vadd.f32 %v3613_v62, %v3150_v57 }
 0x343   : > { %v4940_v59 = vpop.xlane.xlu0 %4939  ;;  %v4593_v51 = vadd.f32 %v4540_v37, %v3967_v24  ;;  %v10673_v53 = vrot.slane %v10603_v17, 2  ;;  %v4543_v35 = vsel %vm1628_vm11, %v4541_v47, %v4542_v29  ;;  %v4546_v34 = vrot.slane %v9744_v48, 1 }
 0x344   : > { %v5034_v40 = vrot.slane %v4940_v59, 2  ;;  %v10672_v59 = vld [vmem:[#allocation68_spill] sm:$0xff]  ;;  %v4547_v49 = vrot.slane %v9746_v14, 1  ;;  %v3969_v27 = vadd.f32 %v9563_v0, %v3638_v25  ;;  %v4594_v62 = vadd.f32 %v4543_v35, %v3968_v12 }
 0x345   : > { %v4943_v4 = vpop.xlane.xlu1 %4942  ;;  %v9860_v61 = vadd.f32 %v3603_v50, %v10672_v59  ;;  %v3618_v26 = vsel %vm2123_vm12, %v10673_v53, %v3617_v22  ;;  %v3970_v37 = vadd.f32 %v9577_v41, %v3639_v63  ;;  %v4552_v41 = vrot.slane %v9752_v52, 1 }
 0x346   : > { %v5035_v46 = vrot.slane %v4943_v4, 2  ;;  %v9888_v48 = vadd.f32 %v3618_v26, %v9812_v60  ;;  %v4548_v0 = vsel %vm1628_vm11, %v4546_v34, %v4547_v49  ;;  %v4550_v25 = vsel %vm1628_vm11, %v4547_v49, %v4549_v30 }
 0x347   : > { %v4946_v55 = vpop.xlane.xlu0 %4945  ;;  %v3971_v47 = vadd.f32 %v9587_v23, %v9836_v43  ;;  %v3973_v26 = vadd.f32 %v9611_v7, %v9839_v11  ;;  %v4556_v34 = vrot.slane %v9756_v8, 1  ;;  %v4559_v7 = vrot.slane %v9760_v1, 1 }
 0x348   : > { %v5036_v28 = vsel %vm2123_vm12, %v5034_v40, %v5035_v46  ;;  %v5037_v33 = vrot.slane %v4946_v55, 2  ;;  %v4545_v40 = vsel %vm1628_vm11, %v4542_v29, %v4544_v3  ;;  %v3975_v49 = vadd.f32 %v9636_v15, %v9860_v61 }
 0x349   : > { %v5090_v39 = vadd.f32 %v5036_v28, %v4592_v6  ;;  %v4949_v50 = vpop.xlane.xlu1 %4948  ;;  %v4595_v14 = vadd.f32 %v4545_v40, %v3969_v27  ;;  %v3972_v28 = vadd.f32 %v9600_v36, %v9842_v20  ;;  %v4597_v35 = vadd.f32 %v4550_v25, %v3971_v47 }
 0x34a   : > { %v5038_v18 = vsel %vm2123_vm12, %v5035_v46, %v5037_v33  ;;  %v5039_v21 = vrot.slane %v4949_v50, 2  ;;  %v4554_v33 = vrot.slane %v9754_v31, 1  ;;  %v4551_v50 = vrot.slane %v9750_v16, 1 }
 0x34b   : > { %v5370_v57 = vadd.f32 %v9866_v10, %v5090_v39  ;;  %v5091_v5 = vadd.f32 %v5038_v18, %v4593_v51  ;;  %v4952_v32 = vpop.xlane.xlu0 %4951  ;;  %v4596_v39 = vadd.f32 %v4548_v0, %v3970_v37  ;;  %v4557_v16 = vrot.slane %v9758_v9, 1 }
 0x34c   : > { %v5040_v17 = vrot.slane %v4952_v32, 2  ;;  %v4553_v43 = vsel %vm1628_vm11, %v4551_v50, %v4552_v41  ;;  %v4555_v40 = vsel %vm1628_vm11, %v4552_v41, %v4554_v33  ;;  %v3974_v30 = vadd.f32 %v9625_v13, %v9846_v44 }
 0x34d   : > { %v6326_v4 = vmul.f32 -1.442695, %v5370_v57  ;;  %v5371_v54 = vadd.f32 %v9866_v10, %v5091_v5  ;;  %v4955_v22 = vpop.xlane.xlu1 %4954  ;;  %v3976_v8 = vadd.f32 %v9652_v2, %v9863_v42  ;;  %v4598_v9 = vadd.f32 %v4553_v43, %v3972_v28 }
 0x34e   : > { %v5042_v29 = vrot.slane %v4955_v22, 2  ;;  %v5041_v46 = vsel %vm2123_vm12, %v5039_v21, %v5040_v17  ;;  %v4560_v15 = vsel %vm1628_vm11, %v4557_v16, %v4559_v7  ;;  %v4564_v2 = vrot.slane %v9770_v19, 1  ;;  %v10678_v7 = vld [vmem:[#allocation10_spill] sm:$0xff] }
 0x34f   : > { %6995 = vpow2.f32 %v6326_v4  ;;  %v6327_v58 = vmul.f32 -1.442695, %v5371_v54  ;;  %v5092_v24 = vadd.f32 %v5041_v46, %v4594_v62  ;;  %v4958_v59 = vpop.xlane.xlu0 %4957  ;;  %v4599_v4 = vadd.f32 %v4555_v40, %v3973_v26 }
 0x350   : > { %v5043_v6 = vsel %vm2123_vm12, %v5040_v17, %v5042_v29  ;;  %v5044_v3 = vrot.slane %v4958_v59, 2  ;;  %v4558_v54 = vsel %vm1628_vm11, %v4556_v34, %v4557_v16  ;;  %v4562_v42 = vrot.slane %v9764_v45, 1 }
 0x351   : > { %6997 = vpow2.f32 %v6327_v58  ;;  %v5093_v60 = vadd.f32 %v5043_v6, %v4595_v14  ;;  %v5372_v63 = vadd.f32 %v9866_v10, %v5092_v24  ;;  %v4961_v55 = vpop.xlane.xlu1 %4960  ;;  %v10674_v6 = vld [vmem:[#allocation14_spill] sm:$0xff]  ;;  %v4600_v41 = vadd.f32 %v4558_v54, %v3974_v30 }
 0x352   : > { %v5045_v51 = vrot.slane %v4961_v55, 2  ;;  %v4601_v33 = vadd.f32 %v4560_v15, %v3975_v49 }
 0x353   : > { %v5373_v12 = vadd.f32 %v9866_v10, %v5093_v60  ;;  %v6328_v52 = vmul.f32 -1.442695, %v5372_v63  ;;  %v4964_v53 = vpop.xlane.xlu0 %4963  ;;  %v10675_v60 = vld [vmem:[#allocation85_spill] sm:$0xff] }
 0x354   : > { %v5046_v18 = vsel %vm2123_vm12, %v5044_v3, %v5045_v51  ;;  %v5047_v23 = vrot.slane %v4964_v53, 2  ;;  %v3977_v3 = vadd.f32 %v10674_v6, %v9869_v56  ;;  %v4561_v63 = vrot.slane %v10675_v60, 1 }
 0x355   : > { %6999 = vpow2.f32 %v6328_v52  ;;  %v6329_v36 = vmul.f32 -1.442695, %v5373_v12  ;;  %v5094_v31 = vadd.f32 %v5046_v18, %v4596_v39  ;;  %v4967_v20 = vpop.xlane.xlu1 %4966  ;;  %v4565_v12 = vsel %vm1628_vm11, %v4562_v42, %v4564_v2 }
 0x356   : > { %v5048_v57 = vsel %vm2123_vm12, %v5045_v51, %v5047_v23  ;;  %v5049_v21 = vrot.slane %v4967_v20, 2  ;;  %v4563_v51 = vsel %vm1628_vm11, %v4561_v63, %v4562_v42  ;;  %v10677_v23 = vld [vmem:[#allocation21_spill] sm:$0xff] }
 0x357   : > { %7001 = vpow2.f32 %v6329_v36  ;;  %v5374_v11 = vadd.f32 %v9866_v10, %v5094_v31  ;;  %v5095_v5 = vadd.f32 %v5048_v57, %v4597_v35  ;;  %v4970_v32 = vpop.xlane.xlu0 %4969  ;;  %v10676_v35 = vld [vmem:[#allocation91_spill] sm:$0xff]  ;;  %v4566_v43 = vrot.slane %v10677_v23, 1 }
 0x358   : > { %v5050_v17 = vrot.slane %v4970_v32, 2  ;;  %v4567_v18 = vrot.slane %v10676_v35, 1  ;;  %v4602_v57 = vadd.f32 %v4563_v51, %v3976_v8 }
 0x359   : > { %v6330_v27 = vmul.f32 -1.442695, %v5374_v11  ;;  %v5375_v1 = vadd.f32 %v9866_v10, %v5095_v5  ;;  %v4973_v62 = vpop.xlane.xlu1 %4972  ;;  %v4569_v11 = vrot.slane %v10678_v7, 1  ;;  %v10685_v7 = vld [vmem:[#allocation88_spill] sm:$0xff] }
 0x35a   : > { %v5052_v22 = vrot.slane %v4973_v62, 2  ;;  %v5051_v37 = vsel %vm2123_vm12, %v5049_v21, %v5050_v17  ;;  %v4568_v54 = vsel %vm1628_vm11, %v4566_v43, %v4567_v18 }
 0x35b   : > { %7003 = vpow2.f32 %v6330_v27  ;;  %v6331_v13 = vmul.f32 -1.442695, %v5375_v1  ;;  %v5096_v44 = vadd.f32 %v5051_v37, %v4598_v9  ;;  %v4976_v61 = vpop.xlane.xlu0 %4975  ;;  %v10679_v9 = vld [vmem:[#allocation28_spill] sm:$0xff]  ;;  %v4603_v1 = vadd.f32 %v4565_v12, %v3977_v3 }
 0x35c   : > { %v6996_v29 = vpop.eup %6995  ;;  %v5053_v46 = vsel %vm2123_vm12, %v5050_v17, %v5052_v22  ;;  %v5054_v14 = vrot.slane %v4976_v61, 2  ;;  %v3979_v27 = vadd.f32 %v10679_v9, %v9871_v38 }
 0x35d   : > { %v5434_v58 = vadd.f32 1.0, %v6996_v29  ;;  %7005 = vpow2.f32 %v6331_v13  ;;  %v5097_v24 = vadd.f32 %v5053_v46, %v4599_v4  ;;  %v5376_v59 = vadd.f32 %v9866_v10, %v5096_v44  ;;  %v4979_v0 = vpop.xlane.xlu1 %4978 }
 0x35e   : > { %v6998_v25 = vpop.eup %6997  ;;  %v5055_v55 = vrot.slane %v4979_v0, 2  ;;  %v4570_v13 = vsel %vm1628_vm11, %v4567_v18, %v4569_v11  ;;  %v10682_v0 = vld [vmem:[#allocation8_spill] sm:$0xff] }
 0x35f   : > { %7007 = vrcp.f32 %v5434_v58  ;;  %v5435_v19 = vadd.f32 1.0, %v6998_v25  ;;  %v5377_v45 = vadd.f32 %v9866_v10, %v5097_v24  ;;  %v6332_v47 = vmul.f32 -1.442695, %v5376_v59  ;;  %v4982_v28 = vpop.xlane.xlu0 %4981  ;;  %v10681_v24 = vld [vmem:[#allocation69_spill] sm:$0xff] }
 0x360   : > { %v5056_v39 = vsel %vm2123_vm12, %v5054_v14, %v5055_v55  ;;  %v5057_v50 = vrot.slane %v4982_v28, 2  ;;  %v10680_v14 = vld [vmem:[#allocation15_spill] sm:$0xff]  ;;  %v4574_v59 = vrot.slane %v10681_v24, 1  ;;  %v4572_v25 = vrot.slane %v10682_v0, 1 }
 0x361   : > { %7009 = vrcp.f32 %v5435_v19  ;;  %v6333_v56 = vmul.f32 -1.442695, %v5377_v45  ;;  %v5098_v52 = vadd.f32 %v5056_v39, %v4600_v41  ;;  %v4985_v53 = vpop.xlane.xlu1 %4984  ;;  %v4604_v58 = vadd.f32 %v4568_v54, %v10680_v14  ;;  %v10683_v19 = vld [vmem:[#allocation56_spill] sm:$0xff] }
 0x362   : > { %v7000_v26 = vpop.eup %6999  ;;  %7011 = vpow2.f32 %v6332_v47  ;;  %v5058_v36 = vsel %vm2123_vm12, %v5055_v55, %v5057_v50  ;;  %v5059_v5 = vrot.slane %v4985_v53, 2  ;;  %v4571_v45 = vrot.slane %v10683_v19, 1 }
 0x363   : > { %v5436_v31 = vadd.f32 1.0, %v7000_v26  ;;  %7013 = vpow2.f32 %v6333_v56  ;;  %v5378_v20 = vadd.f32 %v9866_v10, %v5098_v52  ;;  %v5099_v40 = vadd.f32 %v5058_v36, %v4601_v33  ;;  %v4988_v16 = vpop.xlane.xlu0 %4987 }
 0x364   : > { %v7002_v34 = vpop.eup %7001  ;;  %v5060_v32 = vrot.slane %v4988_v16, 2  ;;  %v4605_v47 = vadd.f32 %v4570_v13, %v3979_v27  ;;  %v4573_v52 = vsel %vm1628_vm11, %v4571_v45, %v4572_v25  ;;  %v4575_v53 = vsel %vm1628_vm11, %v4572_v25, %v4574_v59 }
 0x365   : > { %v5437_v49 = vadd.f32 1.0, %v7002_v34  ;;  %7015 = vrcp.f32 %v5436_v31  ;;  %v6334_v30 = vmul.f32 -1.442695, %v5378_v20  ;;  %v5379_v21 = vadd.f32 %v9866_v10, %v5099_v40  ;;  %v4991_v17 = vpop.xlane.xlu1 %4990  ;;  %v10684_v20 = vld [vmem:[#allocation19_spill] sm:$0xff] }
 0x366   : > { %v5062_v62 = vrot.slane %v4991_v17, 2  ;;  %v5061_v4 = vsel %vm2123_vm12, %v5059_v5, %v5060_v32  ;;  %v3981_v40 = vadd.f32 %v10684_v20, %v9888_v48  ;;  %v4606_v11 = vadd.f32 %v4573_v52, %v10685_v7 }
 0x367   : > { %7017 = vrcp.f32 %v5437_v49  ;;  %v6335_v8 = vmul.f32 -1.442695, %v5379_v21  ;;  %v5100_v22 = vadd.f32 %v5061_v4, %v4602_v57  ;;  %v4994_v37 = vpop.xlane.xlu0 %4993 }
 0x368   : > { %v7004_v15 = vpop.eup %7003  ;;  %7019 = vpow2.f32 %v6334_v30  ;;  %v5063_v44 = vsel %vm2123_vm12, %v5060_v32, %v5062_v62  ;;  %v5064_v61 = vrot.slane %v4994_v37, 2  ;;  %v4607_v17 = vadd.f32 %v4575_v53, %v3981_v40 }
 0x369   : > { %v5438_v29 = vadd.f32 1.0, %v7004_v15  ;;  %7021 = vpow2.f32 %v6335_v8  ;;  %v5101_v38 = vadd.f32 %v5063_v44, %v4603_v1  ;;  %v5380_v2 = vadd.f32 %v9866_v10, %v5100_v22  ;;  %v4997_v42 = vpop.xlane.xlu1 %4996 }
 0x36a   : > { %v7006_v46 = vpop.eup %7005  ;;  %v5065_v6 = vrot.slane %v4997_v42, 2 }
 0x36b   : > { %7023 = vrcp.f32 %v5438_v29  ;;  %v5439_v3 = vadd.f32 1.0, %v7006_v46  ;;  %v5381_v41 = vadd.f32 %v9866_v10, %v5101_v38  ;;  %v6336_v60 = vmul.f32 -1.442695, %v5380_v2  ;;  %v5000_v63 = vpop.xlane.xlu0 %4999 }
 0x36c   : > { %v9951_v55 = vpop.eup %7007  ;;  %v5066_v28 = vsel %vm2123_vm12, %v5064_v61, %v5065_v6  ;;  %v5067_v33 = vrot.slane %v5000_v63, 2 }
 0x36d   : > { %7025 = vrcp.f32 %v5439_v3  ;;  %v6337_v51 = vmul.f32 -1.442695, %v5381_v41  ;;  %v5102_v39 = vadd.f32 %v5066_v28, %v4604_v58  ;;  %v5003_v50 = vpop.xlane.xlu1 %5002  ;;  %v5482_v12 = vsub.f32 1.0, %v9951_v55 }
 0x36e   : > { %v9956_v56 = vpop.eup %7009  ;;  %7027 = vpow2.f32 %v6336_v60  ;;  %v5068_v26 = vsel %vm2123_vm12, %v5065_v6, %v5067_v33  ;;  %v5069_v34 = vrot.slane %v5003_v50, 2 }
 0x36f   : > { %v7012_v35 = vpop.eup %7011  ;;  %7029 = vpow2.f32 %v6337_v51  ;;  %v5382_v18 = vadd.f32 %v9866_v10, %v5102_v39  ;;  %v5103_v23 = vadd.f32 %v5068_v26, %v4605_v47  ;;  %5500 = vperm.xlu1 %6837, %v5482_v12   ;;  %v5006_v43 = vpop.xlane.xlu0 %5005  ;;  %v5483_v36 = vsub.f32 1.0, %v9956_v56 }
 0x370   : > { %v7014_v31 = vpop.eup %7013  ;;  %v5440_v16 = vadd.f32 1.0, %v7012_v35  ;;  %v5070_v57 = vrot.slane %v5006_v43, 2 }
 0x371   : > { %v5441_v5 = vadd.f32 1.0, %v7014_v31  ;;  %v6338_v32 = vmul.f32 -1.442695, %v5382_v18  ;;  %v5383_v49 = vadd.f32 %v9866_v10, %v5103_v23  ;;  %v5009_v30 = vpop.xlane.xlu1 %5008  ;;  %5505 = vperm.xlu0 %6838, %v5483_v36  }
 0x372   : > { %v9967_v21 = vpop.eup %7015  ;;  %7031 = vrcp.f32 %v5440_v16  ;;  %v5072_v9 = vrot.slane %v5009_v30, 2  ;;  %v5071_v27 = vsel %vm2123_vm12, %v5069_v34, %v5070_v57 }
 0x373   : > { %7033 = vrcp.f32 %v5441_v5  ;;  %v6339_v48 = vmul.f32 -1.442695, %v5383_v49  ;;  %v5104_v1 = vadd.f32 %v5071_v27, %v4606_v11  ;;  %v5484_v62 = vsub.f32 1.0, %v9967_v21  ;;  %v9993_v11 = vpop.permute.xlu0 %5242 }
 0x374   : > { %v9971_v4 = vpop.eup %7017  ;;  %7035 = vpow2.f32 %v6338_v32  ;;  %v5073_v54 = vsel %vm2123_vm12, %v5070_v57, %v5072_v9 }
 0x375   : > { %v7020_v8 = vpop.eup %7019  ;;  %7037 = vpow2.f32 %v6339_v48  ;;  %v5105_v22 = vadd.f32 %v5073_v54, %v4607_v17  ;;  %v5384_v37 = vadd.f32 %v9866_v10, %v5104_v1  ;;  %5510 = vperm.xlu1 %6837, %v5484_v62   ;;  %v5485_v38 = vsub.f32 1.0, %v9971_v4  ;;  %v9985_v57 = vpop.permute.xlu1 %5244 }
 0x376   : > { %v7022_v15 = vpop.eup %7021  ;;  %v5442_v13 = vadd.f32 1.0, %v7020_v8 }
 0x377   : > { %v5443_v44 = vadd.f32 1.0, %v7022_v15  ;;  %v5385_v61 = vadd.f32 %v9866_v10, %v5105_v22  ;;  %v6340_v29 = vmul.f32 -1.442695, %v5384_v37  ;;  %v9997_v32 = vpop.permute.xlu0 %5250 }
 0x378   : > { %v9977_v2 = vpop.eup %7023  ;;  %7039 = vrcp.f32 %v5442_v13 }
 0x379   : > { %7041 = vrcp.f32 %v5443_v44  ;;  %v6341_v42 = vmul.f32 -1.442695, %v5385_v61  ;;  %5515 = vperm.xlu1 %6837, %v5485_v38   ;;  %v5486_v46 = vsub.f32 1.0, %v9977_v2  ;;  %v10697_v44 = vld [vmem:[#allocation45_spill] sm:$0xff] }
 0x37a   : > { %v7026_v14 = vpop.eup %7025  ;;  %7043 = vpow2.f32 %v6340_v29  ;;  %v5157_v61 = vrot.slane %v10697_v44, 1  ;;  %v10698_v29 = vld [vmem:[#allocation32_spill] sm:$0xff] }
 0x37b   : > { %v7028_v58 = vpop.eup %7027  ;;  %7045 = vpow2.f32 %v6341_v42  ;;  %5520 = vperm.xlu0 %6838, %v5486_v46   ;;  %v5487_v24 = vsub.f32 1.0, %v7026_v14  ;;  %v10001_v30 = vpop.permute.xlu0 %5254  ;;  %v5155_v38 = vrot.slane %v10698_v29, 1  ;;  %v10700_v46 = vld [vmem:[#allocation34_spill] sm:$0xff] }
 0x37c   : > { %v7030_v59 = vpop.eup %7029  ;;  %v5444_v0 = vadd.f32 1.0, %v7028_v58  ;;  %10688 = vst [vmem:[#allocation73_spill] sm:$0xff] %v10001_v30 }
 0x37d   : > { %v5445_v10 = vadd.f32 1.0, %v7030_v59  ;;  %5525 = vperm.xlu1 %6837, %v5487_v24   ;;  %v10702_v24 = vld [vmem:[#allocation35_spill] sm:$0xff] }
 0x37e   : > { %7047 = vrcp.f32 %v5444_v0  ;;  %v5164_v59 = vrot.slane %v10702_v24, 1  ;;  %v10703_v0 = vld [vmem:[#allocation36_spill] sm:$0xff] }
 0x37f   : > { %v7032_v25 = vpop.eup %7031  ;;  %7049 = vrcp.f32 %v5445_v10  ;;  %v10005_v17 = vpop.permute.xlu0 %5258  ;;  %v5165_v10 = vrot.slane %v10703_v0, 1 }
 0x380   : > { %v7034_v6 = vpop.eup %7033  ;;  %v5488_v3 = vsub.f32 1.0, %v7032_v25  ;;  %10690 = vst [vmem:[#allocation74_spill] sm:$0xff] %v10005_v17 }
 0x381   : > { %v7036_v41 = vpop.eup %7035  ;;  %v5489_v60 = vsub.f32 1.0, %v7034_v6 }
 0x382   : > { %v7038_v63 = vpop.eup %7037  ;;  %v5446_v19 = vadd.f32 1.0, %v7036_v41  ;;  %5530 = vperm.xlu0 %6838, %v5488_v3   ;;  %v5158_v41 = vsel %vm1628_vm11, %v5155_v38, %v5157_v61  ;;  %v10717_v61 = vld [vmem:[#allocation48_spill] sm:$0xff] }
 0x383   : > { %v5447_v45 = vadd.f32 1.0, %v7038_v63  ;;  %5535 = vperm.xlu1 %6837, %v5489_v60   ;;  %v10009_v27 = vpop.permute.xlu0 %5262  ;;  %v10706_v60 = vld [vmem:[#allocation46_spill] sm:$0xff] }
 0x384   : > { %7051 = vrcp.f32 %v5446_v19  ;;  %10692 = vst [vmem:[#allocation7_spill] sm:$0xff] %v10009_v27  ;;  %v5162_v63 = vrot.slane %v10706_v60, 1  ;;  %v10707_v19 = vld [vmem:[#allocation38_spill] sm:$0xff] }
 0x385   : > { %v7040_v47 = vpop.eup %7039  ;;  %7053 = vrcp.f32 %v5447_v45  ;;  %v5170_v45 = vrot.slane %v10707_v19, 1 }
 0x386   : > { %v7042_v28 = vpop.eup %7041  ;;  %v5490_v33 = vsub.f32 1.0, %v7040_v47 }
 0x387   : > { %v7044_v51 = vpop.eup %7043  ;;  %v5491_v39 = vsub.f32 1.0, %v7042_v28  ;;  %v10013_v1 = vpop.permute.xlu0 %5266 }
 0x388   : > { %v7046_v50 = vpop.eup %7045  ;;  %v5448_v12 = vadd.f32 1.0, %v7044_v51  ;;  %5540 = vperm.xlu0 %6838, %v5490_v33   ;;  %10694 = vst [vmem:[#allocation78_spill] sm:$0xff] %v10013_v1 }
 0x389   : > { %v5449_v52 = vadd.f32 1.0, %v7046_v50  ;;  %5545 = vperm.xlu1 %6837, %v5491_v39   ;;  %v10709_v39 = vld [vmem:[#allocation47_spill] sm:$0xff] }
 0x38a   : > { %7055 = vrcp.f32 %v5448_v12  ;;  %v5167_v50 = vrot.slane %v10709_v39, 1  ;;  %v5166_v12 = vsel %vm1628_vm11, %v5164_v59, %v5165_v10 }
 0x38b   : > { %v7048_v53 = vpop.eup %7047  ;;  %7057 = vrcp.f32 %v5449_v52  ;;  %v10710_v52 = vld [vmem:[#allocation37_spill] sm:$0xff] }
 0x38c   : > { %v7050_v26 = vpop.eup %7049  ;;  %v5492_v35 = vsub.f32 1.0, %v7048_v53 }
 0x38d   : > { %v5493_v18 = vsub.f32 1.0, %v7050_v26 }
 0x38e   : > { %5550 = vperm.xlu0 %6838, %v5492_v35  }
 0x38f   : > { %5555 = vperm.xlu1 %6837, %v5493_v18   ;;  %v10712_v18 = vld [vmem:[#allocation40_spill] sm:$0xff] }
 0x391   : > { %v7052_v23 = vpop.eup %7051 }
 0x392   : > { %v7054_v43 = vpop.eup %7053  ;;  %v5494_v36 = vsub.f32 1.0, %v7052_v23 }
 0x393   : > { %v5495_v31 = vsub.f32 1.0, %v7054_v43 }
 0x394   : > { %5560 = vperm.xlu0 %6838, %v5494_v36   ;;  %v10714_v36 = vld [vmem:[#allocation23_spill] sm:$0xff] }
 0x395   : > { %5565 = vperm.xlu1 %6837, %v5495_v31  }
 0x397   : > { %v7056_v20 = vpop.eup %7055 }
 0x398   : > { %v7058_v40 = vpop.eup %7057  ;;  %v5496_v16 = vsub.f32 1.0, %v7056_v20 }
 0x399   : > { %v5497_v34 = vsub.f32 1.0, %v7058_v40 }
 0x39a   : > { %5570 = vperm.xlu0 %6838, %v5496_v16   ;;  %v10716_v16 = vld [vmem:[#allocation12_spill] sm:$0xff] }
 0x39b   : > { %5575 = vperm.xlu1 %6837, %v5497_v34   ;;  %v10064_v34 = vmul.f32 %v5166_v12, %v10716_v16  ;;  %v5168_v12 = vsel %vm1628_vm11, %v5165_v10, %v5167_v50  ;;  %v10723_v16 = vld [vmem:[#allocation41_spill] sm:$0xff] }
 0x39e   : > { %5596 = vperm.xlu0 %6838, %v9951_v55   ;;  %v9987_v55 = vpop.permute.xlu1 %5246 }
 0x39f   : > { %5601 = vperm.xlu1 %6837, %v9956_v56  }
 0x3a2   : > { %5606 = vperm.xlu0 %6838, %v9967_v21   ;;  %v9989_v56 = vpop.permute.xlu1 %5248 }
 0x3a3   : > { %5611 = vperm.xlu1 %6837, %v9971_v4   ;;  %v10017_v4 = vpop.permute.xlu0 %5270 }
 0x3a4   : > { %10695 = vst [vmem:[#allocation81_spill] sm:$0xff] %v10017_v4 }
 0x3a6   : > { %5616 = vperm.xlu0 %6838, %v9977_v2   ;;  %v9991_v7 = vpop.permute.xlu1 %5252  ;;  %v10699_v2 = vld [vmem:[#allocation31_spill] sm:$0xff] }
 0x3a7   : > { %5621 = vperm.xlu1 %6837, %v7026_v14   ;;  %v10021_v8 = vpop.permute.xlu0 %5336  ;;  %v5154_v42 = vrot.slane %v10699_v2, 1  ;;  %v5160_v14 = vrot.slane %v10700_v46, 1 }
 0x3a9   : > { %v5156_v33 = vsel %vm1628_vm11, %v5154_v42, %v5155_v38  ;;  %v5172_v38 = vrot.slane %v10717_v61, 1  ;;  %v5163_v59 = vsel %vm1628_vm11, %v5160_v14, %v5162_v63  ;;  %v10725_v63 = vld [vmem:[#allocation44_spill] sm:$0xff] }
 0x3aa   : > { %5626 = vperm.xlu0 %6838, %v7032_v25   ;;  %v9995_v5 = vpop.permute.xlu1 %5256  ;;  %v10058_v31 = vmul.f32 %v5156_v33, %v10714_v36  ;;  %v10721_v33 = vld [vmem:[#allocation25_spill] sm:$0xff] }
 0x3ab   : > { %5631 = vperm.xlu1 %6837, %v7034_v6   ;;  %10686 = vst [vmem:[#allocation67_spill] sm:$0xff] %v9995_v5  ;;  %v10705_v6 = vld [vmem:[#allocation33_spill] sm:$0xff]  ;;  %v10074_v36 = vmul.f32 %v5163_v59, %v10721_v33  ;;  %v10728_v59 = vld [vmem:[#allocation27_spill] sm:$0xff]  ;;  %v10739_v5 = vld [vmem:[#allocation30_spill] sm:$0xff] }
 0x3ac   : > { %v5159_v3 = vrot.slane %v10705_v6, 1 }
 0x3ae   : > { %5636 = vperm.xlu0 %6838, %v7040_v47   ;;  %v9999_v49 = vpop.permute.xlu1 %5260  ;;  %v10708_v47 = vld [vmem:[#allocation11_spill] sm:$0xff]  ;;  %v5161_v51 = vsel %vm1628_vm11, %v5159_v3, %v5160_v14 }
 0x3af   : > { %5641 = vperm.xlu1 %6837, %v7042_v28   ;;  %10687 = vst [vmem:[#allocation70_spill] sm:$0xff] %v9999_v49  ;;  %v10046_v28 = vmul.f32 %v5158_v41, %v10708_v47  ;;  %v10719_v41 = vld [vmem:[#allocation42_spill] sm:$0xff]  ;;  %v10732_v49 = vld [vmem:[#allocation24_spill] sm:$0xff] }
 0x3b0   : > { %v5180_v47 = vrot.slane %v10719_v41, 1 }
 0x3b2   : > { %5646 = vperm.xlu0 %6838, %v7048_v53   ;;  %v10003_v21 = vpop.permute.xlu1 %5264  ;;  %v5169_v53 = vrot.slane %v10710_v52, 1 }
 0x3b3   : > { %5651 = vperm.xlu1 %6837, %v7050_v26   ;;  %10689 = vst [vmem:[#allocation75_spill] sm:$0xff] %v10003_v21  ;;  %v10711_v26 = vld [vmem:[#allocation39_spill] sm:$0xff]  ;;  %v10726_v21 = vld [vmem:[#allocation50_spill] sm:$0xff] }
 0x3b4   : > { %v5174_v35 = vrot.slane %v10711_v26, 1  ;;  %v5171_v3 = vsel %vm1628_vm11, %v5169_v53, %v5170_v45  ;;  %v5185_v53 = vrot.slane %v10725_v63, 1  ;;  %v5182_v27 = vrot.slane %v10726_v21, 1 }
 0x3b6   : > { %5656 = vperm.xlu0 %6838, %v7052_v23   ;;  %v10007_v9 = vpop.permute.xlu1 %5268  ;;  %v5175_v23 = vrot.slane %v10712_v18, 1 }
 0x3b7   : > { %5661 = vperm.xlu1 %6837, %v7054_v43   ;;  %10691 = vst [vmem:[#allocation76_spill] sm:$0xff] %v10007_v9  ;;  %v5179_v9 = vrot.slane %v10723_v16, 1 }
 0x3b8   : > { %v5176_v1 = vsel %vm1628_vm11, %v5174_v35, %v5175_v23 }
 0x3b9   : > { %v10089_v33 = vmul.f32 %v5176_v1, %v10728_v59  ;;  %v5181_v17 = vsel %vm1628_vm11, %v5179_v9, %v5180_v47  ;;  %v10735_v59 = vld [vmem:[#allocation26_spill] sm:$0xff]  ;;  %v5183_v9 = vsel %vm1628_vm11, %v5180_v47, %v5182_v27 }
 0x3ba   : > { %5666 = vperm.xlu0 %6838, %v7056_v20   ;;  %v10011_v48 = vpop.permute.xlu1 %5272  ;;  %v10715_v20 = vld [vmem:[#allocation20_spill] sm:$0xff] }
 0x3bb   : > { %5671 = vperm.xlu1 %6837, %v7058_v40   ;;  %10693 = vst [vmem:[#allocation79_spill] sm:$0xff] %v10011_v48  ;;  %v10061_v40 = vmul.f32 %v5161_v51, %v10715_v20  ;;  %v10720_v48 = vld [vmem:[#allocation49_spill] sm:$0xff]  ;;  %v10722_v51 = vld [vmem:[#allocation22_spill] sm:$0xff]  ;;  %10729 = vst [vmem:[#allocation6_spill] sm:$0xff] %v10089_v33 }
 0x3bc   : > { %v5177_v4 = vrot.slane %v10720_v48, 1  ;;  %v10077_v20 = vmul.f32 %v5171_v3, %v10722_v51  ;;  %v5173_v3 = vsel %vm1628_vm11, %v5170_v45, %v5172_v38  ;;  %v10730_v51 = vld [vmem:[#allocation51_spill] sm:$0xff]  ;;  %v10736_v38 = vld [vmem:[#allocation53_spill] sm:$0xff] }
 0x3bd   : > { %v5187_v10 = vrot.slane %v10730_v51, 1  ;;  %v10096_v35 = vmul.f32 %v5173_v3, %v10732_v49  ;;  %v5189_v33 = vrot.slane %v10736_v38, 1 }
 0x3ea   : > { %v10015_v62 = vpop.permute.xlu1 %5500 }
 0x3ec   : > { %v10025_v37 = vpop.permute.xlu0 %5505 }
 0x3f0   : > { %v10019_v54 = vpop.permute.xlu1 %5510 }
 0x3f4   : > { %v10023_v22 = vpop.permute.xlu1 %5515 }
 0x3f6   : > { %v10029_v13 = vpop.permute.xlu0 %5520 }
 0x3f8   : > { %v10027_v15 = vpop.permute.xlu1 %5525 }
 0x3f9   : > { %10696 = vst [vmem:[#allocation80_spill] sm:$0xff] %v10027_v15  ;;  %v10733_v15 = vld [vmem:[#allocation3_spill] sm:$0xff] }
 0x3fd   : > { %v10035_v58 = vpop.permute.xlu0 %5530 }
 0x3fe   : > { %10701 = vst [vmem:[#allocation82_spill] sm:$0xff] %v10035_v58  ;;  %v10039_v25 = vpop.permute.xlu1 %5535  ;;  %v5178_v58 = vsel %vm1628_vm11, %v5175_v23, %v5177_v4  ;;  %v10738_v4 = vld [vmem:[#allocation54_spill] sm:$0xff] }
 0x3ff   : > { %10704 = vst [vmem:[#allocation84_spill] sm:$0xff] %v10039_v25  ;;  %v10107_v45 = vmul.f32 %v5178_v58, %v10735_v59  ;;  %v5313_v23 = vmul.f32 %v10738_v4, %v10698_v29  ;;  %v5314_v3 = vmul.f32 %v10738_v4, %v10697_v44  ;;  %v5188_v59 = vsel %vm1628_vm11, %v5185_v53, %v5187_v10  ;;  %v10742_v29 = vld [vmem:[#allocation71_spill] sm:$0xff] }
 0x400   : > { %v5312_v30 = vmul.f32 %v10738_v4, %v10699_v2  ;;  %v10132_v47 = vmul.f32 %v5188_v59, %v10742_v29  ;;  %v5322_v59 = vmul.f32 %v10738_v4, %v10707_v19  ;;  %v10173_v19 = vmul.f32 %v10738_v4, %v10719_v41 }
 0x401   : > { %v5340_v2 = vadd.f32 %v10021_v8, %v5313_v23  ;;  %v10165_v23 = vmul.f32 %v10738_v4, %v10720_v48 }
 0x402   : > { %v5339_v10 = vadd.f32 %v10021_v8, %v5312_v30  ;;  %v5323_v30 = vmul.f32 %v10738_v4, %v10717_v61 }
 0x403   : > { %v10067_v42 = vpop.permute.xlu0 %5540  ;;  %v5699_v48 = vrot.slane %v5340_v2, 1 }
 0x404   : > { %v10055_v43 = vpop.permute.xlu1 %5545  ;;  %10718 = vst [vmem:[#allocation86_spill] sm:$0xff] %v10067_v42  ;;  %v10727_v42 = vld [vmem:[#allocation13_spill] sm:$0xff]  ;;  %v5698_v61 = vrot.slane %v5339_v10, 1 }
 0x405   : > { %10713 = vst [vmem:[#allocation77_spill] sm:$0xff] %v10055_v43  ;;  %v10724_v43 = vld [vmem:[#allocation43_spill] sm:$0xff]  ;;  %v10086_v25 = vmul.f32 %v5168_v12, %v10727_v42  ;;  %v10734_v12 = vld [vmem:[#allocation29_spill] sm:$0xff] }
 0x406   : > { %v5184_v14 = vrot.slane %v10724_v43, 1  ;;  %v10104_v1 = vmul.f32 %v5181_v17, %v10734_v12  ;;  %v10740_v12 = vld [vmem:[#allocation63_spill] sm:$0xff]  ;;  %v10200_v2 = vmul.f32 %v10738_v4, %v10724_v43 }
 0x407   : > { %v10121_v58 = vmul.f32 %v5183_v9, %v10740_v12  ;;  %v5319_v9 = vmul.f32 %v10738_v4, %v10703_v0  ;;  %v5341_v12 = vadd.f32 %v10021_v8, %v5314_v3  ;;  %v10161_v0 = vmul.f32 %v10738_v4, %v10712_v18 }
 0x408   : > { %v5186_v49 = vsel %vm1628_vm11, %v5184_v14, %v5185_v53  ;;  %v10741_v14 = vrot.slane %v10733_v15, 1 }
 0x409   : > { %v10093_v50 = vpop.permute.xlu0 %5550  ;;  %v10118_v17 = vmul.f32 %v5186_v49, %v10739_v5  ;;  %v5316_v5 = vmul.f32 %v10738_v4, %v10700_v46  ;;  %v5317_v49 = vmul.f32 %v10738_v4, %v10706_v60  ;;  %v5320_v46 = vmul.f32 %v10738_v4, %v10709_v39 }
 0x40a   : > { %10731 = vst [vmem:[#allocation5_spill] sm:$0xff] %v10093_v50  ;;  %v10101_v42 = vpop.permute.xlu1 %5555  ;;  %v10737_v50 = vld [vmem:[#allocation4_spill] sm:$0xff]  ;;  %v10129_v27 = vsel %vm1628_vm11, %v5189_v33, %v10741_v14  ;;  %v5315_v33 = vmul.f32 %v10738_v4, %v10705_v6  ;;  %v5318_v60 = vmul.f32 %v10738_v4, %v10702_v24  ;;  %v5321_v6 = vmul.f32 %v10738_v4, %v10710_v52 }
 0x40b   : > { %v10169_v24 = vmul.f32 %v10738_v4, %v10711_v26  ;;  %v10177_v39 = vmul.f32 %v10738_v4, %v10726_v21  ;;  %v10181_v52 = vmul.f32 %v10738_v4, %v10723_v16  ;;  %v5343_v26 = vadd.f32 %v10021_v8, %v5316_v5  ;;  %v7089_v5 = vld [vmem:[%s9720_s13] ss:$0 sm:$0xff] }
 0x40c   : > { %v5342_v3 = vadd.f32 %v10021_v8, %v5315_v33  ;;  %v5701_v41 = vrot.slane %v5341_v12, 1  ;;  %v5344_v29 = vadd.f32 %v10021_v8, %v5317_v49  ;;  %v10192_v21 = vmul.f32 %v10738_v4, %v10725_v63 }
 0x40d   : > { %v10196_v16 = vmul.f32 %v10738_v4, %v10730_v51  ;;  %v10204_v10 = vmul.f32 %v7089_v5, %v10733_v15  ;;  %v10207_v33 = vmul.f32 %v7089_v5, %v10737_v50  ;;  %v10210_v49 = vmul.f32 %v7089_v5, %v10736_v38 }
 0x40e   : > { %v5291_v63 = vadd.f32 %v9985_v57, %v10046_v28  ;;  %v5290_v51 = vadd.f32 %v9993_v11, %v10058_v31  ;;  %v5346_v43 = vadd.f32 %v10021_v8, %v5319_v9  ;;  %v5347_v4 = vadd.f32 %v10021_v8, %v5320_v46 }
 0x40f   : > { %v10140_v53 = vpop.permute.xlu0 %5560  ;;  %v5700_v12 = vsel %vm1628_vm11, %v5698_v61, %v5699_v48  ;;  %v5702_v57 = vsel %vm1628_vm11, %v5699_v48, %v5701_v41  ;;  %v5706_v15 = vrot.slane %v5344_v29, 1  ;;  %v5292_v11 = vadd.f32 %v9987_v55, %v10061_v40 }
 0x410   : > { %v10134_v44 = vpop.permute.xlu1 %5565  ;;  %10744 = vst [vmem:[#allocation89_spill] sm:$0xff] %v10140_v53  ;;  %v5345_v53 = vadd.f32 %v10021_v8, %v5318_v60  ;;  %v5578_v38 = vmul.f32 %v10015_v62, %v5290_v51  ;;  %v5293_v31 = vadd.f32 %v9989_v56, %v10074_v36  ;;  %v5579_v9 = vmul.f32 %v10025_v37, %v5291_v63 }
 0x411   : > { %10743 = vst [vmem:[#allocation83_spill] sm:$0xff] %v10134_v44  ;;  %v5703_v44 = vrot.slane %v5342_v3, 1  ;;  %v5709_v60 = vrot.slane %v5346_v43, 1  ;;  %v5711_v48 = vrot.slane %v5347_v4, 1  ;;  %v5349_v61 = vadd.f32 %v10021_v8, %v5322_v59 }
 0x412   : > { %v5708_v56 = vrot.slane %v5345_v53, 1  ;;  %v5348_v37 = vadd.f32 %v10021_v8, %v5321_v6  ;;  %v5580_v36 = vmul.f32 %v10019_v54, %v5292_v11  ;;  %v5350_v29 = vadd.f32 %v10021_v8, %v5323_v30 }
 0x413   : > { %v5294_v59 = vadd.f32 %v9997_v32, %v10064_v34  ;;  %v5581_v53 = vmul.f32 %v10023_v22, %v5293_v31  ;;  %v5712_v63 = vsel %vm1628_vm11, %v5709_v60, %v5711_v48  ;;  %v5714_v51 = vrot.slane %v5349_v61, 1  ;;  %v10750_v48 = vld [vmem:[#allocation82_spill] sm:$0xff] }
 0x414   : > { %v5713_v34 = vrot.slane %v5348_v37, 1  ;;  %v5716_v4 = vrot.slane %v5350_v29, 1  ;;  %v10752_v37 = vld [vmem:[#allocation74_spill] sm:$0xff] }
 0x415   : > { %v10183_v18 = vpop.permute.xlu0 %5570  ;;  %v5582_v22 = vmul.f32 %v10029_v13, %v5294_v59 }
 0x416   : > { %10745 = vst [vmem:[#allocation87_spill] sm:$0xff] %v10183_v18  ;;  %v10187_v14 = vpop.permute.xlu1 %5575  ;;  %v5704_v18 = vrot.slane %v5343_v26, 1 }
 0x417   : > { %10746 = vst [vmem:[#allocation55_spill] sm:$0xff] %v10187_v14 }
 0x418   : > { %v5705_v55 = vsel %vm1628_vm11, %v5703_v44, %v5704_v18  ;;  %v5295_v44 = vadd.f32 %v9991_v7, %v10086_v25  ;;  %v5351_v7 = vadd.f32 %v10021_v8, %v10169_v24 }
 0x419   : > { %v5597_v14 = vpop.permute.xlu0 %5596 }
 0x41a   : > { %v5602_v5 = vpop.permute.xlu1 %5601  ;;  %v5754_v28 = vmul.f32 %v5700_v12, %v5597_v14  ;;  %v5707_v14 = vsel %vm1628_vm11, %v5704_v18, %v5706_v15  ;;  %v5352_v15 = vadd.f32 %v10021_v8, %v10161_v0  ;;  %v5710_v18 = vsel %vm1628_vm11, %v5708_v56, %v5709_v60  ;;  %v10747_v0 = vld [vmem:[#allocation73_spill] sm:$0xff]  ;;  %v10751_v56 = vld [vmem:[#allocation6_spill] sm:$0xff] }
 0x41b   : > { %v5755_v62 = vmul.f32 %v5702_v57, %v5602_v5  ;;  %v5353_v12 = vadd.f32 %v10021_v8, %v10165_v23  ;;  %v10748_v5 = vld [vmem:[#allocation67_spill] sm:$0xff]  ;;  %v5356_v23 = vadd.f32 %v10021_v8, %v10177_v39  ;;  %v5718_v60 = vrot.slane %v5351_v7, 1 }
 0x41c   : > { %v5770_v46 = vadd.f32 %v5754_v28, %v5578_v38  ;;  %v5296_v38 = vadd.f32 %v10747_v0, %v10077_v20  ;;  %v5297_v57 = vadd.f32 %v10748_v5, %v10096_v35  ;;  %v10749_v28 = vld [vmem:[#allocation80_spill] sm:$0xff]  ;;  %v5719_v31 = vrot.slane %v5352_v15, 1  ;;  %v10755_v15 = vld [vmem:[#allocation86_spill] sm:$0xff] }
 0x41d   : > { %v5771_v26 = vadd.f32 %v5755_v62, %v5579_v9  ;;  %v5607_v40 = vpop.permute.xlu0 %5606  ;;  %v5583_v11 = vmul.f32 %v10749_v28, %v5295_v44  ;;  %v5355_v9 = vadd.f32 %v10021_v8, %v10173_v19  ;;  %v5715_v20 = vsel %vm1628_vm11, %v5713_v34, %v5714_v51 }
 0x41e   : > { %5786 = vst.msk [vmem:[%s10231_s16] sm:$0xff] %vm396_vm0, %v5770_v46  ;;  %v5612_v3 = vpop.permute.xlu1 %5611  ;;  %v5756_v41 = vmul.f32 %v5705_v55, %v5607_v40  ;;  %v5354_v35 = vadd.f32 %v10021_v8, %v10181_v52  ;;  %v5584_v61 = vmul.f32 %v10750_v48, %v5296_v38  ;;  %v5717_v55 = vsel %vm1628_vm11, %v5714_v51, %v5716_v4  ;;  %v10758_v4 = vld [vmem:[#allocation77_spill] sm:$0xff]  ;;  %v10762_v48 = vld [vmem:[#allocation76_spill] sm:$0xff] }
 0x41f   : > { %5787 = vst.msk [vmem:[%s10231_s16 + $0x8] sm:$0xff] %vm396_vm0, %v5771_v26  ;;  %v5757_v54 = vmul.f32 %v5707_v14, %v5612_v3  ;;  %v5721_v40 = vrot.slane %v5353_v12, 1  ;;  %v5298_v39 = vadd.f32 %v10752_v37, %v10751_v56  ;;  %v10754_v14 = vld [vmem:[#allocation84_spill] sm:$0xff]  ;;  %v5724_v59 = vrot.slane %v5355_v9, 1 }
 0x420   : > { %v5772_v6 = vadd.f32 %v5756_v41, %v5580_v36  ;;  %v10753_v36 = vld [vmem:[#allocation70_spill] sm:$0xff]  ;;  %v5585_v41 = vmul.f32 %v10754_v14, %v5297_v57  ;;  %v5726_v44 = vrot.slane %v5356_v23, 1  ;;  %v5723_v51 = vrot.slane %v5354_v35, 1  ;;  %v10767_v14 = vld [vmem:[#allocation16_spill] sm:$0xff] }
 0x421   : > { %v5773_v30 = vadd.f32 %v5757_v54, %v5581_v53  ;;  %v5617_v32 = vpop.permute.xlu0 %5616  ;;  %v5299_v3 = vadd.f32 %v10753_v36, %v10107_v45  ;;  %v5358_v53 = vadd.f32 %v10021_v8, %v10192_v21  ;;  %v5357_v45 = vadd.f32 %v10021_v8, %v10200_v2  ;;  %v10756_v21 = vld [vmem:[#allocation7_spill] sm:$0xff] }
 0x422   : > { %5788 = vst.msk [vmem:[%s10231_s16 + $0x10] sm:$0xff] %vm396_vm0, %v5772_v6  ;;  %v5622_v25 = vpop.permute.xlu1 %5621  ;;  %v5758_v43 = vmul.f32 %v5710_v18, %v5617_v32  ;;  %v5720_v6 = vsel %vm1628_vm11, %v5718_v60, %v5719_v31  ;;  %v5722_v32 = vsel %vm1628_vm11, %v5719_v31, %v5721_v40  ;;  %v5359_v7 = vadd.f32 %v10021_v8, %v10196_v16 }
 0x423   : > { %5789 = vst.msk [vmem:[%s10231_s16 + $0x18] sm:$0xff] %vm396_vm0, %v5773_v30  ;;  %v5759_v13 = vmul.f32 %v5712_v63, %v5622_v25  ;;  %v5586_v30 = vmul.f32 %v10755_v15, %v5298_v39  ;;  %v10757_v25 = vld [vmem:[#allocation75_spill] sm:$0xff]  ;;  %v5587_v2 = vmul.f32 %v10758_v4, %v5299_v3  ;;  %v5727_v38 = vsel %vm1628_vm11, %v5724_v59, %v5726_v44  ;;  %v10766_v39 = vld [vmem:[#allocation89_spill] sm:$0xff] }
 0x424   : > { %v5774_v24 = vadd.f32 %v5758_v43, %v5582_v22  ;;  %v5300_v22 = vadd.f32 %v10756_v21, %v10104_v1  ;;  %v5301_v43 = vadd.f32 %v10757_v25, %v10121_v58  ;;  %v5729_v5 = vrot.slane %v5358_v53, 1  ;;  %v10769_v44 = vld [vmem:[#allocation81_spill] sm:$0xff]  ;;  %v10772_v21 = vld [vmem:[#allocation55_spill] sm:$0xff] }
 0x425   : > { %v5775_v62 = vadd.f32 %v5759_v13, %v5583_v11  ;;  %v5627_v46 = vpop.permute.xlu0 %5626  ;;  %v5361_v16 = vadd.f32 %v10021_v8, %v10204_v10  ;;  %v5725_v28 = vsel %vm1628_vm11, %v5723_v51, %v5724_v59  ;;  %v5728_v11 = vrot.slane %v5357_v45, 1  ;;  %v10759_v13 = vld [vmem:[#allocation5_spill] sm:$0xff]  ;;  %v10760_v10 = vld [vmem:[#allocation72_spill] sm:$0xff] }
 0x426   : > { %5790 = vst.msk [vmem:[%s10231_s16 + $0x20] sm:$0xff] %vm396_vm0, %v5774_v24  ;;  %v5632_v26 = vpop.permute.xlu1 %5631  ;;  %v5760_v19 = vmul.f32 %v5715_v20, %v5627_v46  ;;  %v5360_v58 = vadd.f32 %v10021_v8, %v10210_v49  ;;  %v5588_v24 = vmul.f32 %v10759_v13, %v5300_v22  ;;  %v5731_v23 = vrot.slane %v5359_v7, 1  ;;  %v10761_v49 = vld [vmem:[#allocation78_spill] sm:$0xff] }
 0x427   : > { %5791 = vst.msk [vmem:[%s10231_s16 + $0x28] sm:$0xff] %vm396_vm0, %v5775_v62  ;;  %v5761_v52 = vmul.f32 %v5717_v55, %v5632_v26  ;;  %v5362_v62 = vadd.f32 %v10021_v8, %v10207_v33  ;;  %v5224_v20 = vmul.f32 %v10129_v27, %v10760_v10  ;;  %v5589_v46 = vmul.f32 %v10101_v42, %v5301_v43  ;;  %v10764_v55 = vld [vmem:[#allocation3_spill] sm:$0xff] }
 0x428   : > { %v5776_v29 = vadd.f32 %v5760_v19, %v5584_v61  ;;  %v5302_v35 = vadd.f32 %v10761_v49, %v10118_v17  ;;  %v5303_v61 = vadd.f32 %v10762_v48, %v10132_v47  ;;  %v10763_v26 = vrot.slane %v10737_v50, 1 }
 0x429   : > { %v5777_v54 = vadd.f32 %v5761_v52, %v5585_v41  ;;  %v5637_v63 = vpop.permute.xlu0 %5636  ;;  %v10765_v19 = vrot.slane %v10764_v55, 1  ;;  %v5730_v42 = vsel %vm1628_vm11, %v5728_v11, %v5729_v5  ;;  %v5734_v56 = vrot.slane %v5361_v16, 1  ;;  %v10768_v52 = vld [vmem:[#allocation83_spill] sm:$0xff] }
 0x42a   : > { %5792 = vst.msk [vmem:[%s10231_s16 + $0x30] sm:$0xff] %vm396_vm0, %v5776_v29  ;;  %v5642_v18 = vpop.permute.xlu1 %5641  ;;  %v5762_v34 = vmul.f32 %v5720_v6, %v5637_v63  ;;  %v5733_v37 = vrot.slane %v5360_v58, 1  ;;  %v5590_v36 = vmul.f32 %v10766_v39, %v5302_v35  ;;  %v5732_v50 = vsel %vm1628_vm11, %v5729_v5, %v5731_v23  ;;  %v10770_v6 = vld [vmem:[#allocation79_spill] sm:$0xff] }
 0x42b   : > { %5793 = vst.msk [vmem:[%s10231_s16 + $0x38] sm:$0xff] %vm396_vm0, %v5777_v54  ;;  %v5763_v12 = vmul.f32 %v5722_v32, %v5642_v18  ;;  %v5193_v8 = vsel %vm1628_vm11, %v10765_v19, %v10763_v26  ;;  %v5736_v3 = vrot.slane %v5362_v62, 1  ;;  %v5591_v29 = vmul.f32 %v10768_v52, %v5303_v61 }
 0x42c   : > { %v5778_v0 = vadd.f32 %v5762_v34, %v5586_v30  ;;  %v5225_v41 = vmul.f32 %v5193_v8, %v10767_v14  ;;  %v5304_v53 = vadd.f32 %v10769_v44, %v5224_v20  ;;  %v5735_v45 = vsel %vm1628_vm11, %v5733_v37, %v5734_v56  ;;  %v10771_v30 = vld [vmem:[#allocation87_spill] sm:$0xff] }
 0x42d   : > { %v5779_v57 = vadd.f32 %v5763_v12, %v5587_v2  ;;  %v5647_v1 = vpop.permute.xlu0 %5646  ;;  %v5737_v34 = vsel %vm1628_vm11, %v5734_v56, %v5736_v3 }
 0x42e   : > { %5794 = vst.msk [vmem:[%s10231_s16 + $0x40] sm:$0xff] %vm396_vm0, %v5778_v0  ;;  %v5652_v31 = vpop.permute.xlu1 %5651  ;;  %v5764_v9 = vmul.f32 %v5725_v28, %v5647_v1  ;;  %v5305_v63 = vadd.f32 %v10770_v6, %v5225_v41  ;;  %v5592_v18 = vmul.f32 %v10771_v30, %v5304_v53 }
 0x42f   : > { %5795 = vst.msk [vmem:[%s10231_s16 + $0x48] sm:$0xff] %vm396_vm0, %v5779_v57  ;;  %v5765_v60 = vmul.f32 %v5727_v38, %v5652_v31 }
 0x430   : > { %v5780_v33 = vadd.f32 %v5764_v9, %v5588_v24  ;;  %v5593_v22 = vmul.f32 %v10772_v21, %v5305_v63 }
 0x431   : > { %v5781_v27 = vadd.f32 %v5765_v60, %v5589_v46  ;;  %v5657_v40 = vpop.permute.xlu0 %5656 }
 0x432   : > { %5796 = vst.msk [vmem:[%s10231_s16 + $0x50] sm:$0xff] %vm396_vm0, %v5780_v33  ;;  %v5662_v17 = vpop.permute.xlu1 %5661  ;;  %v5766_v47 = vmul.f32 %v5730_v42, %v5657_v40 }
 0x433   : > { %5797 = vst.msk [vmem:[%s10231_s16 + $0x58] sm:$0xff] %vm396_vm0, %v5781_v27  ;;  %v5767_v59 = vmul.f32 %v5732_v50, %v5662_v17 }
 0x434   : > { %v5782_v54 = vadd.f32 %v5766_v47, %v5590_v36 }
 0x435   : > { %v5783_v51 = vadd.f32 %v5767_v59, %v5591_v29  ;;  %v5667_v15 = vpop.permute.xlu0 %5666 }
 0x436   : > { %5798 = vst.msk [vmem:[%s10231_s16 + $0x60] sm:$0xff] %vm396_vm0, %v5782_v54  ;;  %v5672_v32 = vpop.permute.xlu1 %5671  ;;  %v5768_v7 = vmul.f32 %v5735_v45, %v5667_v15 }
 0x437   : > { %5799 = vst.msk [vmem:[%s10231_s16 + $0x68] sm:$0xff] %vm396_vm0, %v5783_v51  ;;  %v5769_v25 = vmul.f32 %v5737_v34, %v5672_v32 }
 0x438   : > { %v5784_v43 = vadd.f32 %v5768_v7, %v5592_v18 }
 0x439   : > { %v5785_v4 = vadd.f32 %v5769_v25, %v5593_v22 }
 0x43a   : > { %5800 = vst.msk [vmem:[%s10231_s16 + $0x70] sm:$0xff] %vm396_vm0, %v5784_v43 }
 0x43b   : > { %5801 = vst.msk [vmem:[%s10231_s16 + $0x78] sm:$0xff] %vm396_vm0, %v5785_v4 }
 0x43c PF: > { %s19_s30 = sadd.s32 1, %s7128_s30   ;;  %s10773_s26 = smov %s7120_s28 }
 0x43d   : > { %p16_p7 = scmp.ge.s32.totalorder %s19_s30, 6   ;;  %s10774_s27 = smov %s7124_s29 }
 0x43e   : > { %s10775_s28 = smov %s10778_s6  ;;  %s10776_s29 = smov %s10782_s8 }
 0x43f   :  { %18 = sbr.rel (!%p16_p7) target bundleno = 3 (0x3), region = 102 }

</bundles_post_ra>
